<compile_context>
chip_gen: v7x
topology: tpu7x:2x2x1
jax: 0.10.0
libtpu: 0.0.40
codegen_flags: <defaults>
</compile_context>

<pallas_src>
import math

import jax
import jax.numpy as jnp
from jax.experimental import pallas as pl
from jax.experimental.pallas import tpu as pltpu

D_MODEL = 768
D_FF = 4 * 768  # 3072

_INV_SQRT2 = 1.0 / math.sqrt(2.0)
_GELU_C0 = math.sqrt(2.0 / math.pi)  # 0.7978845608...
_GELU_C1 = 0.044715


def _gelu(x, approx):
    if approx:
        # tanh-approximate GELU: tanh goes to the EUP (separate VLIW slot),
        # only ~7 VALU ops/element remain.  x/sqrt(2) divide is gone.
        u = x * (_GELU_C0 + (_GELU_C0 * _GELU_C1) * (x * x))
        return 0.5 * x * (1.0 + jnp.tanh(u))
    # Exact erf GELU (reference semantics); divide replaced by multiply.
    return 0.5 * x * (1.0 + jax.lax.erf(x * _INV_SQRT2))


def _make_ffn_kernel(compute_dtype, dff_chunk, approx_gelu):
    def ffn_kernel(x_ref, w1_ref, b1_ref, w2_ref, b2_ref, o_ref):
        # x_ref : (TM, d_model)   input dtype (cast to bf16 in-kernel)
        # w1_ref: (d_model, d_ff) bf16, VMEM-resident
        # b1_ref: (1, d_ff)       f32
        # w2_ref: (d_ff, d_model) bf16, VMEM-resident
        # b2_ref: (1, d_model)    f32
        # o_ref : (TM, d_model)   output dtype
        x = x_ref[...].astype(compute_dtype)
        d_ff = w1_ref.shape[1]
        n_chunks = d_ff // dff_chunk

        acc = jnp.zeros(o_ref.shape, jnp.float32)
        # Fully unrolled d_ff chunking: overlap MXU (matmuls) with VPU/EUP
        # (bias + GELU + cast) and keep the live hidden slab small.
        for c in range(n_chunks):
            lo = c * dff_chunk
            hi = lo + dff_chunk
            h = jnp.dot(x, w1_ref[:, lo:hi],
                        preferred_element_type=jnp.float32)
            h = _gelu(h + b1_ref[:, lo:hi], approx_gelu)
            acc = acc + jnp.dot(h.astype(compute_dtype), w2_ref[lo:hi, :],
                                preferred_element_type=jnp.float32)

        o_ref[...] = (acc + b2_ref[...]).astype(o_ref.dtype)

    return ffn_kernel


def _round_up(n, m):
    return ((n + m - 1) // m) * m


def fed_forward(
    x,
    w1,
    b1,
    w2,
    b2,
    *,
    tm=256,
    dff_chunk=512,
    compute_dtype=jnp.bfloat16,
    out_dtype=None,
    approx_gelu=True,
    vmem_limit_bytes=48 * 1024 * 1024,
):
    """x: [batch, seq, d_model].  w1: [d_model, d_ff], b1: [d_ff],
    w2: [d_ff, d_model], b2: [d_model].  Weights are stored
    [in_features, out_features] (transposed vs. nn.Linear's [out, in]).

    Matmul operands use `compute_dtype` (default bf16) on the MXU with f32
    accumulation; pass weights already in `compute_dtype` to avoid the
    per-call cast.  `approx_gelu=True` uses the tanh GELU (EUP path);
    `approx_gelu=False` keeps the exact erf reference semantics.
    """
    batch, seq, d_model = x.shape
    d_ff = w1.shape[1]
    out_dtype = x.dtype if out_dtype is None else out_dtype

    if d_ff % dff_chunk != 0:
        dff_chunk = d_ff  # fall back to a single chunk

    M = batch * seq
    # Row tile: at most tm, >= 8 rows, and small enough that the "parallel"
    # M axis has >= 2 tiles whenever M > 8 (both v7x TensorCores get work).
    half_rows = _round_up(max((M + 1) // 2, 1), 8)
    tm_eff = max(8, min(tm, half_rows))
    grid_m = pl.cdiv(M, tm_eff)

    x2 = x.reshape(M, d_model)  # dtype cast happens inside the kernel
    w1c = w1 if w1.dtype == compute_dtype else w1.astype(compute_dtype)
    w2c = w2 if w2.dtype == compute_dtype else w2.astype(compute_dtype)
    b1_2 = b1.reshape(1, d_ff).astype(jnp.float32)
    b2_2 = b2.reshape(1, d_model).astype(jnp.float32)

    kernel = _make_ffn_kernel(compute_dtype, dff_chunk, approx_gelu)

    out = pl.pallas_call(
        kernel,
        out_shape=jax.ShapeDtypeStruct((M, d_model), out_dtype),
        grid_spec=pltpu.PrefetchScalarGridSpec(
            num_scalar_prefetch=0,
            grid=(grid_m,),
            in_specs=[
                pl.BlockSpec((tm_eff, d_model), lambda m: (m, 0)),  # x tile
                pl.BlockSpec((d_model, d_ff), lambda m: (0, 0)),    # W1 resident
                pl.BlockSpec((1, d_ff), lambda m: (0, 0)),          # b1 resident
                pl.BlockSpec((d_ff, d_model), lambda m: (0, 0)),    # W2 resident
                pl.BlockSpec((1, d_model), lambda m: (0, 0)),       # b2 resident
            ],
            out_specs=pl.BlockSpec((tm_eff, d_model), lambda m: (m, 0)),
        ),
        compiler_params=pltpu.CompilerParams(
            dimension_semantics=("parallel",),
            vmem_limit_bytes=vmem_limit_bytes,
        ),
    )(x2, w1c, b1_2, w2c, b2_2)

    return out.reshape(batch, seq, d_model)


def fed_forward_ref(x, w1, b1, w2, b2):
    # Pure-JAX f32 reference with the exact erf GELU (PyTorch semantics).
    h = jnp.dot(x, w1) + b1
    h = h * 0.5 * (1.0 + jax.lax.erf(h * _INV_SQRT2))
    return jnp.dot(h, w2) + b2


if __name__ == "__main__":
    key = jax.random.PRNGKey(0)
    k_x, k_w1, k_b1, k_w2, k_b2 = jax.random.split(key, 5)

    batch, seq = 2, 8
    x = jax.random.normal(k_x, (batch, seq, D_MODEL), dtype=jnp.float32)

    # deterministic init mimicking nn.Linear: U(-1/sqrt(fan_in), 1/sqrt(fan_in))
    bound1 = 1.0 / math.sqrt(D_MODEL)
    bound2 = 1.0 / math.sqrt(D_FF)
    w1 = jax.random.uniform(k_w1, (D_MODEL, D_FF), jnp.float32, -bound1, bound1)
    b1 = jax.random.uniform(k_b1, (D_FF,), jnp.float32, -bound1, bound1)
    w2 = jax.random.uniform(k_w2, (D_FF, D_MODEL), jnp.float32, -bound2, bound2)
    b2 = jax.random.uniform(k_b2, (D_MODEL,), jnp.float32, -bound2, bound2)

    ref = fed_forward_ref(x, w1, b1, w2, b2)

    # Default path: tanh-approx GELU (EUP).  bf16 MXU operands + the tanh
    # approximation give ~1e-3-level abs error vs the pure-f32 erf reference.
    out = jax.block_until_ready(fed_forward(x, w1, b1, w2, b2))
    assert out.shape == (batch, seq, D_MODEL)
    assert jnp.allclose(out, ref, rtol=2e-2, atol=2e-2), (
        float(jnp.max(jnp.abs(out - ref)))
    )

    # Exact-erf path (reference semantics preserved; bf16 MXU error only).
    out_exact = jax.block_until_ready(
        fed_forward(x, w1, b1, w2, b2, approx_gelu=False)
    )
    assert jnp.allclose(out_exact, ref, rtol=2e-2, atol=2e-2), (
        float(jnp.max(jnp.abs(out_exact - ref)))
    )

    print("KERNEL_OK")
</pallas_src>

<mosaic_0001>
module attributes {stable_mosaic.version = 11 : i64} {
  func.func @ffn_kernel(%arg0: i32, %arg1: memref<8x768xf32, #tpu.memory_space<vmem>>, %arg2: memref<768x3072xbf16, #tpu.memory_space<vmem>>, %arg3: memref<1x3072xf32, #tpu.memory_space<vmem>>, %arg4: memref<3072x768xbf16, #tpu.memory_space<vmem>>, %arg5: memref<1x768xf32, #tpu.memory_space<vmem>>, %arg6: memref<8x768xf32, #tpu.memory_space<vmem>>) attributes {dimension_semantics = [#tpu.dimension_semantics<parallel>], iteration_bounds = array<i64: 2>, scalar_prefetch = 0 : i64, scratch_operands = 0 : i64, tpu.core_type = #tpu.core_type<tc>, window_params = [{transform_indices = @transform_0, window_bounds = array<i64: 8, 768>}, {pipeline_mode = #tpu.pipeline_mode<synchronous>, transform_indices = @transform_1, window_bounds = array<i64: 768, 3072>}, {pipeline_mode = #tpu.pipeline_mode<synchronous>, transform_indices = @transform_2, window_bounds = array<i64: 1, 3072>}, {pipeline_mode = #tpu.pipeline_mode<synchronous>, transform_indices = @transform_3, window_bounds = array<i64: 3072, 768>}, {pipeline_mode = #tpu.pipeline_mode<synchronous>, transform_indices = @transform_4, window_bounds = array<i64: 1, 768>}, {transform_indices = @transform_5, window_bounds = array<i64: 8, 768>}]} {
    %c0 = arith.constant 0 : index
    %c0_0 = arith.constant 0 : index
    %0 = vector.load %arg1[%c0, %c0_0] : memref<8x768xf32, #tpu.memory_space<vmem>>, vector<8x768xf32>
    %1 = arith.truncf %0 : vector<8x768xf32> to vector<8x768xbf16>
    %cst = arith.constant 0.000000e+00 : f32
    %2 = vector.broadcast %cst : f32 to vector<8x768xf32>
    %c0_1 = arith.constant 0 : index
    %c0_2 = arith.constant 0 : index
    %3 = vector.load %arg2[%c0_1, %c0_2] : memref<768x3072xbf16, #tpu.memory_space<vmem>>, vector<768x512xbf16>
    %cst_3 = arith.constant dense<0.000000e+00> : vector<8x512xf32>
    %4 = tpu.matmul %1, %3, %cst_3 {dimension_numbers = #tpu.dot_dimension_numbers<[1], [0], [0], [1], [0, 0, 1, 1], [], []>} : vector<8x768xbf16>, vector<768x512xbf16>, vector<8x512xf32> -> vector<8x512xf32>
    %c0_4 = arith.constant 0 : index
    %c0_5 = arith.constant 0 : index
    %5 = vector.load %arg3[%c0_4, %c0_5] : memref<1x3072xf32, #tpu.memory_space<vmem>>, vector<1x512xf32>
    %6 = vector.broadcast %5 : vector<1x512xf32> to vector<8x512xf32>
    %7 = arith.addf %4, %6 : vector<8x512xf32>
    %8 = arith.mulf %7, %7 : vector<8x512xf32>
    %cst_6 = arith.constant 0.0356774069 : f32
    %9 = vector.broadcast %cst_6 : f32 to vector<8x512xf32>
    %10 = arith.mulf %9, %8 : vector<8x512xf32>
    %cst_7 = arith.constant 0.797884583 : f32
    %11 = vector.broadcast %cst_7 : f32 to vector<8x512xf32>
    %12 = arith.addf %11, %10 : vector<8x512xf32>
    %13 = arith.mulf %7, %12 : vector<8x512xf32>
    %cst_8 = arith.constant 5.000000e-01 : f32
    %14 = vector.broadcast %cst_8 : f32 to vector<8x512xf32>
    %15 = arith.mulf %14, %7 : vector<8x512xf32>
    %16 = math.tanh %13 : vector<8x512xf32>
    %cst_9 = arith.constant 1.000000e+00 : f32
    %17 = vector.broadcast %cst_9 : f32 to vector<8x512xf32>
    %18 = arith.addf %17, %16 : vector<8x512xf32>
    %19 = arith.mulf %15, %18 : vector<8x512xf32>
    %20 = arith.truncf %19 : vector<8x512xf32> to vector<8x512xbf16>
    %c0_10 = arith.constant 0 : index
    %c0_11 = arith.constant 0 : index
    %21 = vector.load %arg4[%c0_10, %c0_11] : memref<3072x768xbf16, #tpu.memory_space<vmem>>, vector<512x768xbf16>
    %cst_12 = arith.constant dense<0.000000e+00> : vector<8x768xf32>
    %22 = tpu.matmul %20, %21, %cst_12 {dimension_numbers = #tpu.dot_dimension_numbers<[1], [0], [0], [1], [0, 0, 1, 1], [], []>} : vector<8x512xbf16>, vector<512x768xbf16>, vector<8x768xf32> -> vector<8x768xf32>
    %23 = arith.addf %2, %22 : vector<8x768xf32>
    %c0_13 = arith.constant 0 : index
    %c512 = arith.constant 512 : index
    %24 = vector.load %arg2[%c0_13, %c512] : memref<768x3072xbf16, #tpu.memory_space<vmem>>, vector<768x512xbf16>
    %cst_14 = arith.constant dense<0.000000e+00> : vector<8x512xf32>
    %25 = tpu.matmul %1, %24, %cst_14 {dimension_numbers = #tpu.dot_dimension_numbers<[1], [0], [0], [1], [0, 0, 1, 1], [], []>} : vector<8x768xbf16>, vector<768x512xbf16>, vector<8x512xf32> -> vector<8x512xf32>
    %c0_15 = arith.constant 0 : index
    %c512_16 = arith.constant 512 : index
    %26 = vector.load %arg3[%c0_15, %c512_16] : memref<1x3072xf32, #tpu.memory_space<vmem>>, vector<1x512xf32>
    %27 = vector.broadcast %26 : vector<1x512xf32> to vector<8x512xf32>
    %28 = arith.addf %25, %27 : vector<8x512xf32>
    %29 = arith.mulf %28, %28 : vector<8x512xf32>
    %cst_17 = arith.constant 0.0356774069 : f32
    %30 = vector.broadcast %cst_17 : f32 to vector<8x512xf32>
    %31 = arith.mulf %30, %29 : vector<8x512xf32>
    %cst_18 = arith.constant 0.797884583 : f32
    %32 = vector.broadcast %cst_18 : f32 to vector<8x512xf32>
    %33 = arith.addf %32, %31 : vector<8x512xf32>
    %34 = arith.mulf %28, %33 : vector<8x512xf32>
    %cst_19 = arith.constant 5.000000e-01 : f32
    %35 = vector.broadcast %cst_19 : f32 to vector<8x512xf32>
    %36 = arith.mulf %35, %28 : vector<8x512xf32>
    %37 = math.tanh %34 : vector<8x512xf32>
    %cst_20 = arith.constant 1.000000e+00 : f32
    %38 = vector.broadcast %cst_20 : f32 to vector<8x512xf32>
    %39 = arith.addf %38, %37 : vector<8x512xf32>
    %40 = arith.mulf %36, %39 : vector<8x512xf32>
    %41 = arith.truncf %40 : vector<8x512xf32> to vector<8x512xbf16>
    %c512_21 = arith.constant 512 : index
    %c0_22 = arith.constant 0 : index
    %42 = vector.load %arg4[%c512_21, %c0_22] : memref<3072x768xbf16, #tpu.memory_space<vmem>>, vector<512x768xbf16>
    %cst_23 = arith.constant dense<0.000000e+00> : vector<8x768xf32>
    %43 = tpu.matmul %41, %42, %cst_23 {dimension_numbers = #tpu.dot_dimension_numbers<[1], [0], [0], [1], [0, 0, 1, 1], [], []>} : vector<8x512xbf16>, vector<512x768xbf16>, vector<8x768xf32> -> vector<8x768xf32>
    %44 = arith.addf %23, %43 : vector<8x768xf32>
    %c0_24 = arith.constant 0 : index
    %c1024 = arith.constant 1024 : index
    %45 = vector.load %arg2[%c0_24, %c1024] : memref<768x3072xbf16, #tpu.memory_space<vmem>>, vector<768x512xbf16>
    %cst_25 = arith.constant dense<0.000000e+00> : vector<8x512xf32>
    %46 = tpu.matmul %1, %45, %cst_25 {dimension_numbers = #tpu.dot_dimension_numbers<[1], [0], [0], [1], [0, 0, 1, 1], [], []>} : vector<8x768xbf16>, vector<768x512xbf16>, vector<8x512xf32> -> vector<8x512xf32>
    %c0_26 = arith.constant 0 : index
    %c1024_27 = arith.constant 1024 : index
    %47 = vector.load %arg3[%c0_26, %c1024_27] : memref<1x3072xf32, #tpu.memory_space<vmem>>, vector<1x512xf32>
    %48 = vector.broadcast %47 : vector<1x512xf32> to vector<8x512xf32>
    %49 = arith.addf %46, %48 : vector<8x512xf32>
    %50 = arith.mulf %49, %49 : vector<8x512xf32>
    %cst_28 = arith.constant 0.0356774069 : f32
    %51 = vector.broadcast %cst_28 : f32 to vector<8x512xf32>
    %52 = arith.mulf %51, %50 : vector<8x512xf32>
    %cst_29 = arith.constant 0.797884583 : f32
    %53 = vector.broadcast %cst_29 : f32 to vector<8x512xf32>
    %54 = arith.addf %53, %52 : vector<8x512xf32>
    %55 = arith.mulf %49, %54 : vector<8x512xf32>
    %cst_30 = arith.constant 5.000000e-01 : f32
    %56 = vector.broadcast %cst_30 : f32 to vector<8x512xf32>
    %57 = arith.mulf %56, %49 : vector<8x512xf32>
    %58 = math.tanh %55 : vector<8x512xf32>
    %cst_31 = arith.constant 1.000000e+00 : f32
    %59 = vector.broadcast %cst_31 : f32 to vector<8x512xf32>
    %60 = arith.addf %59, %58 : vector<8x512xf32>
    %61 = arith.mulf %57, %60 : vector<8x512xf32>
    %62 = arith.truncf %61 : vector<8x512xf32> to vector<8x512xbf16>
    %c1024_32 = arith.constant 1024 : index
    %c0_33 = arith.constant 0 : index
    %63 = vector.load %arg4[%c1024_32, %c0_33] : memref<3072x768xbf16, #tpu.memory_space<vmem>>, vector<512x768xbf16>
    %cst_34 = arith.constant dense<0.000000e+00> : vector<8x768xf32>
    %64 = tpu.matmul %62, %63, %cst_34 {dimension_numbers = #tpu.dot_dimension_numbers<[1], [0], [0], [1], [0, 0, 1, 1], [], []>} : vector<8x512xbf16>, vector<512x768xbf16>, vector<8x768xf32> -> vector<8x768xf32>
    %65 = arith.addf %44, %64 : vector<8x768xf32>
    %c0_35 = arith.constant 0 : index
    %c1536 = arith.constant 1536 : index
    %66 = vector.load %arg2[%c0_35, %c1536] : memref<768x3072xbf16, #tpu.memory_space<vmem>>, vector<768x512xbf16>
    %cst_36 = arith.constant dense<0.000000e+00> : vector<8x512xf32>
    %67 = tpu.matmul %1, %66, %cst_36 {dimension_numbers = #tpu.dot_dimension_numbers<[1], [0], [0], [1], [0, 0, 1, 1], [], []>} : vector<8x768xbf16>, vector<768x512xbf16>, vector<8x512xf32> -> vector<8x512xf32>
    %c0_37 = arith.constant 0 : index
    %c1536_38 = arith.constant 1536 : index
    %68 = vector.load %arg3[%c0_37, %c1536_38] : memref<1x3072xf32, #tpu.memory_space<vmem>>, vector<1x512xf32>
    %69 = vector.broadcast %68 : vector<1x512xf32> to vector<8x512xf32>
    %70 = arith.addf %67, %69 : vector<8x512xf32>
    %71 = arith.mulf %70, %70 : vector<8x512xf32>
    %cst_39 = arith.constant 0.0356774069 : f32
    %72 = vector.broadcast %cst_39 : f32 to vector<8x512xf32>
    %73 = arith.mulf %72, %71 : vector<8x512xf32>
    %cst_40 = arith.constant 0.797884583 : f32
    %74 = vector.broadcast %cst_40 : f32 to vector<8x512xf32>
    %75 = arith.addf %74, %73 : vector<8x512xf32>
    %76 = arith.mulf %70, %75 : vector<8x512xf32>
    %cst_41 = arith.constant 5.000000e-01 : f32
    %77 = vector.broadcast %cst_41 : f32 to vector<8x512xf32>
    %78 = arith.mulf %77, %70 : vector<8x512xf32>
    %79 = math.tanh %76 : vector<8x512xf32>
    %cst_42 = arith.constant 1.000000e+00 : f32
    %80 = vector.broadcast %cst_42 : f32 to vector<8x512xf32>
    %81 = arith.addf %80, %79 : vector<8x512xf32>
    %82 = arith.mulf %78, %81 : vector<8x512xf32>
    %83 = arith.truncf %82 : vector<8x512xf32> to vector<8x512xbf16>
    %c1536_43 = arith.constant 1536 : index
    %c0_44 = arith.constant 0 : index
    %84 = vector.load %arg4[%c1536_43, %c0_44] : memref<3072x768xbf16, #tpu.memory_space<vmem>>, vector<512x768xbf16>
    %cst_45 = arith.constant dense<0.000000e+00> : vector<8x768xf32>
    %85 = tpu.matmul %83, %84, %cst_45 {dimension_numbers = #tpu.dot_dimension_numbers<[1], [0], [0], [1], [0, 0, 1, 1], [], []>} : vector<8x512xbf16>, vector<512x768xbf16>, vector<8x768xf32> -> vector<8x768xf32>
    %86 = arith.addf %65, %85 : vector<8x768xf32>
    %c0_46 = arith.constant 0 : index
    %c2048 = arith.constant 2048 : index
    %87 = vector.load %arg2[%c0_46, %c2048] : memref<768x3072xbf16, #tpu.memory_space<vmem>>, vector<768x512xbf16>
    %cst_47 = arith.constant dense<0.000000e+00> : vector<8x512xf32>
    %88 = tpu.matmul %1, %87, %cst_47 {dimension_numbers = #tpu.dot_dimension_numbers<[1], [0], [0], [1], [0, 0, 1, 1], [], []>} : vector<8x768xbf16>, vector<768x512xbf16>, vector<8x512xf32> -> vector<8x512xf32>
    %c0_48 = arith.constant 0 : index
    %c2048_49 = arith.constant 2048 : index
    %89 = vector.load %arg3[%c0_48, %c2048_49] : memref<1x3072xf32, #tpu.memory_space<vmem>>, vector<1x512xf32>
    %90 = vector.broadcast %89 : vector<1x512xf32> to vector<8x512xf32>
    %91 = arith.addf %88, %90 : vector<8x512xf32>
    %92 = arith.mulf %91, %91 : vector<8x512xf32>
    %cst_50 = arith.constant 0.0356774069 : f32
    %93 = vector.broadcast %cst_50 : f32 to vector<8x512xf32>
    %94 = arith.mulf %93, %92 : vector<8x512xf32>
    %cst_51 = arith.constant 0.797884583 : f32
    %95 = vector.broadcast %cst_51 : f32 to vector<8x512xf32>
    %96 = arith.addf %95, %94 : vector<8x512xf32>
    %97 = arith.mulf %91, %96 : vector<8x512xf32>
    %cst_52 = arith.constant 5.000000e-01 : f32
    %98 = vector.broadcast %cst_52 : f32 to vector<8x512xf32>
    %99 = arith.mulf %98, %91 : vector<8x512xf32>
    %100 = math.tanh %97 : vector<8x512xf32>
    %cst_53 = arith.constant 1.000000e+00 : f32
    %101 = vector.broadcast %cst_53 : f32 to vector<8x512xf32>
    %102 = arith.addf %101, %100 : vector<8x512xf32>
    %103 = arith.mulf %99, %102 : vector<8x512xf32>
    %104 = arith.truncf %103 : vector<8x512xf32> to vector<8x512xbf16>
    %c2048_54 = arith.constant 2048 : index
    %c0_55 = arith.constant 0 : index
    %105 = vector.load %arg4[%c2048_54, %c0_55] : memref<3072x768xbf16, #tpu.memory_space<vmem>>, vector<512x768xbf16>
    %cst_56 = arith.constant dense<0.000000e+00> : vector<8x768xf32>
    %106 = tpu.matmul %104, %105, %cst_56 {dimension_numbers = #tpu.dot_dimension_numbers<[1], [0], [0], [1], [0, 0, 1, 1], [], []>} : vector<8x512xbf16>, vector<512x768xbf16>, vector<8x768xf32> -> vector<8x768xf32>
    %107 = arith.addf %86, %106 : vector<8x768xf32>
    %c0_57 = arith.constant 0 : index
    %c2560 = arith.constant 2560 : index
    %108 = vector.load %arg2[%c0_57, %c2560] : memref<768x3072xbf16, #tpu.memory_space<vmem>>, vector<768x512xbf16>
    %cst_58 = arith.constant dense<0.000000e+00> : vector<8x512xf32>
    %109 = tpu.matmul %1, %108, %cst_58 {dimension_numbers = #tpu.dot_dimension_numbers<[1], [0], [0], [1], [0, 0, 1, 1], [], []>} : vector<8x768xbf16>, vector<768x512xbf16>, vector<8x512xf32> -> vector<8x512xf32>
    %c0_59 = arith.constant 0 : index
    %c2560_60 = arith.constant 2560 : index
    %110 = vector.load %arg3[%c0_59, %c2560_60] : memref<1x3072xf32, #tpu.memory_space<vmem>>, vector<1x512xf32>
    %111 = vector.broadcast %110 : vector<1x512xf32> to vector<8x512xf32>
    %112 = arith.addf %109, %111 : vector<8x512xf32>
    %113 = arith.mulf %112, %112 : vector<8x512xf32>
    %cst_61 = arith.constant 0.0356774069 : f32
    %114 = vector.broadcast %cst_61 : f32 to vector<8x512xf32>
    %115 = arith.mulf %114, %113 : vector<8x512xf32>
    %cst_62 = arith.constant 0.797884583 : f32
    %116 = vector.broadcast %cst_62 : f32 to vector<8x512xf32>
    %117 = arith.addf %116, %115 : vector<8x512xf32>
    %118 = arith.mulf %112, %117 : vector<8x512xf32>
    %cst_63 = arith.constant 5.000000e-01 : f32
    %119 = vector.broadcast %cst_63 : f32 to vector<8x512xf32>
    %120 = arith.mulf %119, %112 : vector<8x512xf32>
    %121 = math.tanh %118 : vector<8x512xf32>
    %cst_64 = arith.constant 1.000000e+00 : f32
    %122 = vector.broadcast %cst_64 : f32 to vector<8x512xf32>
    %123 = arith.addf %122, %121 : vector<8x512xf32>
    %124 = arith.mulf %120, %123 : vector<8x512xf32>
    %125 = arith.truncf %124 : vector<8x512xf32> to vector<8x512xbf16>
    %c2560_65 = arith.constant 2560 : index
    %c0_66 = arith.constant 0 : index
    %126 = vector.load %arg4[%c2560_65, %c0_66] : memref<3072x768xbf16, #tpu.memory_space<vmem>>, vector<512x768xbf16>
    %cst_67 = arith.constant dense<0.000000e+00> : vector<8x768xf32>
    %127 = tpu.matmul %125, %126, %cst_67 {dimension_numbers = #tpu.dot_dimension_numbers<[1], [0], [0], [1], [0, 0, 1, 1], [], []>} : vector<8x512xbf16>, vector<512x768xbf16>, vector<8x768xf32> -> vector<8x768xf32>
    %128 = arith.addf %107, %127 : vector<8x768xf32>
    %c0_68 = arith.constant 0 : index
    %c0_69 = arith.constant 0 : index
    %129 = vector.load %arg5[%c0_68, %c0_69] : memref<1x768xf32, #tpu.memory_space<vmem>>, vector<1x768xf32>
    %130 = vector.broadcast %129 : vector<1x768xf32> to vector<8x768xf32>
    %131 = arith.addf %128, %130 : vector<8x768xf32>
    %c0_70 = arith.constant 0 : index
    %c0_71 = arith.constant 0 : index
    %132 = vector.load %arg6[%c0_70, %c0_71] : memref<8x768xf32, #tpu.memory_space<vmem>>, vector<8x768xf32>
    tpu.vector_store %arg6[%c0_70, %c0_71], %131 {strides = array<i32>} : memref<8x768xf32, #tpu.memory_space<vmem>>, vector<8x768xf32>,
    return
  }
  func.func @transform_0(%arg0: i32) -> (i32, i32) {
    %c0_i32 = arith.constant 0 : i32
    %c0_i32_0 = arith.constant 0 : i32
    return %arg0, %c0_i32 : i32, i32
  }
  func.func @transform_1(%arg0: i32) -> (i32, i32) {
    %c0_i32 = arith.constant 0 : i32
    %c0_i32_0 = arith.constant 0 : i32
    %c0_i32_1 = arith.constant 0 : i32
    return %c0_i32, %c0_i32_0 : i32, i32
  }
  func.func @transform_2(%arg0: i32) -> (i32, i32) {
    %c0_i32 = arith.constant 0 : i32
    %c0_i32_0 = arith.constant 0 : i32
    %c0_i32_1 = arith.constant 0 : i32
    return %c0_i32, %c0_i32_0 : i32, i32
  }
  func.func @transform_3(%arg0: i32) -> (i32, i32) {
    %c0_i32 = arith.constant 0 : i32
    %c0_i32_0 = arith.constant 0 : i32
    %c0_i32_1 = arith.constant 0 : i32
    return %c0_i32, %c0_i32_0 : i32, i32
  }
  func.func @transform_4(%arg0: i32) -> (i32, i32) {
    %c0_i32 = arith.constant 0 : i32
    %c0_i32_0 = arith.constant 0 : i32
    %c0_i32_1 = arith.constant 0 : i32
    return %c0_i32, %c0_i32_0 : i32, i32
  }
  func.func @transform_5(%arg0: i32) -> (i32, i32) {
    %c0_i32 = arith.constant 0 : i32
    %c0_i32_0 = arith.constant 0 : i32
    return %arg0, %c0_i32 : i32, i32
  }
}

</mosaic_0001>

<bundles_post_ra>
// kernel: tpu_custom_call.1
= control target key start
LH: loop header
LB: loop body
LE: loop exit
PB: predicated region body
PF: predicated region fallthrough
CT: control target
= control target key end

     0   :  { %10 = vsyncpa [#allocation3], 0  ;;  %s22862_s0 = inlined_call_operand.hbm [shape: f32[16,768], index: 0, kind: input, shape index: {}]   ;;  %s22863_s1 = inlined_call_operand.hbm [shape: bf16[768,3072], index: 1, kind: input, shape index: {}]   ;;  %s22864_s2 = inlined_call_operand.hbm [shape: f32[1,3072], index: 2, kind: input, shape index: {}]   ;;  %s22865_s3 = inlined_call_operand.hbm [shape: bf16[3072,768], index: 3, kind: input, shape index: {}]   ;;  %s22866_s4 = inlined_call_operand.hbm [shape: f32[1,768], index: 4, kind: input, shape index: {}]   ;;  %s22867_s5 = inlined_call_operand.hbm [shape: f32[16,768], index: 5, kind: output, shape index: {}]  }
   0x1   :  { %12 = vsyncpa [#allocation3 + $0x1], 0 }
   0x2   :  { %13 = vsyncpa [#allocation6], 0 }
   0x3   :  { %14 = vsyncpa [#allocation9], 0 }
   0x4   :  { %15 = vsyncpa [#allocation4], 0 }
   0x5   :  { %17 = vsyncpa [#allocation4 + $0x1], 0  ;;  %s22191_s18 = smov 0   ;;  %s22193_s19 = smov 0  }
   0x6   :  { %s22195_s20 = smov 0   ;;  %s22197_s21 = smov 0  }
   0x7 LB: > { %s22151_s22 = smov [#allocation5]   ;;  %s22212_s24 = sadd.s32 4294967295, %s22149_s21   ;;  %s22149_s21 = sphi %s22197_s21, %s22890_s21   ;;  %s22145_s20 = sphi %s22195_s20, %s22889_s20   ;;  %s22141_s19 = sphi %s22193_s19, %s22888_s19   ;;  %s22137_s18 = sphi %s22191_s18, %s22887_s18  }
   0x8   : > { %s176_s23 = sshll.u32 %s22151_s22, 4  ;;  %p17623_p0 = scmp.ge.s32.totalorder %s22149_s21, 1  ;;  %s22217_s23 = int_to_ptr.vmem [resolvable:$true] %s176_s23 }
   0x9   : > { %p22868_p1 = scmp.eq.s32.totalorder %s22212_s24, 0  ;;  %p164_p2 = scmp.lt.s32.totalorder %s22149_s21, 3 }
   0xa   : > { %s22152_s26 = smov [#allocation8]   ;;  %s22153_s29 = smov [#allocation7]  }
   0xb   : > { %p22219_p3 = pnand %p17623_p0, %p164_p2  ;;  %s200_s27 = sshll.u32 %s22152_s26, 4  ;;  %s22232_s27 = int_to_ptr.vmem [resolvable:$true] %s200_s27 }
   0xc   : > { %s22234_s30 = sshll.u32 %s22153_s29, 4  ;;  %s21933_s8 = scalar_lea.hbm %s22863_s1, 147456  ;;  %s191_s30 = int_to_ptr.vmem [resolvable:$true] %s22234_s30 }
   0xd   : > { %s22871_s25 = scalar_select %p22219_p3, 1, 0 }
   0xe   : > { %p20086_p5 = pneg %p22219_p3  ;;  %p21934_p7 = scmp.ne.s32.totalorder %s22863_s1, %s21933_s8 }
   0xf   : > { %p21940_p11 = scmp.lt.u32.totalorder %s21933_s8, %s22863_s1 }
  0x10   : > { %p22228_p6 = pnand %p20086_p5, %p22868_p1 }
  0x12   : > { %p22244_p8 = pneg %p22228_p6 }
  0x14   : > { %p21936_p9 = pnand %p22244_p8, %p21934_p7 }
  0x16   : > { %p21937_p10 = pneg %p21936_p9 }
  0x18   : > { %p21942_p12 = pnand %p21940_p11, %p21937_p10 }
  0x1a   : > { %21945 = shalt.err (!%p21942_p12)
}
  0x1b   : > { %s21946_s14 = scalar_lea.vmem %s22217_s23, 147456  ;;  %p21954_p5 = scmp.lt.s32.totalorder %s22217_s23, %s22217_s23 }
  0x1c   : > { %p21947_p13 = scmp.ne.s32.totalorder %s22217_s23, %s21946_s14  ;;  %p21955_p4 = scmp.lt.s32.totalorder %s21946_s14, %s21946_s14 }
  0x1e   : > { %p21949_p0 = pnand %p21947_p13, %p22244_p8  ;;  %p21956_p7 = por %p21955_p4, %p21954_p5 }
  0x20   : > { %p21950_p2 = pneg %p21949_p0 }
  0x22   : > { %p21957_p9 = pnand %p21956_p7, %p21950_p2 }
  0x24   : > { %21960 = shalt.err (!%p21957_p9)
}
  0x25   : > { %s22154_s15 = smov 1536   ;;  %s22155_s16 = smov 96  }
  0x26   : > { %20089 = dma.hbm_to_vmem [thread:$0]  (!%p22228_p6), %s22863_s1, 147456, %s22217_s23, [#allocation6], %s22154_s15, %s22154_s15, %s22155_s16  }
  0x27   : > { %s21961_s6 = scalar_lea.hbm %s22865_s3, 147456 }
  0x28   : > { %p21962_p4 = scmp.ne.s32.totalorder %s22865_s3, %s21961_s6  ;;  %p21968_p12 = scmp.lt.u32.totalorder %s21961_s6, %s22865_s3 }
  0x2a   : > { %p21964_p10 = pnand %p21962_p4, %p22244_p8 }
  0x2c   : > { %p21965_p11 = pneg %p21964_p10 }
  0x2e   : > { %p21970_p13 = pnand %p21968_p12, %p21965_p11 }
  0x30   : > { %21973 = shalt.err (!%p21970_p13)
}
  0x31   : > { %s21974_s23 = scalar_lea.vmem %s22232_s27, 147456  ;;  %p21982_p7 = scmp.lt.s32.totalorder %s22232_s27, %s22232_s27 }
  0x32   : > { %p21975_p0 = scmp.ne.s32.totalorder %s22232_s27, %s21974_s23  ;;  %p21983_p9 = scmp.lt.s32.totalorder %s21974_s23, %s21974_s23 }
  0x34   : > { %p21977_p2 = pnand %p21975_p0, %p22244_p8  ;;  %p21984_p4 = por %p21983_p9, %p21982_p7 }
  0x36   : > { %p21978_p5 = pneg %p21977_p2 }
  0x38   : > { %p21985_p10 = pnand %p21984_p4, %p21978_p5 }
  0x3a   : > { %21988 = shalt.err (!%p21985_p10)
}
  0x3b   : > { %s22156_s12 = smov 384   ;;  %s22157_s13 = smov 24  }
  0x3c   : > { %20095 = dma.hbm_to_vmem [thread:$0]  (!%p22228_p6), %s22865_s3, 147456, %s22232_s27, [#allocation9], %s22156_s12, %s22156_s12, %s22157_s13  }
  0x3d   : > { %s21989_s22 = scalar_lea.hbm %s22864_s2, 384 }
  0x3e   : > { %p21990_p11 = scmp.ne.s32.totalorder %s22864_s2, %s21989_s22  ;;  %p21996_p0 = scmp.lt.u32.totalorder %s21989_s22, %s22864_s2 }
  0x40   : > { %p21992_p12 = pnand %p21990_p11, %p22244_p8 }
  0x42   : > { %p21993_p13 = pneg %p21992_p12 }
  0x44   : > { %p21998_p2 = pnand %p21996_p0, %p21993_p13 }
  0x46   : > { %22001 = shalt.err (!%p21998_p2)
}
  0x47   : > { %s22002_s8 = scalar_lea.vmem %s191_s30, 384  ;;  %p22010_p4 = scmp.lt.s32.totalorder %s191_s30, %s191_s30 }
  0x48   : > { %p22003_p5 = scmp.ne.s32.totalorder %s191_s30, %s22002_s8  ;;  %p22011_p10 = scmp.lt.s32.totalorder %s22002_s8, %s22002_s8 }
  0x4a   : > { %p22005_p7 = pnand %p22003_p5, %p22244_p8  ;;  %p22012_p1 = por %p22011_p10, %p22010_p4 }
  0x4c   : > { %p22006_p9 = pneg %p22005_p7 }
  0x4e   : > { %p22013_p3 = pnand %p22012_p1, %p22006_p9 }
  0x50   : > { %22016 = shalt.err (!%p22013_p3)
}
  0x51   : > { %20092 = dma.hbm_to_vmem [thread:$0]  (!%p22228_p6), %s22864_s2, 384, %s191_s30, [#allocation6]  }
  0x52   : > { %s22158_s10 = smov [#allocation10]   ;;  %s22017_s14 = scalar_lea.hbm %s22866_s4, 96 }
  0x53   : > { %s214_s23 = sshll.u32 %s22158_s10, 4  ;;  %p22018_p11 = scmp.ne.s32.totalorder %s22866_s4, %s22017_s14  ;;  %s215_s23 = int_to_ptr.vmem [resolvable:$true] %s214_s23 }
  0x54   : > { %p22024_p12 = scmp.lt.u32.totalorder %s22017_s14, %s22866_s4 }
  0x55   : > { %p22020_p1 = pnand %p22018_p11, %p22244_p8 }
  0x57   : > { %p22021_p3 = pneg %p22020_p1 }
  0x59   : > { %p22026_p13 = pnand %p22024_p12, %p22021_p3 }
  0x5b   : > { %22029 = shalt.err (!%p22026_p13)
}
  0x5c   : > { %s22030_s30 = scalar_lea.vmem %s215_s23, 96  ;;  %p22038_p7 = scmp.lt.s32.totalorder %s215_s23, %s215_s23 }
  0x5d   : > { %p22031_p0 = scmp.ne.s32.totalorder %s215_s23, %s22030_s30  ;;  %p22039_p9 = scmp.lt.s32.totalorder %s22030_s30, %s22030_s30 }
  0x5f   : > { %p22033_p2 = pnand %p22031_p0, %p22244_p8  ;;  %p22040_p4 = por %p22039_p9, %p22038_p7 }
  0x61   : > { %p22034_p5 = pneg %p22033_p2 }
  0x63   : > { %p22041_p10 = pnand %p22040_p4, %p22034_p5 }
  0x65   : > { %22044 = shalt.err (!%p22041_p10)
}
  0x66   : > { %20098 = dma.hbm_to_vmem [thread:$0]  (!%p22228_p6), %s22866_s4, 96, %s215_s23, [#allocation9]  }
  0x67   : > { %s17622_s11 = sadd.s32 4294967294, %s22149_s21   ;;  %s22327_s28 = sadd.s32 1, %s22149_s21  }
  0x68   : > { %s27_s6 = ssub.s32 %s22149_s21, %s22327_s28  ;;  %s30_s7 = sadd.s32 1, %s22145_s20 }
  0x69   : > { %p28_p8 = scmp.eq.s32.totalorder %s27_s6, 0  ;;  %p37_p11 = scmp.ne.s32.totalorder %s22145_s20, %s22141_s19 }
  0x6a   : > { %p38_p1 = scmp.eq.s32.totalorder %s22149_s21, 0  ;;  %p43_p3 = scmp.ne.s32.totalorder %s22141_s19, %s22137_s18 }
  0x6b   : > { %s22338_s8 = scalar_select %p28_p8, %s22145_s20, %s30_s7  }
  0x6c   : > { %p39_p12 = por %p38_p1, %p37_p11  ;;  %p22874_p13 = scmp.eq.s32.totalorder %s22212_s24, 0 }
  0x6d   : > { %p151_p6 = scmp.eq.s32.totalorder %s22212_s24, 1  ;;  %p157_p2 = scmp.eq.s32.totalorder %s17622_s11, 1 }
  0x6e   : > { %p22342_p0 = por %p22874_p13, %p43_p3  ;;  %p20111_p5 = scmp.lt.s32.totalorder %s22149_s21, 2 }
  0x6f   : > { %s225_s9 = sand.u32 1, %s22145_s20   ;;  %p22349_p7 = por %p151_p6, %p37_p11 }
  0x70   : > { %p22353_p9 = por %p157_p2, %p43_p3  ;;  %s20062_s12 = smul.u32 48, %s225_s9 }
  0x71   : > { %s22876_s10 = scalar_select %p22349_p7, 1, 0 }
  0x72   : > { %s22877_s23 = scalar_select %p22353_p9, 1, 0 }
  0x73   : > { %s20063_s13 = smul.u32 768, %s22149_s21  ;;  %p22358_p4 = pnand %p20111_p5, %p39_p12 }
  0x74   : > { %s229_s22 = scalar_lea.vmem [#allocation2], %s20062_s12  ;;  %s226_s26 = scalar_lea.sflag [#allocation3], %s225_s9 }
  0x75   : > { %s22365_s17 = scalar_lea.hbm %s22862_s0, %s20063_s13  ;;  %s237_s30 = sshll.u32 %s229_s22, 4  ;;  %s22367_s30 = int_to_ptr.vmem [resolvable:$true] %s237_s30 }
  0x76   : > { %s22045_s29 = scalar_lea.hbm %s22365_s17, 768  ;;  %p22047_p8 = pneg %p22358_p4 }
  0x77   : > { %p22046_p10 = scmp.ne.s32.totalorder %s22365_s17, %s22045_s29  ;;  %s22050_s7 = scalar_lea.hbm %s22862_s0, 1536 }
  0x78   : > { %p22051_p3 = scmp.lt.u32.totalorder %s22365_s17, %s22862_s0  ;;  %p22052_p12 = scmp.lt.u32.totalorder %s22050_s7, %s22045_s29 }
  0x79   : > { %p22048_p11 = pnand %p22047_p8, %p22046_p10  ;;  %p22054_p6 = scmp.lt.u32.totalorder %s22045_s29, %s22365_s17 }
  0x7a   : > { %p22053_p13 = por %p22052_p12, %p22051_p3 }
  0x7b   : > { %p22049_p1 = pneg %p22048_p11 }
  0x7c   : > { %p22055_p2 = por %p22054_p6, %p22053_p13 }
  0x7e   : > { %p22056_p5 = pnand %p22055_p2, %p22049_p1 }
  0x80   : > { %22059 = shalt.err (!%p22056_p5)
}
  0x81   : > { %s22060_s9 = scalar_lea.vmem %s22367_s30, 768  ;;  %s22159_s12 = smov [#allocation2]  }
  0x82   : > { %p22061_p10 = scmp.ne.s32.totalorder %s22367_s30, %s22060_s9  ;;  %s22065_s16 = sshll.u32 %s22159_s12, 4  ;;  %s22066_s16 = int_to_ptr.vmem [resolvable:$false] %s22065_s16 }
  0x83   : > { %s22067_s22 = scalar_lea.vmem %s22066_s16, 1536  ;;  %p22068_p7 = scmp.lt.s32.totalorder %s22367_s30, %s22066_s16 }
  0x84   : > { %p22063_p11 = pnand %p22061_p10, %p22047_p8  ;;  %p22069_p3 = scmp.lt.s32.totalorder %s22067_s22, %s22060_s9 }
  0x86   : > { %p22064_p9 = pneg %p22063_p11  ;;  %p22070_p12 = por %p22069_p3, %p22068_p7 }
  0x88   : > { %p22071_p13 = pnand %p22070_p12, %p22064_p9 }
  0x8a   : > { %22074 = shalt.err (!%p22071_p13)
}
  0x8b   : > { %20102 = dma.hbm_to_vmem [thread:$0]  (!%p22358_p4), %s22365_s17, 768, %s22367_s30, %s226_s26  }
  0x8c   : > { %p22879_p1 = scmp.ne.s32.totalorder %s22871_s25, 0 }
  0x8d   : > { %s22397_s29 = sand.u32 (!%p22879_p1), 1, %s22141_s19  }
  0x8e   : > { %246 = sbr.rel (%p22879_p1) target bundleno = 3588 (0xe04), region = 40  ;;  %s249_s6 = scalar_lea.sflag (!%p22879_p1), [#allocation3], %s22397_s29 }
  0x8f   : > { %s20064_s11 = smul.u32 (!%p22879_p1), 48, %s22397_s29 }
  0x91   : > { %s22403_s7 = scalar_lea.vmem (!%p22879_p1), [#allocation2], %s20064_s11 }
  0x95   : > { %22120 = dma.done.wait (%p22342_p0), %s249_s6, 768  }
  0x96   : > { %22122 = vsyncadd (%p22342_p0), %s249_s6, 4294966528  ;;  %p22880_p7 = scmp.eq.s32.totalorder %s22212_s24, 0 }
  0x98   : > { %22124 = dma.done.wait (%p22880_p7), [#allocation6], 147840   ;;  %p22881_p9 = pmov %p22880_p7 }
  0x99   : > { %p22882_p4 = pmov %p22880_p7 }
  0x9a   : > { %22126 = vsyncadd (%p22881_p9), [#allocation6], 4294819456 }
  0x9b   : > { %22128 = dma.done.wait (%p22882_p4), [#allocation9], 147552   ;;  %p22883_p8 = pmov %p22882_p4 }
  0x9c   : > { %v307_v0 = vld [vmem:[#allocation5] sm:$0xff]  ;;  %v308_v2 = vld [vmem:[#allocation5 + $0x8] sm:$0xff]  ;;  %s22797_s25 = scalar_lea.vmem [#allocation11], %s20064_s11  ;;  %s20065_s27 = smul.u32 768, %s22212_s24 }
  0x9d   : > { %22130 = vsyncadd (%p22883_p8), [#allocation9], 4294819744  ;;  %v309_v1 = vld [vmem:[#allocation5 + $0x60] sm:$0xff]  ;;  %v310_v4 = vld [vmem:[#allocation5 + $0x68] sm:$0xff]  ;;  %s17514_s14 = sshll.u32 %s22797_s25, 4  ;;  %s17500_s24 = scalar_lea.sflag [#allocation4], %s22397_s29  ;;  %s22818_s14 = int_to_ptr.vmem [resolvable:$true] %s17514_s14 }
  0x9e   : > { %v17636_v3 = vcombine.high %v307_v0, %v309_v1  ;;  %v17635_v5 = vcombine.low %v307_v0, %v309_v1  ;;  %v311_v6 = vld [vmem:[#allocation5 + $0xc0] sm:$0xff]  ;;  %v17638_v8 = vcombine.high %v308_v2, %v310_v4  ;;  %v17637_v9 = vcombine.low %v308_v2, %v310_v4  ;;  %v312_v11 = vld [vmem:[#allocation5 + $0xc8] sm:$0xff]  ;;  %s22816_s26 = scalar_lea.hbm %s22867_s5, %s20065_s27  ;;  %s22075_s13 = scalar_lea.vmem %s22818_s14, 768 }
  0x9f   : > { %v313_v7 = vld [vmem:[#allocation5 + $0x120] sm:$0xff]  ;;  %v314_v12 = vld [vmem:[#allocation5 + $0x128] sm:$0xff]  ;;  %p22076_p0 = scmp.ne.s32.totalorder %s22818_s14, %s22075_s13  ;;  %p22884_p6 = scmp.ne.s32.totalorder %s22876_s10, 0 }
  0xa0   : > { %v17640_v10 = vcombine.high %v311_v6, %v313_v7  ;;  %v315_v13 = vld [vmem:[#allocation5 + $0x180] sm:$0xff]  ;;  %1481 = vmatprep.subr.bf16.mxu0 %v17636_v3  ;;  %v17642_v14 = vcombine.high %v312_v11, %v314_v12  ;;  %v316_v16 = vld [vmem:[#allocation5 + $0x188] sm:$0xff]  ;;  %1604 = vmatprep.subr.bf16.mxu1 %v17638_v8  ;;  %v17639_v18 = vcombine.low %v311_v6, %v313_v7  ;;  %s22160_s15 = smov [#allocation11]  }
  0xa1   : > { %v317_v15 = vld [vmem:[#allocation5 + $0x1e0] sm:$0xff]  ;;  %v318_v17 = vld [vmem:[#allocation5 + $0x1e8] sm:$0xff]  ;;  %1482 = vmatpush1.bf16.msra.mxu0 %v17635_v5  ;;  %1605 = vmatpush1.bf16.msra.mxu1 %v17637_v9  ;;  %v17641_v19 = vcombine.low %v312_v11, %v314_v12  ;;  %p22077_p2 = pnand %p22076_p0, %p22884_p6  ;;  %s22079_s9 = sshll.u32 %s22160_s15, 4  ;;  %s22080_s9 = int_to_ptr.vmem [resolvable:$false] %s22079_s9 }
  0xa2   : > { %1483 = vmatprep.subr.bf16.mxu0 %v17640_v10  ;;  %v17644_v20 = vcombine.high %v315_v13, %v317_v15  ;;  %1606 = vmatprep.subr.bf16.mxu1 %v17642_v14  ;;  %v17646_v21 = vcombine.high %v316_v16, %v318_v17  ;;  %v319_v22 = vld [vmem:[#allocation5 + $0x240] sm:$0xff]  ;;  %v320_v24 = vld [vmem:[#allocation5 + $0x248] sm:$0xff]  ;;  %v17643_v26 = vcombine.low %v315_v13, %v317_v15  ;;  %s22081_s12 = scalar_lea.vmem %s22080_s9, 1536  ;;  %p22082_p10 = scmp.lt.s32.totalorder %s22818_s14, %s22080_s9 }
  0xa3   : > { %v321_v23 = vld [vmem:[#allocation5 + $0x2a0] sm:$0xff]  ;;  %v322_v25 = vld [vmem:[#allocation5 + $0x2a8] sm:$0xff]  ;;  %v17645_v27 = vcombine.low %v316_v16, %v318_v17  ;;  %p22078_p5 = pneg %p22077_p2  ;;  %p22083_p11 = scmp.lt.s32.totalorder %s22081_s12, %s22075_s13 }
  0xa4   : > { %v17648_v28 = vcombine.high %v319_v22, %v321_v23  ;;  %v17650_v29 = vcombine.high %v320_v24, %v322_v25  ;;  %v323_v30 = vld [vmem:[#allocation5 + $0x300] sm:$0xff]  ;;  %v324_v32 = vld [vmem:[#allocation5 + $0x308] sm:$0xff]  ;;  %v17647_v34 = vcombine.low %v319_v22, %v321_v23  ;;  %v17649_v35 = vcombine.low %v320_v24, %v322_v25 }
  0xa5   : > { %1484 = vmatpush1.bf16.msra.mxu0 %v17639_v18  ;;  %1607 = vmatpush1.bf16.msra.mxu1 %v17641_v19  ;;  %v325_v31 = vld [vmem:[#allocation5 + $0x360] sm:$0xff]  ;;  %v326_v33 = vld [vmem:[#allocation5 + $0x368] sm:$0xff]  ;;  %p22084_p3 = por %p22083_p11, %p22082_p10 }
  0xa6   : > { %1485 = vmatprep.subr.bf16.mxu0 %v17644_v20  ;;  %1608 = vmatprep.subr.bf16.mxu1 %v17646_v21  ;;  %v17652_v36 = vcombine.high %v323_v30, %v325_v31  ;;  %v17654_v37 = vcombine.high %v324_v32, %v326_v33  ;;  %v327_v38 = vld [vmem:[#allocation5 + $0x3c0] sm:$0xff]  ;;  %v328_v40 = vld [vmem:[#allocation5 + $0x3c8] sm:$0xff]  ;;  %v17651_v42 = vcombine.low %v323_v30, %v325_v31 }
  0xa7   : > { %v329_v39 = vld [vmem:[#allocation5 + $0x420] sm:$0xff]  ;;  %v330_v41 = vld [vmem:[#allocation5 + $0x428] sm:$0xff]  ;;  %v17653_v43 = vcombine.low %v324_v32, %v326_v33  ;;  %p22085_p12 = pnand %p22084_p3, %p22078_p5 }
  0xa8   : > { %v17656_v44 = vcombine.high %v327_v38, %v329_v39  ;;  %v17658_v45 = vcombine.high %v328_v40, %v330_v41  ;;  %v331_v46 = vld [vmem:[#allocation5 + $0x480] sm:$0xff]  ;;  %v332_v48 = vld [vmem:[#allocation5 + $0x488] sm:$0xff]  ;;  %v17655_v50 = vcombine.low %v327_v38, %v329_v39  ;;  %v17657_v51 = vcombine.low %v328_v40, %v330_v41 }
  0xa9   : > { %1486 = vmatpush1.bf16.msra.mxu0 %v17643_v26  ;;  %1609 = vmatpush1.bf16.msra.mxu1 %v17645_v27  ;;  %v333_v47 = vld [vmem:[#allocation5 + $0x4e0] sm:$0xff]  ;;  %v334_v49 = vld [vmem:[#allocation5 + $0x4e8] sm:$0xff] }
  0xaa   : > { %1487 = vmatprep.subr.bf16.mxu0 %v17648_v28  ;;  %1610 = vmatprep.subr.bf16.mxu1 %v17650_v29  ;;  %v17660_v52 = vcombine.high %v331_v46, %v333_v47  ;;  %v296_v53 = vld [vmem:[%s22403_s7 + $0x8] sm:$0xff]  ;;  %v17662_v54 = vcombine.high %v332_v48, %v334_v49  ;;  %v335_v55 = vld [vmem:[#allocation5 + $0x540] sm:$0xff]  ;;  %v17659_v60 = vcombine.low %v331_v46, %v333_v47 }
  0xab   : > { %v337_v56 = vld [vmem:[#allocation5 + $0x5a0] sm:$0xff]  ;;  %v22418_v57 = vpack.c.bf16 %v296_v53, %v296_v53  ;;  %v336_v58 = vld [vmem:[#allocation5 + $0x548] sm:$0xff]  ;;  %v17661_v61 = vcombine.low %v332_v48, %v334_v49 }
  0xac   : > { %v338_v59 = vld [vmem:[#allocation5 + $0x5a8] sm:$0xff]  ;;  %v17664_v62 = vcombine.high %v335_v55, %v337_v56  ;;  %v339_v0 = vld [vmem:[#allocation5 + $0x600] sm:$0xff]  ;;  %v17663_v4 = vcombine.low %v335_v55, %v337_v56 }
  0xad   : > { %1488 = vmatpush1.bf16.msra.mxu0 %v17647_v34  ;;  %1611 = vmatpush1.bf16.msra.mxu1 %v17649_v35  ;;  %v17666_v63 = vcombine.high %v336_v58, %v338_v59  ;;  %v341_v1 = vld [vmem:[#allocation5 + $0x660] sm:$0xff]  ;;  %v340_v2 = vld [vmem:[#allocation5 + $0x608] sm:$0xff]  ;;  %v17665_v5 = vcombine.low %v336_v58, %v338_v59 }
  0xae   : > { %1489 = vmatprep.subr.bf16.mxu0 %v17652_v36  ;;  %1612 = vmatprep.subr.bf16.mxu1 %v17654_v37  ;;  %v342_v3 = vld [vmem:[#allocation5 + $0x668] sm:$0xff]  ;;  %v17668_v6 = vcombine.high %v339_v0, %v341_v1  ;;  %v343_v8 = vld [vmem:[#allocation5 + $0x6c0] sm:$0xff]  ;;  %v17667_v12 = vcombine.low %v339_v0, %v341_v1 }
  0xaf   : > { %1513 = vmatprep.mubr.bf16.mxu0 %v22418_v57  ;;  %1636 = vmatprep.mubr.bf16.mxu1 %v22418_v57  ;;  %v17670_v7 = vcombine.high %v340_v2, %v342_v3  ;;  %v345_v9 = vld [vmem:[#allocation5 + $0x720] sm:$0xff]  ;;  %v344_v10 = vld [vmem:[#allocation5 + $0x6c8] sm:$0xff]  ;;  %v17669_v13 = vcombine.low %v340_v2, %v342_v3 }
  0xb0   : > { %v346_v11 = vld [vmem:[#allocation5 + $0x728] sm:$0xff]  ;;  %v17672_v14 = vcombine.high %v343_v8, %v345_v9  ;;  %v347_v16 = vld [vmem:[#allocation5 + $0x780] sm:$0xff]  ;;  %v17671_v20 = vcombine.low %v343_v8, %v345_v9 }
  0xb1   : > { %1490 = vmatpush1.bf16.msra.mxu0 %v17651_v42  ;;  %1613 = vmatpush1.bf16.msra.mxu1 %v17653_v43  ;;  %v17674_v15 = vcombine.high %v344_v10, %v346_v11  ;;  %v349_v17 = vld [vmem:[#allocation5 + $0x7e0] sm:$0xff]  ;;  %v348_v18 = vld [vmem:[#allocation5 + $0x788] sm:$0xff]  ;;  %v17673_v21 = vcombine.low %v344_v10, %v346_v11 }
  0xb2   : > { %1491 = vmatprep.subr.bf16.mxu0 %v17656_v44  ;;  %1614 = vmatprep.subr.bf16.mxu1 %v17658_v45  ;;  %v350_v19 = vld [vmem:[#allocation5 + $0x7e8] sm:$0xff]  ;;  %v17676_v22 = vcombine.high %v347_v16, %v349_v17  ;;  %v351_v24 = vld [vmem:[#allocation5 + $0x840] sm:$0xff]  ;;  %v17675_v28 = vcombine.low %v347_v16, %v349_v17 }
  0xb3   : > { %v17678_v23 = vcombine.high %v348_v18, %v350_v19  ;;  %v353_v25 = vld [vmem:[#allocation5 + $0x8a0] sm:$0xff]  ;;  %v352_v26 = vld [vmem:[#allocation5 + $0x848] sm:$0xff]  ;;  %v17677_v29 = vcombine.low %v348_v18, %v350_v19 }
  0xb4   : > { %v354_v27 = vld [vmem:[#allocation5 + $0x8a8] sm:$0xff]  ;;  %v17680_v30 = vcombine.high %v351_v24, %v353_v25  ;;  %v355_v32 = vld [vmem:[#allocation5 + $0x900] sm:$0xff]  ;;  %v17679_v36 = vcombine.low %v351_v24, %v353_v25 }
  0xb5   : > { %1492 = vmatpush1.bf16.msra.mxu0 %v17655_v50  ;;  %1615 = vmatpush1.bf16.msra.mxu1 %v17657_v51  ;;  %v17682_v31 = vcombine.high %v352_v26, %v354_v27  ;;  %v357_v33 = vld [vmem:[#allocation5 + $0x960] sm:$0xff]  ;;  %v356_v34 = vld [vmem:[#allocation5 + $0x908] sm:$0xff]  ;;  %v17681_v37 = vcombine.low %v352_v26, %v354_v27 }
  0xb6   : > { %1493 = vmatprep.subr.bf16.mxu0 %v17660_v52  ;;  %1616 = vmatprep.subr.bf16.mxu1 %v17662_v54  ;;  %v358_v35 = vld [vmem:[#allocation5 + $0x968] sm:$0xff]  ;;  %v17684_v38 = vcombine.high %v355_v32, %v357_v33  ;;  %v359_v40 = vld [vmem:[#allocation5 + $0x9c0] sm:$0xff]  ;;  %v17683_v44 = vcombine.low %v355_v32, %v357_v33 }
  0xb7   : > { %v17686_v39 = vcombine.high %v356_v34, %v358_v35  ;;  %v361_v41 = vld [vmem:[#allocation5 + $0xa20] sm:$0xff]  ;;  %v360_v42 = vld [vmem:[#allocation5 + $0x9c8] sm:$0xff]  ;;  %v17685_v45 = vcombine.low %v356_v34, %v358_v35 }
  0xb8   : > { %v362_v43 = vld [vmem:[#allocation5 + $0xa28] sm:$0xff]  ;;  %v17688_v46 = vcombine.high %v359_v40, %v361_v41  ;;  %v363_v48 = vld [vmem:[#allocation5 + $0xa80] sm:$0xff]  ;;  %v17687_v52 = vcombine.low %v359_v40, %v361_v41 }
  0xb9   : > { %1494 = vmatpush1.bf16.msra.mxu0 %v17659_v60  ;;  %1617 = vmatpush1.bf16.msra.mxu1 %v17661_v61  ;;  %v17690_v47 = vcombine.high %v360_v42, %v362_v43  ;;  %v365_v49 = vld [vmem:[#allocation5 + $0xae0] sm:$0xff]  ;;  %v364_v50 = vld [vmem:[#allocation5 + $0xa88] sm:$0xff]  ;;  %v17689_v53 = vcombine.low %v360_v42, %v362_v43 }
  0xba   : > { %1495 = vmatprep.subr.bf16.mxu0 %v17664_v62  ;;  %1618 = vmatprep.subr.bf16.mxu1 %v17666_v63  ;;  %v366_v51 = vld [vmem:[#allocation5 + $0xae8] sm:$0xff]  ;;  %v17692_v54 = vcombine.high %v363_v48, %v365_v49  ;;  %v367_v56 = vld [vmem:[#allocation5 + $0xb40] sm:$0xff]  ;;  %v17691_v61 = vcombine.low %v363_v48, %v365_v49 }
  0xbb   : > { %v17694_v55 = vcombine.high %v364_v50, %v366_v51  ;;  %v369_v58 = vld [vmem:[#allocation5 + $0xba0] sm:$0xff]  ;;  %v368_v59 = vld [vmem:[#allocation5 + $0xb48] sm:$0xff]  ;;  %v17693_v62 = vcombine.low %v364_v50, %v366_v51 }
  0xbc   : > { %v370_v60 = vld [vmem:[#allocation5 + $0xba8] sm:$0xff]  ;;  %v17696_v63 = vcombine.high %v367_v56, %v369_v58  ;;  %v371_v1 = vld [vmem:[#allocation5 + $0xc00] sm:$0xff] }
  0xbd   : > { %1496 = vmatpush1.bf16.msra.mxu0 %v17663_v4  ;;  %1619 = vmatpush1.bf16.msra.mxu1 %v17665_v5  ;;  %v17698_v0 = vcombine.high %v368_v59, %v370_v60  ;;  %v373_v2 = vld [vmem:[#allocation5 + $0xc60] sm:$0xff]  ;;  %v372_v3 = vld [vmem:[#allocation5 + $0xc08] sm:$0xff]  ;;  %v17695_v5 = vcombine.low %v367_v56, %v369_v58 }
  0xbe   : > { %1497 = vmatprep.subr.bf16.mxu0 %v17668_v6  ;;  %1620 = vmatprep.subr.bf16.mxu1 %v17670_v7  ;;  %v374_v4 = vld [vmem:[#allocation5 + $0xc68] sm:$0xff]  ;;  %v295_v6 = vld [vmem:[%s22403_s7] sm:$0xff]  ;;  %v17697_v7 = vcombine.low %v368_v59, %v370_v60  ;;  %v17700_v8 = vcombine.high %v371_v1, %v373_v2  ;;  %v17699_v16 = vcombine.low %v371_v1, %v373_v2 }
  0xbf   : > { %v17702_v9 = vcombine.high %v372_v3, %v374_v4  ;;  %v375_v10 = vld [vmem:[#allocation5 + $0xcc0] sm:$0xff]  ;;  %v17701_v17 = vcombine.low %v372_v3, %v374_v4  ;;  %v382_v24 = vld [vmem:[#allocation5 + $0xde8] sm:$0xff] }
  0xc0   : > { %v377_v11 = vld [vmem:[#allocation5 + $0xd20] sm:$0xff]  ;;  %v386_v32 = vld [vmem:[#allocation5 + $0xea8] sm:$0xff] }
  0xc1   : > { %1498 = vmatpush1.bf16.msra.mxu0 %v17667_v12  ;;  %1621 = vmatpush1.bf16.msra.mxu1 %v17669_v13  ;;  %v22423_v12 = vpack.c.bf16 %v295_v6, %v295_v6  ;;  %v376_v13 = vld [vmem:[#allocation5 + $0xcc8] sm:$0xff]  ;;  %v17704_v18 = vcombine.high %v375_v10, %v377_v11  ;;  %v17703_v25 = vcombine.low %v375_v10, %v377_v11  ;;  %v405_v6 = vld [vmem:[#allocation5 + $0x1260] sm:$0xff] }
  0xc2   : > { %1499 = vmatprep.subr.bf16.mxu0 %v17672_v14  ;;  %1622 = vmatprep.subr.bf16.mxu1 %v17674_v15  ;;  %v378_v14 = vld [vmem:[#allocation5 + $0xd28] sm:$0xff] }
  0xc3   : > { %v298_v15 = vld [vmem:[%s22403_s7 + $0x18] sm:$0xff]  ;;  %v17706_v19 = vcombine.high %v376_v13, %v378_v14  ;;  %v17705_v26 = vcombine.low %v376_v13, %v378_v14  ;;  %v407_v14 = vld [vmem:[#allocation5 + $0x12c0] sm:$0xff] }
  0xc4   : > { %v390_v40 = vld [vmem:[#allocation5 + $0xf68] sm:$0xff] }
  0xc5   : > { %1500 = vmatpush1.bf16.msra.mxu0 %v17671_v20  ;;  %1623 = vmatpush1.bf16.msra.mxu1 %v17673_v21  ;;  %v379_v20 = vld [vmem:[#allocation5 + $0xd80] sm:$0xff]  ;;  %v394_v48 = vld [vmem:[#allocation5 + $0x1028] sm:$0xff] }
  0xc6   : > { %1501 = vmatprep.subr.bf16.mxu0 %v17676_v22  ;;  %1624 = vmatprep.subr.bf16.mxu1 %v17678_v23  ;;  %v381_v21 = vld [vmem:[#allocation5 + $0xde0] sm:$0xff]  ;;  %v380_v22 = vld [vmem:[#allocation5 + $0xd88] sm:$0xff]  ;;  %v22426_v23 = vpack.c.bf16 %v298_v15, %v298_v15 }
  0xc7   : > { %v17708_v27 = vcombine.high %v379_v20, %v381_v21  ;;  %v17707_v33 = vcombine.low %v379_v20, %v381_v21  ;;  %v17709_v34 = vcombine.low %v380_v22, %v382_v24  ;;  %v398_v56 = vld [vmem:[#allocation5 + $0x10e8] sm:$0xff]  ;;  %v409_v15 = vld [vmem:[#allocation5 + $0x1320] sm:$0xff] }
  0xc8   : > { %v402_v1 = vld [vmem:[#allocation5 + $0x11a8] sm:$0xff]  ;;  %v17736_v21 = vcombine.high %v407_v14, %v409_v15 }
  0xc9   : > { %1502 = vmatpush1.bf16.msra.mxu0 %v17675_v28  ;;  %1625 = vmatpush1.bf16.msra.mxu1 %v17677_v29  ;;  %v383_v28 = vld [vmem:[#allocation5 + $0xe40] sm:$0xff] }
  0xca   : > { %1503 = vmatprep.subr.bf16.mxu0 %v17680_v30  ;;  %1626 = vmatprep.subr.bf16.mxu1 %v17682_v31  ;;  %v385_v29 = vld [vmem:[#allocation5 + $0xea0] sm:$0xff]  ;;  %v384_v30 = vld [vmem:[#allocation5 + $0xe48] sm:$0xff]  ;;  %v17710_v31 = vcombine.high %v380_v22, %v382_v24 }
  0xcb   : > { %v17712_v35 = vcombine.high %v383_v28, %v385_v29  ;;  %v17711_v41 = vcombine.low %v383_v28, %v385_v29  ;;  %v17713_v42 = vcombine.low %v384_v30, %v386_v32  ;;  %v411_v22 = vld [vmem:[#allocation5 + $0x1380] sm:$0xff]  ;;  %v17735_v28 = vcombine.low %v407_v14, %v409_v15 }
  0xcc   : > { %v413_v24 = vld [vmem:[#allocation5 + $0x13e0] sm:$0xff] }
  0xcd   : > { %1504 = vmatpush1.bf16.msra.mxu0 %v17679_v36  ;;  %1627 = vmatpush1.bf16.msra.mxu1 %v17681_v37  ;;  %v387_v36 = vld [vmem:[#allocation5 + $0xf00] sm:$0xff] }
  0xce   : > { %1505 = vmatprep.subr.bf16.mxu0 %v17684_v38  ;;  %1628 = vmatprep.subr.bf16.mxu1 %v17686_v39  ;;  %v389_v37 = vld [vmem:[#allocation5 + $0xf60] sm:$0xff]  ;;  %v388_v38 = vld [vmem:[#allocation5 + $0xf08] sm:$0xff]  ;;  %v17714_v39 = vcombine.high %v384_v30, %v386_v32  ;;  %v17740_v30 = vcombine.high %v411_v22, %v413_v24 }
  0xcf   : > { %v17716_v43 = vcombine.high %v387_v36, %v389_v37  ;;  %v17715_v49 = vcombine.low %v387_v36, %v389_v37  ;;  %v17717_v50 = vcombine.low %v388_v38, %v390_v40  ;;  %v417_v32 = vld [vmem:[#allocation5 + $0x14a0] sm:$0xff]  ;;  %v17739_v36 = vcombine.low %v411_v22, %v413_v24  ;;  %v300_v24 = vld [vmem:[%s22403_s7 + $0x28] sm:$0xff] }
  0xd0   : > { %v297_v14 = vld [vmem:[%s22403_s7 + $0x10] sm:$0xff] }
  0xd1   : > { %1506 = vmatpush1.bf16.msra.mxu0 %v17683_v44  ;;  %1629 = vmatpush1.bf16.msra.mxu1 %v17685_v45  ;;  %v391_v44 = vld [vmem:[#allocation5 + $0xfc0] sm:$0xff] }
  0xd2   : > { %1507 = vmatprep.subr.bf16.mxu0 %v17688_v46  ;;  %1630 = vmatprep.subr.bf16.mxu1 %v17690_v47  ;;  %v393_v45 = vld [vmem:[#allocation5 + $0x1020] sm:$0xff]  ;;  %v392_v46 = vld [vmem:[#allocation5 + $0xfc8] sm:$0xff]  ;;  %v17718_v47 = vcombine.high %v388_v38, %v390_v40 }
  0xd3   : > { %v17720_v51 = vcombine.high %v391_v44, %v393_v45  ;;  %v17719_v58 = vcombine.low %v391_v44, %v393_v45  ;;  %v17721_v59 = vcombine.low %v392_v46, %v394_v48  ;;  %v421_v40 = vld [vmem:[#allocation5 + $0x1560] sm:$0xff] }
  0xd5   : > { %1508 = vmatpush1.bf16.msra.mxu0 %v17687_v52  ;;  %1631 = vmatpush1.bf16.msra.mxu1 %v17689_v53  ;;  %v395_v52 = vld [vmem:[#allocation5 + $0x1080] sm:$0xff] }
  0xd6   : > { %1509 = vmatprep.subr.bf16.mxu0 %v17692_v54  ;;  %1632 = vmatprep.subr.bf16.mxu1 %v17694_v55  ;;  %v397_v53 = vld [vmem:[#allocation5 + $0x10e0] sm:$0xff]  ;;  %v396_v54 = vld [vmem:[#allocation5 + $0x1088] sm:$0xff]  ;;  %v17722_v55 = vcombine.high %v392_v46, %v394_v48 }
  0xd7   : > { %v17724_v60 = vcombine.high %v395_v52, %v397_v53  ;;  %v17723_v2 = vcombine.low %v395_v52, %v397_v53  ;;  %v17725_v3 = vcombine.low %v396_v54, %v398_v56  ;;  %v425_v48 = vld [vmem:[#allocation5 + $0x1620] sm:$0xff] }
  0xd9   : > { %1510 = vmatpush1.bf16.msra.mxu0 %v17691_v61  ;;  %1633 = vmatpush1.bf16.msra.mxu1 %v17693_v62  ;;  %v399_v61 = vld [vmem:[#allocation5 + $0x1140] sm:$0xff] }
  0xda   : > { %1511 = vmatprep.subr.bf16.mxu0 %v17696_v63  ;;  %1634 = vmatprep.subr.bf16.mxu1 %v17698_v0  ;;  %v401_v62 = vld [vmem:[#allocation5 + $0x11a0] sm:$0xff]  ;;  %v400_v63 = vld [vmem:[#allocation5 + $0x1148] sm:$0xff]  ;;  %v17726_v0 = vcombine.high %v396_v54, %v398_v56 }
  0xdb   : > { %v17728_v4 = vcombine.high %v399_v61, %v401_v62  ;;  %v17727_v10 = vcombine.low %v399_v61, %v401_v62  ;;  %v17729_v11 = vcombine.low %v400_v63, %v402_v1  ;;  %v429_v56 = vld [vmem:[#allocation5 + $0x16e0] sm:$0xff] }
  0xdd   : > { %1512 = vmatpush1.bf16.msra.mxu0 %v17695_v5  ;;  %1635 = vmatpush1.bf16.msra.mxu1 %v17697_v7  ;;  %v403_v5 = vld [vmem:[#allocation5 + $0x1200] sm:$0xff]  ;;  %v404_v7 = vld [vmem:[#allocation5 + $0x1208] sm:$0xff] }
  0xde   : > { %1522 = vmatprep.subr.bf16.mxu0 %v17700_v8  ;;  %1645 = vmatprep.subr.bf16.mxu1 %v17702_v9  ;;  %v17730_v8 = vcombine.high %v400_v63, %v402_v1  ;;  %v406_v9 = vld [vmem:[#allocation5 + $0x1268] sm:$0xff]  ;;  %v17732_v13 = vcombine.high %v403_v5, %v405_v6  ;;  %v433_v1 = vld [vmem:[#allocation5 + $0x17a0] sm:$0xff] }
  0xdf   : > { %v17733_v20 = vcombine.low %v404_v7, %v406_v9 }
  0xe0   : > { %1514 = vmatmul.mubr.bf16.vlgmr.msra.gmra.mrb[0].mxu0 %v22423_v12  ;;  %1637 = vmatmul.mubr.bf16.vlgmr.msra.gmra.mrb[0].mxu1 %v22423_v12 }
  0xe1   : > { %1523 = vmatpush1.bf16.msra.mxu0 %v17699_v16  ;;  %1646 = vmatpush1.bf16.msra.mxu1 %v17701_v17  ;;  %v408_v16 = vld [vmem:[#allocation5 + $0x12c8] sm:$0xff]  ;;  %v17734_v17 = vcombine.high %v404_v7, %v406_v9  ;;  %v437_v9 = vld [vmem:[#allocation5 + $0x1860] sm:$0xff] }
  0xe2   : > { %1524 = vmatprep.subr.bf16.mxu0 %v17704_v18  ;;  %1647 = vmatprep.subr.bf16.mxu1 %v17706_v19  ;;  %v410_v18 = vld [vmem:[#allocation5 + $0x1328] sm:$0xff]  ;;  %v17731_v19 = vcombine.low %v403_v5, %v405_v6  ;;  %v435_v6 = vld [vmem:[#allocation5 + $0x1800] sm:$0xff] }
  0xe3   : > { %1554 = vmatprep.mubr.bf16.mxu0 %v22426_v23  ;;  %1677 = vmatprep.mubr.bf16.mxu1 %v22426_v23  ;;  %v17737_v29 = vcombine.low %v408_v16, %v410_v18 }
  0xe5   : > { %1525 = vmatpush1.bf16.msra.mxu0 %v17703_v25  ;;  %1648 = vmatpush1.bf16.msra.mxu1 %v17705_v26  ;;  %v412_v25 = vld [vmem:[#allocation5 + $0x1388] sm:$0xff]  ;;  %v17738_v26 = vcombine.high %v408_v16, %v410_v18  ;;  %v439_v16 = vld [vmem:[#allocation5 + $0x18c0] sm:$0xff]  ;;  %v17764_v18 = vcombine.high %v435_v6, %v437_v9 }
  0xe6   : > { %1526 = vmatprep.subr.bf16.mxu0 %v17708_v27  ;;  %1649 = vmatprep.subr.bf16.mxu1 %v17710_v31  ;;  %v414_v27 = vld [vmem:[#allocation5 + $0x13e8] sm:$0xff]  ;;  %v415_v31 = vld [vmem:[#allocation5 + $0x1440] sm:$0xff] }
  0xe7   : > { %v17741_v37 = vcombine.low %v412_v25, %v414_v27  ;;  %v17744_v38 = vcombine.high %v415_v31, %v417_v32  ;;  %v17743_v44 = vcombine.low %v415_v31, %v417_v32  ;;  %v444_v31 = vld [vmem:[#allocation5 + $0x1988] sm:$0xff] }
  0xe9   : > { %1527 = vmatpush1.bf16.msra.mxu0 %v17707_v33  ;;  %1650 = vmatpush1.bf16.msra.mxu1 %v17709_v34  ;;  %v416_v33 = vld [vmem:[#allocation5 + $0x1448] sm:$0xff]  ;;  %v17742_v34 = vcombine.high %v412_v25, %v414_v27  ;;  %v22434_v25 = vpack.c.bf16 %v297_v14, %v297_v14 }
  0xea   : > { %1528 = vmatprep.subr.bf16.mxu0 %v17712_v35  ;;  %1651 = vmatprep.subr.bf16.mxu1 %v17714_v39  ;;  %v418_v35 = vld [vmem:[#allocation5 + $0x14a8] sm:$0xff]  ;;  %v419_v39 = vld [vmem:[#allocation5 + $0x1500] sm:$0xff] }
  0xeb   : > { %v17745_v45 = vcombine.low %v416_v33, %v418_v35  ;;  %v17748_v46 = vcombine.high %v419_v39, %v421_v40  ;;  %v17747_v52 = vcombine.low %v419_v39, %v421_v40  ;;  %v449_v39 = vld [vmem:[#allocation5 + $0x1aa0] sm:$0xff]  ;;  %v448_v40 = vld [vmem:[#allocation5 + $0x1a48] sm:$0xff] }
  0xed   : > { %1529 = vmatpush1.bf16.msra.mxu0 %v17711_v41  ;;  %1652 = vmatpush1.bf16.msra.mxu1 %v17713_v42  ;;  %v420_v41 = vld [vmem:[#allocation5 + $0x1508] sm:$0xff]  ;;  %v17746_v42 = vcombine.high %v416_v33, %v418_v35 }
  0xee   : > { %1530 = vmatprep.subr.bf16.mxu0 %v17716_v43  ;;  %1653 = vmatprep.subr.bf16.mxu1 %v17718_v47  ;;  %v422_v43 = vld [vmem:[#allocation5 + $0x1568] sm:$0xff]  ;;  %v423_v47 = vld [vmem:[#allocation5 + $0x15c0] sm:$0xff] }
  0xef   : > { %v17749_v53 = vcombine.low %v420_v41, %v422_v43  ;;  %v17752_v54 = vcombine.high %v423_v47, %v425_v48  ;;  %v17751_v61 = vcombine.low %v423_v47, %v425_v48  ;;  %v446_v33 = vld [vmem:[#allocation5 + $0x19e8] sm:$0xff]  ;;  %v453_v47 = vld [vmem:[#allocation5 + $0x1b60] sm:$0xff] }
  0xf0   : > { %v452_v48 = vld [vmem:[#allocation5 + $0x1b08] sm:$0xff] }
  0xf1   : > { %1531 = vmatpush1.bf16.msra.mxu0 %v17715_v49  ;;  %1654 = vmatpush1.bf16.msra.mxu1 %v17717_v50  ;;  %v424_v49 = vld [vmem:[#allocation5 + $0x15c8] sm:$0xff]  ;;  %v17750_v50 = vcombine.high %v420_v41, %v422_v43  ;;  %v17774_v41 = vcombine.high %v444_v31, %v446_v33 }
  0xf2   : > { %1532 = vmatprep.subr.bf16.mxu0 %v17720_v51  ;;  %1655 = vmatprep.subr.bf16.mxu1 %v17722_v55  ;;  %v426_v51 = vld [vmem:[#allocation5 + $0x1628] sm:$0xff]  ;;  %v427_v55 = vld [vmem:[#allocation5 + $0x1680] sm:$0xff] }
  0xf3   : > { %v17753_v62 = vcombine.low %v424_v49, %v426_v51  ;;  %v17756_v63 = vcombine.high %v427_v55, %v429_v56  ;;  %v17755_v5 = vcombine.low %v427_v55, %v429_v56  ;;  %v457_v55 = vld [vmem:[#allocation5 + $0x1c20] sm:$0xff]  ;;  %v456_v56 = vld [vmem:[#allocation5 + $0x1bc8] sm:$0xff] }
  0xf5   : > { %1533 = vmatpush1.bf16.msra.mxu0 %v17719_v58  ;;  %1656 = vmatpush1.bf16.msra.mxu1 %v17721_v59  ;;  %v428_v58 = vld [vmem:[#allocation5 + $0x1688] sm:$0xff]  ;;  %v17754_v59 = vcombine.high %v424_v49, %v426_v51 }
  0xf6   : > { %1534 = vmatprep.subr.bf16.mxu0 %v17724_v60  ;;  %1657 = vmatprep.subr.bf16.mxu1 %v17726_v0  ;;  %v430_v60 = vld [vmem:[#allocation5 + $0x16e8] sm:$0xff]  ;;  %v431_v0 = vld [vmem:[#allocation5 + $0x1740] sm:$0xff] }
  0xf7   : > { %v17757_v7 = vcombine.low %v428_v58, %v430_v60  ;;  %v17759_v15 = vcombine.low %v431_v0, %v433_v1 }
  0xf9   : > { %1535 = vmatpush1.bf16.msra.mxu0 %v17723_v2  ;;  %1658 = vmatpush1.bf16.msra.mxu1 %v17725_v3  ;;  %v432_v2 = vld [vmem:[#allocation5 + $0x1748] sm:$0xff]  ;;  %v17758_v3 = vcombine.high %v428_v58, %v430_v60 }
  0xfa   : > { %1536 = vmatprep.subr.bf16.mxu0 %v17728_v4  ;;  %1659 = vmatprep.subr.bf16.mxu1 %v17730_v8  ;;  %v434_v4 = vld [vmem:[#allocation5 + $0x17a8] sm:$0xff]  ;;  %v17760_v8 = vcombine.high %v431_v0, %v433_v1  ;;  %v461_v0 = vld [vmem:[#allocation5 + $0x1ce0] sm:$0xff] }
  0xfb   : > { %v460_v1 = vld [vmem:[#allocation5 + $0x1c88] sm:$0xff] }
  0xfd   : > { %1537 = vmatpush1.bf16.msra.mxu0 %v17727_v10  ;;  %1660 = vmatpush1.bf16.msra.mxu1 %v17729_v11  ;;  %v436_v10 = vld [vmem:[#allocation5 + $0x1808] sm:$0xff] }
  0xfe   : > { %1538 = vmatprep.subr.bf16.mxu0 %v17732_v13  ;;  %1661 = vmatprep.subr.bf16.mxu1 %v17734_v17  ;;  %v438_v11 = vld [vmem:[#allocation5 + $0x1868] sm:$0xff]  ;;  %v17762_v13 = vcombine.high %v432_v2, %v434_v4  ;;  %v17761_v17 = vcombine.low %v432_v2, %v434_v4 }
  0xff   : > { %v17766_v22 = vcombine.high %v436_v10, %v438_v11  ;;  %v17765_v27 = vcombine.low %v436_v10, %v438_v11  ;;  %v466_v11 = vld [vmem:[#allocation5 + $0x1da8] sm:$0xff] }
 0x101   : > { %1539 = vmatpush1.bf16.msra.mxu0 %v17731_v19  ;;  %1662 = vmatpush1.bf16.msra.mxu1 %v17733_v20  ;;  %v441_v19 = vld [vmem:[#allocation5 + $0x1920] sm:$0xff]  ;;  %v440_v20 = vld [vmem:[#allocation5 + $0x18c8] sm:$0xff] }
 0x102   : > { %1540 = vmatprep.subr.bf16.mxu0 %v17736_v21  ;;  %1663 = vmatprep.subr.bf16.mxu1 %v17738_v26  ;;  %v442_v21 = vld [vmem:[#allocation5 + $0x1928] sm:$0xff]  ;;  %v17763_v26 = vcombine.low %v435_v6, %v437_v9  ;;  %v17767_v35 = vcombine.low %v439_v16, %v441_v19 }
 0x103   : > { %v17770_v32 = vcombine.high %v440_v20, %v442_v21  ;;  %v464_v9 = vld [vmem:[#allocation5 + $0x1d48] sm:$0xff] }
 0x105   : > { %1541 = vmatpush1.bf16.msra.mxu0 %v17735_v28  ;;  %1664 = vmatpush1.bf16.msra.mxu1 %v17737_v29  ;;  %v17768_v28 = vcombine.high %v439_v16, %v441_v19  ;;  %v443_v29 = vld [vmem:[#allocation5 + $0x1980] sm:$0xff]  ;;  %v17794_v19 = vcombine.high %v464_v9, %v466_v11 }
 0x106   : > { %1542 = vmatprep.subr.bf16.mxu0 %v17740_v30  ;;  %1665 = vmatprep.subr.bf16.mxu1 %v17742_v34  ;;  %v445_v30 = vld [vmem:[#allocation5 + $0x19e0] sm:$0xff]  ;;  %v22436_v34 = vpack.c.bf16 %v300_v24, %v300_v24 }
 0x107   : > { %v17771_v43 = vcombine.low %v443_v29, %v445_v30  ;;  %v467_v16 = vld [vmem:[#allocation5 + $0x1e00] sm:$0xff] }
 0x109   : > { %1543 = vmatpush1.bf16.msra.mxu0 %v17739_v36  ;;  %1666 = vmatpush1.bf16.msra.mxu1 %v17741_v37  ;;  %v17769_v36 = vcombine.low %v440_v20, %v442_v21  ;;  %v17772_v37 = vcombine.high %v443_v29, %v445_v30  ;;  %v470_v20 = vld [vmem:[#allocation5 + $0x1e68] sm:$0xff] }
 0x10a   : > { %1544 = vmatprep.subr.bf16.mxu0 %v17744_v38  ;;  %1667 = vmatprep.subr.bf16.mxu1 %v17746_v42  ;;  %v447_v38 = vld [vmem:[#allocation5 + $0x1a40] sm:$0xff]  ;;  %v450_v42 = vld [vmem:[#allocation5 + $0x1aa8] sm:$0xff] }
 0x10b   : > { %v17778_v49 = vcombine.high %v448_v40, %v450_v42  ;;  %v17775_v51 = vcombine.low %v447_v38, %v449_v39  ;;  %v474_v30 = vld [vmem:[#allocation5 + $0x1f28] sm:$0xff] }
 0x10d   : > { %1545 = vmatpush1.bf16.msra.mxu0 %v17743_v44  ;;  %1668 = vmatpush1.bf16.msra.mxu1 %v17745_v45  ;;  %v17773_v44 = vcombine.low %v444_v31, %v446_v33  ;;  %v17776_v45 = vcombine.high %v447_v38, %v449_v39  ;;  %v478_v39 = vld [vmem:[#allocation5 + $0x1fe8] sm:$0xff] }
 0x10e   : > { %1546 = vmatprep.subr.bf16.mxu0 %v17748_v46  ;;  %1669 = vmatprep.subr.bf16.mxu1 %v17750_v50  ;;  %v451_v46 = vld [vmem:[#allocation5 + $0x1b00] sm:$0xff]  ;;  %v454_v50 = vld [vmem:[#allocation5 + $0x1b68] sm:$0xff] }
 0x10f   : > { %v17782_v58 = vcombine.high %v452_v48, %v454_v50  ;;  %v17779_v60 = vcombine.low %v451_v46, %v453_v47 }
 0x111   : > { %1547 = vmatpush1.bf16.msra.mxu0 %v17747_v52  ;;  %1670 = vmatpush1.bf16.msra.mxu1 %v17749_v53  ;;  %v17777_v52 = vcombine.low %v448_v40, %v450_v42  ;;  %v17780_v53 = vcombine.high %v451_v46, %v453_v47  ;;  %v482_v47 = vld [vmem:[#allocation5 + $0x20a8] sm:$0xff] }
 0x112   : > { %1548 = vmatprep.subr.bf16.mxu0 %v17752_v54  ;;  %1671 = vmatprep.subr.bf16.mxu1 %v17754_v59  ;;  %v455_v54 = vld [vmem:[#allocation5 + $0x1bc0] sm:$0xff]  ;;  %v458_v59 = vld [vmem:[#allocation5 + $0x1c28] sm:$0xff] }
 0x113   : > { %v17786_v2 = vcombine.high %v456_v56, %v458_v59  ;;  %v17783_v4 = vcombine.low %v455_v54, %v457_v55 }
 0x115   : > { %1549 = vmatpush1.bf16.msra.mxu0 %v17751_v61  ;;  %1672 = vmatpush1.bf16.msra.mxu1 %v17753_v62  ;;  %v17781_v61 = vcombine.low %v452_v48, %v454_v50  ;;  %v17784_v62 = vcombine.high %v455_v54, %v457_v55  ;;  %v486_v55 = vld [vmem:[#allocation5 + $0x2168] sm:$0xff] }
 0x116   : > { %1550 = vmatprep.subr.bf16.mxu0 %v17756_v63  ;;  %1673 = vmatprep.subr.bf16.mxu1 %v17758_v3  ;;  %v459_v63 = vld [vmem:[#allocation5 + $0x1c80] sm:$0xff]  ;;  %v462_v3 = vld [vmem:[#allocation5 + $0x1ce8] sm:$0xff] }
 0x117   : > { %v17788_v6 = vcombine.high %v459_v63, %v461_v0  ;;  %v17790_v10 = vcombine.high %v460_v1, %v462_v3  ;;  %v17789_v14 = vcombine.low %v460_v1, %v462_v3 }
 0x119   : > { %1551 = vmatpush1.bf16.msra.mxu0 %v17755_v5  ;;  %1674 = vmatpush1.bf16.msra.mxu1 %v17757_v7  ;;  %v17785_v5 = vcombine.low %v456_v56, %v458_v59  ;;  %v463_v7 = vld [vmem:[#allocation5 + $0x1d40] sm:$0xff] }
 0x11a   : > { %1552 = vmatprep.subr.bf16.mxu0 %v17760_v8  ;;  %1675 = vmatprep.subr.bf16.mxu1 %v17762_v13  ;;  %v465_v8 = vld [vmem:[#allocation5 + $0x1da0] sm:$0xff]  ;;  %v17787_v13 = vcombine.low %v459_v63, %v461_v0  ;;  %v490_v0 = vld [vmem:[#allocation5 + $0x2228] sm:$0xff] }
 0x11b   : > { %v17791_v21 = vcombine.low %v463_v7, %v465_v8 }
 0x11d   : > { %1553 = vmatpush1.bf16.msra.mxu0 %v17759_v15  ;;  %1676 = vmatpush1.bf16.msra.mxu1 %v17761_v17  ;;  %v17792_v15 = vcombine.high %v463_v7, %v465_v8  ;;  %v469_v17 = vld [vmem:[#allocation5 + $0x1e60] sm:$0xff]  ;;  %v494_v8 = vld [vmem:[#allocation5 + $0x22e8] sm:$0xff] }
 0x11e   : > { %1563 = vmatprep.subr.bf16.mxu0 %v17764_v18  ;;  %1686 = vmatprep.subr.bf16.mxu1 %v17766_v22  ;;  %v468_v18 = vld [vmem:[#allocation5 + $0x1e08] sm:$0xff]  ;;  %v17793_v22 = vcombine.low %v464_v9, %v466_v11  ;;  %v17796_v24 = vcombine.high %v467_v16, %v469_v17  ;;  %v17795_v31 = vcombine.low %v467_v16, %v469_v17 }
 0x11f   : > { %v17798_v29 = vcombine.high %v468_v18, %v470_v20  ;;  %v498_v17 = vld [vmem:[#allocation5 + $0x23a8] sm:$0xff] }
 0x120   : > { %1555 = vmatmul.mubr.bf16.vlgmr.msra.gmra.mrb[0].mxu0 %v22434_v25  ;;  %1678 = vmatmul.mubr.bf16.vlgmr.msra.gmra.mrb[0].mxu1 %v22434_v25 }
 0x121   : > { %1564 = vmatpush1.bf16.msra.mxu0 %v17763_v26  ;;  %1687 = vmatpush1.bf16.msra.mxu1 %v17765_v27  ;;  %v471_v26 = vld [vmem:[#allocation5 + $0x1ec0] sm:$0xff] }
 0x122   : > { %1565 = vmatprep.subr.bf16.mxu0 %v17768_v28  ;;  %1688 = vmatprep.subr.bf16.mxu1 %v17770_v32  ;;  %v473_v27 = vld [vmem:[#allocation5 + $0x1f20] sm:$0xff]  ;;  %v472_v28 = vld [vmem:[#allocation5 + $0x1ec8] sm:$0xff]  ;;  %v17797_v32 = vcombine.low %v468_v18, %v470_v20 }
 0x123   : > { %1595 = vmatprep.mubr.bf16.mxu0 %v22436_v34  ;;  %1718 = vmatprep.mubr.bf16.mxu1 %v22436_v34  ;;  %v17800_v33 = vcombine.high %v471_v26, %v473_v27  ;;  %v17802_v38 = vcombine.high %v472_v28, %v474_v30  ;;  %v17799_v40 = vcombine.low %v471_v26, %v473_v27  ;;  %v299_v27 = vld [vmem:[%s22403_s7 + $0x20] sm:$0xff] }
 0x125   : > { %1566 = vmatpush1.bf16.msra.mxu0 %v17767_v35  ;;  %1689 = vmatpush1.bf16.msra.mxu1 %v17769_v36  ;;  %v475_v35 = vld [vmem:[#allocation5 + $0x1f80] sm:$0xff] }
 0x126   : > { %1567 = vmatprep.subr.bf16.mxu0 %v17772_v37  ;;  %1690 = vmatprep.subr.bf16.mxu1 %v17774_v41  ;;  %v477_v36 = vld [vmem:[#allocation5 + $0x1fe0] sm:$0xff]  ;;  %v476_v37 = vld [vmem:[#allocation5 + $0x1f88] sm:$0xff]  ;;  %v17801_v41 = vcombine.low %v472_v28, %v474_v30  ;;  %v1958_v28 = vld [vmem:[#allocation5 + $0x78] sm:$0xff] }
 0x127   : > { %v17804_v42 = vcombine.high %v475_v35, %v477_v36  ;;  %v17806_v46 = vcombine.high %v476_v37, %v478_v39  ;;  %v17803_v48 = vcombine.low %v475_v35, %v477_v36  ;;  %v1960_v35 = vld [vmem:[#allocation5 + $0xd8] sm:$0xff] }
 0x129   : > { %1568 = vmatpush1.bf16.msra.mxu0 %v17771_v43  ;;  %1691 = vmatpush1.bf16.msra.mxu1 %v17773_v44  ;;  %v479_v43 = vld [vmem:[#allocation5 + $0x2040] sm:$0xff] }
 0x12a   : > { %1569 = vmatprep.subr.bf16.mxu0 %v17776_v45  ;;  %1692 = vmatprep.subr.bf16.mxu1 %v17778_v49  ;;  %v481_v44 = vld [vmem:[#allocation5 + $0x20a0] sm:$0xff]  ;;  %v480_v45 = vld [vmem:[#allocation5 + $0x2048] sm:$0xff]  ;;  %v17805_v49 = vcombine.low %v476_v37, %v478_v39  ;;  %v1962_v37 = vld [vmem:[#allocation5 + $0x138] sm:$0xff] }
 0x12b   : > { %v17808_v50 = vcombine.high %v479_v43, %v481_v44  ;;  %v17810_v54 = vcombine.high %v480_v45, %v482_v47  ;;  %v17807_v56 = vcombine.low %v479_v43, %v481_v44  ;;  %v1965_v43 = vld [vmem:[#allocation5 + $0x1f0] sm:$0xff]  ;;  %v1964_v44 = vld [vmem:[#allocation5 + $0x198] sm:$0xff] }
 0x12d   : > { %1570 = vmatpush1.bf16.msra.mxu0 %v17775_v51  ;;  %1693 = vmatpush1.bf16.msra.mxu1 %v17777_v52  ;;  %v483_v51 = vld [vmem:[#allocation5 + $0x2100] sm:$0xff] }
 0x12e   : > { %1571 = vmatprep.subr.bf16.mxu0 %v17780_v53  ;;  %1694 = vmatprep.subr.bf16.mxu1 %v17782_v58  ;;  %v485_v52 = vld [vmem:[#allocation5 + $0x2160] sm:$0xff]  ;;  %v484_v53 = vld [vmem:[#allocation5 + $0x2108] sm:$0xff]  ;;  %v17809_v58 = vcombine.low %v480_v45, %v482_v47  ;;  %v17834_v45 = vcombine.high %v1960_v35, %v1962_v37 }
 0x12f   : > { %v17812_v59 = vcombine.high %v483_v51, %v485_v52  ;;  %v17814_v63 = vcombine.high %v484_v53, %v486_v55  ;;  %v17811_v1 = vcombine.low %v483_v51, %v485_v52  ;;  %v1969_v51 = vld [vmem:[#allocation5 + $0x2b0] sm:$0xff]  ;;  %v1968_v52 = vld [vmem:[#allocation5 + $0x258] sm:$0xff] }
 0x131   : > { %1572 = vmatpush1.bf16.msra.mxu0 %v17779_v60  ;;  %1695 = vmatpush1.bf16.msra.mxu1 %v17781_v61  ;;  %v487_v60 = vld [vmem:[#allocation5 + $0x21c0] sm:$0xff] }
 0x132   : > { %1573 = vmatprep.subr.bf16.mxu0 %v17784_v62  ;;  %1696 = vmatprep.subr.bf16.mxu1 %v17786_v2  ;;  %v489_v61 = vld [vmem:[#allocation5 + $0x2220] sm:$0xff]  ;;  %v488_v62 = vld [vmem:[#allocation5 + $0x21c8] sm:$0xff]  ;;  %v17813_v2 = vcombine.low %v484_v53, %v486_v55 }
 0x133   : > { %v17816_v3 = vcombine.high %v487_v60, %v489_v61  ;;  %v17818_v7 = vcombine.high %v488_v62, %v490_v0  ;;  %v17815_v9 = vcombine.low %v487_v60, %v489_v61  ;;  %v1973_v60 = vld [vmem:[#allocation5 + $0x370] sm:$0xff]  ;;  %v1972_v61 = vld [vmem:[#allocation5 + $0x318] sm:$0xff] }
 0x135   : > { %1574 = vmatpush1.bf16.msra.mxu0 %v17783_v4  ;;  %1697 = vmatpush1.bf16.msra.mxu1 %v17785_v5  ;;  %v491_v4 = vld [vmem:[#allocation5 + $0x2280] sm:$0xff] }
 0x136   : > { %1575 = vmatprep.subr.bf16.mxu0 %v17788_v6  ;;  %1698 = vmatprep.subr.bf16.mxu1 %v17790_v10  ;;  %v493_v5 = vld [vmem:[#allocation5 + $0x22e0] sm:$0xff]  ;;  %v492_v6 = vld [vmem:[#allocation5 + $0x2288] sm:$0xff]  ;;  %v17817_v10 = vcombine.low %v488_v62, %v490_v0 }
 0x137   : > { %v17820_v11 = vcombine.high %v491_v4, %v493_v5  ;;  %v17822_v16 = vcombine.high %v492_v6, %v494_v8  ;;  %v17819_v18 = vcombine.low %v491_v4, %v493_v5  ;;  %v1977_v4 = vld [vmem:[#allocation5 + $0x430] sm:$0xff]  ;;  %v1976_v5 = vld [vmem:[#allocation5 + $0x3d8] sm:$0xff] }
 0x139   : > { %1576 = vmatpush1.bf16.msra.mxu0 %v17787_v13  ;;  %1699 = vmatpush1.bf16.msra.mxu1 %v17789_v14  ;;  %v495_v13 = vld [vmem:[#allocation5 + $0x2340] sm:$0xff] }
 0x13a   : > { %1577 = vmatprep.subr.bf16.mxu0 %v17792_v15  ;;  %1700 = vmatprep.subr.bf16.mxu1 %v17794_v19  ;;  %v497_v14 = vld [vmem:[#allocation5 + $0x23a0] sm:$0xff]  ;;  %v496_v15 = vld [vmem:[#allocation5 + $0x2348] sm:$0xff]  ;;  %v17821_v19 = vcombine.low %v492_v6, %v494_v8 }
 0x13b   : > { %v17824_v20 = vcombine.high %v495_v13, %v497_v14  ;;  %v17826_v26 = vcombine.high %v496_v15, %v498_v17  ;;  %v17825_v30 = vcombine.low %v496_v15, %v498_v17 }
 0x13d   : > { %1578 = vmatpush1.bf16.msra.mxu0 %v17791_v21  ;;  %1701 = vmatpush1.bf16.msra.mxu1 %v17793_v22  ;;  %v1955_v21 = vld [vmem:[#allocation5 + $0x10] sm:$0xff] }
 0x13e   : > { %1579 = vmatprep.subr.bf16.mxu0 %v17796_v24  ;;  %1702 = vmatprep.subr.bf16.mxu1 %v17798_v29  ;;  %v1957_v22 = vld [vmem:[#allocation5 + $0x70] sm:$0xff]  ;;  %v1956_v24 = vld [vmem:[#allocation5 + $0x18] sm:$0xff]  ;;  %v17823_v29 = vcombine.low %v495_v13, %v497_v14 }
 0x13f   : > { %v17830_v36 = vcombine.high %v1956_v24, %v1958_v28  ;;  %v17827_v39 = vcombine.low %v1955_v21, %v1957_v22  ;;  %v1981_v13 = vld [vmem:[#allocation5 + $0x4f0] sm:$0xff]  ;;  %v1980_v14 = vld [vmem:[#allocation5 + $0x498] sm:$0xff] }
 0x141   : > { %1580 = vmatpush1.bf16.msra.mxu0 %v17795_v31  ;;  %1703 = vmatpush1.bf16.msra.mxu1 %v17797_v32  ;;  %v17828_v31 = vcombine.high %v1955_v21, %v1957_v22  ;;  %v1959_v32 = vld [vmem:[#allocation5 + $0xd0] sm:$0xff]  ;;  %v1984_v22 = vld [vmem:[#allocation5 + $0x558] sm:$0xff] }
 0x142   : > { %1581 = vmatprep.subr.bf16.mxu0 %v17800_v33  ;;  %1704 = vmatprep.subr.bf16.mxu1 %v17802_v38  ;;  %v1961_v33 = vld [vmem:[#allocation5 + $0x130] sm:$0xff]  ;;  %v22443_v38 = vpack.c.bf16 %v299_v27, %v299_v27 }
 0x143   : > { %v17831_v47 = vcombine.low %v1959_v32, %v1961_v33  ;;  %v1985_v21 = vld [vmem:[#allocation5 + $0x5b0] sm:$0xff] }
 0x145   : > { %1582 = vmatpush1.bf16.msra.mxu0 %v17799_v40  ;;  %1705 = vmatpush1.bf16.msra.mxu1 %v17801_v41  ;;  %v17829_v40 = vcombine.low %v1956_v24, %v1958_v28  ;;  %v17832_v41 = vcombine.high %v1959_v32, %v1961_v33  ;;  %v1988_v32 = vld [vmem:[#allocation5 + $0x618] sm:$0xff] }
 0x146   : > { %1583 = vmatprep.subr.bf16.mxu0 %v17804_v42  ;;  %1706 = vmatprep.subr.bf16.mxu1 %v17806_v46  ;;  %v1963_v42 = vld [vmem:[#allocation5 + $0x190] sm:$0xff]  ;;  %v1966_v46 = vld [vmem:[#allocation5 + $0x1f8] sm:$0xff] }
 0x147   : > { %v17838_v53 = vcombine.high %v1964_v44, %v1966_v46  ;;  %v17835_v55 = vcombine.low %v1963_v42, %v1965_v43 }
 0x149   : > { %1584 = vmatpush1.bf16.msra.mxu0 %v17803_v48  ;;  %1707 = vmatpush1.bf16.msra.mxu1 %v17805_v49  ;;  %v17833_v48 = vcombine.low %v1960_v35, %v1962_v37  ;;  %v17836_v49 = vcombine.high %v1963_v42, %v1965_v43  ;;  %v1990_v35 = vld [vmem:[#allocation5 + $0x678] sm:$0xff] }
 0x14a   : > { %1585 = vmatprep.subr.bf16.mxu0 %v17808_v50  ;;  %1708 = vmatprep.subr.bf16.mxu1 %v17810_v54  ;;  %v1967_v50 = vld [vmem:[#allocation5 + $0x250] sm:$0xff]  ;;  %v1970_v54 = vld [vmem:[#allocation5 + $0x2b8] sm:$0xff]  ;;  %v17862_v43 = vcombine.high %v1988_v32, %v1990_v35 }
 0x14b   : > { %v17842_v62 = vcombine.high %v1968_v52, %v1970_v54  ;;  %v17839_v0 = vcombine.low %v1967_v50, %v1969_v51  ;;  %v1992_v42 = vld [vmem:[#allocation5 + $0x6d8] sm:$0xff] }
 0x14d   : > { %1586 = vmatpush1.bf16.msra.mxu0 %v17807_v56  ;;  %1709 = vmatpush1.bf16.msra.mxu1 %v17809_v58  ;;  %v17837_v56 = vcombine.low %v1964_v44, %v1966_v46  ;;  %v17840_v58 = vcombine.high %v1967_v50, %v1969_v51  ;;  %v1994_v44 = vld [vmem:[#allocation5 + $0x738] sm:$0xff]  ;;  %v17861_v46 = vcombine.low %v1988_v32, %v1990_v35 }
 0x14e   : > { %1587 = vmatprep.subr.bf16.mxu0 %v17812_v59  ;;  %1710 = vmatprep.subr.bf16.mxu1 %v17814_v63  ;;  %v1971_v59 = vld [vmem:[#allocation5 + $0x310] sm:$0xff]  ;;  %v1974_v63 = vld [vmem:[#allocation5 + $0x378] sm:$0xff]  ;;  %v17866_v51 = vcombine.high %v1992_v42, %v1994_v44 }
 0x14f   : > { %v17846_v6 = vcombine.high %v1972_v61, %v1974_v63  ;;  %v17843_v8 = vcombine.low %v1971_v59, %v1973_v60  ;;  %v1996_v50 = vld [vmem:[#allocation5 + $0x798] sm:$0xff] }
 0x150   : > { %v2018_v32 = vld [vmem:[#allocation5 + $0xbb8] sm:$0xff] }
 0x151   : > { %1588 = vmatpush1.bf16.msra.mxu0 %v17811_v1  ;;  %1711 = vmatpush1.bf16.msra.mxu1 %v17813_v2  ;;  %v17841_v1 = vcombine.low %v1968_v52, %v1970_v54  ;;  %v17844_v2 = vcombine.high %v1971_v59, %v1973_v60  ;;  %v1998_v52 = vld [vmem:[#allocation5 + $0x7f8] sm:$0xff]  ;;  %v17865_v54 = vcombine.low %v1992_v42, %v1994_v44 }
 0x152   : > { %1589 = vmatprep.subr.bf16.mxu0 %v17816_v3  ;;  %1712 = vmatprep.subr.bf16.mxu1 %v17818_v7  ;;  %v1975_v3 = vld [vmem:[#allocation5 + $0x3d0] sm:$0xff]  ;;  %v1978_v7 = vld [vmem:[#allocation5 + $0x438] sm:$0xff]  ;;  %v17870_v60 = vcombine.high %v1996_v50, %v1998_v52 }
 0x153   : > { %v17850_v15 = vcombine.high %v1976_v5, %v1978_v7  ;;  %v17847_v17 = vcombine.low %v1975_v3, %v1977_v4  ;;  %v2000_v59 = vld [vmem:[#allocation5 + $0x858] sm:$0xff] }
 0x154   : > { %v2022_v42 = vld [vmem:[#allocation5 + $0xc78] sm:$0xff] }
 0x155   : > { %1590 = vmatpush1.bf16.msra.mxu0 %v17815_v9  ;;  %1713 = vmatpush1.bf16.msra.mxu1 %v17817_v10  ;;  %v17845_v9 = vcombine.low %v1972_v61, %v1974_v63  ;;  %v17848_v10 = vcombine.high %v1975_v3, %v1977_v4  ;;  %v2002_v61 = vld [vmem:[#allocation5 + $0x8b8] sm:$0xff]  ;;  %v17869_v63 = vcombine.low %v1996_v50, %v1998_v52  ;;  %v2027_v52 = vld [vmem:[#allocation5 + $0xd90] sm:$0xff] }
 0x156   : > { %1591 = vmatprep.subr.bf16.mxu0 %v17820_v11  ;;  %1714 = vmatprep.subr.bf16.mxu1 %v17822_v16  ;;  %v1979_v11 = vld [vmem:[#allocation5 + $0x490] sm:$0xff]  ;;  %v1982_v16 = vld [vmem:[#allocation5 + $0x4f8] sm:$0xff]  ;;  %v17874_v4 = vcombine.high %v2000_v59, %v2002_v61 }
 0x157   : > { %v17854_v24 = vcombine.high %v1980_v14, %v1982_v16  ;;  %v17851_v27 = vcombine.low %v1979_v11, %v1981_v13  ;;  %v17853_v28 = vcombine.low %v1980_v14, %v1982_v16  ;;  %v2004_v3 = vld [vmem:[#allocation5 + $0x918] sm:$0xff] }
 0x158   : > { %v2010_v14 = vld [vmem:[#allocation5 + $0xa38] sm:$0xff] }
 0x159   : > { %1592 = vmatpush1.bf16.msra.mxu0 %v17819_v18  ;;  %1715 = vmatpush1.bf16.msra.mxu1 %v17821_v19  ;;  %v17849_v18 = vcombine.low %v1976_v5, %v1978_v7  ;;  %v17852_v19 = vcombine.high %v1979_v11, %v1981_v13  ;;  %v2006_v5 = vld [vmem:[#allocation5 + $0x978] sm:$0xff]  ;;  %v17873_v7 = vcombine.low %v2000_v59, %v2002_v61  ;;  %v2031_v61 = vld [vmem:[#allocation5 + $0xe50] sm:$0xff] }
 0x15a   : > { %1593 = vmatprep.subr.bf16.mxu0 %v17824_v20  ;;  %1716 = vmatprep.subr.bf16.mxu1 %v17826_v26  ;;  %v1983_v20 = vld [vmem:[#allocation5 + $0x550] sm:$0xff]  ;;  %v1986_v26 = vld [vmem:[#allocation5 + $0x5b8] sm:$0xff]  ;;  %v17878_v13 = vcombine.high %v2004_v3, %v2006_v5  ;;  %v17877_v16 = vcombine.low %v2004_v3, %v2006_v5 }
 0x15b   : > { %v17858_v33 = vcombine.high %v1984_v22, %v1986_v26  ;;  %v17857_v37 = vcombine.low %v1984_v22, %v1986_v26  ;;  %v2008_v11 = vld [vmem:[#allocation5 + $0x9d8] sm:$0xff]  ;;  %v2035_v5 = vld [vmem:[#allocation5 + $0xf10] sm:$0xff] }
 0x15c   : > { %v2014_v22 = vld [vmem:[#allocation5 + $0xaf8] sm:$0xff]  ;;  %v17881_v26 = vcombine.low %v2008_v11, %v2010_v14 }
 0x15d   : > { %1594 = vmatpush1.bf16.msra.mxu0 %v17823_v29  ;;  %1717 = vmatpush1.bf16.msra.mxu1 %v17825_v30  ;;  %v17856_v29 = vcombine.high %v1983_v20, %v1985_v21  ;;  %v1987_v30 = vld [vmem:[#allocation5 + $0x610] sm:$0xff]  ;;  %v2026_v50 = vld [vmem:[#allocation5 + $0xd38] sm:$0xff] }
 0x15e   : > { %3129 = vmatprep.subr.bf16.mxu0 %v17828_v31  ;;  %3252 = vmatprep.subr.bf16.mxu1 %v17830_v36  ;;  %v1989_v31 = vld [vmem:[#allocation5 + $0x670] sm:$0xff]  ;;  %v17855_v36 = vcombine.low %v1983_v20, %v1985_v21  ;;  %v2012_v20 = vld [vmem:[#allocation5 + $0xa98] sm:$0xff]  ;;  %v17882_v21 = vcombine.high %v2008_v11, %v2010_v14 }
 0x15f   : > { %v17885_v35 = vcombine.low %v2012_v20, %v2014_v22  ;;  %v2039_v14 = vld [vmem:[#allocation5 + $0xfd0] sm:$0xff] }
 0x160   : > { %1596 = vmatmul.mubr.bf16.vlgmr.msra.gmra.mrb[0].mxu0 %v22443_v38  ;;  %1719 = vmatmul.mubr.bf16.vlgmr.msra.gmra.mrb[0].mxu1 %v22443_v38 }
 0x161   : > { %3130 = vmatpush1.bf16.msra.mxu0 %v17827_v39  ;;  %3253 = vmatpush1.bf16.msra.mxu1 %v17829_v40  ;;  %v17860_v39 = vcombine.high %v1987_v30, %v1989_v31  ;;  %v1991_v40 = vld [vmem:[#allocation5 + $0x6d0] sm:$0xff] }
 0x162   : > { %3131 = vmatprep.subr.bf16.mxu0 %v17832_v41  ;;  %3254 = vmatprep.subr.bf16.mxu1 %v17834_v45  ;;  %v1993_v41 = vld [vmem:[#allocation5 + $0x730] sm:$0xff]  ;;  %v17859_v45 = vcombine.low %v1987_v30, %v1989_v31  ;;  %v2016_v30 = vld [vmem:[#allocation5 + $0xb58] sm:$0xff]  ;;  %v17886_v31 = vcombine.high %v2012_v20, %v2014_v22 }
 0x163   : > { %3161 = vmatprep.mubr.bf16.mxu0 %v22418_v57  ;;  %3284 = vmatprep.mubr.bf16.mxu1 %v22418_v57  ;;  %v17889_v44 = vcombine.low %v2016_v30, %v2018_v32  ;;  %v2043_v22 = vld [vmem:[#allocation5 + $0x1090] sm:$0xff] }
 0x165   : > { %3132 = vmatpush1.bf16.msra.mxu0 %v17831_v47  ;;  %3255 = vmatpush1.bf16.msra.mxu1 %v17833_v48  ;;  %v17864_v47 = vcombine.high %v1991_v40, %v1993_v41  ;;  %v1995_v48 = vld [vmem:[#allocation5 + $0x790] sm:$0xff] }
 0x166   : > { %3133 = vmatprep.subr.bf16.mxu0 %v17836_v49  ;;  %3256 = vmatprep.subr.bf16.mxu1 %v17838_v53  ;;  %v1997_v49 = vld [vmem:[#allocation5 + $0x7f0] sm:$0xff]  ;;  %v17863_v53 = vcombine.low %v1991_v40, %v1993_v41  ;;  %v2020_v40 = vld [vmem:[#allocation5 + $0xc18] sm:$0xff]  ;;  %v17890_v41 = vcombine.high %v2016_v30, %v2018_v32 }
 0x167   : > { %v2047_v32 = vld [vmem:[#allocation5 + $0x1150] sm:$0xff] }
 0x169   : > { %3134 = vmatpush1.bf16.msra.mxu0 %v17835_v55  ;;  %3257 = vmatpush1.bf16.msra.mxu1 %v17837_v56  ;;  %v17868_v55 = vcombine.high %v1995_v48, %v1997_v49  ;;  %v1999_v56 = vld [vmem:[#allocation5 + $0x850] sm:$0xff] }
 0x16a   : > { %3135 = vmatprep.subr.bf16.mxu0 %v17840_v58  ;;  %3258 = vmatprep.subr.bf16.mxu1 %v17842_v62  ;;  %v2001_v58 = vld [vmem:[#allocation5 + $0x8b0] sm:$0xff]  ;;  %v17867_v62 = vcombine.low %v1995_v48, %v1997_v49  ;;  %v2024_v48 = vld [vmem:[#allocation5 + $0xcd8] sm:$0xff]  ;;  %v17894_v49 = vcombine.high %v2020_v40, %v2022_v42 }
 0x16b   : > { %v17898_v59 = vcombine.high %v2024_v48, %v2026_v50 }
 0x16d   : > { %3136 = vmatpush1.bf16.msra.mxu0 %v17839_v0  ;;  %3259 = vmatpush1.bf16.msra.mxu1 %v17841_v1  ;;  %v17872_v0 = vcombine.high %v1999_v56, %v2001_v58  ;;  %v2003_v1 = vld [vmem:[#allocation5 + $0x910] sm:$0xff] }
 0x16e   : > { %3137 = vmatprep.subr.bf16.mxu0 %v17844_v2  ;;  %3260 = vmatprep.subr.bf16.mxu1 %v17846_v6  ;;  %v2005_v2 = vld [vmem:[#allocation5 + $0x970] sm:$0xff]  ;;  %v17871_v6 = vcombine.low %v1999_v56, %v2001_v58  ;;  %v2028_v56 = vld [vmem:[#allocation5 + $0xd98] sm:$0xff] }
 0x16f   : > { %v2030_v58 = vld [vmem:[#allocation5 + $0xdf8] sm:$0xff] }
 0x170   : > { %v17902_v3 = vcombine.high %v2028_v56, %v2030_v58 }
 0x171   : > { %3138 = vmatpush1.bf16.msra.mxu0 %v17843_v8  ;;  %3261 = vmatpush1.bf16.msra.mxu1 %v17845_v9  ;;  %v17876_v8 = vcombine.high %v2003_v1, %v2005_v2  ;;  %v2007_v9 = vld [vmem:[#allocation5 + $0x9d0] sm:$0xff] }
 0x172   : > { %3139 = vmatprep.subr.bf16.mxu0 %v17848_v10  ;;  %3262 = vmatprep.subr.bf16.mxu1 %v17850_v15  ;;  %v2009_v10 = vld [vmem:[#allocation5 + $0xa30] sm:$0xff]  ;;  %v17875_v15 = vcombine.low %v2003_v1, %v2005_v2  ;;  %v2032_v1 = vld [vmem:[#allocation5 + $0xe58] sm:$0xff] }
 0x173   : > { %v2034_v2 = vld [vmem:[#allocation5 + $0xeb8] sm:$0xff] }
 0x174   : > { %v17906_v11 = vcombine.high %v2032_v1, %v2034_v2 }
 0x175   : > { %3140 = vmatpush1.bf16.msra.mxu0 %v17847_v17  ;;  %3263 = vmatpush1.bf16.msra.mxu1 %v17849_v18  ;;  %v17880_v17 = vcombine.high %v2007_v9, %v2009_v10  ;;  %v2011_v18 = vld [vmem:[#allocation5 + $0xa90] sm:$0xff] }
 0x176   : > { %3141 = vmatprep.subr.bf16.mxu0 %v17852_v19  ;;  %3264 = vmatprep.subr.bf16.mxu1 %v17854_v24  ;;  %v2013_v19 = vld [vmem:[#allocation5 + $0xaf0] sm:$0xff]  ;;  %v17879_v24 = vcombine.low %v2007_v9, %v2009_v10  ;;  %v2036_v9 = vld [vmem:[#allocation5 + $0xf18] sm:$0xff] }
 0x177   : > { %v2038_v10 = vld [vmem:[#allocation5 + $0xf78] sm:$0xff] }
 0x178   : > { %v17910_v20 = vcombine.high %v2036_v9, %v2038_v10 }
 0x179   : > { %3142 = vmatpush1.bf16.msra.mxu0 %v17851_v27  ;;  %3265 = vmatpush1.bf16.msra.mxu1 %v17853_v28  ;;  %v17884_v27 = vcombine.high %v2011_v18, %v2013_v19  ;;  %v2015_v28 = vld [vmem:[#allocation5 + $0xb50] sm:$0xff] }
 0x17a   : > { %3143 = vmatprep.subr.bf16.mxu0 %v17856_v29  ;;  %3266 = vmatprep.subr.bf16.mxu1 %v17858_v33  ;;  %v2017_v29 = vld [vmem:[#allocation5 + $0xbb0] sm:$0xff]  ;;  %v17883_v33 = vcombine.low %v2011_v18, %v2013_v19  ;;  %v2040_v18 = vld [vmem:[#allocation5 + $0xfd8] sm:$0xff] }
 0x17b   : > { %v2042_v19 = vld [vmem:[#allocation5 + $0x1038] sm:$0xff] }
 0x17c   : > { %v17914_v30 = vcombine.high %v2040_v18, %v2042_v19 }
 0x17d   : > { %3144 = vmatpush1.bf16.msra.mxu0 %v17855_v36  ;;  %3267 = vmatpush1.bf16.msra.mxu1 %v17857_v37  ;;  %v17888_v36 = vcombine.high %v2015_v28, %v2017_v29  ;;  %v2019_v37 = vld [vmem:[#allocation5 + $0xc10] sm:$0xff] }
 0x17e   : > { %3145 = vmatprep.subr.bf16.mxu0 %v17860_v39  ;;  %3268 = vmatprep.subr.bf16.mxu1 %v17862_v43  ;;  %v2021_v39 = vld [vmem:[#allocation5 + $0xc70] sm:$0xff]  ;;  %v17887_v43 = vcombine.low %v2015_v28, %v2017_v29  ;;  %v2044_v28 = vld [vmem:[#allocation5 + $0x1098] sm:$0xff] }
 0x17f   : > { %v2046_v29 = vld [vmem:[#allocation5 + $0x10f8] sm:$0xff] }
 0x181   : > { %3146 = vmatpush1.bf16.msra.mxu0 %v17859_v45  ;;  %3269 = vmatpush1.bf16.msra.mxu1 %v17861_v46  ;;  %v17892_v45 = vcombine.high %v2019_v37, %v2021_v39  ;;  %v2023_v46 = vld [vmem:[#allocation5 + $0xcd0] sm:$0xff] }
 0x182   : > { %3147 = vmatprep.subr.bf16.mxu0 %v17864_v47  ;;  %3270 = vmatprep.subr.bf16.mxu1 %v17866_v51  ;;  %v2025_v47 = vld [vmem:[#allocation5 + $0xd30] sm:$0xff]  ;;  %v17891_v51 = vcombine.low %v2019_v37, %v2021_v39  ;;  %v2048_v37 = vld [vmem:[#allocation5 + $0x1158] sm:$0xff] }
 0x183   : > { %v2050_v39 = vld [vmem:[#allocation5 + $0x11b8] sm:$0xff] }
 0x185   : > { %3148 = vmatpush1.bf16.msra.mxu0 %v17863_v53  ;;  %3271 = vmatpush1.bf16.msra.mxu1 %v17865_v54  ;;  %v2029_v53 = vld [vmem:[#allocation5 + $0xdf0] sm:$0xff]  ;;  %v17893_v54 = vcombine.low %v2020_v40, %v2022_v42  ;;  %v17918_v40 = vcombine.high %v2044_v28, %v2046_v29 }
 0x186   : > { %3149 = vmatprep.subr.bf16.mxu0 %v17868_v55  ;;  %3272 = vmatprep.subr.bf16.mxu1 %v17870_v60  ;;  %v17896_v55 = vcombine.high %v2023_v46, %v2025_v47  ;;  %v17895_v60 = vcombine.low %v2023_v46, %v2025_v47  ;;  %v2051_v42 = vld [vmem:[#allocation5 + $0x1210] sm:$0xff]  ;;  %v2052_v46 = vld [vmem:[#allocation5 + $0x1218] sm:$0xff] }
 0x187   : > { %v2054_v47 = vld [vmem:[#allocation5 + $0x1278] sm:$0xff] }
 0x189   : > { %3150 = vmatpush1.bf16.msra.mxu0 %v17867_v62  ;;  %3273 = vmatpush1.bf16.msra.mxu1 %v17869_v63  ;;  %v2033_v62 = vld [vmem:[#allocation5 + $0xeb0] sm:$0xff]  ;;  %v17897_v63 = vcombine.low %v2024_v48, %v2026_v50  ;;  %v17922_v48 = vcombine.high %v2048_v37, %v2050_v39 }
 0x18a   : > { %3151 = vmatprep.subr.bf16.mxu0 %v17872_v0  ;;  %3274 = vmatprep.subr.bf16.mxu1 %v17874_v4  ;;  %v17900_v0 = vcombine.high %v2027_v52, %v2029_v53  ;;  %v17899_v4 = vcombine.low %v2027_v52, %v2029_v53  ;;  %v2055_v50 = vld [vmem:[#allocation5 + $0x12d0] sm:$0xff]  ;;  %v17921_v52 = vcombine.low %v2048_v37, %v2050_v39  ;;  %v2078_v37 = vld [vmem:[#allocation5 + $0x16f8] sm:$0xff] }
 0x18d   : > { %3152 = vmatpush1.bf16.msra.mxu0 %v17871_v6  ;;  %3275 = vmatpush1.bf16.msra.mxu1 %v17873_v7  ;;  %v2037_v6 = vld [vmem:[#allocation5 + $0xf70] sm:$0xff]  ;;  %v17901_v7 = vcombine.low %v2028_v56, %v2030_v58  ;;  %v17926_v56 = vcombine.high %v2052_v46, %v2054_v47 }
 0x18e   : > { %3153 = vmatprep.subr.bf16.mxu0 %v17876_v8  ;;  %3276 = vmatprep.subr.bf16.mxu1 %v17878_v13  ;;  %v17904_v8 = vcombine.high %v2031_v61, %v2033_v62  ;;  %v17903_v13 = vcombine.low %v2031_v61, %v2033_v62  ;;  %v17925_v61 = vcombine.low %v2052_v46, %v2054_v47  ;;  %v2082_v46 = vld [vmem:[#allocation5 + $0x17b8] sm:$0xff] }
 0x191   : > { %3154 = vmatpush1.bf16.msra.mxu0 %v17875_v15  ;;  %3277 = vmatpush1.bf16.msra.mxu1 %v17877_v16  ;;  %v2041_v15 = vld [vmem:[#allocation5 + $0x1030] sm:$0xff]  ;;  %v17905_v16 = vcombine.low %v2032_v1, %v2034_v2 }
 0x192   : > { %3155 = vmatprep.subr.bf16.mxu0 %v17880_v17  ;;  %3278 = vmatprep.subr.bf16.mxu1 %v17882_v21  ;;  %v17908_v17 = vcombine.high %v2035_v5, %v2037_v6  ;;  %v17907_v21 = vcombine.low %v2035_v5, %v2037_v6 }
 0x195   : > { %3156 = vmatpush1.bf16.msra.mxu0 %v17879_v24  ;;  %3279 = vmatpush1.bf16.msra.mxu1 %v17881_v26  ;;  %v2045_v24 = vld [vmem:[#allocation5 + $0x10f0] sm:$0xff]  ;;  %v17909_v26 = vcombine.low %v2036_v9, %v2038_v10 }
 0x196   : > { %3157 = vmatprep.subr.bf16.mxu0 %v17884_v27  ;;  %3280 = vmatprep.subr.bf16.mxu1 %v17886_v31  ;;  %v17912_v27 = vcombine.high %v2039_v14, %v2041_v15  ;;  %v17911_v31 = vcombine.low %v2039_v14, %v2041_v15 }
 0x199   : > { %3158 = vmatpush1.bf16.msra.mxu0 %v17883_v33  ;;  %3281 = vmatpush1.bf16.msra.mxu1 %v17885_v35  ;;  %v2049_v33 = vld [vmem:[#allocation5 + $0x11b0] sm:$0xff]  ;;  %v17913_v35 = vcombine.low %v2040_v18, %v2042_v19 }
 0x19a   : > { %3159 = vmatprep.subr.bf16.mxu0 %v17888_v36  ;;  %3282 = vmatprep.subr.bf16.mxu1 %v17890_v41  ;;  %v17916_v36 = vcombine.high %v2043_v22, %v2045_v24  ;;  %v17915_v41 = vcombine.low %v2043_v22, %v2045_v24 }
 0x19d   : > { %3160 = vmatpush1.bf16.msra.mxu0 %v17887_v43  ;;  %3283 = vmatpush1.bf16.msra.mxu1 %v17889_v44  ;;  %v2053_v43 = vld [vmem:[#allocation5 + $0x1270] sm:$0xff]  ;;  %v17917_v44 = vcombine.low %v2044_v28, %v2046_v29  ;;  %v2074_v28 = vld [vmem:[#allocation5 + $0x1638] sm:$0xff] }
 0x19e   : > { %3170 = vmatprep.subr.bf16.mxu0 %v17892_v45  ;;  %3293 = vmatprep.subr.bf16.mxu1 %v17894_v49  ;;  %v17920_v45 = vcombine.high %v2047_v32, %v2049_v33  ;;  %v17919_v49 = vcombine.low %v2047_v32, %v2049_v33  ;;  %v17924_v53 = vcombine.high %v2051_v42, %v2053_v43  ;;  %v2075_v33 = vld [vmem:[#allocation5 + $0x1690] sm:$0xff] }
 0x19f   : > { %v17923_v58 = vcombine.low %v2051_v42, %v2053_v43  ;;  %v2079_v43 = vld [vmem:[#allocation5 + $0x1750] sm:$0xff] }
 0x1a0   : > { %3162 = vmatmul.mubr.bf16.vlgmr.msra.gmra.mrb[4].mxu0 %v22423_v12  ;;  %3285 = vmatmul.mubr.bf16.vlgmr.msra.gmra.mrb[4].mxu1 %v22423_v12 }
 0x1a1   : > { %3171 = vmatpush1.bf16.msra.mxu0 %v17891_v51  ;;  %3294 = vmatpush1.bf16.msra.mxu1 %v17893_v54  ;;  %v2057_v51 = vld [vmem:[#allocation5 + $0x1330] sm:$0xff]  ;;  %v2056_v54 = vld [vmem:[#allocation5 + $0x12d8] sm:$0xff] }
 0x1a2   : > { %3172 = vmatprep.subr.bf16.mxu0 %v17896_v55  ;;  %3295 = vmatprep.subr.bf16.mxu1 %v17898_v59  ;;  %v2058_v55 = vld [vmem:[#allocation5 + $0x1338] sm:$0xff]  ;;  %v2059_v59 = vld [vmem:[#allocation5 + $0x1390] sm:$0xff]  ;;  %v17928_v62 = vcombine.high %v2055_v50, %v2057_v51  ;;  %v17927_v2 = vcombine.low %v2055_v50, %v2057_v51 }
 0x1a3   : > { %3202 = vmatprep.mubr.bf16.mxu0 %v22426_v23  ;;  %3325 = vmatprep.mubr.bf16.mxu1 %v22426_v23  ;;  %v17930_v1 = vcombine.high %v2056_v54, %v2058_v55  ;;  %v17929_v5 = vcombine.low %v2056_v54, %v2058_v55  ;;  %v2083_v51 = vld [vmem:[#allocation5 + $0x1810] sm:$0xff]  ;;  %v2086_v54 = vld [vmem:[#allocation5 + $0x1878] sm:$0xff] }
 0x1a5   : > { %3173 = vmatpush1.bf16.msra.mxu0 %v17895_v60  ;;  %3296 = vmatpush1.bf16.msra.mxu1 %v17897_v63  ;;  %v2061_v60 = vld [vmem:[#allocation5 + $0x13f0] sm:$0xff]  ;;  %v2060_v63 = vld [vmem:[#allocation5 + $0x1398] sm:$0xff] }
 0x1a6   : > { %3174 = vmatprep.subr.bf16.mxu0 %v17900_v0  ;;  %3297 = vmatprep.subr.bf16.mxu1 %v17902_v3  ;;  %v2062_v0 = vld [vmem:[#allocation5 + $0x13f8] sm:$0xff]  ;;  %v2063_v3 = vld [vmem:[#allocation5 + $0x1450] sm:$0xff]  ;;  %v17932_v6 = vcombine.high %v2059_v59, %v2061_v60  ;;  %v17931_v10 = vcombine.low %v2059_v59, %v2061_v60 }
 0x1a7   : > { %v17934_v9 = vcombine.high %v2060_v63, %v2062_v0  ;;  %v17933_v14 = vcombine.low %v2060_v63, %v2062_v0 }
 0x1a9   : > { %3175 = vmatpush1.bf16.msra.mxu0 %v17899_v4  ;;  %3298 = vmatpush1.bf16.msra.mxu1 %v17901_v7  ;;  %v2065_v4 = vld [vmem:[#allocation5 + $0x14b0] sm:$0xff]  ;;  %v2064_v7 = vld [vmem:[#allocation5 + $0x1458] sm:$0xff] }
 0x1aa   : > { %3176 = vmatprep.subr.bf16.mxu0 %v17904_v8  ;;  %3299 = vmatprep.subr.bf16.mxu1 %v17906_v11  ;;  %v2066_v8 = vld [vmem:[#allocation5 + $0x14b8] sm:$0xff]  ;;  %v2067_v11 = vld [vmem:[#allocation5 + $0x1510] sm:$0xff]  ;;  %v17936_v15 = vcombine.high %v2063_v3, %v2065_v4  ;;  %v17935_v19 = vcombine.low %v2063_v3, %v2065_v4 }
 0x1ab   : > { %v17938_v18 = vcombine.high %v2064_v7, %v2066_v8  ;;  %v17937_v22 = vcombine.low %v2064_v7, %v2066_v8 }
 0x1ad   : > { %3177 = vmatpush1.bf16.msra.mxu0 %v17903_v13  ;;  %3300 = vmatpush1.bf16.msra.mxu1 %v17905_v16  ;;  %v2069_v13 = vld [vmem:[#allocation5 + $0x1570] sm:$0xff]  ;;  %v2068_v16 = vld [vmem:[#allocation5 + $0x1518] sm:$0xff] }
 0x1ae   : > { %3178 = vmatprep.subr.bf16.mxu0 %v17908_v17  ;;  %3301 = vmatprep.subr.bf16.mxu1 %v17910_v20  ;;  %v2070_v17 = vld [vmem:[#allocation5 + $0x1578] sm:$0xff]  ;;  %v2071_v20 = vld [vmem:[#allocation5 + $0x15d0] sm:$0xff]  ;;  %v17940_v24 = vcombine.high %v2067_v11, %v2069_v13  ;;  %v17939_v29 = vcombine.low %v2067_v11, %v2069_v13 }
 0x1b1   : > { %3179 = vmatpush1.bf16.msra.mxu0 %v17907_v21  ;;  %3302 = vmatpush1.bf16.msra.mxu1 %v17909_v26  ;;  %v2073_v21 = vld [vmem:[#allocation5 + $0x1630] sm:$0xff]  ;;  %v17942_v26 = vcombine.high %v2068_v16, %v2070_v17 }
 0x1b2   : > { %3180 = vmatprep.subr.bf16.mxu0 %v17912_v27  ;;  %3303 = vmatprep.subr.bf16.mxu1 %v17914_v30  ;;  %v2072_v27 = vld [vmem:[#allocation5 + $0x15d8] sm:$0xff]  ;;  %v17941_v30 = vcombine.low %v2068_v16, %v2070_v17  ;;  %v17943_v39 = vcombine.low %v2071_v20, %v2073_v21 }
 0x1b3   : > { %v17946_v32 = vcombine.high %v2072_v27, %v2074_v28 }
 0x1b5   : > { %3181 = vmatpush1.bf16.msra.mxu0 %v17911_v31  ;;  %3304 = vmatpush1.bf16.msra.mxu1 %v17913_v35  ;;  %v17944_v31 = vcombine.high %v2071_v20, %v2073_v21  ;;  %v2077_v35 = vld [vmem:[#allocation5 + $0x16f0] sm:$0xff] }
 0x1b6   : > { %3182 = vmatprep.subr.bf16.mxu0 %v17916_v36  ;;  %3305 = vmatprep.subr.bf16.mxu1 %v17918_v40  ;;  %v2076_v36 = vld [vmem:[#allocation5 + $0x1698] sm:$0xff]  ;;  %v17945_v40 = vcombine.low %v2072_v27, %v2074_v28  ;;  %v17947_v47 = vcombine.low %v2075_v33, %v2077_v35  ;;  %v2103_v28 = vld [vmem:[#allocation5 + $0x1bd0] sm:$0xff] }
 0x1b7   : > { %v17950_v42 = vcombine.high %v2076_v36, %v2078_v37 }
 0x1b9   : > { %3183 = vmatpush1.bf16.msra.mxu0 %v17915_v41  ;;  %3306 = vmatpush1.bf16.msra.mxu1 %v17917_v44  ;;  %v17948_v41 = vcombine.high %v2075_v33, %v2077_v35  ;;  %v2081_v44 = vld [vmem:[#allocation5 + $0x17b0] sm:$0xff]  ;;  %v2106_v33 = vld [vmem:[#allocation5 + $0x1c38] sm:$0xff] }
 0x1ba   : > { %3184 = vmatprep.subr.bf16.mxu0 %v17920_v45  ;;  %3307 = vmatprep.subr.bf16.mxu1 %v17922_v48  ;;  %v2080_v45 = vld [vmem:[#allocation5 + $0x1758] sm:$0xff]  ;;  %v17949_v48 = vcombine.low %v2076_v36, %v2078_v37  ;;  %v17951_v55 = vcombine.low %v2079_v43, %v2081_v44  ;;  %v2107_v37 = vld [vmem:[#allocation5 + $0x1c90] sm:$0xff] }
 0x1bb   : > { %v17954_v50 = vcombine.high %v2080_v45, %v2082_v46  ;;  %v17953_v59 = vcombine.low %v2080_v45, %v2082_v46  ;;  %v2111_v46 = vld [vmem:[#allocation5 + $0x1d50] sm:$0xff] }
 0x1bd   : > { %3185 = vmatpush1.bf16.msra.mxu0 %v17919_v49  ;;  %3308 = vmatpush1.bf16.msra.mxu1 %v17921_v52  ;;  %v17952_v49 = vcombine.high %v2079_v43, %v2081_v44  ;;  %v2085_v52 = vld [vmem:[#allocation5 + $0x1870] sm:$0xff]  ;;  %v2110_v43 = vld [vmem:[#allocation5 + $0x1cf8] sm:$0xff] }
 0x1be   : > { %3186 = vmatprep.subr.bf16.mxu0 %v17924_v53  ;;  %3309 = vmatprep.subr.bf16.mxu1 %v17926_v56  ;;  %v2084_v53 = vld [vmem:[#allocation5 + $0x1818] sm:$0xff]  ;;  %v2087_v56 = vld [vmem:[#allocation5 + $0x18d0] sm:$0xff]  ;;  %v17956_v60 = vcombine.high %v2083_v51, %v2085_v52  ;;  %v17955_v0 = vcombine.low %v2083_v51, %v2085_v52 }
 0x1bf   : > { %v17958_v63 = vcombine.high %v2084_v53, %v2086_v54  ;;  %v17957_v3 = vcombine.low %v2084_v53, %v2086_v54  ;;  %v2114_v51 = vld [vmem:[#allocation5 + $0x1db8] sm:$0xff]  ;;  %v2115_v54 = vld [vmem:[#allocation5 + $0x1e10] sm:$0xff] }
 0x1c1   : > { %3187 = vmatpush1.bf16.msra.mxu0 %v17923_v58  ;;  %3310 = vmatpush1.bf16.msra.mxu1 %v17925_v61  ;;  %v2089_v58 = vld [vmem:[#allocation5 + $0x1930] sm:$0xff]  ;;  %v2088_v61 = vld [vmem:[#allocation5 + $0x18d8] sm:$0xff] }
 0x1c2   : > { %3188 = vmatprep.subr.bf16.mxu0 %v17928_v62  ;;  %3311 = vmatprep.subr.bf16.mxu1 %v17930_v1  ;;  %v2090_v62 = vld [vmem:[#allocation5 + $0x1938] sm:$0xff]  ;;  %v2091_v1 = vld [vmem:[#allocation5 + $0x1990] sm:$0xff]  ;;  %v17960_v4 = vcombine.high %v2087_v56, %v2089_v58  ;;  %v17959_v8 = vcombine.low %v2087_v56, %v2089_v58 }
 0x1c3   : > { %v17962_v7 = vcombine.high %v2088_v61, %v2090_v62  ;;  %v17961_v11 = vcombine.low %v2088_v61, %v2090_v62 }
 0x1c5   : > { %3189 = vmatpush1.bf16.msra.mxu0 %v17927_v2  ;;  %3312 = vmatpush1.bf16.msra.mxu1 %v17929_v5  ;;  %v2093_v2 = vld [vmem:[#allocation5 + $0x19f0] sm:$0xff]  ;;  %v2092_v5 = vld [vmem:[#allocation5 + $0x1998] sm:$0xff] }
 0x1c6   : > { %3190 = vmatprep.subr.bf16.mxu0 %v17932_v6  ;;  %3313 = vmatprep.subr.bf16.mxu1 %v17934_v9  ;;  %v2094_v6 = vld [vmem:[#allocation5 + $0x19f8] sm:$0xff]  ;;  %v2095_v9 = vld [vmem:[#allocation5 + $0x1a50] sm:$0xff]  ;;  %v17964_v13 = vcombine.high %v2091_v1, %v2093_v2  ;;  %v17963_v17 = vcombine.low %v2091_v1, %v2093_v2 }
 0x1c7   : > { %v17966_v16 = vcombine.high %v2092_v5, %v2094_v6  ;;  %v17965_v20 = vcombine.low %v2092_v5, %v2094_v6 }
 0x1c9   : > { %3191 = vmatpush1.bf16.msra.mxu0 %v17931_v10  ;;  %3314 = vmatpush1.bf16.msra.mxu1 %v17933_v14  ;;  %v2097_v10 = vld [vmem:[#allocation5 + $0x1ab0] sm:$0xff]  ;;  %v2096_v14 = vld [vmem:[#allocation5 + $0x1a58] sm:$0xff] }
 0x1ca   : > { %3192 = vmatprep.subr.bf16.mxu0 %v17936_v15  ;;  %3315 = vmatprep.subr.bf16.mxu1 %v17938_v18  ;;  %v2098_v15 = vld [vmem:[#allocation5 + $0x1ab8] sm:$0xff]  ;;  %v2099_v18 = vld [vmem:[#allocation5 + $0x1b10] sm:$0xff]  ;;  %v17968_v21 = vcombine.high %v2095_v9, %v2097_v10  ;;  %v17967_v27 = vcombine.low %v2095_v9, %v2097_v10 }
 0x1cd   : > { %3193 = vmatpush1.bf16.msra.mxu0 %v17935_v19  ;;  %3316 = vmatpush1.bf16.msra.mxu1 %v17937_v22  ;;  %v2101_v19 = vld [vmem:[#allocation5 + $0x1b70] sm:$0xff]  ;;  %v2100_v22 = vld [vmem:[#allocation5 + $0x1b18] sm:$0xff] }
 0x1ce   : > { %3194 = vmatprep.subr.bf16.mxu0 %v17940_v24  ;;  %3317 = vmatprep.subr.bf16.mxu1 %v17942_v26  ;;  %v2102_v24 = vld [vmem:[#allocation5 + $0x1b78] sm:$0xff]  ;;  %v17970_v26 = vcombine.high %v2096_v14, %v2098_v15  ;;  %v17971_v36 = vcombine.low %v2099_v18, %v2101_v19 }
 0x1cf   : > { %v17974_v35 = vcombine.high %v2100_v22, %v2102_v24 }
 0x1d1   : > { %3195 = vmatpush1.bf16.msra.mxu0 %v17939_v29  ;;  %3318 = vmatpush1.bf16.msra.mxu1 %v17941_v30  ;;  %v2105_v29 = vld [vmem:[#allocation5 + $0x1c30] sm:$0xff]  ;;  %v17969_v30 = vcombine.low %v2096_v14, %v2098_v15 }
 0x1d2   : > { %3196 = vmatprep.subr.bf16.mxu0 %v17944_v31  ;;  %3319 = vmatprep.subr.bf16.mxu1 %v17946_v32  ;;  %v17972_v31 = vcombine.high %v2099_v18, %v2101_v19  ;;  %v2104_v32 = vld [vmem:[#allocation5 + $0x1bd8] sm:$0xff]  ;;  %v17975_v45 = vcombine.low %v2103_v28, %v2105_v29 }
 0x1d3   : > { %v17978_v44 = vcombine.high %v2104_v32, %v2106_v33 }
 0x1d5   : > { %3197 = vmatpush1.bf16.msra.mxu0 %v17943_v39  ;;  %3320 = vmatpush1.bf16.msra.mxu1 %v17945_v40  ;;  %v2109_v39 = vld [vmem:[#allocation5 + $0x1cf0] sm:$0xff]  ;;  %v17973_v40 = vcombine.low %v2100_v22, %v2102_v24 }
 0x1d6   : > { %3198 = vmatprep.subr.bf16.mxu0 %v17948_v41  ;;  %3321 = vmatprep.subr.bf16.mxu1 %v17950_v42  ;;  %v17976_v41 = vcombine.high %v2103_v28, %v2105_v29  ;;  %v2108_v42 = vld [vmem:[#allocation5 + $0x1c98] sm:$0xff]  ;;  %v17979_v53 = vcombine.low %v2107_v37, %v2109_v39 }
 0x1d7   : > { %v17982_v52 = vcombine.high %v2108_v42, %v2110_v43  ;;  %v17981_v56 = vcombine.low %v2108_v42, %v2110_v43 }
 0x1d9   : > { %3199 = vmatpush1.bf16.msra.mxu0 %v17947_v47  ;;  %3322 = vmatpush1.bf16.msra.mxu1 %v17949_v48  ;;  %v2113_v47 = vld [vmem:[#allocation5 + $0x1db0] sm:$0xff]  ;;  %v17977_v48 = vcombine.low %v2104_v32, %v2106_v33 }
 0x1da   : > { %3200 = vmatprep.subr.bf16.mxu0 %v17952_v49  ;;  %3323 = vmatprep.subr.bf16.mxu1 %v17954_v50  ;;  %v17980_v49 = vcombine.high %v2107_v37, %v2109_v39  ;;  %v2112_v50 = vld [vmem:[#allocation5 + $0x1d58] sm:$0xff]  ;;  %v17984_v58 = vcombine.high %v2111_v46, %v2113_v47  ;;  %v17983_v62 = vcombine.low %v2111_v46, %v2113_v47 }
 0x1db   : > { %v17986_v61 = vcombine.high %v2112_v50, %v2114_v51  ;;  %v17985_v1 = vcombine.low %v2112_v50, %v2114_v51 }
 0x1dd   : > { %3201 = vmatpush1.bf16.msra.mxu0 %v17951_v55  ;;  %3324 = vmatpush1.bf16.msra.mxu1 %v17953_v59  ;;  %v2117_v55 = vld [vmem:[#allocation5 + $0x1e70] sm:$0xff]  ;;  %v2116_v59 = vld [vmem:[#allocation5 + $0x1e18] sm:$0xff] }
 0x1de   : > { %3211 = vmatprep.subr.bf16.mxu0 %v17956_v60  ;;  %3334 = vmatprep.subr.bf16.mxu1 %v17958_v63  ;;  %v2118_v60 = vld [vmem:[#allocation5 + $0x1e78] sm:$0xff]  ;;  %v2119_v63 = vld [vmem:[#allocation5 + $0x1ed0] sm:$0xff]  ;;  %v17988_v2 = vcombine.high %v2115_v54, %v2117_v55  ;;  %v17987_v6 = vcombine.low %v2115_v54, %v2117_v55 }
 0x1df   : > { %v17990_v5 = vcombine.high %v2116_v59, %v2118_v60  ;;  %v17989_v9 = vcombine.low %v2116_v59, %v2118_v60 }
 0x1e0   : > { %3203 = vmatmul.mubr.bf16.vlgmr.msra.gmra.mrb[4].mxu0 %v22434_v25  ;;  %3326 = vmatmul.mubr.bf16.vlgmr.msra.gmra.mrb[4].mxu1 %v22434_v25 }
 0x1e1   : > { %3212 = vmatpush1.bf16.msra.mxu0 %v17955_v0  ;;  %3335 = vmatpush1.bf16.msra.mxu1 %v17957_v3  ;;  %v2121_v0 = vld [vmem:[#allocation5 + $0x1f30] sm:$0xff]  ;;  %v2120_v3 = vld [vmem:[#allocation5 + $0x1ed8] sm:$0xff] }
 0x1e2   : > { %3213 = vmatprep.subr.bf16.mxu0 %v17960_v4  ;;  %3336 = vmatprep.subr.bf16.mxu1 %v17962_v7  ;;  %v2122_v4 = vld [vmem:[#allocation5 + $0x1f38] sm:$0xff]  ;;  %v2123_v7 = vld [vmem:[#allocation5 + $0x1f90] sm:$0xff]  ;;  %v17992_v10 = vcombine.high %v2119_v63, %v2121_v0  ;;  %v17991_v15 = vcombine.low %v2119_v63, %v2121_v0 }
 0x1e3   : > { %3243 = vmatprep.mubr.bf16.mxu0 %v22436_v34  ;;  %3366 = vmatprep.mubr.bf16.mxu1 %v22436_v34  ;;  %v17994_v14 = vcombine.high %v2120_v3, %v2122_v4  ;;  %v17993_v18 = vcombine.low %v2120_v3, %v2122_v4  ;;  %v20159_v0 = vld [vmem:[#allocation8 + $0x604] ss:$24 sps:$4 sm:$0xff]   ;;  %v20157_v4 = vld [vmem:[#allocation8 + $0x600] ss:$24 sps:$4 sm:$0xff]  }
 0x1e5   : > { %3214 = vmatpush1.bf16.msra.mxu0 %v17959_v8  ;;  %3337 = vmatpush1.bf16.msra.mxu1 %v17961_v11  ;;  %v2125_v8 = vld [vmem:[#allocation5 + $0x1ff0] sm:$0xff]  ;;  %v2124_v11 = vld [vmem:[#allocation5 + $0x1f98] sm:$0xff] }
 0x1e6   : > { %3215 = vmatprep.subr.bf16.mxu0 %v17964_v13  ;;  %3338 = vmatprep.subr.bf16.mxu1 %v17966_v16  ;;  %v2126_v13 = vld [vmem:[#allocation5 + $0x1ff8] sm:$0xff]  ;;  %v2127_v16 = vld [vmem:[#allocation5 + $0x2050] sm:$0xff]  ;;  %v17996_v19 = vcombine.high %v2123_v7, %v2125_v8  ;;  %v17995_v24 = vcombine.low %v2123_v7, %v2125_v8  ;;  %v20168_v7 = vld [vmem:[#allocation8 + $0x934] ss:$24 sps:$4 sm:$0xff]  }
 0x1e7   : > { %v17998_v22 = vcombine.high %v2124_v11, %v2126_v13  ;;  %v17997_v28 = vcombine.low %v2124_v11, %v2126_v13  ;;  %v20163_v8 = vld [vmem:[#allocation8 + $0x630] ss:$24 sps:$4 sm:$0xff]   ;;  %v20174_v11 = vld [vmem:[#allocation8 + $0x964] ss:$24 sps:$4 sm:$0xff]   ;;  %v20169_v13 = vld [vmem:[#allocation8 + $0x660] ss:$24 sps:$4 sm:$0xff]  }
 0x1e9   : > { %3216 = vmatpush1.bf16.msra.mxu0 %v17963_v17  ;;  %3339 = vmatpush1.bf16.msra.mxu1 %v17965_v20  ;;  %v2129_v17 = vld [vmem:[#allocation5 + $0x20b0] sm:$0xff]  ;;  %v2128_v20 = vld [vmem:[#allocation5 + $0x2058] sm:$0xff] }
 0x1ea   : > { %3217 = vmatprep.subr.bf16.mxu0 %v17968_v21  ;;  %3340 = vmatprep.subr.bf16.mxu1 %v17970_v26  ;;  %v2130_v21 = vld [vmem:[#allocation5 + $0x20b8] sm:$0xff]  ;;  %v2131_v26 = vld [vmem:[#allocation5 + $0x2110] sm:$0xff]  ;;  %v18000_v29 = vcombine.high %v2127_v16, %v2129_v17  ;;  %v17999_v33 = vcombine.low %v2127_v16, %v2129_v17  ;;  %v20180_v16 = vld [vmem:[#allocation8 + $0x994] ss:$24 sps:$4 sm:$0xff]  }
 0x1eb   : > { %v18002_v32 = vcombine.high %v2128_v20, %v2130_v21  ;;  %v18001_v37 = vcombine.low %v2128_v20, %v2130_v21  ;;  %v20175_v17 = vld [vmem:[#allocation8 + $0x690] ss:$24 sps:$4 sm:$0xff]   ;;  %v20186_v20 = vld [vmem:[#allocation8 + $0x9c4] ss:$24 sps:$4 sm:$0xff]   ;;  %v20181_v21 = vld [vmem:[#allocation8 + $0x6c0] ss:$24 sps:$4 sm:$0xff]  }
 0x1ed   : > { %3218 = vmatpush1.bf16.msra.mxu0 %v17967_v27  ;;  %3341 = vmatpush1.bf16.msra.mxu1 %v17969_v30  ;;  %v2133_v27 = vld [vmem:[#allocation5 + $0x2170] sm:$0xff]  ;;  %v2132_v30 = vld [vmem:[#allocation5 + $0x2118] sm:$0xff] }
 0x1ee   : > { %3219 = vmatprep.subr.bf16.mxu0 %v17972_v31  ;;  %3342 = vmatprep.subr.bf16.mxu1 %v17974_v35  ;;  %v2134_v31 = vld [vmem:[#allocation5 + $0x2178] sm:$0xff]  ;;  %v2135_v35 = vld [vmem:[#allocation5 + $0x21d0] sm:$0xff]  ;;  %v18004_v39 = vcombine.high %v2131_v26, %v2133_v27  ;;  %v18003_v43 = vcombine.low %v2131_v26, %v2133_v27  ;;  %v20192_v26 = vld [vmem:[#allocation8 + $0x9f4] ss:$24 sps:$4 sm:$0xff]  }
 0x1ef   : > { %v18006_v42 = vcombine.high %v2132_v30, %v2134_v31  ;;  %v18005_v46 = vcombine.low %v2132_v30, %v2134_v31  ;;  %v20187_v27 = vld [vmem:[#allocation8 + $0x6f0] ss:$24 sps:$4 sm:$0xff]   ;;  %v20198_v30 = vld [vmem:[#allocation8 + $0xa24] ss:$24 sps:$4 sm:$0xff]  }
 0x1f1   : > { %3220 = vmatpush1.bf16.msra.mxu0 %v17971_v36  ;;  %3343 = vmatpush1.bf16.msra.mxu1 %v17973_v40  ;;  %v2137_v36 = vld [vmem:[#allocation5 + $0x2230] sm:$0xff]  ;;  %v2136_v40 = vld [vmem:[#allocation5 + $0x21d8] sm:$0xff] }
 0x1f2   : > { %3221 = vmatprep.subr.bf16.mxu0 %v17976_v41  ;;  %3344 = vmatprep.subr.bf16.mxu1 %v17978_v44  ;;  %v2138_v41 = vld [vmem:[#allocation5 + $0x2238] sm:$0xff]  ;;  %v2139_v44 = vld [vmem:[#allocation5 + $0x2290] sm:$0xff]  ;;  %v18008_v47 = vcombine.high %v2135_v35, %v2137_v36  ;;  %v18007_v51 = vcombine.low %v2135_v35, %v2137_v36 }
 0x1f3   : > { %v18010_v50 = vcombine.high %v2136_v40, %v2138_v41  ;;  %v18009_v54 = vcombine.low %v2136_v40, %v2138_v41  ;;  %v20196_v36 = vld [vmem:[#allocation8 + $0xa20] ss:$24 sps:$4 sm:$0xff]   ;;  %v20204_v41 = vld [vmem:[#allocation8 + $0xa54] ss:$24 sps:$4 sm:$0xff]  }
 0x1f5   : > { %3222 = vmatpush1.bf16.msra.mxu0 %v17975_v45  ;;  %3345 = vmatpush1.bf16.msra.mxu1 %v17977_v48  ;;  %v2141_v45 = vld [vmem:[#allocation5 + $0x22f0] sm:$0xff]  ;;  %v2140_v48 = vld [vmem:[#allocation5 + $0x2298] sm:$0xff] }
 0x1f6   : > { %3223 = vmatprep.subr.bf16.mxu0 %v17980_v49  ;;  %3346 = vmatprep.subr.bf16.mxu1 %v17982_v52  ;;  %v2142_v49 = vld [vmem:[#allocation5 + $0x22f8] sm:$0xff]  ;;  %v2143_v52 = vld [vmem:[#allocation5 + $0x2350] sm:$0xff]  ;;  %v18012_v55 = vcombine.high %v2139_v44, %v2141_v45  ;;  %v18011_v60 = vcombine.low %v2139_v44, %v2141_v45  ;;  %v20199_v45 = vld [vmem:[#allocation8 + $0x750] ss:$24 sps:$4 sm:$0xff]  }
 0x1f7   : > { %v18014_v59 = vcombine.high %v2140_v48, %v2142_v49 }
 0x1f9   : > { %3224 = vmatpush1.bf16.msra.mxu0 %v17979_v53  ;;  %3347 = vmatpush1.bf16.msra.mxu1 %v17981_v56  ;;  %v2145_v53 = vld [vmem:[#allocation5 + $0x23b0] sm:$0xff]  ;;  %v2144_v56 = vld [vmem:[#allocation5 + $0x2358] sm:$0xff] }
 0x1fa   : > { %3225 = vmatprep.subr.bf16.mxu0 %v17984_v58  ;;  %3348 = vmatprep.subr.bf16.mxu1 %v17986_v61  ;;  %v2146_v58 = vld [vmem:[#allocation5 + $0x23b8] sm:$0xff]  ;;  %v18013_v61 = vcombine.low %v2140_v48, %v2142_v49 }
 0x1fb   : > { %v18018_v63 = vcombine.high %v2144_v56, %v2146_v58  ;;  %v18017_v3 = vcombine.low %v2144_v56, %v2146_v58  ;;  %v20205_v48 = vld [vmem:[#allocation8 + $0x780] ss:$24 sps:$4 sm:$0xff]   ;;  %v20210_v49 = vld [vmem:[#allocation8 + $0xa84] ss:$24 sps:$4 sm:$0xff]  }
 0x1fc   : > { %v20222_v56 = vld [vmem:[#allocation8 + $0xae4] ss:$24 sps:$4 sm:$0xff]   ;;  %v20217_v58 = vld [vmem:[#allocation8 + $0x7e0] ss:$24 sps:$4 sm:$0xff]  }
 0x1fd   : > { %3226 = vmatpush1.bf16.msra.mxu0 %v17983_v62  ;;  %3349 = vmatpush1.bf16.msra.mxu1 %v17985_v1  ;;  %v18016_v62 = vcombine.high %v2143_v52, %v2145_v53  ;;  %v18015_v1 = vcombine.low %v2143_v52, %v2145_v53  ;;  %v20216_v52 = vld [vmem:[#allocation8 + $0xab4] ss:$24 sps:$4 sm:$0xff]   ;;  %v20211_v53 = vld [vmem:[#allocation8 + $0x7b0] ss:$24 sps:$4 sm:$0xff]  }
 0x1fe   : > { %3227 = vmatprep.subr.bf16.mxu0 %v17988_v2  ;;  %3350 = vmatprep.subr.bf16.mxu1 %v17990_v5  ;;  %v20162_v2 = vld [vmem:[#allocation8 + $0x904] ss:$24 sps:$4 sm:$0xff]   ;;  %v20160_v5 = vld [vmem:[#allocation8 + $0x900] ss:$24 sps:$4 sm:$0xff]  }
 0x201   : > { %3228 = vmatpush1.bf16.msra.mxu0 %v17987_v6  ;;  %3351 = vmatpush1.bf16.msra.mxu1 %v17989_v9  ;;  %v20165_v6 = vld [vmem:[#allocation8 + $0x634] ss:$24 sps:$4 sm:$0xff]   ;;  %v20166_v9 = vld [vmem:[#allocation8 + $0x930] ss:$24 sps:$4 sm:$0xff]  }
 0x202   : > { %3229 = vmatprep.subr.bf16.mxu0 %v17992_v10  ;;  %3352 = vmatprep.subr.bf16.mxu1 %v17994_v14  ;;  %v20171_v10 = vld [vmem:[#allocation8 + $0x664] ss:$24 sps:$4 sm:$0xff]   ;;  %v20172_v14 = vld [vmem:[#allocation8 + $0x960] ss:$24 sps:$4 sm:$0xff]  }
 0x205   : > { %3230 = vmatpush1.bf16.msra.mxu0 %v17991_v15  ;;  %3353 = vmatpush1.bf16.msra.mxu1 %v17993_v18  ;;  %v20177_v15 = vld [vmem:[#allocation8 + $0x694] ss:$24 sps:$4 sm:$0xff]   ;;  %v20178_v18 = vld [vmem:[#allocation8 + $0x990] ss:$24 sps:$4 sm:$0xff]  }
 0x206   : > { %3231 = vmatprep.subr.bf16.mxu0 %v17996_v19  ;;  %3354 = vmatprep.subr.bf16.mxu1 %v17998_v22  ;;  %v20183_v19 = vld [vmem:[#allocation8 + $0x6c4] ss:$24 sps:$4 sm:$0xff]   ;;  %v20184_v22 = vld [vmem:[#allocation8 + $0x9c0] ss:$24 sps:$4 sm:$0xff]  }
 0x209   : > { %3232 = vmatpush1.bf16.msra.mxu0 %v17995_v24  ;;  %3355 = vmatpush1.bf16.msra.mxu1 %v17997_v28  ;;  %v20189_v24 = vld [vmem:[#allocation8 + $0x6f4] ss:$24 sps:$4 sm:$0xff]   ;;  %v20190_v28 = vld [vmem:[#allocation8 + $0x9f0] ss:$24 sps:$4 sm:$0xff]  }
 0x20a   : > { %3233 = vmatprep.subr.bf16.mxu0 %v18000_v29  ;;  %3356 = vmatprep.subr.bf16.mxu1 %v18002_v32  ;;  %v20195_v29 = vld [vmem:[#allocation8 + $0x724] ss:$24 sps:$4 sm:$0xff]   ;;  %v20193_v32 = vld [vmem:[#allocation8 + $0x720] ss:$24 sps:$4 sm:$0xff]  }
 0x20d   : > { %3234 = vmatpush1.bf16.msra.mxu0 %v17999_v33  ;;  %3357 = vmatpush1.bf16.msra.mxu1 %v18001_v37  ;;  %v20201_v37 = vld [vmem:[#allocation8 + $0x754] ss:$24 sps:$4 sm:$0xff]  }
 0x20e   : > { %3235 = vmatprep.subr.bf16.mxu0 %v18004_v39  ;;  %3358 = vmatprep.subr.bf16.mxu1 %v18006_v42 }
 0x211   : > { %3236 = vmatpush1.bf16.msra.mxu0 %v18003_v43  ;;  %3359 = vmatpush1.bf16.msra.mxu1 %v18005_v46  ;;  %v20202_v46 = vld [vmem:[#allocation8 + $0xa50] ss:$24 sps:$4 sm:$0xff]  }
 0x212   : > { %3237 = vmatprep.subr.bf16.mxu0 %v18008_v47  ;;  %3360 = vmatprep.subr.bf16.mxu1 %v18010_v50  ;;  %v20207_v47 = vld [vmem:[#allocation8 + $0x784] ss:$24 sps:$4 sm:$0xff]   ;;  %v20208_v50 = vld [vmem:[#allocation8 + $0xa80] ss:$24 sps:$4 sm:$0xff]  }
 0x215   : > { %3238 = vmatpush1.bf16.msra.mxu0 %v18007_v51  ;;  %3361 = vmatpush1.bf16.msra.mxu1 %v18009_v54  ;;  %v20213_v51 = vld [vmem:[#allocation8 + $0x7b4] ss:$24 sps:$4 sm:$0xff]   ;;  %v20214_v54 = vld [vmem:[#allocation8 + $0xab0] ss:$24 sps:$4 sm:$0xff]  }
 0x216   : > { %3239 = vmatprep.subr.bf16.mxu0 %v18012_v55  ;;  %3362 = vmatprep.subr.bf16.mxu1 %v18014_v59  ;;  %v20219_v55 = vld [vmem:[#allocation8 + $0x7e4] ss:$24 sps:$4 sm:$0xff]   ;;  %v20220_v59 = vld [vmem:[#allocation8 + $0xae0] ss:$24 sps:$4 sm:$0xff]  }
 0x219   : > { %3240 = vmatpush1.bf16.msra.mxu0 %v18011_v60  ;;  %3363 = vmatpush1.bf16.msra.mxu1 %v18013_v61  ;;  %v20225_v60 = vld [vmem:[#allocation8 + $0x814] ss:$24 sps:$4 sm:$0xff]  }
 0x21a   : > { %3241 = vmatprep.subr.bf16.mxu0 %v18016_v62  ;;  %3364 = vmatprep.subr.bf16.mxu1 %v18018_v63  ;;  %v20228_v61 = vld [vmem:[#allocation8 + $0xb14] ss:$24 sps:$4 sm:$0xff]   ;;  %v20223_v62 = vld [vmem:[#allocation8 + $0x810] ss:$24 sps:$4 sm:$0xff]  }
 0x21b   : > { %v20226_v63 = vld [vmem:[#allocation8 + $0xb10] ss:$24 sps:$4 sm:$0xff]  }
 0x21d   : > { %3242 = vmatpush1.bf16.msra.mxu0 %v18015_v1  ;;  %3365 = vmatpush1.bf16.msra.mxu1 %v18017_v3  ;;  %v20234_v1 = vld [vmem:[#allocation8 + $0xb44] ss:$24 sps:$4 sm:$0xff]   ;;  %v20232_v3 = vld [vmem:[#allocation8 + $0xb40] ss:$24 sps:$4 sm:$0xff]  }
 0x21e   : > { %4563 = vmatprep.subr.bf16.mxu0 %v20159_v0  ;;  %4604 = vmatprep.subr.bf16.mxu1 %v20162_v2  ;;  %v20231_v0 = vld [vmem:[#allocation8 + $0x844] ss:$24 sps:$4 sm:$0xff]   ;;  %v20229_v2 = vld [vmem:[#allocation8 + $0x840] ss:$24 sps:$4 sm:$0xff]  }
 0x220   : > { %3244 = vmatmul.mubr.bf16.vlgmr.msra.gmra.mrb[4].mxu0 %v22443_v38  ;;  %3367 = vmatmul.mubr.bf16.vlgmr.msra.gmra.mrb[4].mxu1 %v22443_v38 }
 0x221   : > { %4564 = vmatpush1.bf16.msra.mxu0 %v20157_v4  ;;  %4605 = vmatpush1.bf16.msra.mxu1 %v20160_v5  ;;  %v20237_v4 = vld [vmem:[#allocation8 + $0x874] ss:$24 sps:$4 sm:$0xff]  }
 0x222   : > { %4565 = vmatprep.subr.bf16.mxu0 %v20165_v6  ;;  %4606 = vmatprep.subr.bf16.mxu1 %v20168_v7  ;;  %v20240_v5 = vld [vmem:[#allocation8 + $0xb74] ss:$24 sps:$4 sm:$0xff]   ;;  %v20235_v6 = vld [vmem:[#allocation8 + $0x870] ss:$24 sps:$4 sm:$0xff]  }
 0x223   : > { %v20238_v7 = vld [vmem:[#allocation8 + $0xb70] ss:$24 sps:$4 sm:$0xff]  }
 0x225   : > { %4566 = vmatpush1.bf16.msra.mxu0 %v20163_v8  ;;  %4607 = vmatpush1.bf16.msra.mxu1 %v20166_v9  ;;  %v20243_v8 = vld [vmem:[#allocation8 + $0x8a4] ss:$24 sps:$4 sm:$0xff]  }
 0x226   : > { %4567 = vmatprep.subr.bf16.mxu0 %v20171_v10  ;;  %4608 = vmatprep.subr.bf16.mxu1 %v20174_v11  ;;  %v20246_v9 = vld [vmem:[#allocation8 + $0xba4] ss:$24 sps:$4 sm:$0xff]   ;;  %v20241_v10 = vld [vmem:[#allocation8 + $0x8a0] ss:$24 sps:$4 sm:$0xff]  }
 0x227   : > { %v20244_v11 = vld [vmem:[#allocation8 + $0xba0] ss:$24 sps:$4 sm:$0xff]  }
 0x229   : > { %4568 = vmatpush1.bf16.msra.mxu0 %v20169_v13  ;;  %4609 = vmatpush1.bf16.msra.mxu1 %v20172_v14  ;;  %v20247_v13 = vld [vmem:[#allocation8 + $0x8d0] ss:$24 sps:$4 sm:$0xff]   ;;  %v20249_v14 = vld [vmem:[#allocation8 + $0x8d4] ss:$24 sps:$4 sm:$0xff]  }
 0x22a   : > { %4569 = vmatprep.subr.bf16.mxu0 %v20177_v15  ;;  %4610 = vmatprep.subr.bf16.mxu1 %v20180_v16  ;;  %v20250_v15 = vld [vmem:[#allocation8 + $0xbd0] ss:$24 sps:$4 sm:$0xff]   ;;  %v20252_v16 = vld [vmem:[#allocation8 + $0xbd4] ss:$24 sps:$4 sm:$0xff]  }
 0x22d   : > { %4570 = vmatpush1.bf16.msra.mxu0 %v20175_v17  ;;  %4611 = vmatpush1.bf16.msra.mxu1 %v20178_v18  ;;  %v20255_v17 = vld [vmem:[#allocation8 + $0x60c] ss:$24 sps:$4 sm:$0xff]  }
 0x22e   : > { %4571 = vmatprep.subr.bf16.mxu0 %v20183_v19  ;;  %4612 = vmatprep.subr.bf16.mxu1 %v20186_v20  ;;  %v20258_v18 = vld [vmem:[#allocation8 + $0x90c] ss:$24 sps:$4 sm:$0xff]   ;;  %v501_v19 = vlaneseq }
 0x230   : > { %v22467_v20 = vshrl.u32 %v501_v19, 7 }
 0x231   : > { %4572 = vmatpush1.bf16.msra.mxu0 %v20181_v21  ;;  %4613 = vmatpush1.bf16.msra.mxu1 %v20184_v22  ;;  %v2147_v21 = vld [vmem:[#allocation7 + $0x4] sm:$0xf] }
 0x232   : > { %4573 = vmatprep.subr.bf16.mxu0 %v20189_v24  ;;  %4614 = vmatprep.subr.bf16.mxu1 %v20192_v26  ;;  %v22470_v22 = vsub.s32 0, %v22467_v20  ;;  %v22473_v24 = vsub.s32 2, %v22467_v20  ;;  %v22476_v26 = vsub.s32 1, %v22467_v20 }
 0x233   : > { %v22459_v31 = vpop.f32.mrb[0].mxu0  ;;  %v22461_v33 = vpop.f32.mrb[0].mxu1 }
 0x234   : > { %v22463_v35 = vpop.f32.mrb[1].mxu0  ;;  %v22465_v39 = vpop.f32.mrb[1].mxu1 }
 0x235   : > { %v1601_v40 = vpop.f32.mrb[2].mxu0  ;;  %4574 = vmatpush1.bf16.msra.mxu0 %v20187_v27  ;;  %v1724_v42 = vpop.f32.mrb[2].mxu1  ;;  %4615 = vmatpush1.bf16.msra.mxu1 %v20190_v28  ;;  %v22479_v27 = vsub.s32 3, %v22467_v20  ;;  %v2152_v28 = vrot.slane %v2147_v21, %v22470_v22 }
 0x236   : > { %v1602_v43 = vpop.f32.mrb[3].mxu0  ;;  %4575 = vmatprep.subr.bf16.mxu0 %v20195_v29  ;;  %v1725_v44 = vpop.f32.mrb[3].mxu1  ;;  %4616 = vmatprep.subr.bf16.mxu1 %v20198_v30  ;;  %v2160_v29 = vrot.slane %v2147_v21, %v22473_v24  ;;  %v2156_v30 = vrot.slane %v2147_v21, %v22476_v26 }
 0x239   : > { %4576 = vmatpush1.bf16.msra.mxu0 %v20193_v32  ;;  %4617 = vmatpush1.bf16.msra.mxu1 %v20196_v36  ;;  %v2164_v32 = vrot.slane %v2147_v21, %v22479_v27 }
 0x23a   : > { %4577 = vmatprep.subr.bf16.mxu0 %v20201_v37  ;;  %4618 = vmatprep.subr.bf16.mxu1 %v20204_v41 }
 0x23d   : > { %4578 = vmatpush1.bf16.msra.mxu0 %v20199_v45  ;;  %4619 = vmatpush1.bf16.msra.mxu1 %v20202_v46 }
 0x23e   : > { %4579 = vmatprep.subr.bf16.mxu0 %v20207_v47  ;;  %4620 = vmatprep.subr.bf16.mxu1 %v20210_v49 }
 0x241   : > { %4580 = vmatpush1.bf16.msra.mxu0 %v20205_v48  ;;  %4621 = vmatpush1.bf16.msra.mxu1 %v20208_v50 }
 0x242   : > { %4581 = vmatprep.subr.bf16.mxu0 %v20213_v51  ;;  %4622 = vmatprep.subr.bf16.mxu1 %v20216_v52 }
 0x245   : > { %4582 = vmatpush1.bf16.msra.mxu0 %v20211_v53  ;;  %4623 = vmatpush1.bf16.msra.mxu1 %v20214_v54 }
 0x246   : > { %4583 = vmatprep.subr.bf16.mxu0 %v20219_v55  ;;  %4624 = vmatprep.subr.bf16.mxu1 %v20222_v56 }
 0x249   : > { %4584 = vmatpush1.bf16.msra.mxu0 %v20217_v58  ;;  %4625 = vmatpush1.bf16.msra.mxu1 %v20220_v59 }
 0x24a   : > { %4585 = vmatprep.subr.bf16.mxu0 %v20225_v60  ;;  %4626 = vmatprep.subr.bf16.mxu1 %v20228_v61 }
 0x24d   : > { %4586 = vmatpush1.bf16.msra.mxu0 %v20223_v62  ;;  %4627 = vmatpush1.bf16.msra.mxu1 %v20226_v63 }
 0x24e   : > { %4587 = vmatprep.subr.bf16.mxu0 %v20231_v0  ;;  %4628 = vmatprep.subr.bf16.mxu1 %v20234_v1 }
 0x251   : > { %4588 = vmatpush1.bf16.msra.mxu0 %v20229_v2  ;;  %4629 = vmatpush1.bf16.msra.mxu1 %v20232_v3 }
 0x252   : > { %4589 = vmatprep.subr.bf16.mxu0 %v20237_v4  ;;  %4630 = vmatprep.subr.bf16.mxu1 %v20240_v5 }
 0x255   : > { %4590 = vmatpush1.bf16.msra.mxu0 %v20235_v6  ;;  %4631 = vmatpush1.bf16.msra.mxu1 %v20238_v7 }
 0x256   : > { %4591 = vmatprep.subr.bf16.mxu0 %v20243_v8  ;;  %4632 = vmatprep.subr.bf16.mxu1 %v20246_v9 }
 0x259   : > { %4592 = vmatpush1.bf16.msra.mxu0 %v20241_v10  ;;  %4633 = vmatpush1.bf16.msra.mxu1 %v20244_v11 }
 0x25a   : > { %4593 = vmatprep.subr.bf16.mxu0 %v20249_v14  ;;  %4634 = vmatprep.subr.bf16.mxu1 %v20252_v16 }
 0x25d   : > { %4594 = vmatpush1.bf16.msra.mxu0 %v20247_v13  ;;  %4635 = vmatpush1.bf16.msra.mxu1 %v20250_v15 }
 0x25e   : > { %4645 = vmatprep.subr.bf16.mxu0 %v20255_v17  ;;  %4686 = vmatprep.subr.bf16.mxu1 %v20258_v18 }
 0x2f3   : > { %v3245_v36 = vpop.f32.mrb[4].mxu0  ;;  %v3368_v40 = vpop.f32.mrb[4].mxu1 }
 0x2f4   : > { %v19946_v37 = vadd.f32 %v3245_v36, %v2152_v28  ;;  %v3247_v41 = vpop.f32.mrb[5].mxu0  ;;  %v19948_v42 = vadd.f32 %v3368_v40, %v2160_v29  ;;  %v3370_v44 = vpop.f32.mrb[5].mxu1  ;;  %v20253_v28 = vld [vmem:[#allocation8 + $0x608] ss:$24 sps:$4 sm:$0xff]   ;;  %v20264_v40 = vld [vmem:[#allocation8 + $0x93c] ss:$24 sps:$4 sm:$0xff]  }
 0x2f5   : > { %v19947_v43 = vadd.f32 %v3247_v41, %v2156_v30  ;;  %v3249_v45 = vpop.f32.mrb[6].mxu0  ;;  %v19949_v47 = vadd.f32 %v3370_v44, %v2164_v32  ;;  %v3372_v48 = vpop.f32.mrb[6].mxu1  ;;  %v20256_v30 = vld [vmem:[#allocation8 + $0x908] ss:$24 sps:$4 sm:$0xff]   ;;  %v20259_v41 = vld [vmem:[#allocation8 + $0x638] ss:$24 sps:$4 sm:$0xff]  }
 0x2f6   : > { %v3375_v46 = vmul.f32 %v19946_v37, %v19946_v37  ;;  %v3250_v49 = vpop.f32.mrb[7].mxu0  ;;  %v3377_v50 = vmul.f32 %v19948_v42, %v19948_v42  ;;  %v3373_v52 = vpop.f32.mrb[7].mxu1  ;;  %v3391_v7 = vmul.f32 0.5, %v19946_v37  ;;  %v3393_v10 = vmul.f32 0.5, %v19948_v42  ;;  %v20270_v44 = vld [vmem:[#allocation8 + $0x96c] ss:$24 sps:$4 sm:$0xff]  }
 0x2f7   : > { %v3376_v51 = vmul.f32 %v19947_v43, %v19947_v43  ;;  %v3378_v54 = vmul.f32 %v19949_v47, %v19949_v47  ;;  %v3392_v11 = vmul.f32 0.5, %v19947_v43  ;;  %v3394_v15 = vmul.f32 0.5, %v19949_v47  ;;  %v20265_v45 = vld [vmem:[#allocation8 + $0x668] ss:$24 sps:$4 sm:$0xff]   ;;  %v20276_v48 = vld [vmem:[#allocation8 + $0x99c] ss:$24 sps:$4 sm:$0xff]  }
 0x2f8   : > { %v3379_v53 = vmul.f32 0.035677407, %v3375_v46  ;;  %v3381_v55 = vmul.f32 0.035677407, %v3377_v50  ;;  %v20268_v46 = vld [vmem:[#allocation8 + $0x968] ss:$24 sps:$4 sm:$0xff]  }
 0x2f9   : > { %v3380_v56 = vmul.f32 0.035677407, %v3376_v51  ;;  %v3382_v59 = vmul.f32 0.035677407, %v3378_v54  ;;  %v20271_v49 = vld [vmem:[#allocation8 + $0x698] ss:$24 sps:$4 sm:$0xff]  }
 0x2fa   : > { %v3383_v58 = vadd.f32 0.7978846, %v3379_v53  ;;  %v3385_v60 = vadd.f32 0.7978846, %v3381_v55  ;;  %v20274_v50 = vld [vmem:[#allocation8 + $0x998] ss:$24 sps:$4 sm:$0xff]  }
 0x2fb   : > { %v3384_v61 = vadd.f32 0.7978846, %v3380_v56  ;;  %v3386_v63 = vadd.f32 0.7978846, %v3382_v59  ;;  %v20279_v51 = vld [vmem:[#allocation8 + $0x6cc] ss:$24 sps:$4 sm:$0xff]  }
 0x2fc   : > { %v3387_v62 = vmul.f32 %v19946_v37, %v3383_v58  ;;  %v3389_v0 = vmul.f32 %v19948_v42, %v3385_v60  ;;  %v20261_v37 = vld [vmem:[#allocation8 + $0x63c] ss:$24 sps:$4 sm:$0xff]   ;;  %v20262_v42 = vld [vmem:[#allocation8 + $0x938] ss:$24 sps:$4 sm:$0xff]   ;;  %v20282_v52 = vld [vmem:[#allocation8 + $0x9cc] ss:$24 sps:$4 sm:$0xff]  }
 0x2fd   : > { %v3388_v1 = vmul.f32 %v19947_v43, %v3384_v61  ;;  %v3390_v2 = vmul.f32 %v19949_v47, %v3386_v63  ;;  %v20267_v43 = vld [vmem:[#allocation8 + $0x66c] ss:$24 sps:$4 sm:$0xff]   ;;  %v20273_v47 = vld [vmem:[#allocation8 + $0x69c] ss:$24 sps:$4 sm:$0xff]   ;;  %v20277_v53 = vld [vmem:[#allocation8 + $0x6c8] ss:$24 sps:$4 sm:$0xff]  }
 0x2fe   : > { %21885 = vtanh.f32 %v3387_v62  ;;  %v20280_v54 = vld [vmem:[#allocation8 + $0x9c8] ss:$24 sps:$4 sm:$0xff]   ;;  %v20285_v55 = vld [vmem:[#allocation8 + $0x6fc] ss:$24 sps:$4 sm:$0xff]   ;;  %v20283_v58 = vld [vmem:[#allocation8 + $0x6f8] ss:$24 sps:$4 sm:$0xff]  }
 0x2ff   : > { %21887 = vtanh.f32 %v3389_v0  ;;  %v20288_v56 = vld [vmem:[#allocation8 + $0x9fc] ss:$24 sps:$4 sm:$0xff]   ;;  %v20286_v59 = vld [vmem:[#allocation8 + $0x9f8] ss:$24 sps:$4 sm:$0xff]   ;;  %v20291_v60 = vld [vmem:[#allocation8 + $0x72c] ss:$24 sps:$4 sm:$0xff]  }
 0x300   : > { %21889 = vtanh.f32 %v3388_v1  ;;  %v20294_v61 = vld [vmem:[#allocation8 + $0xa2c] ss:$24 sps:$4 sm:$0xff]   ;;  %v20289_v62 = vld [vmem:[#allocation8 + $0x728] ss:$24 sps:$4 sm:$0xff]   ;;  %v20297_v0 = vld [vmem:[#allocation8 + $0x75c] ss:$24 sps:$4 sm:$0xff]  }
 0x301   : > { %21891 = vtanh.f32 %v3390_v2  ;;  %v20292_v63 = vld [vmem:[#allocation8 + $0xa28] ss:$24 sps:$4 sm:$0xff]   ;;  %v20300_v1 = vld [vmem:[#allocation8 + $0xa5c] ss:$24 sps:$4 sm:$0xff]   ;;  %v20295_v2 = vld [vmem:[#allocation8 + $0x758] ss:$24 sps:$4 sm:$0xff]  }
 0x308   : > { %v21886_v3 = vpop.eup %21885 }
 0x309   : > { %v21888_v4 = vpop.eup %21887  ;;  %v3399_v5 = vadd.f32 1.0, %v21886_v3  ;;  %v20298_v3 = vld [vmem:[#allocation8 + $0xa58] ss:$24 sps:$4 sm:$0xff]  }
 0x30a   : > { %v21890_v6 = vpop.eup %21889  ;;  %v3401_v8 = vadd.f32 1.0, %v21888_v4  ;;  %v20303_v4 = vld [vmem:[#allocation8 + $0x78c] ss:$24 sps:$4 sm:$0xff]  }
 0x30b   : > { %v21892_v9 = vpop.eup %21891  ;;  %v3400_v13 = vadd.f32 1.0, %v21890_v6  ;;  %v3403_v14 = vmul.f32 %v3399_v5, %v3391_v7  ;;  %v20306_v5 = vld [vmem:[#allocation8 + $0xa8c] ss:$24 sps:$4 sm:$0xff]   ;;  %v20301_v6 = vld [vmem:[#allocation8 + $0x788] ss:$24 sps:$4 sm:$0xff]  }
 0x30c   : > { %v3402_v16 = vadd.f32 1.0, %v21892_v9  ;;  %v3405_v17 = vmul.f32 %v3401_v8, %v3393_v10  ;;  %v20304_v7 = vld [vmem:[#allocation8 + $0xa88] ss:$24 sps:$4 sm:$0xff]   ;;  %v20309_v8 = vld [vmem:[#allocation8 + $0x7bc] ss:$24 sps:$4 sm:$0xff]  }
 0x30d   : > { %v3404_v18 = vmul.f32 %v3400_v13, %v3392_v11  ;;  %v22489_v32 = vpack.c.bf16 %v3403_v14, %v3403_v14  ;;  %v20312_v9 = vld [vmem:[#allocation8 + $0xabc] ss:$24 sps:$4 sm:$0xff]   ;;  %v20307_v10 = vld [vmem:[#allocation8 + $0x7b8] ss:$24 sps:$4 sm:$0xff]   ;;  %v20315_v13 = vld [vmem:[#allocation8 + $0x7ec] ss:$24 sps:$4 sm:$0xff]  }
 0x30e   : > { %v3406_v19 = vmul.f32 %v3402_v16, %v3394_v15  ;;  %v22492_v36 = vpack.c.bf16 %v3405_v17, %v3405_v17  ;;  %v20310_v11 = vld [vmem:[#allocation8 + $0xab8] ss:$24 sps:$4 sm:$0xff]   ;;  %v20318_v14 = vld [vmem:[#allocation8 + $0xaec] ss:$24 sps:$4 sm:$0xff]   ;;  %v20313_v15 = vld [vmem:[#allocation8 + $0x7e8] ss:$24 sps:$4 sm:$0xff]  }
 0x30f   : > { %v22485_v21 = vpack.c.bf16 %v3404_v18, %v3404_v18  ;;  %v20316_v16 = vld [vmem:[#allocation8 + $0xae8] ss:$24 sps:$4 sm:$0xff]   ;;  %v20321_v17 = vld [vmem:[#allocation8 + $0x81c] ss:$24 sps:$4 sm:$0xff]  }
 0x310   : > { %v22487_v29 = vpack.c.bf16 %v3406_v19, %v3406_v19  ;;  %v20324_v18 = vld [vmem:[#allocation8 + $0xb1c] ss:$24 sps:$4 sm:$0xff]   ;;  %v20319_v19 = vld [vmem:[#allocation8 + $0x818] ss:$24 sps:$4 sm:$0xff]  }
 0x311   : > { %4595 = vmatprep.mubr.bf16.mxu0 %v22485_v21 }
 0x312   : > { %4636 = vmatprep.mubr.bf16.mxu1 %v22487_v29  ;;  %4596 = vmatmul.mubr.bf16.vlgmr.msra.gmra.mrb[8].mxu0 %v22489_v32 }
 0x313   : > { %4637 = vmatmul.mubr.bf16.vlgmr.msra.gmra.mrb[8].mxu1 %v22492_v36  ;;  %4646 = vmatpush1.bf16.msra.mxu0 %v20253_v28  ;;  %v20322_v28 = vld [vmem:[#allocation8 + $0xb18] ss:$24 sps:$4 sm:$0xff]  }
 0x314   : > { %4687 = vmatpush1.bf16.msra.mxu1 %v20256_v30  ;;  %4677 = vmatprep.mubr.bf16.mxu0 %v22485_v21  ;;  %v20327_v30 = vld [vmem:[#allocation8 + $0x84c] ss:$24 sps:$4 sm:$0xff]  }
 0x315   : > { %4718 = vmatprep.mubr.bf16.mxu1 %v22487_v29  ;;  %4647 = vmatprep.subr.bf16.mxu0 %v20261_v37  ;;  %v20330_v37 = vld [vmem:[#allocation8 + $0xb4c] ss:$24 sps:$4 sm:$0xff]  }
 0x316   : > { %4688 = vmatprep.subr.bf16.mxu1 %v20264_v40  ;;  %v20325_v40 = vld [vmem:[#allocation8 + $0x848] ss:$24 sps:$4 sm:$0xff]  }
 0x317   : > { %4648 = vmatpush1.bf16.msra.mxu0 %v20259_v41  ;;  %v20328_v41 = vld [vmem:[#allocation8 + $0xb48] ss:$24 sps:$4 sm:$0xff]  }
 0x318   : > { %4689 = vmatpush1.bf16.msra.mxu1 %v20262_v42  ;;  %4649 = vmatprep.subr.bf16.mxu0 %v20267_v43  ;;  %v20333_v42 = vld [vmem:[#allocation8 + $0x87c] ss:$24 sps:$4 sm:$0xff]  }
 0x319   : > { %4690 = vmatprep.subr.bf16.mxu1 %v20270_v44  ;;  %v20336_v43 = vld [vmem:[#allocation8 + $0xb7c] ss:$24 sps:$4 sm:$0xff]   ;;  %v20331_v44 = vld [vmem:[#allocation8 + $0x878] ss:$24 sps:$4 sm:$0xff]  }
 0x31b   : > { %4650 = vmatpush1.bf16.msra.mxu0 %v20265_v45  ;;  %v20334_v45 = vld [vmem:[#allocation8 + $0xb78] ss:$24 sps:$4 sm:$0xff]  }
 0x31c   : > { %4691 = vmatpush1.bf16.msra.mxu1 %v20268_v46  ;;  %4651 = vmatprep.subr.bf16.mxu0 %v20273_v47  ;;  %v20339_v46 = vld [vmem:[#allocation8 + $0x8ac] ss:$24 sps:$4 sm:$0xff]  }
 0x31d   : > { %4692 = vmatprep.subr.bf16.mxu1 %v20276_v48  ;;  %v20342_v47 = vld [vmem:[#allocation8 + $0xbac] ss:$24 sps:$4 sm:$0xff]   ;;  %v20337_v48 = vld [vmem:[#allocation8 + $0x8a8] ss:$24 sps:$4 sm:$0xff]  }
 0x31f   : > { %4652 = vmatpush1.bf16.msra.mxu0 %v20271_v49  ;;  %v20340_v49 = vld [vmem:[#allocation8 + $0xba8] ss:$24 sps:$4 sm:$0xff]  }
 0x320   : > { %4693 = vmatpush1.bf16.msra.mxu1 %v20274_v50  ;;  %4653 = vmatprep.subr.bf16.mxu0 %v20279_v51  ;;  %v20345_v50 = vld [vmem:[#allocation8 + $0x8dc] ss:$24 sps:$4 sm:$0xff]  }
 0x321   : > { %4694 = vmatprep.subr.bf16.mxu1 %v20282_v52  ;;  %v20348_v51 = vld [vmem:[#allocation8 + $0xbdc] ss:$24 sps:$4 sm:$0xff]   ;;  %v20343_v52 = vld [vmem:[#allocation8 + $0x8d8] ss:$24 sps:$4 sm:$0xff]  }
 0x323   : > { %4654 = vmatpush1.bf16.msra.mxu0 %v20277_v53  ;;  %v20346_v53 = vld [vmem:[#allocation8 + $0xbd8] ss:$24 sps:$4 sm:$0xff]  }
 0x324   : > { %4695 = vmatpush1.bf16.msra.mxu1 %v20280_v54  ;;  %4655 = vmatprep.subr.bf16.mxu0 %v20285_v55  ;;  %v20351_v54 = vld [vmem:[#allocation8 + $0x614] ss:$24 sps:$4 sm:$0xff]  }
 0x325   : > { %4696 = vmatprep.subr.bf16.mxu1 %v20288_v56  ;;  %v20354_v55 = vld [vmem:[#allocation8 + $0x914] ss:$24 sps:$4 sm:$0xff]   ;;  %v20349_v56 = vld [vmem:[#allocation8 + $0x610] ss:$24 sps:$4 sm:$0xff]  }
 0x327   : > { %4656 = vmatpush1.bf16.msra.mxu0 %v20283_v58  ;;  %v20352_v58 = vld [vmem:[#allocation8 + $0x910] ss:$24 sps:$4 sm:$0xff]  }
 0x328   : > { %4697 = vmatpush1.bf16.msra.mxu1 %v20286_v59  ;;  %4657 = vmatprep.subr.bf16.mxu0 %v20291_v60  ;;  %v20357_v59 = vld [vmem:[#allocation8 + $0x644] ss:$24 sps:$4 sm:$0xff]  }
 0x329   : > { %4698 = vmatprep.subr.bf16.mxu1 %v20294_v61  ;;  %v20360_v60 = vld [vmem:[#allocation8 + $0x944] ss:$24 sps:$4 sm:$0xff]   ;;  %v20355_v61 = vld [vmem:[#allocation8 + $0x640] ss:$24 sps:$4 sm:$0xff]  }
 0x32b   : > { %4658 = vmatpush1.bf16.msra.mxu0 %v20289_v62  ;;  %v20358_v62 = vld [vmem:[#allocation8 + $0x940] ss:$24 sps:$4 sm:$0xff]  }
 0x32c   : > { %4699 = vmatpush1.bf16.msra.mxu1 %v20292_v63  ;;  %4659 = vmatprep.subr.bf16.mxu0 %v20297_v0  ;;  %v20363_v63 = vld [vmem:[#allocation8 + $0x674] ss:$24 sps:$4 sm:$0xff]  }
 0x32d   : > { %4700 = vmatprep.subr.bf16.mxu1 %v20300_v1  ;;  %v20366_v0 = vld [vmem:[#allocation8 + $0x974] ss:$24 sps:$4 sm:$0xff]   ;;  %v20361_v1 = vld [vmem:[#allocation8 + $0x670] ss:$24 sps:$4 sm:$0xff]  }
 0x32f   : > { %4660 = vmatpush1.bf16.msra.mxu0 %v20295_v2  ;;  %v20364_v2 = vld [vmem:[#allocation8 + $0x970] ss:$24 sps:$4 sm:$0xff]  }
 0x330   : > { %4701 = vmatpush1.bf16.msra.mxu1 %v20298_v3  ;;  %4661 = vmatprep.subr.bf16.mxu0 %v20303_v4  ;;  %v20369_v3 = vld [vmem:[#allocation8 + $0x6a4] ss:$24 sps:$4 sm:$0xff]  }
 0x331   : > { %4702 = vmatprep.subr.bf16.mxu1 %v20306_v5  ;;  %v20372_v4 = vld [vmem:[#allocation8 + $0x9a4] ss:$24 sps:$4 sm:$0xff]   ;;  %v20367_v5 = vld [vmem:[#allocation8 + $0x6a0] ss:$24 sps:$4 sm:$0xff]  }
 0x333   : > { %4662 = vmatpush1.bf16.msra.mxu0 %v20301_v6  ;;  %v20375_v6 = vld [vmem:[#allocation8 + $0x6d4] ss:$24 sps:$4 sm:$0xff]  }
 0x334   : > { %4703 = vmatpush1.bf16.msra.mxu1 %v20304_v7  ;;  %4663 = vmatprep.subr.bf16.mxu0 %v20309_v8  ;;  %v20378_v7 = vld [vmem:[#allocation8 + $0x9d4] ss:$24 sps:$4 sm:$0xff]   ;;  %v20376_v8 = vld [vmem:[#allocation8 + $0x9d0] ss:$24 sps:$4 sm:$0xff]  }
 0x335   : > { %4704 = vmatprep.subr.bf16.mxu1 %v20312_v9  ;;  %v20381_v9 = vld [vmem:[#allocation8 + $0x704] ss:$24 sps:$4 sm:$0xff]  }
 0x337   : > { %4664 = vmatpush1.bf16.msra.mxu0 %v20307_v10  ;;  %v20384_v10 = vld [vmem:[#allocation8 + $0xa04] ss:$24 sps:$4 sm:$0xff]  }
 0x338   : > { %4705 = vmatpush1.bf16.msra.mxu1 %v20310_v11  ;;  %4665 = vmatprep.subr.bf16.mxu0 %v20315_v13  ;;  %v22503_v11 = vld [vmem:[#allocation7] sm:$0xf]  ;;  %v20379_v13 = vld [vmem:[#allocation8 + $0x700] ss:$24 sps:$4 sm:$0xff]  }
 0x339   : > { %4706 = vmatprep.subr.bf16.mxu1 %v20318_v14  ;;  %v20382_v14 = vld [vmem:[#allocation8 + $0xa00] ss:$24 sps:$4 sm:$0xff]  }
 0x33b   : > { %4666 = vmatpush1.bf16.msra.mxu0 %v20313_v15  ;;  %v20387_v15 = vld [vmem:[#allocation8 + $0x734] ss:$24 sps:$4 sm:$0xff]  }
 0x33c   : > { %4707 = vmatpush1.bf16.msra.mxu1 %v20316_v16  ;;  %4667 = vmatprep.subr.bf16.mxu0 %v20321_v17  ;;  %v508_v16 = vrot.slane %v22503_v11, %v22476_v26  ;;  %v20390_v17 = vld [vmem:[#allocation8 + $0xa34] ss:$24 sps:$4 sm:$0xff]  }
 0x33d   : > { %4708 = vmatprep.subr.bf16.mxu1 %v20324_v18  ;;  %v516_v18 = vrot.slane %v22503_v11, %v22479_v27 }
 0x33f   : > { %4668 = vmatpush1.bf16.msra.mxu0 %v20319_v19  ;;  %v20385_v19 = vld [vmem:[#allocation8 + $0x730] ss:$24 sps:$4 sm:$0xff]  }
 0x340   : > { %4709 = vmatpush1.bf16.msra.mxu1 %v20322_v28  ;;  %4669 = vmatprep.subr.bf16.mxu0 %v20327_v30  ;;  %v20388_v28 = vld [vmem:[#allocation8 + $0xa30] ss:$24 sps:$4 sm:$0xff]   ;;  %v20393_v30 = vld [vmem:[#allocation8 + $0x764] ss:$24 sps:$4 sm:$0xff]  }
 0x341   : > { %4710 = vmatprep.subr.bf16.mxu1 %v20330_v37  ;;  %v22510_v37 = vadd.f32 %v22463_v35, %v508_v16  ;;  %v20436_v16 = vld [vmem:[#allocation8 + $0xbb0] ss:$24 sps:$4 sm:$0xff]  }
 0x343   : > { %4670 = vmatpush1.bf16.msra.mxu0 %v20325_v40  ;;  %v20396_v40 = vld [vmem:[#allocation8 + $0xa64] ss:$24 sps:$4 sm:$0xff]  }
 0x344   : > { %4711 = vmatpush1.bf16.msra.mxu1 %v20328_v41  ;;  %4671 = vmatprep.subr.bf16.mxu0 %v20333_v42  ;;  %v22513_v41 = vadd.f32 %v22465_v39, %v516_v18  ;;  %v20391_v42 = vld [vmem:[#allocation8 + $0x760] ss:$24 sps:$4 sm:$0xff]   ;;  %v20400_v39 = vld [vmem:[#allocation8 + $0xa90] ss:$24 sps:$4 sm:$0xff]   ;;  %v20444_v18 = vld [vmem:[#allocation8 + $0xbe4] ss:$24 sps:$4 sm:$0xff]  }
 0x345   : > { %4712 = vmatprep.subr.bf16.mxu1 %v20336_v43  ;;  %v20394_v43 = vld [vmem:[#allocation8 + $0xa60] ss:$24 sps:$4 sm:$0xff]  }
 0x346   : > { %v1730_v35 = vmul.f32 %v22513_v41, %v22513_v41 }
 0x347   : > { %4672 = vmatpush1.bf16.msra.mxu0 %v20331_v44  ;;  %v20399_v44 = vld [vmem:[#allocation8 + $0x794] ss:$24 sps:$4 sm:$0xff]  }
 0x348   : > { %4713 = vmatpush1.bf16.msra.mxu1 %v20334_v45  ;;  %4673 = vmatprep.subr.bf16.mxu0 %v20339_v46  ;;  %v1728_v45 = vmul.f32 %v22510_v37, %v22510_v37  ;;  %v20402_v46 = vld [vmem:[#allocation8 + $0xa94] ss:$24 sps:$4 sm:$0xff]  }
 0x349   : > { %4714 = vmatprep.subr.bf16.mxu1 %v20342_v47  ;;  %v20397_v47 = vld [vmem:[#allocation8 + $0x790] ss:$24 sps:$4 sm:$0xff]  }
 0x34b   : > { %4674 = vmatpush1.bf16.msra.mxu0 %v20337_v48  ;;  %v20405_v48 = vld [vmem:[#allocation8 + $0x7c4] ss:$24 sps:$4 sm:$0xff]  }
 0x34c   : > { %4715 = vmatpush1.bf16.msra.mxu1 %v20340_v49  ;;  %4675 = vmatprep.subr.bf16.mxu0 %v20345_v50  ;;  %v1732_v49 = vmul.f32 0.035677407, %v1728_v45  ;;  %v20408_v50 = vld [vmem:[#allocation8 + $0xac4] ss:$24 sps:$4 sm:$0xff]  }
 0x34d   : > { %4716 = vmatprep.subr.bf16.mxu1 %v20348_v51  ;;  %v1734_v51 = vmul.f32 0.035677407, %v1730_v35  ;;  %v20450_v45 = vld [vmem:[#allocation8 + $0x304] ss:$24 sps:$4 sm:$0xff]   ;;  %v20445_v35 = vld [vmem:[#allocation8] ss:$24 sps:$4 sm:$0xff]  }
 0x34f   : > { %4676 = vmatpush1.bf16.msra.mxu0 %v20343_v52  ;;  %v20403_v52 = vld [vmem:[#allocation8 + $0x7c0] ss:$24 sps:$4 sm:$0xff]  }
 0x350   : > { %4717 = vmatpush1.bf16.msra.mxu1 %v20346_v53  ;;  %4727 = vmatprep.subr.bf16.mxu0 %v20351_v54  ;;  %v20406_v53 = vld [vmem:[#allocation8 + $0xac0] ss:$24 sps:$4 sm:$0xff]   ;;  %v20411_v54 = vld [vmem:[#allocation8 + $0x7f4] ss:$24 sps:$4 sm:$0xff]  }
 0x351   : > { %4768 = vmatprep.subr.bf16.mxu1 %v20354_v55  ;;  %v1736_v55 = vadd.f32 0.7978846, %v1732_v49  ;;  %v20456_v49 = vld [vmem:[#allocation8 + $0x334] ss:$24 sps:$4 sm:$0xff]  }
 0x352   : > { %4678 = vmatmul.mubr.bf16.vlgmr.msra.gmra.mrb[12].mxu0 %v22489_v32 }
 0x353   : > { %4719 = vmatmul.mubr.bf16.vlgmr.msra.gmra.mrb[12].mxu1 %v22492_v36  ;;  %4728 = vmatpush1.bf16.msra.mxu0 %v20349_v56  ;;  %v20414_v56 = vld [vmem:[#allocation8 + $0xaf4] ss:$24 sps:$4 sm:$0xff]  }
 0x354   : > { %4759 = vmatprep.mubr.bf16.mxu0 %v22485_v21  ;;  %4769 = vmatpush1.bf16.msra.mxu1 %v20352_v58  ;;  %v20370_v21 = vld [vmem:[#allocation8 + $0x9a0] ss:$24 sps:$4 sm:$0xff]   ;;  %v1738_v58 = vadd.f32 0.7978846, %v1734_v51  ;;  %v20454_v51 = vld [vmem:[#allocation8 + $0x330] ss:$24 sps:$4 sm:$0xff]  }
 0x355   : > { %4800 = vmatprep.mubr.bf16.mxu1 %v22487_v29  ;;  %4729 = vmatprep.subr.bf16.mxu0 %v20357_v59  ;;  %v20373_v29 = vld [vmem:[#allocation8 + $0x6d0] ss:$24 sps:$4 sm:$0xff]  }
 0x356   : > { %4770 = vmatprep.subr.bf16.mxu1 %v20360_v60  ;;  %v20409_v59 = vld [vmem:[#allocation8 + $0x7f0] ss:$24 sps:$4 sm:$0xff]  }
 0x357   : > { %4730 = vmatpush1.bf16.msra.mxu0 %v20355_v61  ;;  %v20412_v60 = vld [vmem:[#allocation8 + $0xaf0] ss:$24 sps:$4 sm:$0xff]   ;;  %v20417_v61 = vld [vmem:[#allocation8 + $0x824] ss:$24 sps:$4 sm:$0xff]  }
 0x358   : > { %4771 = vmatpush1.bf16.msra.mxu1 %v20358_v62  ;;  %4731 = vmatprep.subr.bf16.mxu0 %v20363_v63  ;;  %v1740_v62 = vmul.f32 %v22510_v37, %v1736_v55  ;;  %v20420_v63 = vld [vmem:[#allocation8 + $0xb24] ss:$24 sps:$4 sm:$0xff]   ;;  %v20468_v55 = vld [vmem:[#allocation8 + $0x394] ss:$24 sps:$4 sm:$0xff]  }
 0x359   : > { %4772 = vmatprep.subr.bf16.mxu1 %v20366_v0  ;;  %v1742_v0 = vmul.f32 %v22513_v41, %v1738_v58  ;;  %v20466_v58 = vld [vmem:[#allocation8 + $0x390] ss:$24 sps:$4 sm:$0xff]  }
 0x35a   : > { %21893 = vtanh.f32 %v1740_v62  ;;  %v20472_v62 = vld [vmem:[#allocation8 + $0x3c0] ss:$24 sps:$4 sm:$0xff]  }
 0x35b   : > { %4732 = vmatpush1.bf16.msra.mxu0 %v20361_v1  ;;  %v20415_v1 = vld [vmem:[#allocation8 + $0x820] ss:$24 sps:$4 sm:$0xff]   ;;  %21895 = vtanh.f32 %v1742_v0  ;;  %v20480_v0 = vld [vmem:[#allocation8 + $0x3f4] ss:$24 sps:$4 sm:$0xff]  }
 0x35c   : > { %4773 = vmatpush1.bf16.msra.mxu1 %v20364_v2  ;;  %4733 = vmatprep.subr.bf16.mxu0 %v20369_v3  ;;  %v20418_v2 = vld [vmem:[#allocation8 + $0xb20] ss:$24 sps:$4 sm:$0xff]   ;;  %v20423_v3 = vld [vmem:[#allocation8 + $0x854] ss:$24 sps:$4 sm:$0xff]  }
 0x35d   : > { %4774 = vmatprep.subr.bf16.mxu1 %v20372_v4  ;;  %v20426_v4 = vld [vmem:[#allocation8 + $0xb54] ss:$24 sps:$4 sm:$0xff]  }
 0x35f   : > { %4734 = vmatpush1.bf16.msra.mxu0 %v20367_v5  ;;  %v20421_v5 = vld [vmem:[#allocation8 + $0x850] ss:$24 sps:$4 sm:$0xff]  }
 0x360   : > { %4775 = vmatpush1.bf16.msra.mxu1 %v20370_v21  ;;  %4735 = vmatprep.subr.bf16.mxu0 %v20375_v6  ;;  %v20424_v21 = vld [vmem:[#allocation8 + $0xb50] ss:$24 sps:$4 sm:$0xff]   ;;  %v20429_v6 = vld [vmem:[#allocation8 + $0x884] ss:$24 sps:$4 sm:$0xff]  }
 0x361   : > { %4776 = vmatprep.subr.bf16.mxu1 %v20378_v7  ;;  %v20432_v7 = vld [vmem:[#allocation8 + $0xb84] ss:$24 sps:$4 sm:$0xff]  }
 0x363   : > { %4736 = vmatpush1.bf16.msra.mxu0 %v20373_v29  ;;  %v20427_v29 = vld [vmem:[#allocation8 + $0x880] ss:$24 sps:$4 sm:$0xff]  }
 0x364   : > { %4777 = vmatpush1.bf16.msra.mxu1 %v20376_v8  ;;  %4737 = vmatprep.subr.bf16.mxu0 %v20381_v9  ;;  %v20430_v8 = vld [vmem:[#allocation8 + $0xb80] ss:$24 sps:$4 sm:$0xff]   ;;  %v20435_v9 = vld [vmem:[#allocation8 + $0x8b4] ss:$24 sps:$4 sm:$0xff]  }
 0x365   : > { %4778 = vmatprep.subr.bf16.mxu1 %v20384_v10  ;;  %v20438_v10 = vld [vmem:[#allocation8 + $0xbb4] ss:$24 sps:$4 sm:$0xff]  }
 0x367   : > { %4738 = vmatpush1.bf16.msra.mxu0 %v20379_v13  ;;  %v21894_v13 = vpop.eup %21893 }
 0x368   : > { %4779 = vmatpush1.bf16.msra.mxu1 %v20382_v14  ;;  %4739 = vmatprep.subr.bf16.mxu0 %v20387_v15  ;;  %v20433_v14 = vld [vmem:[#allocation8 + $0x8b0] ss:$24 sps:$4 sm:$0xff]   ;;  %v21896_v15 = vpop.eup %21895 }
 0x369   : > { %4780 = vmatprep.subr.bf16.mxu1 %v20390_v17  ;;  %v20441_v17 = vld [vmem:[#allocation8 + $0x8e4] ss:$24 sps:$4 sm:$0xff]  }
 0x36b   : > { %4740 = vmatpush1.bf16.msra.mxu0 %v20385_v19  ;;  %v1752_v19 = vadd.f32 1.0, %v21894_v13  ;;  %v20487_v13 = vld [vmem:[#allocation8 + $0x150] ss:$24 sps:$4 sm:$0xff]  }
 0x36c   : > { %4781 = vmatpush1.bf16.msra.mxu1 %v20388_v28  ;;  %4741 = vmatprep.subr.bf16.mxu0 %v20393_v30  ;;  %v20439_v28 = vld [vmem:[#allocation8 + $0x8e0] ss:$24 sps:$4 sm:$0xff]   ;;  %v1754_v30 = vadd.f32 1.0, %v21896_v15  ;;  %v20495_v15 = vld [vmem:[#allocation8 + $0x184] ss:$24 sps:$4 sm:$0xff]  }
 0x36d   : > { %4782 = vmatprep.subr.bf16.mxu1 %v20396_v40  ;;  %v1744_v40 = vmul.f32 0.5, %v22510_v37 }
 0x36f   : > { %4742 = vmatpush1.bf16.msra.mxu0 %v20391_v42  ;;  %v20442_v42 = vld [vmem:[#allocation8 + $0xbe0] ss:$24 sps:$4 sm:$0xff]  }
 0x370   : > { %4783 = vmatpush1.bf16.msra.mxu1 %v20394_v43  ;;  %4743 = vmatprep.subr.bf16.mxu0 %v20399_v44  ;;  %v20447_v43 = vld [vmem:[#allocation8 + $0x4] ss:$24 sps:$4 sm:$0xff]   ;;  %v1746_v44 = vmul.f32 0.5, %v22513_v41 }
 0x371   : > { %4784 = vmatprep.subr.bf16.mxu1 %v20402_v46  ;;  %v1756_v46 = vmul.f32 %v1752_v19, %v1744_v40  ;;  %v20496_v19 = vld [vmem:[#allocation8 + $0x480] ss:$24 sps:$4 sm:$0xff]  }
 0x373   : > { %4744 = vmatpush1.bf16.msra.mxu0 %v20397_v47  ;;  %v1758_v47 = vmul.f32 %v1754_v30, %v1746_v44  ;;  %v22524_v37 = vpack.c.bf16 %v1756_v46, %v1756_v46  ;;  %v20504_v30 = vld [vmem:[#allocation8 + $0x4b4] ss:$24 sps:$4 sm:$0xff]   ;;  %v20502_v44 = vld [vmem:[#allocation8 + $0x4b0] ss:$24 sps:$4 sm:$0xff]   ;;  %v20510_v46 = vld [vmem:[#allocation8 + $0x4e4] ss:$24 sps:$4 sm:$0xff]  }
 0x374   : > { %4785 = vmatpush1.bf16.msra.mxu1 %v20400_v39  ;;  %4745 = vmatprep.subr.bf16.mxu0 %v20405_v48  ;;  %v20448_v39 = vld [vmem:[#allocation8 + $0x300] ss:$24 sps:$4 sm:$0xff]   ;;  %v20453_v48 = vld [vmem:[#allocation8 + $0x34] ss:$24 sps:$4 sm:$0xff]  }
 0x375   : > { %4786 = vmatprep.subr.bf16.mxu1 %v20408_v50  ;;  %v22527_v41 = vpack.c.bf16 %v1758_v47, %v1758_v47  ;;  %v20451_v50 = vld [vmem:[#allocation8 + $0x30] ss:$24 sps:$4 sm:$0xff]   ;;  %v20505_v47 = vld [vmem:[#allocation8 + $0x1e0] ss:$24 sps:$4 sm:$0xff]  }
 0x377   : > { %4746 = vmatpush1.bf16.msra.mxu0 %v20403_v52  ;;  %v20459_v52 = vld [vmem:[#allocation8 + $0x64] ss:$24 sps:$4 sm:$0xff]  }
 0x378   : > { %4787 = vmatpush1.bf16.msra.mxu1 %v20406_v53  ;;  %4747 = vmatprep.subr.bf16.mxu0 %v20411_v54  ;;  %v20462_v53 = vld [vmem:[#allocation8 + $0x364] ss:$24 sps:$4 sm:$0xff]   ;;  %v20460_v54 = vld [vmem:[#allocation8 + $0x360] ss:$24 sps:$4 sm:$0xff]  }
 0x379   : > { %4788 = vmatprep.subr.bf16.mxu1 %v20414_v56  ;;  %v20463_v56 = vld [vmem:[#allocation8 + $0x90] ss:$24 sps:$4 sm:$0xff]  }
 0x37b   : > { %4748 = vmatpush1.bf16.msra.mxu0 %v20409_v59  ;;  %v20471_v59 = vld [vmem:[#allocation8 + $0xc4] ss:$24 sps:$4 sm:$0xff]  }
 0x37c   : > { %4789 = vmatpush1.bf16.msra.mxu1 %v20412_v60  ;;  %4749 = vmatprep.subr.bf16.mxu0 %v20417_v61  ;;  %v20474_v60 = vld [vmem:[#allocation8 + $0x3c4] ss:$24 sps:$4 sm:$0xff]   ;;  %v20469_v61 = vld [vmem:[#allocation8 + $0xc0] ss:$24 sps:$4 sm:$0xff]  }
 0x37d   : > { %4790 = vmatprep.subr.bf16.mxu1 %v20420_v63  ;;  %v20477_v63 = vld [vmem:[#allocation8 + $0xf4] ss:$24 sps:$4 sm:$0xff]  }
 0x37f   : > { %4750 = vmatpush1.bf16.msra.mxu0 %v20415_v1  ;;  %v504_v1 = vrot.slane %v22503_v11, %v22470_v22 }
 0x380   : > { %4791 = vmatpush1.bf16.msra.mxu1 %v20418_v2  ;;  %4751 = vmatprep.subr.bf16.mxu0 %v20423_v3  ;;  %v20475_v2 = vld [vmem:[#allocation8 + $0xf0] ss:$24 sps:$4 sm:$0xff]   ;;  %v512_v3 = vrot.slane %v22503_v11, %v22473_v24  ;;  %v20492_v11 = vld [vmem:[#allocation8 + $0x454] ss:$24 sps:$4 sm:$0xff]  }
 0x381   : > { %4792 = vmatprep.subr.bf16.mxu1 %v20426_v4  ;;  %v20478_v4 = vld [vmem:[#allocation8 + $0x3f0] ss:$24 sps:$4 sm:$0xff]  }
 0x383   : > { %4752 = vmatpush1.bf16.msra.mxu0 %v20421_v5  ;;  %v20483_v5 = vld [vmem:[#allocation8 + $0x124] ss:$24 sps:$4 sm:$0xff]  }
 0x384   : > { %4793 = vmatpush1.bf16.msra.mxu1 %v20424_v21  ;;  %4753 = vmatprep.subr.bf16.mxu0 %v20429_v6  ;;  %v20486_v21 = vld [vmem:[#allocation8 + $0x424] ss:$24 sps:$4 sm:$0xff]   ;;  %v22536_v6 = vadd.f32 %v22459_v31, %v504_v1 }
 0x385   : > { %4794 = vmatprep.subr.bf16.mxu1 %v20432_v7  ;;  %v20481_v7 = vld [vmem:[#allocation8 + $0x120] ss:$24 sps:$4 sm:$0xff]  }
 0x387   : > { %4754 = vmatpush1.bf16.msra.mxu0 %v20427_v29  ;;  %v22539_v29 = vadd.f32 %v22461_v33, %v512_v3  ;;  %v20498_v33 = vld [vmem:[#allocation8 + $0x484] ss:$24 sps:$4 sm:$0xff]   ;;  %v20537_v3 = vld [vmem:[#allocation8 + $0x2d4] ss:$24 sps:$4 sm:$0xff]  }
 0x388   : > { %4795 = vmatpush1.bf16.msra.mxu1 %v20430_v8  ;;  %4755 = vmatprep.subr.bf16.mxu0 %v20435_v9  ;;  %v20484_v8 = vld [vmem:[#allocation8 + $0x420] ss:$24 sps:$4 sm:$0xff]   ;;  %v20489_v9 = vld [vmem:[#allocation8 + $0x154] ss:$24 sps:$4 sm:$0xff]  }
 0x389   : > { %4796 = vmatprep.subr.bf16.mxu1 %v20438_v10  ;;  %v1727_v10 = vmul.f32 %v22536_v6, %v22536_v6  ;;  %v1729_v31 = vmul.f32 %v22539_v29, %v22539_v29 }
 0x38b   : > { %4756 = vmatpush1.bf16.msra.mxu0 %v20433_v14  ;;  %v20490_v14 = vld [vmem:[#allocation8 + $0x450] ss:$24 sps:$4 sm:$0xff]  }
 0x38c   : > { %4797 = vmatpush1.bf16.msra.mxu1 %v20436_v16  ;;  %4757 = vmatprep.subr.bf16.mxu0 %v20441_v17  ;;  %v1731_v16 = vmul.f32 0.035677407, %v1727_v10  ;;  %v20493_v17 = vld [vmem:[#allocation8 + $0x180] ss:$24 sps:$4 sm:$0xff]   ;;  %v20543_v10 = vld [vmem:[#allocation8 + $0xc] ss:$24 sps:$4 sm:$0xff]  }
 0x38d   : > { %4798 = vmatprep.subr.bf16.mxu1 %v20444_v18  ;;  %v1733_v18 = vmul.f32 0.035677407, %v1729_v31  ;;  %v20546_v31 = vld [vmem:[#allocation8 + $0x30c] ss:$24 sps:$4 sm:$0xff]  }
 0x38e   : > { %v1735_v40 = vadd.f32 0.7978846, %v1731_v16  ;;  %v20552_v16 = vld [vmem:[#allocation8 + $0x33c] ss:$24 sps:$4 sm:$0xff]  }
 0x38f   : > { %4758 = vmatpush1.bf16.msra.mxu0 %v20439_v28  ;;  %v20501_v28 = vld [vmem:[#allocation8 + $0x1b4] ss:$24 sps:$4 sm:$0xff]  }
 0x390   : > { %4799 = vmatpush1.bf16.msra.mxu1 %v20442_v42  ;;  %5769 = vmatprep.subr.bf16.mxu0 %v20447_v43  ;;  %v20499_v42 = vld [vmem:[#allocation8 + $0x1b0] ss:$24 sps:$4 sm:$0xff]   ;;  %v1737_v43 = vadd.f32 0.7978846, %v1733_v18 }
 0x391   : > { %5810 = vmatprep.subr.bf16.mxu1 %v20450_v45  ;;  %v20507_v45 = vld [vmem:[#allocation8 + $0x1e4] ss:$24 sps:$4 sm:$0xff]   ;;  %v20550_v18 = vld [vmem:[#allocation8 + $0x338] ss:$24 sps:$4 sm:$0xff]  }
 0x392   : > { %4760 = vmatmul.mubr.bf16.vlgmr.msra.gmra.mrb[16].mxu0 %v22489_v32  ;;  %v20457_v32 = vld [vmem:[#allocation8 + $0x60] ss:$24 sps:$4 sm:$0xff]  }
 0x393   : > { %4801 = vmatmul.mubr.bf16.vlgmr.msra.gmra.mrb[16].mxu1 %v22492_v36  ;;  %5770 = vmatpush1.bf16.msra.mxu0 %v20445_v35  ;;  %v20465_v36 = vld [vmem:[#allocation8 + $0x94] ss:$24 sps:$4 sm:$0xff]   ;;  %v1739_v35 = vmul.f32 %v22536_v6, %v1735_v40  ;;  %v20556_v40 = vld [vmem:[#allocation8 + $0x368] ss:$24 sps:$4 sm:$0xff]  }
 0x394   : > { %5801 = vmatprep.mubr.bf16.mxu0 %v22524_v37  ;;  %5811 = vmatpush1.bf16.msra.mxu1 %v20448_v39  ;;  %v1741_v39 = vmul.f32 %v22539_v29, %v1737_v43  ;;  %v20564_v43 = vld [vmem:[#allocation8 + $0x39c] ss:$24 sps:$4 sm:$0xff]  }
 0x395   : > { %5842 = vmatprep.mubr.bf16.mxu1 %v22527_v41  ;;  %5771 = vmatprep.subr.bf16.mxu0 %v20453_v48  ;;  %v20508_v48 = vld [vmem:[#allocation8 + $0x4e0] ss:$24 sps:$4 sm:$0xff]   ;;  %21897 = vtanh.f32 %v1739_v35  ;;  %v20570_v35 = vld [vmem:[#allocation8 + $0x3cc] ss:$24 sps:$4 sm:$0xff]  }
 0x396   : > { %5812 = vmatprep.subr.bf16.mxu1 %v20456_v49  ;;  %v20513_v49 = vld [vmem:[#allocation8 + $0x214] ss:$24 sps:$4 sm:$0xff]   ;;  %21899 = vtanh.f32 %v1741_v39  ;;  %v20568_v39 = vld [vmem:[#allocation8 + $0x3c8] ss:$24 sps:$4 sm:$0xff]  }
 0x397   : > { %5772 = vmatpush1.bf16.msra.mxu0 %v20451_v50  ;;  %v20516_v50 = vld [vmem:[#allocation8 + $0x514] ss:$24 sps:$4 sm:$0xff]  }
 0x398   : > { %5813 = vmatpush1.bf16.msra.mxu1 %v20454_v51  ;;  %5773 = vmatprep.subr.bf16.mxu0 %v20459_v52  ;;  %v20511_v51 = vld [vmem:[#allocation8 + $0x210] ss:$24 sps:$4 sm:$0xff]  }
 0x399   : > { %5814 = vmatprep.subr.bf16.mxu1 %v20462_v53  ;;  %v20514_v52 = vld [vmem:[#allocation8 + $0x510] ss:$24 sps:$4 sm:$0xff]   ;;  %v20519_v53 = vld [vmem:[#allocation8 + $0x244] ss:$24 sps:$4 sm:$0xff]  }
 0x39b   : > { %5774 = vmatpush1.bf16.msra.mxu0 %v20457_v32  ;;  %v20522_v32 = vld [vmem:[#allocation8 + $0x544] ss:$24 sps:$4 sm:$0xff]  }
 0x39c   : > { %5815 = vmatpush1.bf16.msra.mxu1 %v20460_v54  ;;  %5775 = vmatprep.subr.bf16.mxu0 %v20465_v36  ;;  %v20517_v54 = vld [vmem:[#allocation8 + $0x240] ss:$24 sps:$4 sm:$0xff]  }
 0x39d   : > { %5816 = vmatprep.subr.bf16.mxu1 %v20468_v55  ;;  %v20520_v36 = vld [vmem:[#allocation8 + $0x540] ss:$24 sps:$4 sm:$0xff]   ;;  %v20525_v55 = vld [vmem:[#allocation8 + $0x274] ss:$24 sps:$4 sm:$0xff]  }
 0x39f   : > { %5776 = vmatpush1.bf16.msra.mxu0 %v20463_v56  ;;  %v20528_v56 = vld [vmem:[#allocation8 + $0x574] ss:$24 sps:$4 sm:$0xff]  }
 0x3a0   : > { %5817 = vmatpush1.bf16.msra.mxu1 %v20466_v58  ;;  %5777 = vmatprep.subr.bf16.mxu0 %v20471_v59  ;;  %v20523_v58 = vld [vmem:[#allocation8 + $0x270] ss:$24 sps:$4 sm:$0xff]  }
 0x3a1   : > { %5818 = vmatprep.subr.bf16.mxu1 %v20474_v60  ;;  %v20526_v59 = vld [vmem:[#allocation8 + $0x570] ss:$24 sps:$4 sm:$0xff]   ;;  %v20531_v60 = vld [vmem:[#allocation8 + $0x2a4] ss:$24 sps:$4 sm:$0xff]  }
 0x3a3   : > { %5778 = vmatpush1.bf16.msra.mxu0 %v20469_v61  ;;  %v21898_v61 = vpop.eup %21897 }
 0x3a4   : > { %5819 = vmatpush1.bf16.msra.mxu1 %v20472_v62  ;;  %5779 = vmatprep.subr.bf16.mxu0 %v20477_v63  ;;  %v20534_v62 = vld [vmem:[#allocation8 + $0x5a4] ss:$24 sps:$4 sm:$0xff]   ;;  %v21900_v63 = vpop.eup %21899  ;;  %v1751_v1 = vadd.f32 1.0, %v21898_v61 }
 0x3a5   : > { %5820 = vmatprep.subr.bf16.mxu1 %v20480_v0  ;;  %v20529_v0 = vld [vmem:[#allocation8 + $0x2a0] ss:$24 sps:$4 sm:$0xff]  }
 0x3a7   : > { %5780 = vmatpush1.bf16.msra.mxu0 %v20475_v2  ;;  %v20532_v2 = vld [vmem:[#allocation8 + $0x5a0] ss:$24 sps:$4 sm:$0xff]  }
 0x3a8   : > { %5821 = vmatpush1.bf16.msra.mxu1 %v20478_v4  ;;  %5781 = vmatprep.subr.bf16.mxu0 %v20483_v5  ;;  %v1753_v4 = vadd.f32 1.0, %v21900_v63  ;;  %v20540_v5 = vld [vmem:[#allocation8 + $0x5d4] ss:$24 sps:$4 sm:$0xff]   ;;  %v20580_v63 = vld [vmem:[#allocation8 + $0x428] ss:$24 sps:$4 sm:$0xff]  }
 0x3a9   : > { %5822 = vmatprep.subr.bf16.mxu1 %v20486_v21  ;;  %v1743_v21 = vmul.f32 0.5, %v22536_v6 }
 0x3ab   : > { %5782 = vmatpush1.bf16.msra.mxu0 %v20481_v7  ;;  %v1745_v7 = vmul.f32 0.5, %v22539_v29  ;;  %v20549_v29 = vld [vmem:[#allocation8 + $0x3c] ss:$24 sps:$4 sm:$0xff]  }
 0x3ac   : > { %5823 = vmatpush1.bf16.msra.mxu1 %v20484_v8  ;;  %5783 = vmatprep.subr.bf16.mxu0 %v20489_v9  ;;  %v20535_v8 = vld [vmem:[#allocation8 + $0x2d0] ss:$24 sps:$4 sm:$0xff]   ;;  %v1755_v9 = vmul.f32 %v1751_v1, %v1743_v21  ;;  %v20594_v21 = vld [vmem:[#allocation8 + $0x48c] ss:$24 sps:$4 sm:$0xff]  }
 0x3ad   : > { %5824 = vmatprep.subr.bf16.mxu1 %v20492_v11  ;;  %v20538_v11 = vld [vmem:[#allocation8 + $0x5d0] ss:$24 sps:$4 sm:$0xff]  }
 0x3af   : > { %5784 = vmatpush1.bf16.msra.mxu0 %v20487_v13  ;;  %v1757_v13 = vmul.f32 %v1753_v4, %v1745_v7  ;;  %v20586_v4 = vld [vmem:[#allocation8 + $0x458] ss:$24 sps:$4 sm:$0xff]   ;;  %v20589_v7 = vld [vmem:[#allocation8 + $0x188] ss:$24 sps:$4 sm:$0xff]  }
 0x3b0   : > { %5825 = vmatpush1.bf16.msra.mxu1 %v20490_v14  ;;  %5785 = vmatprep.subr.bf16.mxu0 %v20495_v15  ;;  %v20541_v14 = vld [vmem:[#allocation8 + $0x8] ss:$24 sps:$4 sm:$0xff]   ;;  %v22549_v15 = vpack.c.bf16 %v1755_v9, %v1755_v9  ;;  %v20597_v9 = vld [vmem:[#allocation8 + $0x1bc] ss:$24 sps:$4 sm:$0xff]  }
 0x3b1   : > { %5826 = vmatprep.subr.bf16.mxu1 %v20498_v33  ;;  %v20544_v33 = vld [vmem:[#allocation8 + $0x308] ss:$24 sps:$4 sm:$0xff]   ;;  %v22551_v6 = vpack.c.bf16 %v1757_v13, %v1757_v13  ;;  %v20598_v13 = vld [vmem:[#allocation8 + $0x4b8] ss:$24 sps:$4 sm:$0xff]  }
 0x3b3   : > { %5786 = vmatpush1.bf16.msra.mxu0 %v20493_v17  ;;  %v20547_v17 = vld [vmem:[#allocation8 + $0x38] ss:$24 sps:$4 sm:$0xff]  }
 0x3b4   : > { %5827 = vmatpush1.bf16.msra.mxu1 %v20496_v19  ;;  %5787 = vmatprep.subr.bf16.mxu0 %v20501_v28  ;;  %v20555_v19 = vld [vmem:[#allocation8 + $0x6c] ss:$24 sps:$4 sm:$0xff]  }
 0x3b5   : > { %5828 = vmatprep.subr.bf16.mxu1 %v20504_v30  ;;  %v20558_v28 = vld [vmem:[#allocation8 + $0x36c] ss:$24 sps:$4 sm:$0xff]   ;;  %v20553_v30 = vld [vmem:[#allocation8 + $0x68] ss:$24 sps:$4 sm:$0xff]  }
 0x3b7   : > { %5788 = vmatpush1.bf16.msra.mxu0 %v20499_v42  ;;  %v20561_v42 = vld [vmem:[#allocation8 + $0x9c] ss:$24 sps:$4 sm:$0xff]  }
 0x3b8   : > { %5829 = vmatpush1.bf16.msra.mxu1 %v20502_v44  ;;  %5789 = vmatprep.subr.bf16.mxu0 %v20507_v45  ;;  %v20559_v44 = vld [vmem:[#allocation8 + $0x98] ss:$24 sps:$4 sm:$0xff]  }
 0x3b9   : > { %5830 = vmatprep.subr.bf16.mxu1 %v20510_v46  ;;  %v20562_v45 = vld [vmem:[#allocation8 + $0x398] ss:$24 sps:$4 sm:$0xff]   ;;  %v20567_v46 = vld [vmem:[#allocation8 + $0xcc] ss:$24 sps:$4 sm:$0xff]  }
 0x3bb   : > { %5790 = vmatpush1.bf16.msra.mxu0 %v20505_v47  ;;  %v20565_v47 = vld [vmem:[#allocation8 + $0xc8] ss:$24 sps:$4 sm:$0xff]  }
 0x3bc   : > { %5831 = vmatpush1.bf16.msra.mxu1 %v20508_v48  ;;  %5791 = vmatprep.subr.bf16.mxu0 %v20513_v49  ;;  %v20573_v48 = vld [vmem:[#allocation8 + $0xfc] ss:$24 sps:$4 sm:$0xff]  }
 0x3bd   : > { %5832 = vmatprep.subr.bf16.mxu1 %v20516_v50  ;;  %v20576_v49 = vld [vmem:[#allocation8 + $0x3fc] ss:$24 sps:$4 sm:$0xff]   ;;  %v20571_v50 = vld [vmem:[#allocation8 + $0xf8] ss:$24 sps:$4 sm:$0xff]  }
 0x3bf   : > { %5792 = vmatpush1.bf16.msra.mxu0 %v20511_v51  ;;  %v20574_v51 = vld [vmem:[#allocation8 + $0x3f8] ss:$24 sps:$4 sm:$0xff]  }
 0x3c0   : > { %5833 = vmatpush1.bf16.msra.mxu1 %v20514_v52  ;;  %5793 = vmatprep.subr.bf16.mxu0 %v20519_v53  ;;  %v20579_v52 = vld [vmem:[#allocation8 + $0x12c] ss:$24 sps:$4 sm:$0xff]  }
 0x3c1   : > { %5834 = vmatprep.subr.bf16.mxu1 %v20522_v32  ;;  %v20582_v32 = vld [vmem:[#allocation8 + $0x42c] ss:$24 sps:$4 sm:$0xff]  }
 0x3c3   : > { %5794 = vmatpush1.bf16.msra.mxu0 %v20517_v54 }
 0x3c4   : > { %5835 = vmatpush1.bf16.msra.mxu1 %v20520_v36  ;;  %5795 = vmatprep.subr.bf16.mxu0 %v20525_v55 }
 0x3c5   : > { %5836 = vmatprep.subr.bf16.mxu1 %v20528_v56 }
 0x3c7   : > { %5796 = vmatpush1.bf16.msra.mxu0 %v20523_v58 }
 0x3c8   : > { %5837 = vmatpush1.bf16.msra.mxu1 %v20526_v59  ;;  %5797 = vmatprep.subr.bf16.mxu0 %v20531_v60  ;;  %v20577_v59 = vld [vmem:[#allocation8 + $0x128] ss:$24 sps:$4 sm:$0xff]  }
 0x3c9   : > { %5838 = vmatprep.subr.bf16.mxu1 %v20534_v62 }
 0x3cb   : > { %5798 = vmatpush1.bf16.msra.mxu0 %v20529_v0  ;;  %v20585_v0 = vld [vmem:[#allocation8 + $0x15c] ss:$24 sps:$4 sm:$0xff]  }
 0x3cc   : > { %5839 = vmatpush1.bf16.msra.mxu1 %v20532_v2  ;;  %5799 = vmatprep.subr.bf16.mxu0 %v20537_v3  ;;  %v20588_v2 = vld [vmem:[#allocation8 + $0x45c] ss:$24 sps:$4 sm:$0xff]   ;;  %v20583_v3 = vld [vmem:[#allocation8 + $0x158] ss:$24 sps:$4 sm:$0xff]  }
 0x3cd   : > { %5840 = vmatprep.subr.bf16.mxu1 %v20540_v5  ;;  %v20591_v5 = vld [vmem:[#allocation8 + $0x18c] ss:$24 sps:$4 sm:$0xff]  }
 0x3cf   : > { %5800 = vmatpush1.bf16.msra.mxu0 %v20535_v8  ;;  %v20592_v8 = vld [vmem:[#allocation8 + $0x488] ss:$24 sps:$4 sm:$0xff]  }
 0x3d0   : > { %5841 = vmatpush1.bf16.msra.mxu1 %v20538_v11  ;;  %5851 = vmatprep.subr.bf16.mxu0 %v20543_v10  ;;  %v20600_v11 = vld [vmem:[#allocation8 + $0x4bc] ss:$24 sps:$4 sm:$0xff]   ;;  %v20595_v10 = vld [vmem:[#allocation8 + $0x1b8] ss:$24 sps:$4 sm:$0xff]  }
 0x3d1   : > { %5892 = vmatprep.subr.bf16.mxu1 %v20546_v31  ;;  %v20603_v31 = vld [vmem:[#allocation8 + $0x1ec] ss:$24 sps:$4 sm:$0xff]  }
 0x3d2   : > { %5802 = vmatmul.mubr.bf16.vlgmr.msra.gmra.mrb[20].mxu0 %v22549_v15 }
 0x3d3   : > { %5843 = vmatmul.mubr.bf16.vlgmr.msra.gmra.mrb[20].mxu1 %v22551_v6  ;;  %5852 = vmatpush1.bf16.msra.mxu0 %v20541_v14  ;;  %v20606_v14 = vld [vmem:[#allocation8 + $0x4ec] ss:$24 sps:$4 sm:$0xff]  }
 0x3d4   : > { %5883 = vmatprep.mubr.bf16.mxu0 %v22524_v37  ;;  %5893 = vmatpush1.bf16.msra.mxu1 %v20544_v33  ;;  %v20601_v33 = vld [vmem:[#allocation8 + $0x1e8] ss:$24 sps:$4 sm:$0xff]  }
 0x3d5   : > { %5924 = vmatprep.mubr.bf16.mxu1 %v22527_v41  ;;  %5853 = vmatprep.subr.bf16.mxu0 %v20549_v29  ;;  %v20604_v29 = vld [vmem:[#allocation8 + $0x4e8] ss:$24 sps:$4 sm:$0xff]  }
 0x3d6   : > { %5894 = vmatprep.subr.bf16.mxu1 %v20552_v16  ;;  %v20609_v16 = vld [vmem:[#allocation8 + $0x21c] ss:$24 sps:$4 sm:$0xff]  }
 0x3d7   : > { %5854 = vmatpush1.bf16.msra.mxu0 %v20547_v17  ;;  %v20612_v17 = vld [vmem:[#allocation8 + $0x51c] ss:$24 sps:$4 sm:$0xff]  }
 0x3d8   : > { %5895 = vmatpush1.bf16.msra.mxu1 %v20550_v18  ;;  %5855 = vmatprep.subr.bf16.mxu0 %v20555_v19  ;;  %v20607_v18 = vld [vmem:[#allocation8 + $0x218] ss:$24 sps:$4 sm:$0xff]  }
 0x3d9   : > { %5896 = vmatprep.subr.bf16.mxu1 %v20558_v28  ;;  %v20610_v19 = vld [vmem:[#allocation8 + $0x518] ss:$24 sps:$4 sm:$0xff]   ;;  %v20615_v28 = vld [vmem:[#allocation8 + $0x24c] ss:$24 sps:$4 sm:$0xff]  }
 0x3db   : > { %5856 = vmatpush1.bf16.msra.mxu0 %v20553_v30  ;;  %v20618_v30 = vld [vmem:[#allocation8 + $0x54c] ss:$24 sps:$4 sm:$0xff]  }
 0x3dc   : > { %5897 = vmatpush1.bf16.msra.mxu1 %v20556_v40  ;;  %5857 = vmatprep.subr.bf16.mxu0 %v20561_v42  ;;  %v20613_v40 = vld [vmem:[#allocation8 + $0x248] ss:$24 sps:$4 sm:$0xff]  }
 0x3dd   : > { %5898 = vmatprep.subr.bf16.mxu1 %v20564_v43  ;;  %v20616_v42 = vld [vmem:[#allocation8 + $0x548] ss:$24 sps:$4 sm:$0xff]   ;;  %v20621_v43 = vld [vmem:[#allocation8 + $0x27c] ss:$24 sps:$4 sm:$0xff]  }
 0x3df   : > { %5858 = vmatpush1.bf16.msra.mxu0 %v20559_v44  ;;  %v20624_v44 = vld [vmem:[#allocation8 + $0x57c] ss:$24 sps:$4 sm:$0xff]  }
 0x3e0   : > { %5899 = vmatpush1.bf16.msra.mxu1 %v20562_v45  ;;  %5859 = vmatprep.subr.bf16.mxu0 %v20567_v46  ;;  %v20619_v45 = vld [vmem:[#allocation8 + $0x278] ss:$24 sps:$4 sm:$0xff]  }
 0x3e1   : > { %5900 = vmatprep.subr.bf16.mxu1 %v20570_v35  ;;  %v20622_v46 = vld [vmem:[#allocation8 + $0x578] ss:$24 sps:$4 sm:$0xff]   ;;  %v20627_v35 = vld [vmem:[#allocation8 + $0x2ac] ss:$24 sps:$4 sm:$0xff]  }
 0x3e3   : > { %5860 = vmatpush1.bf16.msra.mxu0 %v20565_v47  ;;  %v20630_v47 = vld [vmem:[#allocation8 + $0x5ac] ss:$24 sps:$4 sm:$0xff]  }
 0x3e4   : > { %5901 = vmatpush1.bf16.msra.mxu1 %v20568_v39  ;;  %5861 = vmatprep.subr.bf16.mxu0 %v20573_v48  ;;  %v20625_v39 = vld [vmem:[#allocation8 + $0x2a8] ss:$24 sps:$4 sm:$0xff]  }
 0x3e5   : > { %v4597_v53 = vpop.f32.mrb[8].mxu0  ;;  %5902 = vmatprep.subr.bf16.mxu1 %v20576_v49  ;;  %v20628_v48 = vld [vmem:[#allocation8 + $0x5a8] ss:$24 sps:$4 sm:$0xff]   ;;  %v20633_v49 = vld [vmem:[#allocation8 + $0x2dc] ss:$24 sps:$4 sm:$0xff]  }
 0x3e6   : > { %v4638_v54 = vpop.f32.mrb[8].mxu1  ;;  %v4599_v36 = vpop.f32.mrb[9].mxu0 }
 0x3e7   : > { %v22557_v55 = vadd.f32 %v4638_v54, %v4597_v53  ;;  %v4640_v56 = vpop.f32.mrb[9].mxu1  ;;  %5862 = vmatpush1.bf16.msra.mxu0 %v20571_v50  ;;  %v4601_v58 = vpop.f32.mrb[10].mxu0  ;;  %v20636_v50 = vld [vmem:[#allocation8 + $0x5dc] ss:$24 sps:$4 sm:$0xff]   ;;  %v20637_v54 = vld [vmem:[#allocation8 + $0x10] ss:$24 sps:$4 sm:$0xff]  }
 0x3e8   : > { %v22559_v60 = vadd.f32 %v4640_v56, %v4599_v36  ;;  %5903 = vmatpush1.bf16.msra.mxu1 %v20574_v51  ;;  %v4642_v61 = vpop.f32.mrb[10].mxu1  ;;  %v4602_v62 = vpop.f32.mrb[11].mxu0  ;;  %5863 = vmatprep.subr.bf16.mxu0 %v20579_v52  ;;  %v20631_v51 = vld [vmem:[#allocation8 + $0x2d8] ss:$24 sps:$4 sm:$0xff]   ;;  %v20639_v53 = vld [vmem:[#allocation8 + $0x14] ss:$24 sps:$4 sm:$0xff]  }
 0x3e9   : > { %v4643_v1 = vpop.f32.mrb[11].mxu1  ;;  %5904 = vmatprep.subr.bf16.mxu1 %v20582_v32  ;;  %v20634_v52 = vld [vmem:[#allocation8 + $0x5d8] ss:$24 sps:$4 sm:$0xff]   ;;  %v20642_v32 = vld [vmem:[#allocation8 + $0x314] ss:$24 sps:$4 sm:$0xff]  }
 0x3ea   : > { %v20640_v36 = vld [vmem:[#allocation8 + $0x310] ss:$24 sps:$4 sm:$0xff]   ;;  %v20645_v56 = vld [vmem:[#allocation8 + $0x44] ss:$24 sps:$4 sm:$0xff]   ;;  %v20646_v61 = vld [vmem:[#allocation8 + $0x340] ss:$24 sps:$4 sm:$0xff]  }
 0x3eb   : > { %5864 = vmatpush1.bf16.msra.mxu0 %v20577_v59  ;;  %v20648_v58 = vld [vmem:[#allocation8 + $0x344] ss:$24 sps:$4 sm:$0xff]   ;;  %v20643_v59 = vld [vmem:[#allocation8 + $0x40] ss:$24 sps:$4 sm:$0xff]   ;;  %v20651_v62 = vld [vmem:[#allocation8 + $0x74] ss:$24 sps:$4 sm:$0xff]  }
 0x3ec   : > { %5905 = vmatpush1.bf16.msra.mxu1 %v20580_v63  ;;  %5865 = vmatprep.subr.bf16.mxu0 %v20585_v0  ;;  %v20654_v63 = vld [vmem:[#allocation8 + $0x374] ss:$24 sps:$4 sm:$0xff]   ;;  %v20649_v0 = vld [vmem:[#allocation8 + $0x70] ss:$24 sps:$4 sm:$0xff]  }
 0x3ed   : > { %5906 = vmatprep.subr.bf16.mxu1 %v20588_v2  ;;  %v20652_v1 = vld [vmem:[#allocation8 + $0x370] ss:$24 sps:$4 sm:$0xff]   ;;  %v20657_v2 = vld [vmem:[#allocation8 + $0xa4] ss:$24 sps:$4 sm:$0xff]  }
 0x3ef   : > { %5866 = vmatpush1.bf16.msra.mxu0 %v20583_v3  ;;  %v20660_v3 = vld [vmem:[#allocation8 + $0x3a4] ss:$24 sps:$4 sm:$0xff]  }
 0x3f0   : > { %5907 = vmatpush1.bf16.msra.mxu1 %v20586_v4  ;;  %5867 = vmatprep.subr.bf16.mxu0 %v20591_v5  ;;  %v20655_v4 = vld [vmem:[#allocation8 + $0xa0] ss:$24 sps:$4 sm:$0xff]   ;;  %v20663_v5 = vld [vmem:[#allocation8 + $0xd4] ss:$24 sps:$4 sm:$0xff]  }
 0x3f1   : > { %5908 = vmatprep.subr.bf16.mxu1 %v20594_v21  ;;  %v20666_v21 = vld [vmem:[#allocation8 + $0x3d4] ss:$24 sps:$4 sm:$0xff]  }
 0x3f3   : > { %5868 = vmatpush1.bf16.msra.mxu0 %v20589_v7  ;;  %v20664_v7 = vld [vmem:[#allocation8 + $0x3d0] ss:$24 sps:$4 sm:$0xff]  }
 0x3f4   : > { %5909 = vmatpush1.bf16.msra.mxu1 %v20592_v8  ;;  %5869 = vmatprep.subr.bf16.mxu0 %v20597_v9  ;;  %v20669_v8 = vld [vmem:[#allocation8 + $0x104] ss:$24 sps:$4 sm:$0xff]  }
 0x3f5   : > { %5910 = vmatprep.subr.bf16.mxu1 %v20600_v11  ;;  %v20672_v9 = vld [vmem:[#allocation8 + $0x404] ss:$24 sps:$4 sm:$0xff]   ;;  %v20667_v11 = vld [vmem:[#allocation8 + $0x100] ss:$24 sps:$4 sm:$0xff]  }
 0x3f7   : > { %5870 = vmatpush1.bf16.msra.mxu0 %v20595_v10  ;;  %v20670_v10 = vld [vmem:[#allocation8 + $0x400] ss:$24 sps:$4 sm:$0xff]  }
 0x3f8   : > { %5911 = vmatpush1.bf16.msra.mxu1 %v20598_v13  ;;  %5871 = vmatprep.subr.bf16.mxu0 %v20603_v31  ;;  %v20675_v13 = vld [vmem:[#allocation8 + $0x134] ss:$24 sps:$4 sm:$0xff]  }
 0x3f9   : > { %5912 = vmatprep.subr.bf16.mxu1 %v20606_v14  ;;  %v20678_v14 = vld [vmem:[#allocation8 + $0x434] ss:$24 sps:$4 sm:$0xff]  }
 0x3fb   : > { %5872 = vmatpush1.bf16.msra.mxu0 %v20601_v33 }
 0x3fc   : > { %5913 = vmatpush1.bf16.msra.mxu1 %v20604_v29  ;;  %5873 = vmatprep.subr.bf16.mxu0 %v20609_v16 }
 0x3fd   : > { %5914 = vmatprep.subr.bf16.mxu1 %v20612_v17 }
 0x3ff   : > { %5874 = vmatpush1.bf16.msra.mxu0 %v20607_v18 }
 0x400   : > { %5915 = vmatpush1.bf16.msra.mxu1 %v20610_v19  ;;  %5875 = vmatprep.subr.bf16.mxu0 %v20615_v28  ;;  %v20673_v19 = vld [vmem:[#allocation8 + $0x130] ss:$24 sps:$4 sm:$0xff]  }
 0x401   : > { %5916 = vmatprep.subr.bf16.mxu1 %v20618_v30 }
 0x403   : > { %5876 = vmatpush1.bf16.msra.mxu0 %v20613_v40 }
 0x404   : > { %5917 = vmatpush1.bf16.msra.mxu1 %v20616_v42  ;;  %5877 = vmatprep.subr.bf16.mxu0 %v20621_v43  ;;  %v20676_v42 = vld [vmem:[#allocation8 + $0x430] ss:$24 sps:$4 sm:$0xff]   ;;  %v20681_v43 = vld [vmem:[#allocation8 + $0x164] ss:$24 sps:$4 sm:$0xff]  }
 0x405   : > { %5918 = vmatprep.subr.bf16.mxu1 %v20624_v44 }
 0x407   : > { %5878 = vmatpush1.bf16.msra.mxu0 %v20619_v45  ;;  %v20684_v45 = vld [vmem:[#allocation8 + $0x464] ss:$24 sps:$4 sm:$0xff]  }
 0x408   : > { %5919 = vmatpush1.bf16.msra.mxu1 %v20622_v46  ;;  %5879 = vmatprep.subr.bf16.mxu0 %v20627_v35  ;;  %v20679_v46 = vld [vmem:[#allocation8 + $0x160] ss:$24 sps:$4 sm:$0xff]  }
 0x409   : > { %5920 = vmatprep.subr.bf16.mxu1 %v20630_v47  ;;  %v20682_v35 = vld [vmem:[#allocation8 + $0x460] ss:$24 sps:$4 sm:$0xff]   ;;  %v20687_v47 = vld [vmem:[#allocation8 + $0x194] ss:$24 sps:$4 sm:$0xff]  }
 0x40b   : > { %5880 = vmatpush1.bf16.msra.mxu0 %v20625_v39  ;;  %v20690_v39 = vld [vmem:[#allocation8 + $0x494] ss:$24 sps:$4 sm:$0xff]  }
 0x40c   : > { %5921 = vmatpush1.bf16.msra.mxu1 %v20628_v48  ;;  %5881 = vmatprep.subr.bf16.mxu0 %v20633_v49  ;;  %v20685_v48 = vld [vmem:[#allocation8 + $0x190] ss:$24 sps:$4 sm:$0xff]  }
 0x40d   : > { %5922 = vmatprep.subr.bf16.mxu1 %v20636_v50  ;;  %v20688_v49 = vld [vmem:[#allocation8 + $0x490] ss:$24 sps:$4 sm:$0xff]   ;;  %v20693_v50 = vld [vmem:[#allocation8 + $0x1c4] ss:$24 sps:$4 sm:$0xff]  }
 0x40f   : > { %5882 = vmatpush1.bf16.msra.mxu0 %v20631_v51  ;;  %v20696_v51 = vld [vmem:[#allocation8 + $0x4c4] ss:$24 sps:$4 sm:$0xff]  }
 0x410   : > { %5923 = vmatpush1.bf16.msra.mxu1 %v20634_v52  ;;  %5933 = vmatprep.subr.bf16.mxu0 %v20639_v53  ;;  %v20691_v52 = vld [vmem:[#allocation8 + $0x1c0] ss:$24 sps:$4 sm:$0xff]  }
 0x411   : > { %5974 = vmatprep.subr.bf16.mxu1 %v20642_v32  ;;  %v20694_v53 = vld [vmem:[#allocation8 + $0x4c0] ss:$24 sps:$4 sm:$0xff]   ;;  %v20699_v32 = vld [vmem:[#allocation8 + $0x1f4] ss:$24 sps:$4 sm:$0xff]  }
 0x412   : > { %5884 = vmatmul.mubr.bf16.vlgmr.msra.gmra.mrb[24].mxu0 %v22549_v15 }
 0x413   : > { %5925 = vmatmul.mubr.bf16.vlgmr.msra.gmra.mrb[24].mxu1 %v22551_v6  ;;  %5934 = vmatpush1.bf16.msra.mxu0 %v20637_v54  ;;  %v20702_v54 = vld [vmem:[#allocation8 + $0x4f4] ss:$24 sps:$4 sm:$0xff]  }
 0x414   : > { %5965 = vmatprep.mubr.bf16.mxu0 %v22524_v37  ;;  %5975 = vmatpush1.bf16.msra.mxu1 %v20640_v36  ;;  %v20658_v37 = vld [vmem:[#allocation8 + $0x3a0] ss:$24 sps:$4 sm:$0xff]   ;;  %v20697_v36 = vld [vmem:[#allocation8 + $0x1f0] ss:$24 sps:$4 sm:$0xff]  }
 0x415   : > { %6006 = vmatprep.mubr.bf16.mxu1 %v22527_v41  ;;  %5935 = vmatprep.subr.bf16.mxu0 %v20645_v56  ;;  %v20661_v41 = vld [vmem:[#allocation8 + $0xd0] ss:$24 sps:$4 sm:$0xff]  }
 0x416   : > { %5976 = vmatprep.subr.bf16.mxu1 %v20648_v58  ;;  %v20700_v56 = vld [vmem:[#allocation8 + $0x4f0] ss:$24 sps:$4 sm:$0xff]   ;;  %v20705_v58 = vld [vmem:[#allocation8 + $0x224] ss:$24 sps:$4 sm:$0xff]  }
 0x417   : > { %5936 = vmatpush1.bf16.msra.mxu0 %v20643_v59  ;;  %v20708_v59 = vld [vmem:[#allocation8 + $0x524] ss:$24 sps:$4 sm:$0xff]  }
 0x418   : > { %5977 = vmatpush1.bf16.msra.mxu1 %v20646_v61  ;;  %5937 = vmatprep.subr.bf16.mxu0 %v20651_v62  ;;  %v20703_v61 = vld [vmem:[#allocation8 + $0x220] ss:$24 sps:$4 sm:$0xff]  }
 0x419   : > { %5978 = vmatprep.subr.bf16.mxu1 %v20654_v63  ;;  %v20706_v62 = vld [vmem:[#allocation8 + $0x520] ss:$24 sps:$4 sm:$0xff]   ;;  %v20711_v63 = vld [vmem:[#allocation8 + $0x254] ss:$24 sps:$4 sm:$0xff]  }
 0x41b   : > { %5938 = vmatpush1.bf16.msra.mxu0 %v20649_v0  ;;  %v20714_v0 = vld [vmem:[#allocation8 + $0x554] ss:$24 sps:$4 sm:$0xff]  }
 0x41c   : > { %5979 = vmatpush1.bf16.msra.mxu1 %v20652_v1  ;;  %5939 = vmatprep.subr.bf16.mxu0 %v20657_v2  ;;  %v20709_v1 = vld [vmem:[#allocation8 + $0x250] ss:$24 sps:$4 sm:$0xff]  }
 0x41d   : > { %5980 = vmatprep.subr.bf16.mxu1 %v20660_v3  ;;  %v20712_v2 = vld [vmem:[#allocation8 + $0x550] ss:$24 sps:$4 sm:$0xff]   ;;  %v20717_v3 = vld [vmem:[#allocation8 + $0x284] ss:$24 sps:$4 sm:$0xff]  }
 0x41f   : > { %5940 = vmatpush1.bf16.msra.mxu0 %v20655_v4  ;;  %v20720_v4 = vld [vmem:[#allocation8 + $0x584] ss:$24 sps:$4 sm:$0xff]  }
 0x420   : > { %5981 = vmatpush1.bf16.msra.mxu1 %v20658_v37  ;;  %5941 = vmatprep.subr.bf16.mxu0 %v20663_v5  ;;  %v20715_v37 = vld [vmem:[#allocation8 + $0x280] ss:$24 sps:$4 sm:$0xff]  }
 0x421   : > { %5982 = vmatprep.subr.bf16.mxu1 %v20666_v21  ;;  %v20718_v5 = vld [vmem:[#allocation8 + $0x580] ss:$24 sps:$4 sm:$0xff]   ;;  %v20723_v21 = vld [vmem:[#allocation8 + $0x2b4] ss:$24 sps:$4 sm:$0xff]  }
 0x423   : > { %5942 = vmatpush1.bf16.msra.mxu0 %v20661_v41  ;;  %v20726_v41 = vld [vmem:[#allocation8 + $0x5b4] ss:$24 sps:$4 sm:$0xff]  }
 0x424   : > { %5983 = vmatpush1.bf16.msra.mxu1 %v20664_v7  ;;  %5943 = vmatprep.subr.bf16.mxu0 %v20669_v8  ;;  %v20721_v7 = vld [vmem:[#allocation8 + $0x2b0] ss:$24 sps:$4 sm:$0xff]  }
 0x425   : > { %v4679_v31 = vpop.f32.mrb[12].mxu0  ;;  %5984 = vmatprep.subr.bf16.mxu1 %v20672_v9  ;;  %v20724_v8 = vld [vmem:[#allocation8 + $0x5b0] ss:$24 sps:$4 sm:$0xff]   ;;  %v20729_v9 = vld [vmem:[#allocation8 + $0x2e4] ss:$24 sps:$4 sm:$0xff]  }
 0x426   : > { %v4720_v33 = vpop.f32.mrb[12].mxu1  ;;  %v4681_v29 = vpop.f32.mrb[13].mxu0 }
 0x427   : > { %v22565_v16 = vadd.f32 %v4720_v33, %v4679_v31  ;;  %v4722_v17 = vpop.f32.mrb[13].mxu1  ;;  %v4683_v18 = vpop.f32.mrb[14].mxu0  ;;  %5944 = vmatpush1.bf16.msra.mxu0 %v20667_v11  ;;  %v20732_v11 = vld [vmem:[#allocation8 + $0x5e4] ss:$24 sps:$4 sm:$0xff]   ;;  %v6016_v31 = vld [vmem:[#allocation5 + $0x28] sm:$0xff] }
 0x428   : > { %v22567_v28 = vadd.f32 %v4722_v17, %v4681_v29  ;;  %v4724_v30 = vpop.f32.mrb[14].mxu1  ;;  %5985 = vmatpush1.bf16.msra.mxu1 %v20670_v10  ;;  %v4684_v40 = vpop.f32.mrb[15].mxu0  ;;  %5945 = vmatprep.subr.bf16.mxu0 %v20675_v13  ;;  %v6015_v10 = vld [vmem:[#allocation5 + $0x20] sm:$0xff]  ;;  %v20727_v33 = vld [vmem:[#allocation8 + $0x2e0] ss:$24 sps:$4 sm:$0xff]  }
 0x429   : > { %v4725_v44 = vpop.f32.mrb[15].mxu1  ;;  %5986 = vmatprep.subr.bf16.mxu1 %v20678_v14  ;;  %v6017_v13 = vld [vmem:[#allocation5 + $0x80] sm:$0xff]  ;;  %v6018_v14 = vld [vmem:[#allocation5 + $0x88] sm:$0xff]  ;;  %v20730_v29 = vld [vmem:[#allocation8 + $0x5e0] ss:$24 sps:$4 sm:$0xff]  }
 0x42a   : > { %v18404_v17 = vcombine.high %v6015_v10, %v6017_v13  ;;  %v18406_v18 = vcombine.high %v6016_v31, %v6018_v14  ;;  %v6021_v30 = vld [vmem:[#allocation5 + $0x140] sm:$0xff]  ;;  %v6020_v40 = vld [vmem:[#allocation5 + $0xe8] sm:$0xff]  ;;  %v18405_v44 = vcombine.low %v6016_v31, %v6018_v14 }
 0x42b   : > { %5946 = vmatpush1.bf16.msra.mxu0 %v20673_v19  ;;  %v6019_v19 = vld [vmem:[#allocation5 + $0xe0] sm:$0xff]  ;;  %v6042_v31 = vld [vmem:[#allocation5 + $0x508] sm:$0xff] }
 0x42c   : > { %5987 = vmatpush1.bf16.msra.mxu1 %v20676_v42  ;;  %5947 = vmatprep.subr.bf16.mxu0 %v20681_v43  ;;  %v6022_v42 = vld [vmem:[#allocation5 + $0x148] sm:$0xff]  ;;  %v18403_v43 = vcombine.low %v6015_v10, %v6017_v13  ;;  %v6041_v10 = vld [vmem:[#allocation5 + $0x500] sm:$0xff] }
 0x42d   : > { %5988 = vmatprep.subr.bf16.mxu1 %v20684_v45  ;;  %v18408_v45 = vcombine.high %v6019_v19, %v6021_v30  ;;  %v6040_v13 = vld [vmem:[#allocation5 + $0x4a8] sm:$0xff] }
 0x42f   : > { %5948 = vmatpush1.bf16.msra.mxu0 %v20679_v46  ;;  %v18410_v46 = vcombine.high %v6020_v40, %v6022_v42 }
 0x430   : > { %5989 = vmatpush1.bf16.msra.mxu1 %v20682_v35  ;;  %5949 = vmatprep.subr.bf16.mxu0 %v20687_v47  ;;  %v6023_v35 = vld [vmem:[#allocation5 + $0x1a0] sm:$0xff] }
 0x431   : > { %5990 = vmatprep.subr.bf16.mxu1 %v20690_v39  ;;  %v6025_v47 = vld [vmem:[#allocation5 + $0x200] sm:$0xff]  ;;  %v6024_v39 = vld [vmem:[#allocation5 + $0x1a8] sm:$0xff] }
 0x433   : > { %5950 = vmatpush1.bf16.msra.mxu0 %v20685_v48  ;;  %v6026_v48 = vld [vmem:[#allocation5 + $0x208] sm:$0xff] }
 0x434   : > { %5991 = vmatpush1.bf16.msra.mxu1 %v20688_v49  ;;  %5951 = vmatprep.subr.bf16.mxu0 %v20693_v50  ;;  %v18407_v49 = vcombine.low %v6019_v19, %v6021_v30  ;;  %v18409_v50 = vcombine.low %v6020_v40, %v6022_v42  ;;  %v6043_v19 = vld [vmem:[#allocation5 + $0x560] sm:$0xff] }
 0x435   : > { %5992 = vmatprep.subr.bf16.mxu1 %v20696_v51  ;;  %v18412_v51 = vcombine.high %v6023_v35, %v6025_v47  ;;  %v6045_v30 = vld [vmem:[#allocation5 + $0x5c0] sm:$0xff] }
 0x437   : > { %5952 = vmatpush1.bf16.msra.mxu0 %v20691_v52  ;;  %v18414_v52 = vcombine.high %v6024_v39, %v6026_v48 }
 0x438   : > { %5993 = vmatpush1.bf16.msra.mxu1 %v20694_v53  ;;  %5953 = vmatprep.subr.bf16.mxu0 %v20699_v32  ;;  %v6027_v53 = vld [vmem:[#allocation5 + $0x260] sm:$0xff] }
 0x439   : > { %5994 = vmatprep.subr.bf16.mxu1 %v20702_v54  ;;  %v6029_v32 = vld [vmem:[#allocation5 + $0x2c0] sm:$0xff]  ;;  %v6028_v54 = vld [vmem:[#allocation5 + $0x268] sm:$0xff] }
 0x43b   : > { %5954 = vmatpush1.bf16.msra.mxu0 %v20697_v36  ;;  %v6030_v36 = vld [vmem:[#allocation5 + $0x2c8] sm:$0xff] }
 0x43c   : > { %5995 = vmatpush1.bf16.msra.mxu1 %v20700_v56  ;;  %5955 = vmatprep.subr.bf16.mxu0 %v20705_v58  ;;  %v18416_v56 = vcombine.high %v6027_v53, %v6029_v32  ;;  %v18418_v58 = vcombine.high %v6028_v54, %v6030_v36 }
 0x43d   : > { %5996 = vmatprep.subr.bf16.mxu1 %v20708_v59  ;;  %v6031_v59 = vld [vmem:[#allocation5 + $0x320] sm:$0xff] }
 0x43f   : > { %5956 = vmatpush1.bf16.msra.mxu0 %v20703_v61  ;;  %v6033_v61 = vld [vmem:[#allocation5 + $0x380] sm:$0xff] }
 0x440   : > { %5997 = vmatpush1.bf16.msra.mxu1 %v20706_v62  ;;  %5957 = vmatprep.subr.bf16.mxu0 %v20711_v63  ;;  %v6032_v62 = vld [vmem:[#allocation5 + $0x328] sm:$0xff] }
 0x441   : > { %5998 = vmatprep.subr.bf16.mxu1 %v20714_v0  ;;  %v6034_v63 = vld [vmem:[#allocation5 + $0x388] sm:$0xff]  ;;  %v18415_v0 = vcombine.low %v6027_v53, %v6029_v32  ;;  %v6047_v32 = vld [vmem:[#allocation5 + $0x620] sm:$0xff] }
 0x443   : > { %5958 = vmatpush1.bf16.msra.mxu0 %v20709_v1  ;;  %v18417_v1 = vcombine.low %v6028_v54, %v6030_v36  ;;  %v6049_v54 = vld [vmem:[#allocation5 + $0x680] sm:$0xff]  ;;  %v6048_v36 = vld [vmem:[#allocation5 + $0x628] sm:$0xff] }
 0x444   : > { %5999 = vmatpush1.bf16.msra.mxu1 %v20712_v2  ;;  %5959 = vmatprep.subr.bf16.mxu0 %v20717_v3  ;;  %v18420_v2 = vcombine.high %v6031_v59, %v6033_v61  ;;  %v18422_v3 = vcombine.high %v6032_v62, %v6034_v63 }
 0x445   : > { %6000 = vmatprep.subr.bf16.mxu1 %v20720_v4  ;;  %v6035_v4 = vld [vmem:[#allocation5 + $0x3e0] sm:$0xff] }
 0x447   : > { %5960 = vmatpush1.bf16.msra.mxu0 %v20715_v37  ;;  %v6037_v37 = vld [vmem:[#allocation5 + $0x440] sm:$0xff] }
 0x448   : > { %6001 = vmatpush1.bf16.msra.mxu1 %v20718_v5  ;;  %5961 = vmatprep.subr.bf16.mxu0 %v20723_v21  ;;  %v6036_v5 = vld [vmem:[#allocation5 + $0x3e8] sm:$0xff]  ;;  %v18423_v14 = vcombine.low %v6035_v4, %v6037_v37 }
 0x449   : > { %6002 = vmatprep.subr.bf16.mxu1 %v20726_v41  ;;  %v6038_v21 = vld [vmem:[#allocation5 + $0x448] sm:$0xff]  ;;  %v18419_v41 = vcombine.low %v6031_v59, %v6033_v61  ;;  %v6051_v61 = vld [vmem:[#allocation5 + $0x6e0] sm:$0xff] }
 0x44b   : > { %5962 = vmatpush1.bf16.msra.mxu0 %v20721_v7  ;;  %v18421_v7 = vcombine.low %v6032_v62, %v6034_v63  ;;  %v6053_v62 = vld [vmem:[#allocation5 + $0x740] sm:$0xff]  ;;  %v6052_v63 = vld [vmem:[#allocation5 + $0x6e8] sm:$0xff] }
 0x44c   : > { %6003 = vmatpush1.bf16.msra.mxu1 %v20724_v8  ;;  %5963 = vmatprep.subr.bf16.mxu0 %v20729_v9  ;;  %v18424_v8 = vcombine.high %v6035_v4, %v6037_v37  ;;  %v18426_v9 = vcombine.high %v6036_v5, %v6038_v21  ;;  %v6055_v37 = vld [vmem:[#allocation5 + $0x7a0] sm:$0xff] }
 0x44d   : > { %6004 = vmatprep.subr.bf16.mxu1 %v20732_v11  ;;  %v6039_v11 = vld [vmem:[#allocation5 + $0x4a0] sm:$0xff] }
 0x44f   : > { %5964 = vmatpush1.bf16.msra.mxu0 %v20727_v33  ;;  %v18425_v33 = vcombine.low %v6036_v5, %v6038_v21  ;;  %v6057_v5 = vld [vmem:[#allocation5 + $0x800] sm:$0xff]  ;;  %v6056_v21 = vld [vmem:[#allocation5 + $0x7a8] sm:$0xff] }
 0x450   : > { %6005 = vmatpush1.bf16.msra.mxu1 %v20730_v29  ;;  %7189 = vmatprep.subr.bf16.mxu0 %v18404_v17  ;;  %v18428_v29 = vcombine.high %v6039_v11, %v6041_v10 }
 0x451   : > { %7312 = vmatprep.subr.bf16.mxu1 %v18406_v18  ;;  %v18430_v18 = vcombine.high %v6040_v13, %v6042_v31 }
 0x452   : > { %5966 = vmatmul.mubr.bf16.vlgmr.msra.gmra.mrb[28].mxu0 %v22549_v15  ;;  %v18411_v15 = vcombine.low %v6023_v35, %v6025_v47  ;;  %v18427_v47 = vcombine.low %v6039_v11, %v6041_v10  ;;  %v6059_v10 = vld [vmem:[#allocation5 + $0x860] sm:$0xff] }
 0x453   : > { %6007 = vmatmul.mubr.bf16.vlgmr.msra.gmra.mrb[28].mxu1 %v22551_v6  ;;  %7190 = vmatpush1.bf16.msra.mxu0 %v18403_v43  ;;  %v18413_v6 = vcombine.low %v6024_v39, %v6026_v48  ;;  %v6044_v43 = vld [vmem:[#allocation5 + $0x568] sm:$0xff] }
 0x454   : > { %7313 = vmatpush1.bf16.msra.mxu1 %v18405_v44  ;;  %7191 = vmatprep.subr.bf16.mxu0 %v18408_v45  ;;  %v6046_v44 = vld [vmem:[#allocation5 + $0x5c8] sm:$0xff] }
 0x455   : > { %7314 = vmatprep.subr.bf16.mxu1 %v18410_v46  ;;  %7221 = vmatprep.mubr.bf16.mxu0 %v22418_v57  ;;  %v18434_v53 = vcombine.high %v6044_v43, %v6046_v44 }
 0x456   : > { %7344 = vmatprep.mubr.bf16.mxu1 %v22418_v57 }
 0x457   : > { %7192 = vmatpush1.bf16.msra.mxu0 %v18407_v49 }
 0x458   : > { %7315 = vmatpush1.bf16.msra.mxu1 %v18409_v50  ;;  %7193 = vmatprep.subr.bf16.mxu0 %v18412_v51  ;;  %v18429_v50 = vcombine.low %v6040_v13, %v6042_v31  ;;  %v18432_v51 = vcombine.high %v6043_v19, %v6045_v30  ;;  %v6061_v13 = vld [vmem:[#allocation5 + $0x8c0] sm:$0xff]  ;;  %v6060_v31 = vld [vmem:[#allocation5 + $0x868] sm:$0xff] }
 0x459   : > { %7316 = vmatprep.subr.bf16.mxu1 %v18414_v52 }
 0x45b   : > { %7194 = vmatpush1.bf16.msra.mxu0 %v18411_v15  ;;  %v6050_v15 = vld [vmem:[#allocation5 + $0x688] sm:$0xff] }
 0x45c   : > { %7317 = vmatpush1.bf16.msra.mxu1 %v18413_v6  ;;  %7195 = vmatprep.subr.bf16.mxu0 %v18416_v56  ;;  %v18431_v6 = vcombine.low %v6043_v19, %v6045_v30  ;;  %v18433_v56 = vcombine.low %v6044_v43, %v6046_v44  ;;  %v18438_v59 = vcombine.high %v6048_v36, %v6050_v15  ;;  %v6063_v19 = vld [vmem:[#allocation5 + $0x920] sm:$0xff] }
 0x45d   : > { %7318 = vmatprep.subr.bf16.mxu1 %v18418_v58  ;;  %v18436_v58 = vcombine.high %v6047_v32, %v6049_v54  ;;  %v6065_v30 = vld [vmem:[#allocation5 + $0x980] sm:$0xff]  ;;  %v18447_v43 = vcombine.low %v6059_v10, %v6061_v13 }
 0x45f   : > { %7196 = vmatpush1.bf16.msra.mxu0 %v18415_v0  ;;  %v6054_v0 = vld [vmem:[#allocation5 + $0x748] sm:$0xff] }
 0x460   : > { %7319 = vmatpush1.bf16.msra.mxu1 %v18417_v1  ;;  %7197 = vmatprep.subr.bf16.mxu0 %v18420_v2  ;;  %v18435_v1 = vcombine.low %v6047_v32, %v6049_v54  ;;  %v18437_v2 = vcombine.low %v6048_v36, %v6050_v15  ;;  %v18442_v4 = vcombine.high %v6052_v63, %v6054_v0  ;;  %v6071_v54 = vld [vmem:[#allocation5 + $0xaa0] sm:$0xff]  ;;  %v6072_v15 = vld [vmem:[#allocation5 + $0xaa8] sm:$0xff] }
 0x461   : > { %7320 = vmatprep.subr.bf16.mxu1 %v18422_v3  ;;  %v18440_v3 = vcombine.high %v6051_v61, %v6053_v62  ;;  %v6073_v36 = vld [vmem:[#allocation5 + $0xb00] sm:$0xff] }
 0x463   : > { %7198 = vmatpush1.bf16.msra.mxu0 %v18419_v41  ;;  %v6058_v41 = vld [vmem:[#allocation5 + $0x808] sm:$0xff] }
 0x464   : > { %7321 = vmatpush1.bf16.msra.mxu1 %v18421_v7  ;;  %7199 = vmatprep.subr.bf16.mxu0 %v18424_v8  ;;  %v18439_v7 = vcombine.low %v6051_v61, %v6053_v62  ;;  %v18441_v8 = vcombine.low %v6052_v63, %v6054_v0  ;;  %v18446_v11 = vcombine.high %v6056_v21, %v6058_v41  ;;  %v6075_v62 = vld [vmem:[#allocation5 + $0xb60] sm:$0xff]  ;;  %v6076_v0 = vld [vmem:[#allocation5 + $0xb68] sm:$0xff] }
 0x465   : > { %v4761_v17 = vpop.f32.mrb[16].mxu0  ;;  %7322 = vmatprep.subr.bf16.mxu1 %v18426_v9  ;;  %v18444_v9 = vcombine.high %v6055_v37, %v6057_v5  ;;  %v6077_v63 = vld [vmem:[#allocation5 + $0xbc0] sm:$0xff] }
 0x466   : > { %v4802_v40 = vpop.f32.mrb[16].mxu1  ;;  %v4763_v42 = vpop.f32.mrb[17].mxu0 }
 0x467   : > { %v22573_v45 = vadd.f32 %v4802_v40, %v4761_v17  ;;  %v4804_v46 = vpop.f32.mrb[17].mxu1  ;;  %v4765_v35 = vpop.f32.mrb[18].mxu0  ;;  %7200 = vmatpush1.bf16.msra.mxu0 %v18423_v14  ;;  %v6062_v14 = vld [vmem:[#allocation5 + $0x8c8] sm:$0xff]  ;;  %v18448_v17 = vcombine.high %v6059_v10, %v6061_v13  ;;  %v6083_v13 = vld [vmem:[#allocation5 + $0xce0] sm:$0xff] }
 0x468   : > { %v22575_v39 = vadd.f32 %v4804_v46, %v4763_v42  ;;  %v4806_v48 = vpop.f32.mrb[18].mxu1  ;;  %7323 = vmatpush1.bf16.msra.mxu1 %v18425_v33  ;;  %v4766_v49 = vpop.f32.mrb[19].mxu0  ;;  %7201 = vmatprep.subr.bf16.mxu0 %v18428_v29  ;;  %v18443_v33 = vcombine.low %v6055_v37, %v6057_v5  ;;  %v18445_v29 = vcombine.low %v6056_v21, %v6058_v41  ;;  %v6064_v40 = vld [vmem:[#allocation5 + $0x928] sm:$0xff]  ;;  %v6079_v5 = vld [vmem:[#allocation5 + $0xc20] sm:$0xff] }
 0x469   : > { %v4807_v52 = vpop.f32.mrb[19].mxu1  ;;  %7324 = vmatprep.subr.bf16.mxu1 %v18430_v18  ;;  %v18450_v18 = vcombine.high %v6060_v31, %v6062_v14  ;;  %v6066_v42 = vld [vmem:[#allocation5 + $0x988] sm:$0xff]  ;;  %v18449_v44 = vcombine.low %v6060_v31, %v6062_v14  ;;  %v18452_v46 = vcombine.high %v6063_v19, %v6065_v30  ;;  %v6069_v48 = vld [vmem:[#allocation5 + $0xa40] sm:$0xff] }
 0x46a   : > { %v18454_v35 = vcombine.high %v6064_v40, %v6066_v42  ;;  %v6068_v49 = vld [vmem:[#allocation5 + $0x9e8] sm:$0xff]  ;;  %v18453_v52 = vcombine.low %v6064_v40, %v6066_v42  ;;  %v6081_v21 = vld [vmem:[#allocation5 + $0xc80] sm:$0xff] }
 0x46b   : > { %7202 = vmatpush1.bf16.msra.mxu0 %v18427_v47  ;;  %v6067_v47 = vld [vmem:[#allocation5 + $0x9e0] sm:$0xff]  ;;  %v6080_v41 = vld [vmem:[#allocation5 + $0xc28] sm:$0xff] }
 0x46c   : > { %7325 = vmatpush1.bf16.msra.mxu1 %v18429_v50  ;;  %7203 = vmatprep.subr.bf16.mxu0 %v18432_v51  ;;  %v6070_v50 = vld [vmem:[#allocation5 + $0xa48] sm:$0xff]  ;;  %v18451_v51 = vcombine.low %v6063_v19, %v6065_v30  ;;  %v6085_v31 = vld [vmem:[#allocation5 + $0xd40] sm:$0xff] }
 0x46d   : > { %7326 = vmatprep.subr.bf16.mxu1 %v18434_v53  ;;  %v18456_v53 = vcombine.high %v6067_v47, %v6069_v48  ;;  %v18458_v32 = vcombine.high %v6068_v49, %v6070_v50  ;;  %v6084_v14 = vld [vmem:[#allocation5 + $0xce8] sm:$0xff]  ;;  %v6087_v30 = vld [vmem:[#allocation5 + $0xda0] sm:$0xff] }
 0x46e   : > { %v6089_v40 = vld [vmem:[#allocation5 + $0xe00] sm:$0xff]  ;;  %v6088_v42 = vld [vmem:[#allocation5 + $0xda8] sm:$0xff] }
 0x46f   : > { %7204 = vmatpush1.bf16.msra.mxu0 %v18431_v6  ;;  %v6074_v6 = vld [vmem:[#allocation5 + $0xb08] sm:$0xff] }
 0x470   : > { %7327 = vmatpush1.bf16.msra.mxu1 %v18433_v56  ;;  %7205 = vmatprep.subr.bf16.mxu0 %v18436_v58  ;;  %v18455_v56 = vcombine.low %v6067_v47, %v6069_v48  ;;  %v18457_v58 = vcombine.low %v6068_v49, %v6070_v50  ;;  %v18462_v61 = vcombine.high %v6072_v15, %v6074_v6  ;;  %v6091_v48 = vld [vmem:[#allocation5 + $0xe60] sm:$0xff]  ;;  %v6092_v50 = vld [vmem:[#allocation5 + $0xe68] sm:$0xff] }
 0x471   : > { %7328 = vmatprep.subr.bf16.mxu1 %v18438_v59  ;;  %v18460_v59 = vcombine.high %v6071_v54, %v6073_v36  ;;  %v6093_v49 = vld [vmem:[#allocation5 + $0xec0] sm:$0xff] }
 0x473   : > { %7206 = vmatpush1.bf16.msra.mxu0 %v18435_v1  ;;  %v6078_v1 = vld [vmem:[#allocation5 + $0xbc8] sm:$0xff] }
 0x474   : > { %7329 = vmatpush1.bf16.msra.mxu1 %v18437_v2  ;;  %7207 = vmatprep.subr.bf16.mxu0 %v18440_v3  ;;  %v18459_v2 = vcombine.low %v6071_v54, %v6073_v36  ;;  %v18461_v3 = vcombine.low %v6072_v15, %v6074_v6  ;;  %v18466_v37 = vcombine.high %v6076_v0, %v6078_v1  ;;  %v6095_v36 = vld [vmem:[#allocation5 + $0xf20] sm:$0xff]  ;;  %v6096_v6 = vld [vmem:[#allocation5 + $0xf28] sm:$0xff] }
 0x475   : > { %7330 = vmatprep.subr.bf16.mxu1 %v18442_v4  ;;  %v18464_v4 = vcombine.high %v6075_v62, %v6077_v63  ;;  %v6097_v15 = vld [vmem:[#allocation5 + $0xf80] sm:$0xff] }
 0x477   : > { %7208 = vmatpush1.bf16.msra.mxu0 %v18439_v7  ;;  %v6082_v7 = vld [vmem:[#allocation5 + $0xc88] sm:$0xff] }
 0x478   : > { %7331 = vmatpush1.bf16.msra.mxu1 %v18441_v8  ;;  %7209 = vmatprep.subr.bf16.mxu0 %v18444_v9  ;;  %v18463_v8 = vcombine.low %v6075_v62, %v6077_v63  ;;  %v18465_v9 = vcombine.low %v6076_v0, %v6078_v1  ;;  %v18470_v10 = vcombine.high %v6080_v41, %v6082_v7  ;;  %v6099_v63 = vld [vmem:[#allocation5 + $0xfe0] sm:$0xff]  ;;  %v6100_v1 = vld [vmem:[#allocation5 + $0xfe8] sm:$0xff] }
 0x479   : > { %7332 = vmatprep.subr.bf16.mxu1 %v18446_v11  ;;  %v18468_v11 = vcombine.high %v6079_v5, %v6081_v21  ;;  %v6101_v0 = vld [vmem:[#allocation5 + $0x1040] sm:$0xff] }
 0x47b   : > { %7210 = vmatpush1.bf16.msra.mxu0 %v18443_v33  ;;  %v6086_v33 = vld [vmem:[#allocation5 + $0xd48] sm:$0xff] }
 0x47c   : > { %7333 = vmatpush1.bf16.msra.mxu1 %v18445_v29  ;;  %7211 = vmatprep.subr.bf16.mxu0 %v18448_v17  ;;  %v18467_v29 = vcombine.low %v6079_v5, %v6081_v21  ;;  %v18469_v17 = vcombine.low %v6080_v41, %v6082_v7  ;;  %v18474_v19 = vcombine.high %v6084_v14, %v6086_v33  ;;  %v6103_v21 = vld [vmem:[#allocation5 + $0x10a0] sm:$0xff]  ;;  %v6104_v7 = vld [vmem:[#allocation5 + $0x10a8] sm:$0xff] }
 0x47d   : > { %7334 = vmatprep.subr.bf16.mxu1 %v18450_v18  ;;  %v18472_v18 = vcombine.high %v6083_v13, %v6085_v31  ;;  %v6105_v41 = vld [vmem:[#allocation5 + $0x1100] sm:$0xff] }
 0x47f   : > { %7212 = vmatpush1.bf16.msra.mxu0 %v18447_v43  ;;  %v6090_v43 = vld [vmem:[#allocation5 + $0xe08] sm:$0xff] }
 0x480   : > { %7335 = vmatpush1.bf16.msra.mxu1 %v18449_v44  ;;  %7213 = vmatprep.subr.bf16.mxu0 %v18452_v46  ;;  %v18471_v44 = vcombine.low %v6083_v13, %v6085_v31  ;;  %v18473_v46 = vcombine.low %v6084_v14, %v6086_v33  ;;  %v18478_v47 = vcombine.high %v6088_v42, %v6090_v43  ;;  %v6107_v14 = vld [vmem:[#allocation5 + $0x1160] sm:$0xff] }
 0x481   : > { %7336 = vmatprep.subr.bf16.mxu1 %v18454_v35  ;;  %v18476_v35 = vcombine.high %v6087_v30, %v6089_v40  ;;  %v6109_v33 = vld [vmem:[#allocation5 + $0x11c0] sm:$0xff] }
 0x483   : > { %7214 = vmatpush1.bf16.msra.mxu0 %v18451_v51  ;;  %v6094_v51 = vld [vmem:[#allocation5 + $0xec8] sm:$0xff] }
 0x484   : > { %7337 = vmatpush1.bf16.msra.mxu1 %v18453_v52  ;;  %7215 = vmatprep.subr.bf16.mxu0 %v18456_v53  ;;  %v18475_v52 = vcombine.low %v6087_v30, %v6089_v40  ;;  %v18477_v53 = vcombine.low %v6088_v42, %v6090_v43  ;;  %v18482_v54 = vcombine.high %v6092_v50, %v6094_v51  ;;  %v6110_v30 = vld [vmem:[#allocation5 + $0x11c8] sm:$0xff] }
 0x485   : > { %7338 = vmatprep.subr.bf16.mxu1 %v18458_v32  ;;  %v18480_v32 = vcombine.high %v6091_v48, %v6093_v49 }
 0x487   : > { %7216 = vmatpush1.bf16.msra.mxu0 %v18455_v56  ;;  %v6098_v56 = vld [vmem:[#allocation5 + $0xf88] sm:$0xff] }
 0x488   : > { %7339 = vmatpush1.bf16.msra.mxu1 %v18457_v58  ;;  %7217 = vmatprep.subr.bf16.mxu0 %v18460_v59  ;;  %v18479_v58 = vcombine.low %v6091_v48, %v6093_v49  ;;  %v18481_v59 = vcombine.low %v6092_v50, %v6094_v51  ;;  %v18486_v62 = vcombine.high %v6096_v6, %v6098_v56 }
 0x489   : > { %7340 = vmatprep.subr.bf16.mxu1 %v18462_v61  ;;  %v18484_v61 = vcombine.high %v6095_v36, %v6097_v15  ;;  %v18496_v49 = vcombine.high %v6107_v14, %v6109_v33 }
 0x48b   : > { %7218 = vmatpush1.bf16.msra.mxu0 %v18459_v2  ;;  %v6102_v2 = vld [vmem:[#allocation5 + $0x1048] sm:$0xff] }
 0x48c   : > { %7341 = vmatpush1.bf16.msra.mxu1 %v18461_v3  ;;  %7219 = vmatprep.subr.bf16.mxu0 %v18464_v4  ;;  %v18483_v3 = vcombine.low %v6095_v36, %v6097_v15  ;;  %v18485_v4 = vcombine.low %v6096_v6, %v6098_v56  ;;  %v18490_v5 = vcombine.high %v6100_v1, %v6102_v2  ;;  %v6115_v56 = vld [vmem:[#allocation5 + $0x12e0] sm:$0xff] }
 0x48d   : > { %7342 = vmatprep.subr.bf16.mxu1 %v18466_v37  ;;  %v18488_v37 = vcombine.high %v6099_v63, %v6101_v0 }
 0x48f   : > { %7220 = vmatpush1.bf16.msra.mxu0 %v18463_v8  ;;  %v6106_v8 = vld [vmem:[#allocation5 + $0x1108] sm:$0xff] }
 0x490   : > { %7343 = vmatpush1.bf16.msra.mxu1 %v18465_v9  ;;  %7230 = vmatprep.subr.bf16.mxu0 %v18468_v11  ;;  %v18487_v9 = vcombine.low %v6099_v63, %v6101_v0  ;;  %v18489_v11 = vcombine.low %v6100_v1, %v6102_v2  ;;  %v18494_v31 = vcombine.high %v6104_v7, %v6106_v8  ;;  %v6119_v2 = vld [vmem:[#allocation5 + $0x13a0] sm:$0xff] }
 0x491   : > { %7353 = vmatprep.subr.bf16.mxu1 %v18470_v10  ;;  %v18492_v10 = vcombine.high %v6103_v21, %v6105_v41  ;;  %v18493_v48 = vcombine.low %v6104_v7, %v6106_v8  ;;  %v6123_v8 = vld [vmem:[#allocation5 + $0x1460] sm:$0xff] }
 0x492   : > { %7222 = vmatmul.mubr.bf16.vlgmr.msra.gmra.mrb[32].mxu0 %v22423_v12 }
 0x493   : > { %7231 = vmatpush1.bf16.msra.mxu0 %v18467_v29  ;;  %7345 = vmatmul.mubr.bf16.vlgmr.msra.gmra.mrb[32].mxu1 %v22423_v12 }
 0x494   : > { %7354 = vmatpush1.bf16.msra.mxu1 %v18469_v17  ;;  %7232 = vmatprep.subr.bf16.mxu0 %v18472_v18 }
 0x495   : > { %7355 = vmatprep.subr.bf16.mxu1 %v18474_v19  ;;  %7262 = vmatprep.mubr.bf16.mxu0 %v22426_v23  ;;  %v6108_v19 = vld [vmem:[#allocation5 + $0x1168] sm:$0xff] }
 0x496   : > { %7385 = vmatprep.mubr.bf16.mxu1 %v22426_v23  ;;  %v18498_v51 = vcombine.high %v6108_v19, %v6110_v30  ;;  %v18497_v36 = vcombine.low %v6108_v19, %v6110_v30  ;;  %v6130_v19 = vld [vmem:[#allocation5 + $0x1588] sm:$0xff] }
 0x497   : > { %7233 = vmatpush1.bf16.msra.mxu0 %v18471_v44  ;;  %v18491_v44 = vcombine.low %v6103_v21, %v6105_v41 }
 0x498   : > { %7356 = vmatpush1.bf16.msra.mxu1 %v18473_v46  ;;  %7234 = vmatprep.subr.bf16.mxu0 %v18476_v35 }
 0x499   : > { %7357 = vmatprep.subr.bf16.mxu1 %v18478_v47 }
 0x49b   : > { %7235 = vmatpush1.bf16.msra.mxu0 %v18475_v52  ;;  %v6111_v52 = vld [vmem:[#allocation5 + $0x1220] sm:$0xff] }
 0x49c   : > { %7358 = vmatpush1.bf16.msra.mxu1 %v18477_v53  ;;  %7236 = vmatprep.subr.bf16.mxu0 %v18480_v32  ;;  %v6113_v53 = vld [vmem:[#allocation5 + $0x1280] sm:$0xff]  ;;  %v6114_v32 = vld [vmem:[#allocation5 + $0x1288] sm:$0xff] }
 0x49d   : > { %7359 = vmatprep.subr.bf16.mxu1 %v18482_v54  ;;  %v18495_v54 = vcombine.low %v6107_v14, %v6109_v33  ;;  %v18500_v15 = vcombine.high %v6111_v52, %v6113_v53 }
 0x49f   : > { %7237 = vmatpush1.bf16.msra.mxu0 %v18479_v58  ;;  %v6117_v58 = vld [vmem:[#allocation5 + $0x1340] sm:$0xff] }
 0x4a0   : > { %7360 = vmatpush1.bf16.msra.mxu1 %v18481_v59  ;;  %7238 = vmatprep.subr.bf16.mxu0 %v18484_v61  ;;  %v6116_v59 = vld [vmem:[#allocation5 + $0x12e8] sm:$0xff]  ;;  %v18504_v0 = vcombine.high %v6115_v56, %v6117_v58 }
 0x4a1   : > { %7361 = vmatprep.subr.bf16.mxu1 %v18486_v62  ;;  %v6118_v61 = vld [vmem:[#allocation5 + $0x1348] sm:$0xff]  ;;  %v18499_v62 = vcombine.low %v6111_v52, %v6113_v53  ;;  %v6135_v53 = vld [vmem:[#allocation5 + $0x16a0] sm:$0xff] }
 0x4a2   : > { %v18506_v1 = vcombine.high %v6116_v59, %v6118_v61  ;;  %v18505_v21 = vcombine.low %v6116_v59, %v6118_v61  ;;  %v6141_v59 = vld [vmem:[#allocation5 + $0x17c0] sm:$0xff]  ;;  %v6140_v61 = vld [vmem:[#allocation5 + $0x1768] sm:$0xff] }
 0x4a3   : > { %7239 = vmatpush1.bf16.msra.mxu0 %v18483_v3  ;;  %v6121_v3 = vld [vmem:[#allocation5 + $0x1400] sm:$0xff] }
 0x4a4   : > { %7362 = vmatpush1.bf16.msra.mxu1 %v18485_v4  ;;  %7240 = vmatprep.subr.bf16.mxu0 %v18488_v37  ;;  %v6120_v4 = vld [vmem:[#allocation5 + $0x13a8] sm:$0xff]  ;;  %v18508_v41 = vcombine.high %v6119_v2, %v6121_v3 }
 0x4a5   : > { %v5803_v13 = vpop.f32.mrb[20].mxu0  ;;  %7363 = vmatprep.subr.bf16.mxu1 %v18490_v5  ;;  %v6122_v37 = vld [vmem:[#allocation5 + $0x1408] sm:$0xff]  ;;  %v18503_v5 = vcombine.low %v6115_v56, %v6117_v58  ;;  %v6139_v58 = vld [vmem:[#allocation5 + $0x1760] sm:$0xff] }
 0x4a6   : > { %v5804_v29 = vadd.f32 %v5803_v13, %v22557_v55  ;;  %v5844_v17 = vpop.f32.mrb[20].mxu1  ;;  %v5805_v18 = vpop.f32.mrb[21].mxu0  ;;  %v18510_v7 = vcombine.high %v6120_v4, %v6122_v37  ;;  %v18507_v13 = vcombine.low %v6119_v2, %v6121_v3  ;;  %v6143_v3 = vld [vmem:[#allocation5 + $0x1820] sm:$0xff] }
 0x4a7   : > { %v5806_v40 = vadd.f32 %v5805_v18, %v22559_v60  ;;  %v5846_v42 = vpop.f32.mrb[21].mxu1  ;;  %v5807_v43 = vpop.f32.mrb[22].mxu0  ;;  %7241 = vmatpush1.bf16.msra.mxu0 %v18487_v9  ;;  %v6112_v60 = vld [vmem:[#allocation5 + $0x1228] sm:$0xff]  ;;  %v6125_v9 = vld [vmem:[#allocation5 + $0x14c0] sm:$0xff] }
 0x4a8   : > { %v22583_v46 = vadd.f32 %v5844_v17, %v5804_v29  ;;  %v5848_v35 = vpop.f32.mrb[22].mxu1  ;;  %7364 = vmatpush1.bf16.msra.mxu1 %v18489_v11  ;;  %v5808_v47 = vpop.f32.mrb[23].mxu0  ;;  %7242 = vmatprep.subr.bf16.mxu0 %v18492_v10  ;;  %v18502_v6 = vcombine.high %v6112_v60, %v6114_v32  ;;  %v18501_v63 = vcombine.low %v6112_v60, %v6114_v32  ;;  %v6124_v11 = vld [vmem:[#allocation5 + $0x1468] sm:$0xff]  ;;  %v6127_v29 = vld [vmem:[#allocation5 + $0x1520] sm:$0xff] }
 0x4a9   : > { %v22585_v50 = vadd.f32 %v5846_v42, %v5806_v40  ;;  %v5849_v55 = vpop.f32.mrb[23].mxu1  ;;  %7365 = vmatprep.subr.bf16.mxu1 %v18494_v31  ;;  %v6126_v10 = vld [vmem:[#allocation5 + $0x14c8] sm:$0xff]  ;;  %v18509_v31 = vcombine.low %v6120_v4, %v6122_v37  ;;  %v18512_v14 = vcombine.high %v6123_v8, %v6125_v9  ;;  %v6129_v17 = vld [vmem:[#allocation5 + $0x1580] sm:$0xff]  ;;  %v18511_v30 = vcombine.low %v6123_v8, %v6125_v9 }
 0x4aa   : > { %v18514_v33 = vcombine.high %v6124_v11, %v6126_v10  ;;  %v6128_v18 = vld [vmem:[#allocation5 + $0x1528] sm:$0xff]  ;;  %v18513_v40 = vcombine.low %v6124_v11, %v6126_v10  ;;  %v18516_v42 = vcombine.high %v6127_v29, %v6129_v17  ;;  %v6133_v35 = vld [vmem:[#allocation5 + $0x1640] sm:$0xff] }
 0x4ab   : > { %7243 = vmatpush1.bf16.msra.mxu0 %v18491_v44  ;;  %v18518_v43 = vcombine.high %v6128_v18, %v6130_v19  ;;  %v6131_v44 = vld [vmem:[#allocation5 + $0x15e0] sm:$0xff]  ;;  %v6132_v47 = vld [vmem:[#allocation5 + $0x15e8] sm:$0xff]  ;;  %v18517_v55 = vcombine.low %v6128_v18, %v6130_v19 }
 0x4ac   : > { %7366 = vmatpush1.bf16.msra.mxu1 %v18493_v48  ;;  %7244 = vmatprep.subr.bf16.mxu0 %v18496_v49  ;;  %v6134_v48 = vld [vmem:[#allocation5 + $0x1648] sm:$0xff]  ;;  %v18515_v49 = vcombine.low %v6127_v29, %v6129_v17  ;;  %v6137_v60 = vld [vmem:[#allocation5 + $0x1700] sm:$0xff] }
 0x4ad   : > { %7367 = vmatprep.subr.bf16.mxu1 %v18498_v51  ;;  %v18520_v51 = vcombine.high %v6131_v44, %v6133_v35  ;;  %v18522_v52 = vcombine.high %v6132_v47, %v6134_v48  ;;  %v6136_v32 = vld [vmem:[#allocation5 + $0x16a8] sm:$0xff]  ;;  %v6145_v4 = vld [vmem:[#allocation5 + $0x1880] sm:$0xff] }
 0x4ae   : > { %v6144_v37 = vld [vmem:[#allocation5 + $0x1828] sm:$0xff]  ;;  %v6147_v9 = vld [vmem:[#allocation5 + $0x18e0] sm:$0xff] }
 0x4af   : > { %7245 = vmatpush1.bf16.msra.mxu0 %v18495_v54  ;;  %v6138_v54 = vld [vmem:[#allocation5 + $0x1708] sm:$0xff]  ;;  %v6149_v11 = vld [vmem:[#allocation5 + $0x1940] sm:$0xff] }
 0x4b0   : > { %7368 = vmatpush1.bf16.msra.mxu1 %v18497_v36  ;;  %7246 = vmatprep.subr.bf16.mxu0 %v18500_v15  ;;  %v18519_v36 = vcombine.low %v6131_v44, %v6133_v35  ;;  %v18521_v15 = vcombine.low %v6132_v47, %v6134_v48  ;;  %v18526_v56 = vcombine.high %v6136_v32, %v6138_v54  ;;  %v6148_v10 = vld [vmem:[#allocation5 + $0x18e8] sm:$0xff]  ;;  %v6151_v17 = vld [vmem:[#allocation5 + $0x19a0] sm:$0xff] }
 0x4b1   : > { %7369 = vmatprep.subr.bf16.mxu1 %v18502_v6  ;;  %v18524_v6 = vcombine.high %v6135_v53, %v6137_v60  ;;  %v6153_v18 = vld [vmem:[#allocation5 + $0x1a00] sm:$0xff]  ;;  %v6152_v19 = vld [vmem:[#allocation5 + $0x19a8] sm:$0xff] }
 0x4b2   : > { %v6155_v35 = vld [vmem:[#allocation5 + $0x1a60] sm:$0xff]  ;;  %v6156_v48 = vld [vmem:[#allocation5 + $0x1a68] sm:$0xff] }
 0x4b3   : > { %7247 = vmatpush1.bf16.msra.mxu0 %v18499_v62  ;;  %v6142_v62 = vld [vmem:[#allocation5 + $0x17c8] sm:$0xff]  ;;  %v6157_v47 = vld [vmem:[#allocation5 + $0x1ac0] sm:$0xff] }
 0x4b4   : > { %7370 = vmatpush1.bf16.msra.mxu1 %v18501_v63  ;;  %7248 = vmatprep.subr.bf16.mxu0 %v18504_v0  ;;  %v18523_v63 = vcombine.low %v6135_v53, %v6137_v60  ;;  %v18525_v0 = vcombine.low %v6136_v32, %v6138_v54  ;;  %v18530_v2 = vcombine.high %v6140_v61, %v6142_v62  ;;  %v6159_v60 = vld [vmem:[#allocation5 + $0x1b20] sm:$0xff]  ;;  %v6160_v54 = vld [vmem:[#allocation5 + $0x1b28] sm:$0xff] }
 0x4b5   : > { %7371 = vmatprep.subr.bf16.mxu1 %v18506_v1  ;;  %v18528_v1 = vcombine.high %v6139_v58, %v6141_v59  ;;  %v6161_v32 = vld [vmem:[#allocation5 + $0x1b80] sm:$0xff] }
 0x4b7   : > { %7249 = vmatpush1.bf16.msra.mxu0 %v18503_v5  ;;  %v6146_v5 = vld [vmem:[#allocation5 + $0x1888] sm:$0xff] }
 0x4b8   : > { %7372 = vmatpush1.bf16.msra.mxu1 %v18505_v21  ;;  %7250 = vmatprep.subr.bf16.mxu0 %v18508_v41  ;;  %v18527_v21 = vcombine.low %v6139_v58, %v6141_v59  ;;  %v18529_v41 = vcombine.low %v6140_v61, %v6142_v62  ;;  %v18534_v8 = vcombine.high %v6144_v37, %v6146_v5  ;;  %v6163_v59 = vld [vmem:[#allocation5 + $0x1be0] sm:$0xff]  ;;  %v6164_v62 = vld [vmem:[#allocation5 + $0x1be8] sm:$0xff] }
 0x4b9   : > { %7373 = vmatprep.subr.bf16.mxu1 %v18510_v7  ;;  %v18532_v7 = vcombine.high %v6143_v3, %v6145_v4  ;;  %v6165_v61 = vld [vmem:[#allocation5 + $0x1c40] sm:$0xff] }
 0x4bb   : > { %7251 = vmatpush1.bf16.msra.mxu0 %v18507_v13  ;;  %v6150_v13 = vld [vmem:[#allocation5 + $0x1948] sm:$0xff] }
 0x4bc   : > { %7374 = vmatpush1.bf16.msra.mxu1 %v18509_v31  ;;  %7252 = vmatprep.subr.bf16.mxu0 %v18512_v14  ;;  %v18531_v31 = vcombine.low %v6143_v3, %v6145_v4  ;;  %v18533_v14 = vcombine.low %v6144_v37, %v6146_v5  ;;  %v18538_v29 = vcombine.high %v6148_v10, %v6150_v13  ;;  %v6167_v4 = vld [vmem:[#allocation5 + $0x1ca0] sm:$0xff]  ;;  %v6168_v5 = vld [vmem:[#allocation5 + $0x1ca8] sm:$0xff] }
 0x4bd   : > { %7375 = vmatprep.subr.bf16.mxu1 %v18514_v33  ;;  %v18536_v33 = vcombine.high %v6147_v9, %v6149_v11  ;;  %v6169_v37 = vld [vmem:[#allocation5 + $0x1d00] sm:$0xff] }
 0x4bf   : > { %7253 = vmatpush1.bf16.msra.mxu0 %v18511_v30  ;;  %v6154_v30 = vld [vmem:[#allocation5 + $0x1a08] sm:$0xff] }
 0x4c0   : > { %7376 = vmatpush1.bf16.msra.mxu1 %v18513_v40  ;;  %7254 = vmatprep.subr.bf16.mxu0 %v18516_v42  ;;  %v18535_v40 = vcombine.low %v6147_v9, %v6149_v11  ;;  %v18537_v42 = vcombine.low %v6148_v10, %v6150_v13  ;;  %v18542_v44 = vcombine.high %v6152_v19, %v6154_v30  ;;  %v6171_v10 = vld [vmem:[#allocation5 + $0x1d60] sm:$0xff] }
 0x4c1   : > { %7377 = vmatprep.subr.bf16.mxu1 %v18518_v43  ;;  %v18540_v43 = vcombine.high %v6151_v17, %v6153_v18  ;;  %v6173_v13 = vld [vmem:[#allocation5 + $0x1dc0] sm:$0xff] }
 0x4c3   : > { %7255 = vmatpush1.bf16.msra.mxu0 %v18515_v49  ;;  %v6158_v49 = vld [vmem:[#allocation5 + $0x1ac8] sm:$0xff] }
 0x4c4   : > { %7378 = vmatpush1.bf16.msra.mxu1 %v18517_v55  ;;  %7256 = vmatprep.subr.bf16.mxu0 %v18520_v51  ;;  %v18539_v55 = vcombine.low %v6151_v17, %v6153_v18  ;;  %v18541_v51 = vcombine.low %v6152_v19, %v6154_v30  ;;  %v18546_v53 = vcombine.high %v6156_v48, %v6158_v49  ;;  %v6174_v17 = vld [vmem:[#allocation5 + $0x1dc8] sm:$0xff] }
 0x4c5   : > { %7379 = vmatprep.subr.bf16.mxu1 %v18522_v52  ;;  %v18544_v52 = vcombine.high %v6155_v35, %v6157_v47 }
 0x4c7   : > { %7257 = vmatpush1.bf16.msra.mxu0 %v18519_v36  ;;  %v6162_v36 = vld [vmem:[#allocation5 + $0x1b88] sm:$0xff] }
 0x4c8   : > { %7380 = vmatpush1.bf16.msra.mxu1 %v18521_v15  ;;  %7258 = vmatprep.subr.bf16.mxu0 %v18524_v6  ;;  %v18543_v15 = vcombine.low %v6155_v35, %v6157_v47  ;;  %v18545_v6 = vcombine.low %v6156_v48, %v6158_v49  ;;  %v18550_v58 = vcombine.high %v6160_v54, %v6162_v36 }
 0x4c9   : > { %7381 = vmatprep.subr.bf16.mxu1 %v18526_v56  ;;  %v18548_v56 = vcombine.high %v6159_v60, %v6161_v32  ;;  %v18560_v47 = vcombine.high %v6171_v10, %v6173_v13 }
 0x4cb   : > { %7259 = vmatpush1.bf16.msra.mxu0 %v18523_v63  ;;  %v6166_v63 = vld [vmem:[#allocation5 + $0x1c48] sm:$0xff] }
 0x4cc   : > { %7382 = vmatpush1.bf16.msra.mxu1 %v18525_v0  ;;  %7260 = vmatprep.subr.bf16.mxu0 %v18528_v1  ;;  %v18547_v0 = vcombine.low %v6159_v60, %v6161_v32  ;;  %v18549_v1 = vcombine.low %v6160_v54, %v6162_v36  ;;  %v18554_v3 = vcombine.high %v6164_v62, %v6166_v63  ;;  %v6179_v36 = vld [vmem:[#allocation5 + $0x1ee0] sm:$0xff] }
 0x4cd   : > { %7383 = vmatprep.subr.bf16.mxu1 %v18530_v2  ;;  %v18552_v2 = vcombine.high %v6163_v59, %v6165_v61 }
 0x4cf   : > { %7261 = vmatpush1.bf16.msra.mxu0 %v18527_v21  ;;  %v6170_v21 = vld [vmem:[#allocation5 + $0x1d08] sm:$0xff] }
 0x4d0   : > { %7384 = vmatpush1.bf16.msra.mxu1 %v18529_v41  ;;  %7271 = vmatprep.subr.bf16.mxu0 %v18532_v7  ;;  %v18551_v41 = vcombine.low %v6163_v59, %v6165_v61  ;;  %v18553_v7 = vcombine.low %v6164_v62, %v6166_v63  ;;  %v18558_v11 = vcombine.high %v6168_v5, %v6170_v21  ;;  %v6183_v63 = vld [vmem:[#allocation5 + $0x1fa0] sm:$0xff] }
 0x4d1   : > { %7394 = vmatprep.subr.bf16.mxu1 %v18534_v8  ;;  %v18556_v8 = vcombine.high %v6167_v4, %v6169_v37  ;;  %v18557_v35 = vcombine.low %v6168_v5, %v6170_v21  ;;  %v6187_v21 = vld [vmem:[#allocation5 + $0x2060] sm:$0xff] }
 0x4d2   : > { %7263 = vmatmul.mubr.bf16.vlgmr.msra.gmra.mrb[32].mxu0 %v22434_v25 }
 0x4d3   : > { %7272 = vmatpush1.bf16.msra.mxu0 %v18531_v31  ;;  %7386 = vmatmul.mubr.bf16.vlgmr.msra.gmra.mrb[32].mxu1 %v22434_v25 }
 0x4d4   : > { %7395 = vmatpush1.bf16.msra.mxu1 %v18533_v14  ;;  %7273 = vmatprep.subr.bf16.mxu0 %v18536_v33 }
 0x4d5   : > { %7396 = vmatprep.subr.bf16.mxu1 %v18538_v29  ;;  %7303 = vmatprep.mubr.bf16.mxu0 %v22436_v34  ;;  %v6172_v29 = vld [vmem:[#allocation5 + $0x1d68] sm:$0xff] }
 0x4d6   : > { %7426 = vmatprep.mubr.bf16.mxu1 %v22436_v34  ;;  %v18562_v49 = vcombine.high %v6172_v29, %v6174_v17  ;;  %v18561_v60 = vcombine.low %v6172_v29, %v6174_v17  ;;  %v6194_v29 = vld [vmem:[#allocation5 + $0x2188] sm:$0xff] }
 0x4d7   : > { %7274 = vmatpush1.bf16.msra.mxu0 %v18535_v40  ;;  %v18555_v40 = vcombine.low %v6167_v4, %v6169_v37 }
 0x4d8   : > { %7397 = vmatpush1.bf16.msra.mxu1 %v18537_v42  ;;  %7275 = vmatprep.subr.bf16.mxu0 %v18540_v43 }
 0x4d9   : > { %7398 = vmatprep.subr.bf16.mxu1 %v18542_v44 }
 0x4db   : > { %7276 = vmatpush1.bf16.msra.mxu0 %v18539_v55  ;;  %v6175_v55 = vld [vmem:[#allocation5 + $0x1e20] sm:$0xff] }
 0x4dc   : > { %7399 = vmatpush1.bf16.msra.mxu1 %v18541_v51  ;;  %7277 = vmatprep.subr.bf16.mxu0 %v18544_v52  ;;  %v6177_v51 = vld [vmem:[#allocation5 + $0x1e80] sm:$0xff]  ;;  %v6178_v52 = vld [vmem:[#allocation5 + $0x1e88] sm:$0xff] }
 0x4dd   : > { %7400 = vmatprep.subr.bf16.mxu1 %v18546_v53  ;;  %v18559_v53 = vcombine.low %v6171_v10, %v6173_v13  ;;  %v18564_v32 = vcombine.high %v6175_v55, %v6177_v51 }
 0x4df   : > { %7278 = vmatpush1.bf16.msra.mxu0 %v18543_v15  ;;  %v6181_v15 = vld [vmem:[#allocation5 + $0x1f40] sm:$0xff] }
 0x4e0   : > { %7401 = vmatpush1.bf16.msra.mxu1 %v18545_v6  ;;  %7279 = vmatprep.subr.bf16.mxu0 %v18548_v56  ;;  %v6180_v6 = vld [vmem:[#allocation5 + $0x1ee8] sm:$0xff]  ;;  %v18568_v61 = vcombine.high %v6179_v36, %v6181_v15 }
 0x4e1   : > { %7402 = vmatprep.subr.bf16.mxu1 %v18550_v58  ;;  %v6182_v56 = vld [vmem:[#allocation5 + $0x1f48] sm:$0xff]  ;;  %v18563_v58 = vcombine.low %v6175_v55, %v6177_v51  ;;  %v6199_v51 = vld [vmem:[#allocation5 + $0x22a0] sm:$0xff] }
 0x4e2   : > { %v18570_v62 = vcombine.high %v6180_v6, %v6182_v56  ;;  %v18569_v4 = vcombine.low %v6180_v6, %v6182_v56  ;;  %v6205_v6 = vld [vmem:[#allocation5 + $0x23c0] sm:$0xff]  ;;  %v6204_v56 = vld [vmem:[#allocation5 + $0x2368] sm:$0xff] }
 0x4e3   : > { %7280 = vmatpush1.bf16.msra.mxu0 %v18547_v0  ;;  %v6185_v0 = vld [vmem:[#allocation5 + $0x2000] sm:$0xff] }
 0x4e4   : > { %7403 = vmatpush1.bf16.msra.mxu1 %v18549_v1  ;;  %7281 = vmatprep.subr.bf16.mxu0 %v18552_v2  ;;  %v6184_v1 = vld [vmem:[#allocation5 + $0x1fa8] sm:$0xff]  ;;  %v18572_v37 = vcombine.high %v6183_v63, %v6185_v0 }
 0x4e5   : > { %v5885_v9 = vpop.f32.mrb[24].mxu0  ;;  %7404 = vmatprep.subr.bf16.mxu1 %v18554_v3  ;;  %v6186_v2 = vld [vmem:[#allocation5 + $0x2008] sm:$0xff]  ;;  %v18567_v3 = vcombine.low %v6179_v36, %v6181_v15  ;;  %v6203_v15 = vld [vmem:[#allocation5 + $0x2360] sm:$0xff] }
 0x4e6   : > { %v5886_v31 = vadd.f32 %v5885_v9, %v22565_v16  ;;  %v5926_v14 = vpop.f32.mrb[24].mxu1  ;;  %v5887_v33 = vpop.f32.mrb[25].mxu0  ;;  %v18574_v5 = vcombine.high %v6184_v1, %v6186_v2  ;;  %v18571_v9 = vcombine.low %v6183_v63, %v6185_v0  ;;  %v18591_v0 = vcombine.low %v6203_v15, %v6205_v6 }
 0x4e7   : > { %v5888_v18 = vadd.f32 %v5887_v33, %v22567_v28  ;;  %v5928_v19 = vpop.f32.mrb[25].mxu1  ;;  %v5889_v30 = vpop.f32.mrb[26].mxu0  ;;  %7282 = vmatpush1.bf16.msra.mxu0 %v18551_v41  ;;  %v6176_v28 = vld [vmem:[#allocation5 + $0x1e28] sm:$0xff]  ;;  %v6189_v41 = vld [vmem:[#allocation5 + $0x20c0] sm:$0xff] }
 0x4e8   : > { %v22593_v42 = vadd.f32 %v5926_v14, %v5886_v31  ;;  %v5930_v43 = vpop.f32.mrb[26].mxu1  ;;  %7405 = vmatpush1.bf16.msra.mxu1 %v18553_v7  ;;  %v5890_v44 = vpop.f32.mrb[27].mxu0  ;;  %7283 = vmatprep.subr.bf16.mxu0 %v18556_v8  ;;  %v18566_v54 = vcombine.high %v6176_v28, %v6178_v52  ;;  %v18565_v59 = vcombine.low %v6176_v28, %v6178_v52  ;;  %v6188_v7 = vld [vmem:[#allocation5 + $0x2068] sm:$0xff]  ;;  %v6191_v31 = vld [vmem:[#allocation5 + $0x2120] sm:$0xff] }
 0x4e9   : > { %v22595_v48 = vadd.f32 %v5928_v19, %v5888_v18  ;;  %v5931_v16 = vpop.f32.mrb[27].mxu1  ;;  %7406 = vmatprep.subr.bf16.mxu1 %v18558_v11  ;;  %v6190_v8 = vld [vmem:[#allocation5 + $0x20c8] sm:$0xff]  ;;  %v18573_v11 = vcombine.low %v6184_v1, %v6186_v2  ;;  %v18576_v10 = vcombine.high %v6187_v21, %v6189_v41  ;;  %v6193_v14 = vld [vmem:[#allocation5 + $0x2180] sm:$0xff]  ;;  %v18575_v17 = vcombine.low %v6187_v21, %v6189_v41  ;;  %v20735_v2 = vld [vmem:[#allocation8 + $0xc04] ss:$24 sps:$4 sm:$0xff]  }
 0x4ea   : > { %v18578_v13 = vcombine.high %v6188_v7, %v6190_v8  ;;  %v6192_v33 = vld [vmem:[#allocation5 + $0x2128] sm:$0xff]  ;;  %v18577_v18 = vcombine.low %v6188_v7, %v6190_v8  ;;  %v18580_v19 = vcombine.high %v6191_v31, %v6193_v14  ;;  %v6197_v43 = vld [vmem:[#allocation5 + $0x2240] sm:$0xff]  ;;  %v20747_v8 = vld [vmem:[#allocation8 + $0xc64] ss:$24 sps:$4 sm:$0xff]  }
 0x4eb   : > { %7284 = vmatpush1.bf16.msra.mxu0 %v18555_v40  ;;  %v18582_v30 = vcombine.high %v6192_v33, %v6194_v29  ;;  %v6195_v40 = vld [vmem:[#allocation5 + $0x21e0] sm:$0xff]  ;;  %v6196_v44 = vld [vmem:[#allocation5 + $0x21e8] sm:$0xff]  ;;  %v18581_v16 = vcombine.low %v6192_v33, %v6194_v29  ;;  %v20759_v29 = vld [vmem:[#allocation8 + $0xcc4] ss:$24 sps:$4 sm:$0xff]  }
 0x4ec   : > { %7407 = vmatpush1.bf16.msra.mxu1 %v18557_v35  ;;  %7285 = vmatprep.subr.bf16.mxu0 %v18560_v47  ;;  %v6198_v35 = vld [vmem:[#allocation5 + $0x2248] sm:$0xff]  ;;  %v18579_v47 = vcombine.low %v6191_v31, %v6193_v14  ;;  %v6201_v28 = vld [vmem:[#allocation5 + $0x2300] sm:$0xff] }
 0x4ed   : > { %7408 = vmatprep.subr.bf16.mxu1 %v18562_v49  ;;  %v18584_v49 = vcombine.high %v6195_v40, %v6197_v43  ;;  %v18586_v55 = vcombine.high %v6196_v44, %v6198_v35  ;;  %v6200_v52 = vld [vmem:[#allocation5 + $0x22a8] sm:$0xff] }
 0x4ee   : > { %v20744_v21 = vld [vmem:[#allocation8 + $0xf34] ss:$24 sps:$4 sm:$0xff]   ;;  %v20739_v41 = vld [vmem:[#allocation8 + $0xc30] ss:$24 sps:$4 sm:$0xff]  }
 0x4ef   : > { %7286 = vmatpush1.bf16.msra.mxu0 %v18559_v53  ;;  %v6202_v53 = vld [vmem:[#allocation5 + $0x2308] sm:$0xff] }
 0x4f0   : > { %7409 = vmatpush1.bf16.msra.mxu1 %v18561_v60  ;;  %7287 = vmatprep.subr.bf16.mxu0 %v18564_v32  ;;  %v18583_v60 = vcombine.low %v6195_v40, %v6197_v43  ;;  %v18585_v32 = vcombine.low %v6196_v44, %v6198_v35  ;;  %v18590_v36 = vcombine.high %v6200_v52, %v6202_v53  ;;  %v20742_v7 = vld [vmem:[#allocation8 + $0xf30] ss:$24 sps:$4 sm:$0xff]   ;;  %v20756_v31 = vld [vmem:[#allocation8 + $0xf94] ss:$24 sps:$4 sm:$0xff]   ;;  %v20771_v35 = vld [vmem:[#allocation8 + $0xd24] ss:$24 sps:$4 sm:$0xff]  }
 0x4f1   : > { %7410 = vmatprep.subr.bf16.mxu1 %v18566_v54  ;;  %v18588_v54 = vcombine.high %v6199_v51, %v6201_v28  ;;  %v20751_v14 = vld [vmem:[#allocation8 + $0xc90] ss:$24 sps:$4 sm:$0xff]   ;;  %v20768_v40 = vld [vmem:[#allocation8 + $0xff4] ss:$24 sps:$4 sm:$0xff]  }
 0x4f2   : > { %v20754_v33 = vld [vmem:[#allocation8 + $0xf90] ss:$24 sps:$4 sm:$0xff]  }
 0x4f3   : > { %7288 = vmatpush1.bf16.msra.mxu0 %v18563_v58  ;;  %v6206_v58 = vld [vmem:[#allocation5 + $0x23c8] sm:$0xff] }
 0x4f4   : > { %7411 = vmatpush1.bf16.msra.mxu1 %v18565_v59  ;;  %7289 = vmatprep.subr.bf16.mxu0 %v18568_v61  ;;  %v18587_v59 = vcombine.low %v6199_v51, %v6201_v28  ;;  %v18589_v61 = vcombine.low %v6200_v52, %v6202_v53  ;;  %v18594_v63 = vcombine.high %v6204_v56, %v6206_v58  ;;  %v20763_v43 = vld [vmem:[#allocation8 + $0xcf0] ss:$24 sps:$4 sm:$0xff]  }
 0x4f5   : > { %7412 = vmatprep.subr.bf16.mxu1 %v18570_v62  ;;  %v18592_v62 = vcombine.high %v6203_v15, %v6205_v6  ;;  %v18593_v1 = vcombine.low %v6204_v56, %v6206_v58  ;;  %v20766_v44 = vld [vmem:[#allocation8 + $0xff0] ss:$24 sps:$4 sm:$0xff]   ;;  %v20772_v15 = vld [vmem:[#allocation8 + $0x1020] ss:$24 sps:$4 sm:$0xff]   ;;  %v20777_v6 = vld [vmem:[#allocation8 + $0xd54] ss:$24 sps:$4 sm:$0xff]  }
 0x4f7   : > { %7290 = vmatpush1.bf16.msra.mxu0 %v18567_v3  ;;  %v20738_v3 = vld [vmem:[#allocation8 + $0xf04] ss:$24 sps:$4 sm:$0xff]  }
 0x4f8   : > { %7413 = vmatpush1.bf16.msra.mxu1 %v18569_v4  ;;  %7291 = vmatprep.subr.bf16.mxu0 %v18572_v37  ;;  %v20733_v4 = vld [vmem:[#allocation8 + $0xc00] ss:$24 sps:$4 sm:$0xff]  }
 0x4f9   : > { %7414 = vmatprep.subr.bf16.mxu1 %v18574_v5  ;;  %v20736_v37 = vld [vmem:[#allocation8 + $0xf00] ss:$24 sps:$4 sm:$0xff]   ;;  %v20741_v5 = vld [vmem:[#allocation8 + $0xc34] ss:$24 sps:$4 sm:$0xff]  }
 0x4fb   : > { %7292 = vmatpush1.bf16.msra.mxu0 %v18571_v9  ;;  %v20750_v9 = vld [vmem:[#allocation8 + $0xf64] ss:$24 sps:$4 sm:$0xff]  }
 0x4fc   : > { %7415 = vmatpush1.bf16.msra.mxu1 %v18573_v11  ;;  %7293 = vmatprep.subr.bf16.mxu0 %v18576_v10  ;;  %v20745_v11 = vld [vmem:[#allocation8 + $0xc60] ss:$24 sps:$4 sm:$0xff]  }
 0x4fd   : > { %7416 = vmatprep.subr.bf16.mxu1 %v18578_v13  ;;  %v20748_v10 = vld [vmem:[#allocation8 + $0xf60] ss:$24 sps:$4 sm:$0xff]   ;;  %v20753_v13 = vld [vmem:[#allocation8 + $0xc94] ss:$24 sps:$4 sm:$0xff]  }
 0x4ff   : > { %7294 = vmatpush1.bf16.msra.mxu0 %v18575_v17  ;;  %v20762_v17 = vld [vmem:[#allocation8 + $0xfc4] ss:$24 sps:$4 sm:$0xff]  }
 0x500   : > { %7417 = vmatpush1.bf16.msra.mxu1 %v18577_v18  ;;  %7295 = vmatprep.subr.bf16.mxu0 %v18580_v19  ;;  %v20757_v18 = vld [vmem:[#allocation8 + $0xcc0] ss:$24 sps:$4 sm:$0xff]  }
 0x501   : > { %7418 = vmatprep.subr.bf16.mxu1 %v18582_v30  ;;  %v20760_v19 = vld [vmem:[#allocation8 + $0xfc0] ss:$24 sps:$4 sm:$0xff]   ;;  %v20765_v30 = vld [vmem:[#allocation8 + $0xcf4] ss:$24 sps:$4 sm:$0xff]  }
 0x503   : > { %7296 = vmatpush1.bf16.msra.mxu0 %v18579_v47 }
 0x504   : > { %7419 = vmatpush1.bf16.msra.mxu1 %v18581_v16  ;;  %7297 = vmatprep.subr.bf16.mxu0 %v18584_v49  ;;  %v20774_v16 = vld [vmem:[#allocation8 + $0x1024] ss:$24 sps:$4 sm:$0xff]  }
 0x505   : > { %7420 = vmatprep.subr.bf16.mxu1 %v18586_v55 }
 0x507   : > { %7298 = vmatpush1.bf16.msra.mxu0 %v18583_v60  ;;  %v20769_v60 = vld [vmem:[#allocation8 + $0xd20] ss:$24 sps:$4 sm:$0xff]  }
 0x508   : > { %7421 = vmatpush1.bf16.msra.mxu1 %v18585_v32  ;;  %7299 = vmatprep.subr.bf16.mxu0 %v18588_v54 }
 0x509   : > { %7422 = vmatprep.subr.bf16.mxu1 %v18590_v36 }
 0x50b   : > { %7300 = vmatpush1.bf16.msra.mxu0 %v18587_v59  ;;  %v20775_v59 = vld [vmem:[#allocation8 + $0xd50] ss:$24 sps:$4 sm:$0xff]  }
 0x50c   : > { %7423 = vmatpush1.bf16.msra.mxu1 %v18589_v61  ;;  %7301 = vmatprep.subr.bf16.mxu0 %v18592_v62  ;;  %v20783_v61 = vld [vmem:[#allocation8 + $0xd84] ss:$24 sps:$4 sm:$0xff]  }
 0x50d   : > { %7424 = vmatprep.subr.bf16.mxu1 %v18594_v63  ;;  %v20786_v62 = vld [vmem:[#allocation8 + $0x1084] ss:$24 sps:$4 sm:$0xff]   ;;  %v20781_v63 = vld [vmem:[#allocation8 + $0xd80] ss:$24 sps:$4 sm:$0xff]  }
 0x50f   : > { %7302 = vmatpush1.bf16.msra.mxu0 %v18591_v0  ;;  %v20784_v0 = vld [vmem:[#allocation8 + $0x1080] ss:$24 sps:$4 sm:$0xff]  }
 0x510   : > { %7425 = vmatpush1.bf16.msra.mxu1 %v18593_v1  ;;  %8623 = vmatprep.subr.bf16.mxu0 %v20735_v2  ;;  %v20789_v1 = vld [vmem:[#allocation8 + $0xdb4] ss:$24 sps:$4 sm:$0xff]  }
 0x511   : > { %8664 = vmatprep.subr.bf16.mxu1 %v20738_v3  ;;  %v20792_v2 = vld [vmem:[#allocation8 + $0x10b4] ss:$24 sps:$4 sm:$0xff]   ;;  %v20787_v3 = vld [vmem:[#allocation8 + $0xdb0] ss:$24 sps:$4 sm:$0xff]  }
 0x512   : > { %7304 = vmatmul.mubr.bf16.vlgmr.msra.gmra.mrb[32].mxu0 %v22443_v38 }
 0x513   : > { %7427 = vmatmul.mubr.bf16.vlgmr.msra.gmra.mrb[32].mxu1 %v22443_v38  ;;  %8624 = vmatpush1.bf16.msra.mxu0 %v20733_v4  ;;  %v20790_v4 = vld [vmem:[#allocation8 + $0x10b0] ss:$24 sps:$4 sm:$0xff]  }
 0x514   : > { %8665 = vmatpush1.bf16.msra.mxu1 %v20736_v37  ;;  %8625 = vmatprep.subr.bf16.mxu0 %v20741_v5  ;;  %v20795_v37 = vld [vmem:[#allocation8 + $0xde4] ss:$24 sps:$4 sm:$0xff]  }
 0x515   : > { %8666 = vmatprep.subr.bf16.mxu1 %v20744_v21  ;;  %v20798_v5 = vld [vmem:[#allocation8 + $0x10e4] ss:$24 sps:$4 sm:$0xff]   ;;  %v20793_v21 = vld [vmem:[#allocation8 + $0xde0] ss:$24 sps:$4 sm:$0xff]  }
 0x517   : > { %8626 = vmatpush1.bf16.msra.mxu0 %v20739_v41  ;;  %v20796_v41 = vld [vmem:[#allocation8 + $0x10e0] ss:$24 sps:$4 sm:$0xff]  }
 0x518   : > { %8667 = vmatpush1.bf16.msra.mxu1 %v20742_v7  ;;  %8627 = vmatprep.subr.bf16.mxu0 %v20747_v8  ;;  %v20801_v7 = vld [vmem:[#allocation8 + $0xe14] ss:$24 sps:$4 sm:$0xff]  }
 0x519   : > { %8668 = vmatprep.subr.bf16.mxu1 %v20750_v9  ;;  %v20804_v8 = vld [vmem:[#allocation8 + $0x1114] ss:$24 sps:$4 sm:$0xff]   ;;  %v20799_v9 = vld [vmem:[#allocation8 + $0xe10] ss:$24 sps:$4 sm:$0xff]  }
 0x51b   : > { %8628 = vmatpush1.bf16.msra.mxu0 %v20745_v11  ;;  %v20802_v11 = vld [vmem:[#allocation8 + $0x1110] ss:$24 sps:$4 sm:$0xff]  }
 0x51c   : > { %8669 = vmatpush1.bf16.msra.mxu1 %v20748_v10  ;;  %8629 = vmatprep.subr.bf16.mxu0 %v20753_v13  ;;  %v20807_v10 = vld [vmem:[#allocation8 + $0xe44] ss:$24 sps:$4 sm:$0xff]  }
 0x51d   : > { %8670 = vmatprep.subr.bf16.mxu1 %v20756_v31  ;;  %v20810_v13 = vld [vmem:[#allocation8 + $0x1144] ss:$24 sps:$4 sm:$0xff]   ;;  %v20805_v31 = vld [vmem:[#allocation8 + $0xe40] ss:$24 sps:$4 sm:$0xff]  }
 0x51f   : > { %8630 = vmatpush1.bf16.msra.mxu0 %v20751_v14  ;;  %v20808_v14 = vld [vmem:[#allocation8 + $0x1140] ss:$24 sps:$4 sm:$0xff]  }
 0x520   : > { %8671 = vmatpush1.bf16.msra.mxu1 %v20754_v33  ;;  %8631 = vmatprep.subr.bf16.mxu0 %v20759_v29  ;;  %v20813_v33 = vld [vmem:[#allocation8 + $0xe74] ss:$24 sps:$4 sm:$0xff]  }
 0x521   : > { %8672 = vmatprep.subr.bf16.mxu1 %v20762_v17  ;;  %v20816_v29 = vld [vmem:[#allocation8 + $0x1174] ss:$24 sps:$4 sm:$0xff]   ;;  %v20811_v17 = vld [vmem:[#allocation8 + $0xe70] ss:$24 sps:$4 sm:$0xff]  }
 0x523   : > { %8632 = vmatpush1.bf16.msra.mxu0 %v20757_v18  ;;  %v20814_v18 = vld [vmem:[#allocation8 + $0x1170] ss:$24 sps:$4 sm:$0xff]  }
 0x524   : > { %8673 = vmatpush1.bf16.msra.mxu1 %v20760_v19  ;;  %8633 = vmatprep.subr.bf16.mxu0 %v20765_v30  ;;  %v20819_v19 = vld [vmem:[#allocation8 + $0xea4] ss:$24 sps:$4 sm:$0xff]  }
 0x525   : > { %v5967_v47 = vpop.f32.mrb[28].mxu0  ;;  %8674 = vmatprep.subr.bf16.mxu1 %v20768_v40  ;;  %v20822_v30 = vld [vmem:[#allocation8 + $0x11a4] ss:$24 sps:$4 sm:$0xff]   ;;  %v20817_v40 = vld [vmem:[#allocation8 + $0xea0] ss:$24 sps:$4 sm:$0xff]  }
 0x526   : > { %v5968_v49 = vadd.f32 %v5967_v47, %v22573_v45  ;;  %v6008_v55 = vpop.f32.mrb[28].mxu1  ;;  %v5969_v51 = vpop.f32.mrb[29].mxu0  ;;  %v20780_v45 = vld [vmem:[#allocation8 + $0x1054] ss:$24 sps:$4 sm:$0xff]   ;;  %v20826_v47 = vld [vmem:[#allocation8 + $0x11d0] ss:$24 sps:$4 sm:$0xff]  }
 0x527   : > { %v5970_v28 = vadd.f32 %v5969_v51, %v22575_v39  ;;  %v6010_v52 = vpop.f32.mrb[29].mxu1  ;;  %v5971_v53 = vpop.f32.mrb[30].mxu0  ;;  %8634 = vmatpush1.bf16.msra.mxu0 %v20763_v43  ;;  %v20778_v39 = vld [vmem:[#allocation8 + $0x1050] ss:$24 sps:$4 sm:$0xff]   ;;  %v20820_v43 = vld [vmem:[#allocation8 + $0x11a0] ss:$24 sps:$4 sm:$0xff]  }
 0x528   : > { %v22601_v32 = vadd.f32 %v6008_v55, %v5968_v49  ;;  %v6012_v54 = vpop.f32.mrb[30].mxu1  ;;  %v5972_v36 = vpop.f32.mrb[31].mxu0  ;;  %8675 = vmatpush1.bf16.msra.mxu1 %v20766_v44  ;;  %8635 = vmatprep.subr.bf16.mxu0 %v20771_v35  ;;  %v20823_v44 = vld [vmem:[#allocation8 + $0xed0] ss:$24 sps:$4 sm:$0xff]   ;;  %v20825_v35 = vld [vmem:[#allocation8 + $0xed4] ss:$24 sps:$4 sm:$0xff]  }
 0x529   : > { %v22603_v56 = vadd.f32 %v6010_v52, %v5970_v28  ;;  %v6013_v58 = vpop.f32.mrb[31].mxu1  ;;  %8676 = vmatprep.subr.bf16.mxu1 %v20774_v16  ;;  %v20828_v16 = vld [vmem:[#allocation8 + $0x11d4] ss:$24 sps:$4 sm:$0xff]   ;;  %v6207_v51 = vld [vmem:[#allocation7 + $0x8] sm:$0xf] }
 0x52a   : > { %v20831_v49 = vld [vmem:[#allocation8 + $0xc0c] ss:$24 sps:$4 sm:$0xff]   ;;  %v6212_v28 = vrot.slane %v6207_v51, %v22470_v22  ;;  %v6220_v52 = vrot.slane %v6207_v51, %v22473_v24  ;;  %v6216_v53 = vrot.slane %v6207_v51, %v22476_v26 }
 0x52b   : > { %8636 = vmatpush1.bf16.msra.mxu0 %v20769_v60  ;;  %v20834_v55 = vld [vmem:[#allocation8 + $0xf0c] ss:$24 sps:$4 sm:$0xff]   ;;  %v6224_v60 = vrot.slane %v6207_v51, %v22479_v27 }
 0x52c   : > { %8677 = vmatpush1.bf16.msra.mxu1 %v20772_v15  ;;  %8637 = vmatprep.subr.bf16.mxu0 %v20777_v6 }
 0x52d   : > { %8678 = vmatprep.subr.bf16.mxu1 %v20780_v45 }
 0x52f   : > { %8638 = vmatpush1.bf16.msra.mxu0 %v20775_v59 }
 0x530   : > { %8679 = vmatpush1.bf16.msra.mxu1 %v20778_v39  ;;  %8639 = vmatprep.subr.bf16.mxu0 %v20783_v61 }
 0x531   : > { %8680 = vmatprep.subr.bf16.mxu1 %v20786_v62 }
 0x533   : > { %8640 = vmatpush1.bf16.msra.mxu0 %v20781_v63 }
 0x534   : > { %8681 = vmatpush1.bf16.msra.mxu1 %v20784_v0  ;;  %8641 = vmatprep.subr.bf16.mxu0 %v20789_v1 }
 0x535   : > { %8682 = vmatprep.subr.bf16.mxu1 %v20792_v2 }
 0x537   : > { %8642 = vmatpush1.bf16.msra.mxu0 %v20787_v3 }
 0x538   : > { %8683 = vmatpush1.bf16.msra.mxu1 %v20790_v4  ;;  %8643 = vmatprep.subr.bf16.mxu0 %v20795_v37 }
 0x539   : > { %8684 = vmatprep.subr.bf16.mxu1 %v20798_v5 }
 0x53b   : > { %8644 = vmatpush1.bf16.msra.mxu0 %v20793_v21 }
 0x53c   : > { %8685 = vmatpush1.bf16.msra.mxu1 %v20796_v41  ;;  %8645 = vmatprep.subr.bf16.mxu0 %v20801_v7 }
 0x53d   : > { %8686 = vmatprep.subr.bf16.mxu1 %v20804_v8 }
 0x53f   : > { %8646 = vmatpush1.bf16.msra.mxu0 %v20799_v9 }
 0x540   : > { %8687 = vmatpush1.bf16.msra.mxu1 %v20802_v11  ;;  %8647 = vmatprep.subr.bf16.mxu0 %v20807_v10 }
 0x541   : > { %8688 = vmatprep.subr.bf16.mxu1 %v20810_v13 }
 0x543   : > { %8648 = vmatpush1.bf16.msra.mxu0 %v20805_v31 }
 0x544   : > { %8689 = vmatpush1.bf16.msra.mxu1 %v20808_v14  ;;  %8649 = vmatprep.subr.bf16.mxu0 %v20813_v33 }
 0x545   : > { %8690 = vmatprep.subr.bf16.mxu1 %v20816_v29 }
 0x547   : > { %8650 = vmatpush1.bf16.msra.mxu0 %v20811_v17 }
 0x548   : > { %8691 = vmatpush1.bf16.msra.mxu1 %v20814_v18  ;;  %8651 = vmatprep.subr.bf16.mxu0 %v20819_v19 }
 0x549   : > { %8692 = vmatprep.subr.bf16.mxu1 %v20822_v30 }
 0x54b   : > { %8652 = vmatpush1.bf16.msra.mxu0 %v20817_v40 }
 0x54c   : > { %8693 = vmatpush1.bf16.msra.mxu1 %v20820_v43  ;;  %8653 = vmatprep.subr.bf16.mxu0 %v20825_v35 }
 0x54d   : > { %8694 = vmatprep.subr.bf16.mxu1 %v20828_v16 }
 0x54f   : > { %8654 = vmatpush1.bf16.msra.mxu0 %v20823_v44 }
 0x550   : > { %8695 = vmatpush1.bf16.msra.mxu1 %v20826_v47  ;;  %8705 = vmatprep.subr.bf16.mxu0 %v20831_v49 }
 0x551   : > { %8746 = vmatprep.subr.bf16.mxu1 %v20834_v55 }
 0x5e5   : > { %v7305_v54 = vpop.f32.mrb[32].mxu0 }
 0x5e6   : > { %v19950_v36 = vadd.f32 %v7305_v54, %v6212_v28  ;;  %v7428_v15 = vpop.f32.mrb[32].mxu1  ;;  %v7307_v6 = vpop.f32.mrb[33].mxu0  ;;  %v20832_v54 = vld [vmem:[#allocation8 + $0xf08] ss:$24 sps:$4 sm:$0xff]  }
 0x5e7   : > { %v19952_v58 = vadd.f32 %v7428_v15, %v6220_v52  ;;  %v19951_v45 = vadd.f32 %v7307_v6, %v6216_v53  ;;  %v7430_v59 = vpop.f32.mrb[33].mxu1  ;;  %v7309_v39 = vpop.f32.mrb[34].mxu0  ;;  %v20829_v53 = vld [vmem:[#allocation8 + $0xc08] ss:$24 sps:$4 sm:$0xff]   ;;  %v20837_v6 = vld [vmem:[#allocation8 + $0xc3c] ss:$24 sps:$4 sm:$0xff]  }
 0x5e8   : > { %v7435_v61 = vmul.f32 %v19950_v36, %v19950_v36  ;;  %v19953_v62 = vadd.f32 %v7430_v59, %v6224_v60  ;;  %v7432_v63 = vpop.f32.mrb[34].mxu1  ;;  %v7310_v0 = vpop.f32.mrb[35].mxu0  ;;  %v7451_v19 = vmul.f32 0.5, %v19950_v36  ;;  %v20838_v59 = vld [vmem:[#allocation8 + $0xf38] ss:$24 sps:$4 sm:$0xff]  }
 0x5e9   : > { %v7437_v1 = vmul.f32 %v19952_v58, %v19952_v58  ;;  %v7436_v2 = vmul.f32 %v19951_v45, %v19951_v45  ;;  %v7433_v3 = vpop.f32.mrb[35].mxu1  ;;  %v7453_v43 = vmul.f32 0.5, %v19952_v58  ;;  %v7452_v44 = vmul.f32 0.5, %v19951_v45  ;;  %v20843_v39 = vld [vmem:[#allocation8 + $0xc6c] ss:$24 sps:$4 sm:$0xff]  }
 0x5ea   : > { %v7439_v4 = vmul.f32 0.035677407, %v7435_v61  ;;  %v7438_v37 = vmul.f32 %v19953_v62, %v19953_v62  ;;  %v7454_v16 = vmul.f32 0.5, %v19953_v62  ;;  %v20846_v61 = vld [vmem:[#allocation8 + $0xf6c] ss:$24 sps:$4 sm:$0xff]  }
 0x5eb   : > { %v7441_v5 = vmul.f32 0.035677407, %v7437_v1  ;;  %v7440_v21 = vmul.f32 0.035677407, %v7436_v2  ;;  %v20844_v63 = vld [vmem:[#allocation8 + $0xf68] ss:$24 sps:$4 sm:$0xff]  }
 0x5ec   : > { %v7443_v41 = vadd.f32 0.7978846, %v7439_v4  ;;  %v7442_v7 = vmul.f32 0.035677407, %v7438_v37  ;;  %v20849_v0 = vld [vmem:[#allocation8 + $0xc9c] ss:$24 sps:$4 sm:$0xff]  }
 0x5ed   : > { %v7445_v8 = vadd.f32 0.7978846, %v7441_v5  ;;  %v7444_v9 = vadd.f32 0.7978846, %v7440_v21  ;;  %v20852_v1 = vld [vmem:[#allocation8 + $0xf9c] ss:$24 sps:$4 sm:$0xff]  }
 0x5ee   : > { %v7447_v11 = vmul.f32 %v19950_v36, %v7443_v41  ;;  %v7446_v10 = vadd.f32 0.7978846, %v7442_v7  ;;  %v20847_v2 = vld [vmem:[#allocation8 + $0xc98] ss:$24 sps:$4 sm:$0xff]   ;;  %v20855_v4 = vld [vmem:[#allocation8 + $0xccc] ss:$24 sps:$4 sm:$0xff]  }
 0x5ef   : > { %v7449_v13 = vmul.f32 %v19952_v58, %v7445_v8  ;;  %v7448_v31 = vmul.f32 %v19951_v45, %v7444_v9  ;;  %v20840_v58 = vld [vmem:[#allocation8 + $0xf3c] ss:$24 sps:$4 sm:$0xff]   ;;  %v20835_v45 = vld [vmem:[#allocation8 + $0xc38] ss:$24 sps:$4 sm:$0xff]   ;;  %v20858_v37 = vld [vmem:[#allocation8 + $0xfcc] ss:$24 sps:$4 sm:$0xff]  }
 0x5f0   : > { %21901 = vtanh.f32 %v7447_v11  ;;  %v7450_v14 = vmul.f32 %v19953_v62, %v7446_v10  ;;  %v20841_v62 = vld [vmem:[#allocation8 + $0xc68] ss:$24 sps:$4 sm:$0xff]   ;;  %v20850_v3 = vld [vmem:[#allocation8 + $0xf98] ss:$24 sps:$4 sm:$0xff]   ;;  %v20861_v41 = vld [vmem:[#allocation8 + $0xcfc] ss:$24 sps:$4 sm:$0xff]  }
 0x5f1   : > { %21903 = vtanh.f32 %v7449_v13  ;;  %v20853_v5 = vld [vmem:[#allocation8 + $0xcc8] ss:$24 sps:$4 sm:$0xff]   ;;  %v20864_v7 = vld [vmem:[#allocation8 + $0xffc] ss:$24 sps:$4 sm:$0xff]   ;;  %v20859_v8 = vld [vmem:[#allocation8 + $0xcf8] ss:$24 sps:$4 sm:$0xff]  }
 0x5f2   : > { %21905 = vtanh.f32 %v7448_v31  ;;  %v20856_v21 = vld [vmem:[#allocation8 + $0xfc8] ss:$24 sps:$4 sm:$0xff]   ;;  %v20862_v9 = vld [vmem:[#allocation8 + $0xff8] ss:$24 sps:$4 sm:$0xff]   ;;  %v20867_v11 = vld [vmem:[#allocation8 + $0xd2c] ss:$24 sps:$4 sm:$0xff]  }
 0x5f3   : > { %21907 = vtanh.f32 %v7450_v14  ;;  %v20870_v10 = vld [vmem:[#allocation8 + $0x102c] ss:$24 sps:$4 sm:$0xff]   ;;  %v20865_v13 = vld [vmem:[#allocation8 + $0xd28] ss:$24 sps:$4 sm:$0xff]   ;;  %v20873_v14 = vld [vmem:[#allocation8 + $0xd5c] ss:$24 sps:$4 sm:$0xff]  }
 0x5f4   : > { %v20868_v31 = vld [vmem:[#allocation8 + $0x1028] ss:$24 sps:$4 sm:$0xff]  }
 0x5fa   : > { %v21902_v33 = vpop.eup %21901 }
 0x5fb   : > { %v21904_v29 = vpop.eup %21903  ;;  %v7459_v17 = vadd.f32 1.0, %v21902_v33  ;;  %v20876_v33 = vld [vmem:[#allocation8 + $0x105c] ss:$24 sps:$4 sm:$0xff]  }
 0x5fc   : > { %v21906_v18 = vpop.eup %21905  ;;  %v7461_v30 = vadd.f32 1.0, %v21904_v29  ;;  %v20871_v29 = vld [vmem:[#allocation8 + $0xd58] ss:$24 sps:$4 sm:$0xff]  }
 0x5fd   : > { %v21908_v40 = vpop.eup %21907  ;;  %v7460_v35 = vadd.f32 1.0, %v21906_v18  ;;  %v7463_v47 = vmul.f32 %v7459_v17, %v7451_v19  ;;  %v20874_v17 = vld [vmem:[#allocation8 + $0x1058] ss:$24 sps:$4 sm:$0xff]   ;;  %v20879_v18 = vld [vmem:[#allocation8 + $0xd8c] ss:$24 sps:$4 sm:$0xff]  }
 0x5fe   : > { %v7462_v49 = vadd.f32 1.0, %v21908_v40  ;;  %v7465_v55 = vmul.f32 %v7461_v30, %v7453_v43  ;;  %v20882_v19 = vld [vmem:[#allocation8 + $0x108c] ss:$24 sps:$4 sm:$0xff]   ;;  %v20877_v30 = vld [vmem:[#allocation8 + $0xd88] ss:$24 sps:$4 sm:$0xff]  }
 0x5ff   : > { %v7464_v51 = vmul.f32 %v7460_v35, %v7452_v44  ;;  %v22613_v15 = vpack.c.bf16 %v7463_v47, %v7463_v47  ;;  %v20880_v40 = vld [vmem:[#allocation8 + $0x1088] ss:$24 sps:$4 sm:$0xff]   ;;  %v20885_v43 = vld [vmem:[#allocation8 + $0xdbc] ss:$24 sps:$4 sm:$0xff]   ;;  %v20883_v35 = vld [vmem:[#allocation8 + $0xdb8] ss:$24 sps:$4 sm:$0xff]  }
 0x600   : > { %v7466_v28 = vmul.f32 %v7462_v49, %v7454_v16  ;;  %v22616_v36 = vpack.c.bf16 %v7465_v55, %v7465_v55  ;;  %v20888_v44 = vld [vmem:[#allocation8 + $0x10bc] ss:$24 sps:$4 sm:$0xff]   ;;  %v20886_v47 = vld [vmem:[#allocation8 + $0x10b8] ss:$24 sps:$4 sm:$0xff]   ;;  %v20891_v16 = vld [vmem:[#allocation8 + $0xdec] ss:$24 sps:$4 sm:$0xff]  }
 0x601   : > { %v22609_v52 = vpack.c.bf16 %v7464_v51, %v7464_v51  ;;  %v20894_v49 = vld [vmem:[#allocation8 + $0x10ec] ss:$24 sps:$4 sm:$0xff]   ;;  %v20889_v55 = vld [vmem:[#allocation8 + $0xde8] ss:$24 sps:$4 sm:$0xff]  }
 0x602   : > { %v22611_v60 = vpack.c.bf16 %v7466_v28, %v7466_v28  ;;  %v20892_v51 = vld [vmem:[#allocation8 + $0x10e8] ss:$24 sps:$4 sm:$0xff]   ;;  %v20897_v28 = vld [vmem:[#allocation8 + $0xe1c] ss:$24 sps:$4 sm:$0xff]  }
 0x603   : > { %8655 = vmatprep.mubr.bf16.mxu0 %v22609_v52 }
 0x604   : > { %8696 = vmatprep.mubr.bf16.mxu1 %v22611_v60  ;;  %8656 = vmatmul.mubr.bf16.vlgmr.msra.gmra.mrb[36].mxu0 %v22613_v15 }
 0x605   : > { %8697 = vmatmul.mubr.bf16.vlgmr.msra.gmra.mrb[36].mxu1 %v22616_v36  ;;  %8706 = vmatpush1.bf16.msra.mxu0 %v20829_v53  ;;  %v20900_v53 = vld [vmem:[#allocation8 + $0x111c] ss:$24 sps:$4 sm:$0xff]  }
 0x606   : > { %8747 = vmatpush1.bf16.msra.mxu1 %v20832_v54  ;;  %8737 = vmatprep.mubr.bf16.mxu0 %v22609_v52  ;;  %v20895_v54 = vld [vmem:[#allocation8 + $0xe18] ss:$24 sps:$4 sm:$0xff]  }
 0x607   : > { %8778 = vmatprep.mubr.bf16.mxu1 %v22611_v60  ;;  %8707 = vmatprep.subr.bf16.mxu0 %v20837_v6  ;;  %v20898_v6 = vld [vmem:[#allocation8 + $0x1118] ss:$24 sps:$4 sm:$0xff]  }
 0x608   : > { %8748 = vmatprep.subr.bf16.mxu1 %v20840_v58  ;;  %v20903_v58 = vld [vmem:[#allocation8 + $0xe4c] ss:$24 sps:$4 sm:$0xff]  }
 0x609   : > { %8708 = vmatpush1.bf16.msra.mxu0 %v20835_v45  ;;  %v20906_v45 = vld [vmem:[#allocation8 + $0x114c] ss:$24 sps:$4 sm:$0xff]  }
 0x60a   : > { %8749 = vmatpush1.bf16.msra.mxu1 %v20838_v59  ;;  %8709 = vmatprep.subr.bf16.mxu0 %v20843_v39  ;;  %v20901_v59 = vld [vmem:[#allocation8 + $0xe48] ss:$24 sps:$4 sm:$0xff]  }
 0x60b   : > { %8750 = vmatprep.subr.bf16.mxu1 %v20846_v61  ;;  %v20904_v39 = vld [vmem:[#allocation8 + $0x1148] ss:$24 sps:$4 sm:$0xff]   ;;  %v20909_v61 = vld [vmem:[#allocation8 + $0xe7c] ss:$24 sps:$4 sm:$0xff]  }
 0x60d   : > { %8710 = vmatpush1.bf16.msra.mxu0 %v20841_v62  ;;  %v20912_v62 = vld [vmem:[#allocation8 + $0x117c] ss:$24 sps:$4 sm:$0xff]  }
 0x60e   : > { %8751 = vmatpush1.bf16.msra.mxu1 %v20844_v63  ;;  %8711 = vmatprep.subr.bf16.mxu0 %v20849_v0  ;;  %v20907_v63 = vld [vmem:[#allocation8 + $0xe78] ss:$24 sps:$4 sm:$0xff]  }
 0x60f   : > { %8752 = vmatprep.subr.bf16.mxu1 %v20852_v1  ;;  %v20910_v0 = vld [vmem:[#allocation8 + $0x1178] ss:$24 sps:$4 sm:$0xff]   ;;  %v20915_v1 = vld [vmem:[#allocation8 + $0xeac] ss:$24 sps:$4 sm:$0xff]  }
 0x611   : > { %8712 = vmatpush1.bf16.msra.mxu0 %v20847_v2  ;;  %v20918_v2 = vld [vmem:[#allocation8 + $0x11ac] ss:$24 sps:$4 sm:$0xff]  }
 0x612   : > { %8753 = vmatpush1.bf16.msra.mxu1 %v20850_v3  ;;  %8713 = vmatprep.subr.bf16.mxu0 %v20855_v4  ;;  %v20913_v3 = vld [vmem:[#allocation8 + $0xea8] ss:$24 sps:$4 sm:$0xff]  }
 0x613   : > { %8754 = vmatprep.subr.bf16.mxu1 %v20858_v37  ;;  %v20916_v4 = vld [vmem:[#allocation8 + $0x11a8] ss:$24 sps:$4 sm:$0xff]   ;;  %v20921_v37 = vld [vmem:[#allocation8 + $0xedc] ss:$24 sps:$4 sm:$0xff]  }
 0x615   : > { %8714 = vmatpush1.bf16.msra.mxu0 %v20853_v5  ;;  %v20924_v5 = vld [vmem:[#allocation8 + $0x11dc] ss:$24 sps:$4 sm:$0xff]  }
 0x616   : > { %8755 = vmatpush1.bf16.msra.mxu1 %v20856_v21  ;;  %8715 = vmatprep.subr.bf16.mxu0 %v20861_v41  ;;  %v20919_v21 = vld [vmem:[#allocation8 + $0xed8] ss:$24 sps:$4 sm:$0xff]  }
 0x617   : > { %8756 = vmatprep.subr.bf16.mxu1 %v20864_v7  ;;  %v20922_v41 = vld [vmem:[#allocation8 + $0x11d8] ss:$24 sps:$4 sm:$0xff]   ;;  %v20927_v7 = vld [vmem:[#allocation8 + $0xc14] ss:$24 sps:$4 sm:$0xff]  }
 0x619   : > { %8716 = vmatpush1.bf16.msra.mxu0 %v20859_v8  ;;  %v20930_v8 = vld [vmem:[#allocation8 + $0xf14] ss:$24 sps:$4 sm:$0xff]  }
 0x61a   : > { %8757 = vmatpush1.bf16.msra.mxu1 %v20862_v9  ;;  %8717 = vmatprep.subr.bf16.mxu0 %v20867_v11  ;;  %v20925_v9 = vld [vmem:[#allocation8 + $0xc10] ss:$24 sps:$4 sm:$0xff]  }
 0x61b   : > { %8758 = vmatprep.subr.bf16.mxu1 %v20870_v10  ;;  %v20928_v11 = vld [vmem:[#allocation8 + $0xf10] ss:$24 sps:$4 sm:$0xff]   ;;  %v20933_v10 = vld [vmem:[#allocation8 + $0xc44] ss:$24 sps:$4 sm:$0xff]  }
 0x61d   : > { %8718 = vmatpush1.bf16.msra.mxu0 %v20865_v13  ;;  %v20936_v13 = vld [vmem:[#allocation8 + $0xf44] ss:$24 sps:$4 sm:$0xff]  }
 0x61e   : > { %8759 = vmatpush1.bf16.msra.mxu1 %v20868_v31  ;;  %8719 = vmatprep.subr.bf16.mxu0 %v20873_v14  ;;  %v20931_v31 = vld [vmem:[#allocation8 + $0xc40] ss:$24 sps:$4 sm:$0xff]  }
 0x61f   : > { %8760 = vmatprep.subr.bf16.mxu1 %v20876_v33  ;;  %v20934_v14 = vld [vmem:[#allocation8 + $0xf40] ss:$24 sps:$4 sm:$0xff]   ;;  %v20939_v33 = vld [vmem:[#allocation8 + $0xc74] ss:$24 sps:$4 sm:$0xff]  }
 0x621   : > { %8720 = vmatpush1.bf16.msra.mxu0 %v20871_v29  ;;  %v20942_v29 = vld [vmem:[#allocation8 + $0xf74] ss:$24 sps:$4 sm:$0xff]  }
 0x622   : > { %8761 = vmatpush1.bf16.msra.mxu1 %v20874_v17  ;;  %8721 = vmatprep.subr.bf16.mxu0 %v20879_v18  ;;  %v20937_v17 = vld [vmem:[#allocation8 + $0xc70] ss:$24 sps:$4 sm:$0xff]  }
 0x623   : > { %8762 = vmatprep.subr.bf16.mxu1 %v20882_v19  ;;  %v20940_v18 = vld [vmem:[#allocation8 + $0xf70] ss:$24 sps:$4 sm:$0xff]   ;;  %v20945_v19 = vld [vmem:[#allocation8 + $0xca4] ss:$24 sps:$4 sm:$0xff]  }
 0x625   : > { %8722 = vmatpush1.bf16.msra.mxu0 %v20877_v30  ;;  %v20948_v30 = vld [vmem:[#allocation8 + $0xfa4] ss:$24 sps:$4 sm:$0xff]  }
 0x626   : > { %8763 = vmatpush1.bf16.msra.mxu1 %v20880_v40  ;;  %8723 = vmatprep.subr.bf16.mxu0 %v20885_v43  ;;  %v20943_v40 = vld [vmem:[#allocation8 + $0xca0] ss:$24 sps:$4 sm:$0xff]   ;;  %v20951_v43 = vld [vmem:[#allocation8 + $0xcd4] ss:$24 sps:$4 sm:$0xff]  }
 0x627   : > { %8764 = vmatprep.subr.bf16.mxu1 %v20888_v44  ;;  %v20954_v44 = vld [vmem:[#allocation8 + $0xfd4] ss:$24 sps:$4 sm:$0xff]  }
 0x629   : > { %8724 = vmatpush1.bf16.msra.mxu0 %v20883_v35  ;;  %v20952_v35 = vld [vmem:[#allocation8 + $0xfd0] ss:$24 sps:$4 sm:$0xff]  }
 0x62a   : > { %8765 = vmatpush1.bf16.msra.mxu1 %v20886_v47  ;;  %8725 = vmatprep.subr.bf16.mxu0 %v20891_v16  ;;  %v20957_v47 = vld [vmem:[#allocation8 + $0xd04] ss:$24 sps:$4 sm:$0xff]  }
 0x62b   : > { %8766 = vmatprep.subr.bf16.mxu1 %v20894_v49  ;;  %v20960_v16 = vld [vmem:[#allocation8 + $0x1004] ss:$24 sps:$4 sm:$0xff]   ;;  %v20955_v49 = vld [vmem:[#allocation8 + $0xd00] ss:$24 sps:$4 sm:$0xff]  }
 0x62d   : > { %8726 = vmatpush1.bf16.msra.mxu0 %v20889_v55  ;;  %v20958_v55 = vld [vmem:[#allocation8 + $0x1000] ss:$24 sps:$4 sm:$0xff]  }
 0x62e   : > { %8767 = vmatpush1.bf16.msra.mxu1 %v20892_v51  ;;  %8727 = vmatprep.subr.bf16.mxu0 %v20897_v28  ;;  %v20963_v51 = vld [vmem:[#allocation8 + $0xd34] ss:$24 sps:$4 sm:$0xff]  }
 0x62f   : > { %8768 = vmatprep.subr.bf16.mxu1 %v20900_v53  ;;  %v20966_v28 = vld [vmem:[#allocation8 + $0x1034] ss:$24 sps:$4 sm:$0xff]   ;;  %v20961_v53 = vld [vmem:[#allocation8 + $0xd30] ss:$24 sps:$4 sm:$0xff]  }
 0x631   : > { %8728 = vmatpush1.bf16.msra.mxu0 %v20895_v54  ;;  %v20964_v54 = vld [vmem:[#allocation8 + $0x1030] ss:$24 sps:$4 sm:$0xff]  }
 0x632   : > { %8769 = vmatpush1.bf16.msra.mxu1 %v20898_v6  ;;  %8729 = vmatprep.subr.bf16.mxu0 %v20903_v58  ;;  %v20969_v6 = vld [vmem:[#allocation8 + $0xd64] ss:$24 sps:$4 sm:$0xff]  }
 0x633   : > { %8770 = vmatprep.subr.bf16.mxu1 %v20906_v45  ;;  %v20972_v58 = vld [vmem:[#allocation8 + $0x1064] ss:$24 sps:$4 sm:$0xff]   ;;  %v20967_v45 = vld [vmem:[#allocation8 + $0xd60] ss:$24 sps:$4 sm:$0xff]  }
 0x635   : > { %8730 = vmatpush1.bf16.msra.mxu0 %v20901_v59  ;;  %v20970_v59 = vld [vmem:[#allocation8 + $0x1060] ss:$24 sps:$4 sm:$0xff]  }
 0x636   : > { %8771 = vmatpush1.bf16.msra.mxu1 %v20904_v39  ;;  %8731 = vmatprep.subr.bf16.mxu0 %v20909_v61  ;;  %v20975_v39 = vld [vmem:[#allocation8 + $0xd94] ss:$24 sps:$4 sm:$0xff]  }
 0x637   : > { %8772 = vmatprep.subr.bf16.mxu1 %v20912_v62  ;;  %v20978_v61 = vld [vmem:[#allocation8 + $0x1094] ss:$24 sps:$4 sm:$0xff]   ;;  %v20973_v62 = vld [vmem:[#allocation8 + $0xd90] ss:$24 sps:$4 sm:$0xff]  }
 0x639   : > { %8732 = vmatpush1.bf16.msra.mxu0 %v20907_v63  ;;  %v20976_v63 = vld [vmem:[#allocation8 + $0x1090] ss:$24 sps:$4 sm:$0xff]  }
 0x63a   : > { %8773 = vmatpush1.bf16.msra.mxu1 %v20910_v0  ;;  %8733 = vmatprep.subr.bf16.mxu0 %v20915_v1  ;;  %v20981_v0 = vld [vmem:[#allocation8 + $0xdc4] ss:$24 sps:$4 sm:$0xff]  }
 0x63b   : > { %8774 = vmatprep.subr.bf16.mxu1 %v20918_v2  ;;  %v20984_v1 = vld [vmem:[#allocation8 + $0x10c4] ss:$24 sps:$4 sm:$0xff]   ;;  %v20979_v2 = vld [vmem:[#allocation8 + $0xdc0] ss:$24 sps:$4 sm:$0xff]  }
 0x63d   : > { %8734 = vmatpush1.bf16.msra.mxu0 %v20913_v3  ;;  %v20982_v3 = vld [vmem:[#allocation8 + $0x10c0] ss:$24 sps:$4 sm:$0xff]  }
 0x63e   : > { %8775 = vmatpush1.bf16.msra.mxu1 %v20916_v4  ;;  %8735 = vmatprep.subr.bf16.mxu0 %v20921_v37  ;;  %v20987_v4 = vld [vmem:[#allocation8 + $0xdf4] ss:$24 sps:$4 sm:$0xff]  }
 0x63f   : > { %8776 = vmatprep.subr.bf16.mxu1 %v20924_v5  ;;  %v20990_v37 = vld [vmem:[#allocation8 + $0x10f4] ss:$24 sps:$4 sm:$0xff]   ;;  %v20985_v5 = vld [vmem:[#allocation8 + $0xdf0] ss:$24 sps:$4 sm:$0xff]  }
 0x641   : > { %8736 = vmatpush1.bf16.msra.mxu0 %v20919_v21  ;;  %v20988_v21 = vld [vmem:[#allocation8 + $0x10f0] ss:$24 sps:$4 sm:$0xff]  }
 0x642   : > { %8777 = vmatpush1.bf16.msra.mxu1 %v20922_v41  ;;  %8787 = vmatprep.subr.bf16.mxu0 %v20927_v7  ;;  %v20993_v41 = vld [vmem:[#allocation8 + $0xe24] ss:$24 sps:$4 sm:$0xff]  }
 0x643   : > { %8828 = vmatprep.subr.bf16.mxu1 %v20930_v8  ;;  %v20996_v7 = vld [vmem:[#allocation8 + $0x1124] ss:$24 sps:$4 sm:$0xff]   ;;  %v20991_v8 = vld [vmem:[#allocation8 + $0xe20] ss:$24 sps:$4 sm:$0xff]  }
 0x644   : > { %8738 = vmatmul.mubr.bf16.vlgmr.msra.gmra.mrb[40].mxu0 %v22613_v15 }
 0x645   : > { %8779 = vmatmul.mubr.bf16.vlgmr.msra.gmra.mrb[40].mxu1 %v22616_v36  ;;  %8788 = vmatpush1.bf16.msra.mxu0 %v20925_v9  ;;  %v20994_v9 = vld [vmem:[#allocation8 + $0x1120] ss:$24 sps:$4 sm:$0xff]  }
 0x646   : > { %8819 = vmatprep.mubr.bf16.mxu0 %v22609_v52  ;;  %8829 = vmatpush1.bf16.msra.mxu1 %v20928_v11  ;;  %v20946_v52 = vld [vmem:[#allocation8 + $0xfa0] ss:$24 sps:$4 sm:$0xff]   ;;  %v20999_v11 = vld [vmem:[#allocation8 + $0xe54] ss:$24 sps:$4 sm:$0xff]  }
 0x647   : > { %8860 = vmatprep.mubr.bf16.mxu1 %v22611_v60  ;;  %8789 = vmatprep.subr.bf16.mxu0 %v20933_v10  ;;  %v20949_v60 = vld [vmem:[#allocation8 + $0xcd0] ss:$24 sps:$4 sm:$0xff]   ;;  %v21002_v10 = vld [vmem:[#allocation8 + $0x1154] ss:$24 sps:$4 sm:$0xff]  }
 0x648   : > { %8830 = vmatprep.subr.bf16.mxu1 %v20936_v13  ;;  %v20997_v13 = vld [vmem:[#allocation8 + $0xe50] ss:$24 sps:$4 sm:$0xff]  }
 0x649   : > { %8790 = vmatpush1.bf16.msra.mxu0 %v20931_v31  ;;  %v21000_v31 = vld [vmem:[#allocation8 + $0x1150] ss:$24 sps:$4 sm:$0xff]  }
 0x64a   : > { %8831 = vmatpush1.bf16.msra.mxu1 %v20934_v14  ;;  %8791 = vmatprep.subr.bf16.mxu0 %v20939_v33  ;;  %v21005_v14 = vld [vmem:[#allocation8 + $0xe84] ss:$24 sps:$4 sm:$0xff]  }
 0x64b   : > { %8832 = vmatprep.subr.bf16.mxu1 %v20942_v29  ;;  %v21008_v33 = vld [vmem:[#allocation8 + $0x1184] ss:$24 sps:$4 sm:$0xff]   ;;  %v21003_v29 = vld [vmem:[#allocation8 + $0xe80] ss:$24 sps:$4 sm:$0xff]  }
 0x64d   : > { %8792 = vmatpush1.bf16.msra.mxu0 %v20937_v17  ;;  %v21006_v17 = vld [vmem:[#allocation8 + $0x1180] ss:$24 sps:$4 sm:$0xff]  }
 0x64e   : > { %8833 = vmatpush1.bf16.msra.mxu1 %v20940_v18  ;;  %8793 = vmatprep.subr.bf16.mxu0 %v20945_v19  ;;  %v21011_v18 = vld [vmem:[#allocation8 + $0xeb4] ss:$24 sps:$4 sm:$0xff]  }
 0x64f   : > { %8834 = vmatprep.subr.bf16.mxu1 %v20948_v30  ;;  %v21014_v19 = vld [vmem:[#allocation8 + $0x11b4] ss:$24 sps:$4 sm:$0xff]   ;;  %v21009_v30 = vld [vmem:[#allocation8 + $0xeb0] ss:$24 sps:$4 sm:$0xff]  }
 0x651   : > { %8794 = vmatpush1.bf16.msra.mxu0 %v20943_v40  ;;  %v21012_v40 = vld [vmem:[#allocation8 + $0x11b0] ss:$24 sps:$4 sm:$0xff]  }
 0x652   : > { %8835 = vmatpush1.bf16.msra.mxu1 %v20946_v52  ;;  %8795 = vmatprep.subr.bf16.mxu0 %v20951_v43  ;;  %v21017_v52 = vld [vmem:[#allocation8 + $0xee4] ss:$24 sps:$4 sm:$0xff]  }
 0x653   : > { %8836 = vmatprep.subr.bf16.mxu1 %v20954_v44  ;;  %v21020_v43 = vld [vmem:[#allocation8 + $0x11e4] ss:$24 sps:$4 sm:$0xff]  }
 0x654   : > { %v8875_v44 = vld [vmem:[#allocation5 + $0x30] sm:$0xff] }
 0x655   : > { %8796 = vmatpush1.bf16.msra.mxu0 %v20949_v60  ;;  %v8877_v60 = vld [vmem:[#allocation5 + $0x90] sm:$0xff] }
 0x656   : > { %8837 = vmatpush1.bf16.msra.mxu1 %v20952_v35  ;;  %8797 = vmatprep.subr.bf16.mxu0 %v20957_v47  ;;  %v8876_v35 = vld [vmem:[#allocation5 + $0x38] sm:$0xff] }
 0x657   : > { %8838 = vmatprep.subr.bf16.mxu1 %v20960_v16  ;;  %v8878_v47 = vld [vmem:[#allocation5 + $0x98] sm:$0xff] }
 0x658   : > { %v21015_v16 = vld [vmem:[#allocation8 + $0xee0] ss:$24 sps:$4 sm:$0xff]  }
 0x659   : > { %8798 = vmatpush1.bf16.msra.mxu0 %v20955_v49  ;;  %v21018_v49 = vld [vmem:[#allocation8 + $0x11e0] ss:$24 sps:$4 sm:$0xff]  }
 0x65a   : > { %8839 = vmatpush1.bf16.msra.mxu1 %v20958_v55  ;;  %8799 = vmatprep.subr.bf16.mxu0 %v20963_v51  ;;  %v18788_v55 = vcombine.high %v8875_v44, %v8877_v60  ;;  %v18790_v51 = vcombine.high %v8876_v35, %v8878_v47 }
 0x65b   : > { %8840 = vmatprep.subr.bf16.mxu1 %v20966_v28  ;;  %v8879_v28 = vld [vmem:[#allocation5 + $0xf0] sm:$0xff] }
 0x65d   : > { %8800 = vmatpush1.bf16.msra.mxu0 %v20961_v53  ;;  %v8881_v53 = vld [vmem:[#allocation5 + $0x150] sm:$0xff] }
 0x65e   : > { %8841 = vmatpush1.bf16.msra.mxu1 %v20964_v54  ;;  %8801 = vmatprep.subr.bf16.mxu0 %v20969_v6  ;;  %v8880_v54 = vld [vmem:[#allocation5 + $0xf8] sm:$0xff] }
 0x65f   : > { %8842 = vmatprep.subr.bf16.mxu1 %v20972_v58  ;;  %v8882_v6 = vld [vmem:[#allocation5 + $0x158] sm:$0xff]  ;;  %v18787_v58 = vcombine.low %v8875_v44, %v8877_v60  ;;  %v8899_v60 = vld [vmem:[#allocation5 + $0x4b0] sm:$0xff] }
 0x661   : > { %8802 = vmatpush1.bf16.msra.mxu0 %v20967_v45  ;;  %v18789_v45 = vcombine.low %v8876_v35, %v8878_v47  ;;  %v8901_v35 = vld [vmem:[#allocation5 + $0x510] sm:$0xff]  ;;  %v8900_v47 = vld [vmem:[#allocation5 + $0x4b8] sm:$0xff] }
 0x662   : > { %8843 = vmatpush1.bf16.msra.mxu1 %v20970_v59  ;;  %8803 = vmatprep.subr.bf16.mxu0 %v20975_v39  ;;  %v18792_v59 = vcombine.high %v8879_v28, %v8881_v53  ;;  %v18794_v39 = vcombine.high %v8880_v54, %v8882_v6 }
 0x663   : > { %8844 = vmatprep.subr.bf16.mxu1 %v20978_v61  ;;  %v8883_v61 = vld [vmem:[#allocation5 + $0x1b0] sm:$0xff] }
 0x665   : > { %8804 = vmatpush1.bf16.msra.mxu0 %v20973_v62  ;;  %v8885_v62 = vld [vmem:[#allocation5 + $0x210] sm:$0xff] }
 0x666   : > { %8845 = vmatpush1.bf16.msra.mxu1 %v20976_v63  ;;  %8805 = vmatprep.subr.bf16.mxu0 %v20981_v0  ;;  %v8884_v63 = vld [vmem:[#allocation5 + $0x1b8] sm:$0xff] }
 0x667   : > { %8846 = vmatprep.subr.bf16.mxu1 %v20984_v1  ;;  %v8886_v0 = vld [vmem:[#allocation5 + $0x218] sm:$0xff]  ;;  %v18791_v1 = vcombine.low %v8879_v28, %v8881_v53  ;;  %v8903_v53 = vld [vmem:[#allocation5 + $0x570] sm:$0xff] }
 0x669   : > { %8806 = vmatpush1.bf16.msra.mxu0 %v20979_v2  ;;  %v18793_v2 = vcombine.low %v8880_v54, %v8882_v6  ;;  %v8905_v54 = vld [vmem:[#allocation5 + $0x5d0] sm:$0xff]  ;;  %v8904_v6 = vld [vmem:[#allocation5 + $0x578] sm:$0xff] }
 0x66a   : > { %8847 = vmatpush1.bf16.msra.mxu1 %v20982_v3  ;;  %8807 = vmatprep.subr.bf16.mxu0 %v20987_v4  ;;  %v18796_v3 = vcombine.high %v8883_v61, %v8885_v62  ;;  %v18798_v4 = vcombine.high %v8884_v63, %v8886_v0 }
 0x66b   : > { %8848 = vmatprep.subr.bf16.mxu1 %v20990_v37  ;;  %v8887_v37 = vld [vmem:[#allocation5 + $0x270] sm:$0xff] }
 0x66d   : > { %8808 = vmatpush1.bf16.msra.mxu0 %v20985_v5  ;;  %v8889_v5 = vld [vmem:[#allocation5 + $0x2d0] sm:$0xff] }
 0x66e   : > { %8849 = vmatpush1.bf16.msra.mxu1 %v20988_v21  ;;  %8809 = vmatprep.subr.bf16.mxu0 %v20993_v41  ;;  %v8888_v21 = vld [vmem:[#allocation5 + $0x278] sm:$0xff] }
 0x66f   : > { %8850 = vmatprep.subr.bf16.mxu1 %v20996_v7  ;;  %v8890_v41 = vld [vmem:[#allocation5 + $0x2d8] sm:$0xff]  ;;  %v18800_v7 = vcombine.high %v8887_v37, %v8889_v5 }
 0x671   : > { %8810 = vmatpush1.bf16.msra.mxu0 %v20991_v8  ;;  %v18802_v8 = vcombine.high %v8888_v21, %v8890_v41 }
 0x672   : > { %8851 = vmatpush1.bf16.msra.mxu1 %v20994_v9  ;;  %8811 = vmatprep.subr.bf16.mxu0 %v20999_v11  ;;  %v8891_v9 = vld [vmem:[#allocation5 + $0x330] sm:$0xff] }
 0x673   : > { %8852 = vmatprep.subr.bf16.mxu1 %v21002_v10  ;;  %v8893_v11 = vld [vmem:[#allocation5 + $0x390] sm:$0xff]  ;;  %v8892_v10 = vld [vmem:[#allocation5 + $0x338] sm:$0xff] }
 0x675   : > { %8812 = vmatpush1.bf16.msra.mxu0 %v20997_v13  ;;  %v8894_v13 = vld [vmem:[#allocation5 + $0x398] sm:$0xff] }
 0x676   : > { %8853 = vmatpush1.bf16.msra.mxu1 %v21000_v31  ;;  %8813 = vmatprep.subr.bf16.mxu0 %v21005_v14  ;;  %v18799_v31 = vcombine.low %v8887_v37, %v8889_v5  ;;  %v18801_v14 = vcombine.low %v8888_v21, %v8890_v41  ;;  %v8911_v5 = vld [vmem:[#allocation5 + $0x6f0] sm:$0xff]  ;;  %v8912_v41 = vld [vmem:[#allocation5 + $0x6f8] sm:$0xff] }
 0x677   : > { %8854 = vmatprep.subr.bf16.mxu1 %v21008_v33  ;;  %v18804_v33 = vcombine.high %v8891_v9, %v8893_v11  ;;  %v8913_v21 = vld [vmem:[#allocation5 + $0x750] sm:$0xff] }
 0x679   : > { %8814 = vmatpush1.bf16.msra.mxu0 %v21003_v29  ;;  %v18806_v29 = vcombine.high %v8892_v10, %v8894_v13 }
 0x67a   : > { %8855 = vmatpush1.bf16.msra.mxu1 %v21006_v17  ;;  %8815 = vmatprep.subr.bf16.mxu0 %v21011_v18  ;;  %v8895_v17 = vld [vmem:[#allocation5 + $0x3f0] sm:$0xff] }
 0x67b   : > { %8856 = vmatprep.subr.bf16.mxu1 %v21014_v19  ;;  %v8897_v18 = vld [vmem:[#allocation5 + $0x450] sm:$0xff]  ;;  %v8896_v19 = vld [vmem:[#allocation5 + $0x3f8] sm:$0xff] }
 0x67d   : > { %8816 = vmatpush1.bf16.msra.mxu0 %v21009_v30  ;;  %v8898_v30 = vld [vmem:[#allocation5 + $0x458] sm:$0xff] }
 0x67e   : > { %8857 = vmatpush1.bf16.msra.mxu1 %v21012_v40  ;;  %8817 = vmatprep.subr.bf16.mxu0 %v21017_v52  ;;  %v18803_v40 = vcombine.low %v8891_v9, %v8893_v11  ;;  %v18805_v52 = vcombine.low %v8892_v10, %v8894_v13  ;;  %v18810_v44 = vcombine.high %v8896_v19, %v8898_v30  ;;  %v8915_v11 = vld [vmem:[#allocation5 + $0x7b0] sm:$0xff]  ;;  %v8916_v13 = vld [vmem:[#allocation5 + $0x7b8] sm:$0xff] }
 0x67f   : > { %8858 = vmatprep.subr.bf16.mxu1 %v21020_v43  ;;  %v18808_v43 = vcombine.high %v8895_v17, %v8897_v18  ;;  %v8917_v10 = vld [vmem:[#allocation5 + $0x810] sm:$0xff] }
 0x681   : > { %8818 = vmatpush1.bf16.msra.mxu0 %v21015_v16  ;;  %v8902_v16 = vld [vmem:[#allocation5 + $0x518] sm:$0xff] }
 0x682   : > { %8859 = vmatpush1.bf16.msra.mxu1 %v21018_v49  ;;  %10049 = vmatprep.subr.bf16.mxu0 %v18788_v55  ;;  %v18807_v49 = vcombine.low %v8895_v17, %v8897_v18  ;;  %v18809_v55 = vcombine.low %v8896_v19, %v8898_v30  ;;  %v18814_v28 = vcombine.high %v8900_v47, %v8902_v16  ;;  %v8919_v18 = vld [vmem:[#allocation5 + $0x870] sm:$0xff]  ;;  %v8920_v30 = vld [vmem:[#allocation5 + $0x878] sm:$0xff] }
 0x683   : > { %10172 = vmatprep.subr.bf16.mxu1 %v18790_v51  ;;  %v18812_v51 = vcombine.high %v8899_v60, %v8901_v35  ;;  %v8921_v19 = vld [vmem:[#allocation5 + $0x8d0] sm:$0xff] }
 0x684   : > { %8820 = vmatmul.mubr.bf16.vlgmr.msra.gmra.mrb[44].mxu0 %v22613_v15  ;;  %v18795_v15 = vcombine.low %v8883_v61, %v8885_v62  ;;  %v8907_v62 = vld [vmem:[#allocation5 + $0x630] sm:$0xff] }
 0x685   : > { %8861 = vmatmul.mubr.bf16.vlgmr.msra.gmra.mrb[44].mxu1 %v22616_v36  ;;  %10050 = vmatpush1.bf16.msra.mxu0 %v18787_v58  ;;  %v18797_v36 = vcombine.low %v8884_v63, %v8886_v0  ;;  %v8906_v58 = vld [vmem:[#allocation5 + $0x5d8] sm:$0xff]  ;;  %v8909_v63 = vld [vmem:[#allocation5 + $0x690] sm:$0xff] }
 0x686   : > { %10173 = vmatpush1.bf16.msra.mxu1 %v18789_v45  ;;  %10051 = vmatprep.subr.bf16.mxu0 %v18792_v59  ;;  %v18811_v45 = vcombine.low %v8899_v60, %v8901_v35  ;;  %v18813_v59 = vcombine.low %v8900_v47, %v8902_v16  ;;  %v18818_v61 = vcombine.high %v8904_v6, %v8906_v58  ;;  %v8908_v0 = vld [vmem:[#allocation5 + $0x638] sm:$0xff]  ;;  %v8923_v35 = vld [vmem:[#allocation5 + $0x930] sm:$0xff] }
 0x687   : > { %10174 = vmatprep.subr.bf16.mxu1 %v18794_v39  ;;  %10081 = vmatprep.mubr.bf16.mxu0 %v22418_v57  ;;  %v18816_v39 = vcombine.high %v8903_v53, %v8905_v54  ;;  %v8925_v47 = vld [vmem:[#allocation5 + $0x990] sm:$0xff]  ;;  %v8924_v16 = vld [vmem:[#allocation5 + $0x938] sm:$0xff] }
 0x688   : > { %10204 = vmatprep.mubr.bf16.mxu1 %v22418_v57 }
 0x689   : > { %10052 = vmatpush1.bf16.msra.mxu0 %v18791_v1  ;;  %v8910_v1 = vld [vmem:[#allocation5 + $0x698] sm:$0xff] }
 0x68a   : > { %10175 = vmatpush1.bf16.msra.mxu1 %v18793_v2  ;;  %10053 = vmatprep.subr.bf16.mxu0 %v18796_v3  ;;  %v18815_v2 = vcombine.low %v8903_v53, %v8905_v54  ;;  %v18817_v3 = vcombine.low %v8904_v6, %v8906_v58  ;;  %v18822_v37 = vcombine.high %v8908_v0, %v8910_v1  ;;  %v8927_v54 = vld [vmem:[#allocation5 + $0x9f0] sm:$0xff]  ;;  %v8928_v58 = vld [vmem:[#allocation5 + $0x9f8] sm:$0xff] }
 0x68b   : > { %10176 = vmatprep.subr.bf16.mxu1 %v18798_v4  ;;  %v18820_v4 = vcombine.high %v8907_v62, %v8909_v63  ;;  %v8929_v6 = vld [vmem:[#allocation5 + $0xa50] sm:$0xff] }
 0x68d   : > { %10054 = vmatpush1.bf16.msra.mxu0 %v18795_v15  ;;  %v8914_v15 = vld [vmem:[#allocation5 + $0x758] sm:$0xff] }
 0x68e   : > { %10177 = vmatpush1.bf16.msra.mxu1 %v18797_v36  ;;  %10055 = vmatprep.subr.bf16.mxu0 %v18800_v7  ;;  %v18819_v36 = vcombine.low %v8907_v62, %v8909_v63  ;;  %v18821_v7 = vcombine.low %v8908_v0, %v8910_v1  ;;  %v18826_v9 = vcombine.high %v8912_v41, %v8914_v15  ;;  %v8931_v63 = vld [vmem:[#allocation5 + $0xab0] sm:$0xff]  ;;  %v8932_v1 = vld [vmem:[#allocation5 + $0xab8] sm:$0xff] }
 0x68f   : > { %10178 = vmatprep.subr.bf16.mxu1 %v18802_v8  ;;  %v18824_v8 = vcombine.high %v8911_v5, %v8913_v21  ;;  %v8933_v0 = vld [vmem:[#allocation5 + $0xb10] sm:$0xff] }
 0x691   : > { %10056 = vmatpush1.bf16.msra.mxu0 %v18799_v31  ;;  %v8918_v31 = vld [vmem:[#allocation5 + $0x818] sm:$0xff] }
 0x692   : > { %10179 = vmatpush1.bf16.msra.mxu1 %v18801_v14  ;;  %10057 = vmatprep.subr.bf16.mxu0 %v18804_v33  ;;  %v18823_v14 = vcombine.low %v8911_v5, %v8913_v21  ;;  %v18825_v33 = vcombine.low %v8912_v41, %v8914_v15  ;;  %v18830_v17 = vcombine.high %v8916_v13, %v8918_v31  ;;  %v8935_v21 = vld [vmem:[#allocation5 + $0xb70] sm:$0xff]  ;;  %v8936_v15 = vld [vmem:[#allocation5 + $0xb78] sm:$0xff] }
 0x693   : > { %10180 = vmatprep.subr.bf16.mxu1 %v18806_v29  ;;  %v18828_v29 = vcombine.high %v8915_v11, %v8917_v10  ;;  %v8937_v41 = vld [vmem:[#allocation5 + $0xbd0] sm:$0xff] }
 0x695   : > { %10058 = vmatpush1.bf16.msra.mxu0 %v18803_v40  ;;  %v8922_v40 = vld [vmem:[#allocation5 + $0x8d8] sm:$0xff] }
 0x696   : > { %10181 = vmatpush1.bf16.msra.mxu1 %v18805_v52  ;;  %10059 = vmatprep.subr.bf16.mxu0 %v18808_v43  ;;  %v18827_v52 = vcombine.low %v8915_v11, %v8917_v10  ;;  %v18829_v43 = vcombine.low %v8916_v13, %v8918_v31  ;;  %v18834_v60 = vcombine.high %v8920_v30, %v8922_v40  ;;  %v8939_v10 = vld [vmem:[#allocation5 + $0xc30] sm:$0xff]  ;;  %v8940_v31 = vld [vmem:[#allocation5 + $0xc38] sm:$0xff] }
 0x697   : > { %10182 = vmatprep.subr.bf16.mxu1 %v18810_v44  ;;  %v18832_v44 = vcombine.high %v8919_v18, %v8921_v19  ;;  %v8941_v13 = vld [vmem:[#allocation5 + $0xc90] sm:$0xff] }
 0x699   : > { %10060 = vmatpush1.bf16.msra.mxu0 %v18807_v49  ;;  %v8926_v49 = vld [vmem:[#allocation5 + $0x998] sm:$0xff] }
 0x69a   : > { %10183 = vmatpush1.bf16.msra.mxu1 %v18809_v55  ;;  %10061 = vmatprep.subr.bf16.mxu0 %v18812_v51  ;;  %v18831_v55 = vcombine.low %v8919_v18, %v8921_v19  ;;  %v18833_v51 = vcombine.low %v8920_v30, %v8922_v40  ;;  %v18838_v53 = vcombine.high %v8924_v16, %v8926_v49  ;;  %v8943_v19 = vld [vmem:[#allocation5 + $0xcf0] sm:$0xff]  ;;  %v8944_v40 = vld [vmem:[#allocation5 + $0xcf8] sm:$0xff] }
 0x69b   : > { %10184 = vmatprep.subr.bf16.mxu1 %v18814_v28  ;;  %v18836_v28 = vcombine.high %v8923_v35, %v8925_v47  ;;  %v8945_v30 = vld [vmem:[#allocation5 + $0xd50] sm:$0xff] }
 0x69d   : > { %10062 = vmatpush1.bf16.msra.mxu0 %v18811_v45  ;;  %v8930_v45 = vld [vmem:[#allocation5 + $0xa58] sm:$0xff] }
 0x69e   : > { %10185 = vmatpush1.bf16.msra.mxu1 %v18813_v59  ;;  %10063 = vmatprep.subr.bf16.mxu0 %v18816_v39  ;;  %v18835_v59 = vcombine.low %v8923_v35, %v8925_v47  ;;  %v18837_v39 = vcombine.low %v8924_v16, %v8926_v49  ;;  %v18842_v62 = vcombine.high %v8928_v58, %v8930_v45  ;;  %v8947_v47 = vld [vmem:[#allocation5 + $0xdb0] sm:$0xff]  ;;  %v8948_v49 = vld [vmem:[#allocation5 + $0xdb8] sm:$0xff] }
 0x69f   : > { %10186 = vmatprep.subr.bf16.mxu1 %v18818_v61  ;;  %v18840_v61 = vcombine.high %v8927_v54, %v8929_v6  ;;  %v8949_v16 = vld [vmem:[#allocation5 + $0xe10] sm:$0xff] }
 0x6a1   : > { %10064 = vmatpush1.bf16.msra.mxu0 %v18815_v2  ;;  %v8934_v2 = vld [vmem:[#allocation5 + $0xb18] sm:$0xff] }
 0x6a2   : > { %10187 = vmatpush1.bf16.msra.mxu1 %v18817_v3  ;;  %10065 = vmatprep.subr.bf16.mxu0 %v18820_v4  ;;  %v18839_v3 = vcombine.low %v8927_v54, %v8929_v6  ;;  %v18841_v4 = vcombine.low %v8928_v58, %v8930_v45  ;;  %v18846_v5 = vcombine.high %v8932_v1, %v8934_v2  ;;  %v8951_v6 = vld [vmem:[#allocation5 + $0xe70] sm:$0xff]  ;;  %v8952_v45 = vld [vmem:[#allocation5 + $0xe78] sm:$0xff] }
 0x6a3   : > { %10188 = vmatprep.subr.bf16.mxu1 %v18822_v37  ;;  %v18844_v37 = vcombine.high %v8931_v63, %v8933_v0  ;;  %v8953_v58 = vld [vmem:[#allocation5 + $0xed0] sm:$0xff] }
 0x6a5   : > { %10066 = vmatpush1.bf16.msra.mxu0 %v18819_v36  ;;  %v8938_v36 = vld [vmem:[#allocation5 + $0xbd8] sm:$0xff] }
 0x6a6   : > { %10189 = vmatpush1.bf16.msra.mxu1 %v18821_v7  ;;  %10067 = vmatprep.subr.bf16.mxu0 %v18824_v8  ;;  %v18843_v7 = vcombine.low %v8931_v63, %v8933_v0  ;;  %v18845_v8 = vcombine.low %v8932_v1, %v8934_v2  ;;  %v18850_v11 = vcombine.high %v8936_v15, %v8938_v36  ;;  %v8955_v0 = vld [vmem:[#allocation5 + $0xf30] sm:$0xff]  ;;  %v8956_v2 = vld [vmem:[#allocation5 + $0xf38] sm:$0xff] }
 0x6a7   : > { %10190 = vmatprep.subr.bf16.mxu1 %v18826_v9  ;;  %v18848_v9 = vcombine.high %v8935_v21, %v8937_v41  ;;  %v8957_v1 = vld [vmem:[#allocation5 + $0xf90] sm:$0xff] }
 0x6a9   : > { %10068 = vmatpush1.bf16.msra.mxu0 %v18823_v14  ;;  %v8942_v14 = vld [vmem:[#allocation5 + $0xc98] sm:$0xff] }
 0x6aa   : > { %10191 = vmatpush1.bf16.msra.mxu1 %v18825_v33  ;;  %10069 = vmatprep.subr.bf16.mxu0 %v18828_v29  ;;  %v18847_v33 = vcombine.low %v8935_v21, %v8937_v41  ;;  %v18849_v29 = vcombine.low %v8936_v15, %v8938_v36  ;;  %v18854_v18 = vcombine.high %v8940_v31, %v8942_v14  ;;  %v8959_v41 = vld [vmem:[#allocation5 + $0xff0] sm:$0xff]  ;;  %v8960_v36 = vld [vmem:[#allocation5 + $0xff8] sm:$0xff] }
 0x6ab   : > { %10192 = vmatprep.subr.bf16.mxu1 %v18830_v17  ;;  %v18852_v17 = vcombine.high %v8939_v10, %v8941_v13  ;;  %v8961_v15 = vld [vmem:[#allocation5 + $0x1050] sm:$0xff] }
 0x6ad   : > { %10070 = vmatpush1.bf16.msra.mxu0 %v18827_v52  ;;  %v8946_v52 = vld [vmem:[#allocation5 + $0xd58] sm:$0xff] }
 0x6ae   : > { %10193 = vmatpush1.bf16.msra.mxu1 %v18829_v43  ;;  %10071 = vmatprep.subr.bf16.mxu0 %v18832_v44  ;;  %v18851_v43 = vcombine.low %v8939_v10, %v8941_v13  ;;  %v18853_v44 = vcombine.low %v8940_v31, %v8942_v14  ;;  %v18858_v35 = vcombine.high %v8944_v40, %v8946_v52  ;;  %v8963_v13 = vld [vmem:[#allocation5 + $0x10b0] sm:$0xff]  ;;  %v8964_v14 = vld [vmem:[#allocation5 + $0x10b8] sm:$0xff] }
 0x6af   : > { %10194 = vmatprep.subr.bf16.mxu1 %v18834_v60  ;;  %v18856_v60 = vcombine.high %v8943_v19, %v8945_v30  ;;  %v8965_v31 = vld [vmem:[#allocation5 + $0x1110] sm:$0xff] }
 0x6b1   : > { %10072 = vmatpush1.bf16.msra.mxu0 %v18831_v55  ;;  %v8950_v55 = vld [vmem:[#allocation5 + $0xe18] sm:$0xff] }
 0x6b2   : > { %10195 = vmatpush1.bf16.msra.mxu1 %v18833_v51  ;;  %10073 = vmatprep.subr.bf16.mxu0 %v18836_v28  ;;  %v18855_v51 = vcombine.low %v8943_v19, %v8945_v30  ;;  %v18857_v28 = vcombine.low %v8944_v40, %v8946_v52  ;;  %v18862_v54 = vcombine.high %v8948_v49, %v8950_v55  ;;  %v8967_v40 = vld [vmem:[#allocation5 + $0x1170] sm:$0xff] }
 0x6b3   : > { %10196 = vmatprep.subr.bf16.mxu1 %v18838_v53  ;;  %v18860_v53 = vcombine.high %v8947_v47, %v8949_v16  ;;  %v8969_v52 = vld [vmem:[#allocation5 + $0x11d0] sm:$0xff] }
 0x6b5   : > { %10074 = vmatpush1.bf16.msra.mxu0 %v18835_v59  ;;  %v8954_v59 = vld [vmem:[#allocation5 + $0xed8] sm:$0xff] }
 0x6b6   : > { %10197 = vmatpush1.bf16.msra.mxu1 %v18837_v39  ;;  %10075 = vmatprep.subr.bf16.mxu0 %v18840_v61  ;;  %v18859_v39 = vcombine.low %v8947_v47, %v8949_v16  ;;  %v18861_v61 = vcombine.low %v8948_v49, %v8950_v55  ;;  %v18866_v63 = vcombine.high %v8952_v45, %v8954_v59 }
 0x6b7   : > { %10198 = vmatprep.subr.bf16.mxu1 %v18842_v62  ;;  %v18864_v62 = vcombine.high %v8951_v6, %v8953_v58  ;;  %v18875_v55 = vcombine.low %v8963_v13, %v8965_v31 }
 0x6b9   : > { %10076 = vmatpush1.bf16.msra.mxu0 %v18839_v3  ;;  %v8958_v3 = vld [vmem:[#allocation5 + $0xf98] sm:$0xff] }
 0x6ba   : > { %10199 = vmatpush1.bf16.msra.mxu1 %v18841_v4  ;;  %10077 = vmatprep.subr.bf16.mxu0 %v18844_v37  ;;  %v18863_v4 = vcombine.low %v8951_v6, %v8953_v58  ;;  %v18865_v37 = vcombine.low %v8952_v45, %v8954_v59  ;;  %v18870_v21 = vcombine.high %v8956_v2, %v8958_v3 }
 0x6bb   : > { %10200 = vmatprep.subr.bf16.mxu1 %v18846_v5  ;;  %v18868_v5 = vcombine.high %v8955_v0, %v8957_v1  ;;  %v18880_v6 = vcombine.high %v8967_v40, %v8969_v52 }
 0x6bd   : > { %10078 = vmatpush1.bf16.msra.mxu0 %v18843_v7  ;;  %v8962_v7 = vld [vmem:[#allocation5 + $0x1058] sm:$0xff] }
 0x6be   : > { %10201 = vmatpush1.bf16.msra.mxu1 %v18845_v8  ;;  %10079 = vmatprep.subr.bf16.mxu0 %v18848_v9  ;;  %v18867_v8 = vcombine.low %v8955_v0, %v8957_v1  ;;  %v18869_v9 = vcombine.low %v8956_v2, %v8958_v3  ;;  %v18874_v10 = vcombine.high %v8960_v36, %v8962_v7  ;;  %v8974_v0 = vld [vmem:[#allocation5 + $0x1298] sm:$0xff] }
 0x6bf   : > { %10202 = vmatprep.subr.bf16.mxu1 %v18850_v11  ;;  %v18872_v11 = vcombine.high %v8959_v41, %v8961_v15  ;;  %v18879_v1 = vcombine.low %v8967_v40, %v8969_v52 }
 0x6c1   : > { %10080 = vmatpush1.bf16.msra.mxu0 %v18847_v33  ;;  %v8966_v33 = vld [vmem:[#allocation5 + $0x1118] sm:$0xff] }
 0x6c2   : > { %10203 = vmatpush1.bf16.msra.mxu1 %v18849_v29  ;;  %10090 = vmatprep.subr.bf16.mxu0 %v18852_v17  ;;  %v18871_v29 = vcombine.low %v8959_v41, %v8961_v15  ;;  %v18873_v17 = vcombine.low %v8960_v36, %v8962_v7  ;;  %v18878_v30 = vcombine.high %v8964_v14, %v8966_v33  ;;  %v8979_v7 = vld [vmem:[#allocation5 + $0x13b0] sm:$0xff] }
 0x6c3   : > { %10213 = vmatprep.subr.bf16.mxu1 %v18854_v18  ;;  %v18876_v18 = vcombine.high %v8963_v13, %v8965_v31 }
 0x6c4   : > { %10082 = vmatmul.mubr.bf16.vlgmr.msra.gmra.mrb[48].mxu0 %v22423_v12 }
 0x6c5   : > { %10091 = vmatpush1.bf16.msra.mxu0 %v18851_v43  ;;  %10205 = vmatmul.mubr.bf16.vlgmr.msra.gmra.mrb[48].mxu1 %v22423_v12 }
 0x6c6   : > { %10214 = vmatpush1.bf16.msra.mxu1 %v18853_v44  ;;  %10092 = vmatprep.subr.bf16.mxu0 %v18856_v60  ;;  %v8968_v60 = vld [vmem:[#allocation5 + $0x1178] sm:$0xff] }
 0x6c7   : > { %10215 = vmatprep.subr.bf16.mxu1 %v18858_v35  ;;  %10122 = vmatprep.mubr.bf16.mxu0 %v22426_v23  ;;  %v8970_v35 = vld [vmem:[#allocation5 + $0x11d8] sm:$0xff] }
 0x6c8   : > { %10245 = vmatprep.mubr.bf16.mxu1 %v22426_v23  ;;  %v18882_v59 = vcombine.high %v8968_v60, %v8970_v35  ;;  %v18881_v2 = vcombine.low %v8968_v60, %v8970_v35  ;;  %v8988_v60 = vld [vmem:[#allocation5 + $0x1538] sm:$0xff] }
 0x6c9   : > { %10093 = vmatpush1.bf16.msra.mxu0 %v18855_v51  ;;  %v8990_v35 = vld [vmem:[#allocation5 + $0x1598] sm:$0xff] }
 0x6ca   : > { %10216 = vmatpush1.bf16.msra.mxu1 %v18857_v28  ;;  %10094 = vmatprep.subr.bf16.mxu0 %v18860_v53 }
 0x6cb   : > { %10217 = vmatprep.subr.bf16.mxu1 %v18862_v54  ;;  %v18877_v54 = vcombine.low %v8964_v14, %v8966_v33  ;;  %v8983_v33 = vld [vmem:[#allocation5 + $0x1470] sm:$0xff] }
 0x6cd   : > { %10095 = vmatpush1.bf16.msra.mxu0 %v18859_v39  ;;  %v8971_v39 = vld [vmem:[#allocation5 + $0x1230] sm:$0xff] }
 0x6ce   : > { %10218 = vmatpush1.bf16.msra.mxu1 %v18861_v61  ;;  %10096 = vmatprep.subr.bf16.mxu0 %v18864_v62  ;;  %v8973_v61 = vld [vmem:[#allocation5 + $0x1290] sm:$0xff] }
 0x6cf   : > { %10219 = vmatprep.subr.bf16.mxu1 %v18866_v63  ;;  %v8972_v63 = vld [vmem:[#allocation5 + $0x1238] sm:$0xff]  ;;  %v18884_v3 = vcombine.high %v8971_v39, %v8973_v61  ;;  %v18883_v41 = vcombine.low %v8971_v39, %v8973_v61  ;;  %v8995_v61 = vld [vmem:[#allocation5 + $0x16b0] sm:$0xff] }
 0x6d1   : > { %10097 = vmatpush1.bf16.msra.mxu0 %v18863_v4  ;;  %v18886_v4 = vcombine.high %v8972_v63, %v8974_v0 }
 0x6d2   : > { %10220 = vmatpush1.bf16.msra.mxu1 %v18865_v37  ;;  %10098 = vmatprep.subr.bf16.mxu0 %v18868_v5  ;;  %v8977_v37 = vld [vmem:[#allocation5 + $0x1350] sm:$0xff]  ;;  %v8976_v5 = vld [vmem:[#allocation5 + $0x12f8] sm:$0xff] }
 0x6d3   : > { %10221 = vmatprep.subr.bf16.mxu1 %v18870_v21  ;;  %v8978_v21 = vld [vmem:[#allocation5 + $0x1358] sm:$0xff] }
 0x6d4   : > { %v18890_v36 = vcombine.high %v8976_v5, %v8978_v21  ;;  %v18889_v13 = vcombine.low %v8976_v5, %v8978_v21  ;;  %v9001_v5 = vld [vmem:[#allocation5 + $0x17d0] sm:$0xff]  ;;  %v9000_v21 = vld [vmem:[#allocation5 + $0x1778] sm:$0xff] }
 0x6d5   : > { %10099 = vmatpush1.bf16.msra.mxu0 %v18867_v8  ;;  %v8981_v8 = vld [vmem:[#allocation5 + $0x1410] sm:$0xff] }
 0x6d6   : > { %10222 = vmatpush1.bf16.msra.mxu1 %v18869_v9  ;;  %10100 = vmatprep.subr.bf16.mxu0 %v18872_v11  ;;  %v8980_v9 = vld [vmem:[#allocation5 + $0x13b8] sm:$0xff]  ;;  %v18892_v31 = vcombine.high %v8979_v7, %v8981_v8 }
 0x6d7   : > { %v8657_v19 = vpop.f32.mrb[36].mxu0  ;;  %10223 = vmatprep.subr.bf16.mxu1 %v18874_v10  ;;  %v8982_v11 = vld [vmem:[#allocation5 + $0x1418] sm:$0xff] }
 0x6d8   : > { %v8698_v43 = vpop.f32.mrb[36].mxu1  ;;  %v8659_v44 = vpop.f32.mrb[37].mxu0  ;;  %v18894_v14 = vcombine.high %v8980_v9, %v8982_v11 }
 0x6d9   : > { %v8699_v47 = vadd.f32 %v8698_v43, %v8657_v19  ;;  %v8700_v16 = vpop.f32.mrb[37].mxu1  ;;  %10101 = vmatpush1.bf16.msra.mxu0 %v18871_v29  ;;  %v8661_v49 = vpop.f32.mrb[38].mxu0  ;;  %v8985_v29 = vld [vmem:[#allocation5 + $0x14d0] sm:$0xff]  ;;  %v18891_v19 = vcombine.low %v8979_v7, %v8981_v8 }
 0x6da   : > { %v8701_v51 = vadd.f32 %v8700_v16, %v8659_v44  ;;  %10224 = vmatpush1.bf16.msra.mxu1 %v18873_v17  ;;  %v8702_v28 = vpop.f32.mrb[38].mxu1  ;;  %v8662_v53 = vpop.f32.mrb[39].mxu0  ;;  %10102 = vmatprep.subr.bf16.mxu0 %v18876_v18  ;;  %v8984_v17 = vld [vmem:[#allocation5 + $0x1478] sm:$0xff]  ;;  %v18896_v40 = vcombine.high %v8983_v33, %v8985_v29  ;;  %v8987_v43 = vld [vmem:[#allocation5 + $0x1530] sm:$0xff] }
 0x6db   : > { %v22636_v58 = vadd.f32 %v8699_v47, %v22583_v46  ;;  %v8703_v45 = vpop.f32.mrb[39].mxu1  ;;  %10225 = vmatprep.subr.bf16.mxu1 %v18878_v30  ;;  %v8975_v46 = vld [vmem:[#allocation5 + $0x12f0] sm:$0xff]  ;;  %v8986_v18 = vld [vmem:[#allocation5 + $0x14d8] sm:$0xff]  ;;  %v18893_v30 = vcombine.low %v8980_v9, %v8982_v11  ;;  %v18895_v47 = vcombine.low %v8983_v33, %v8985_v29 }
 0x6dc   : > { %v22639_v62 = vadd.f32 %v8701_v51, %v22585_v50  ;;  %v18885_v50 = vcombine.low %v8972_v63, %v8974_v0  ;;  %v18888_v15 = vcombine.high %v8975_v46, %v8977_v37  ;;  %v18887_v10 = vcombine.low %v8975_v46, %v8977_v37  ;;  %v8989_v44 = vld [vmem:[#allocation5 + $0x1590] sm:$0xff]  ;;  %v8992_v53 = vld [vmem:[#allocation5 + $0x15f8] sm:$0xff] }
 0x6dd   : > { %10103 = vmatpush1.bf16.msra.mxu0 %v18875_v55  ;;  %v18898_v52 = vcombine.high %v8984_v17, %v8986_v18  ;;  %v18897_v16 = vcombine.low %v8984_v17, %v8986_v18  ;;  %v18900_v49 = vcombine.high %v8987_v43, %v8989_v44  ;;  %v18902_v55 = vcombine.high %v8988_v60, %v8990_v35  ;;  %v8991_v51 = vld [vmem:[#allocation5 + $0x15f0] sm:$0xff]  ;;  %v8996_v0 = vld [vmem:[#allocation5 + $0x16b8] sm:$0xff] }
 0x6de   : > { %10226 = vmatpush1.bf16.msra.mxu1 %v18877_v54  ;;  %10104 = vmatprep.subr.bf16.mxu0 %v18880_v6  ;;  %v8993_v28 = vld [vmem:[#allocation5 + $0x1650] sm:$0xff]  ;;  %v8994_v54 = vld [vmem:[#allocation5 + $0x1658] sm:$0xff]  ;;  %v18899_v6 = vcombine.low %v8987_v43, %v8989_v44  ;;  %v18901_v45 = vcombine.low %v8988_v60, %v8990_v35 }
 0x6df   : > { %10227 = vmatprep.subr.bf16.mxu1 %v18882_v59  ;;  %v18904_v59 = vcombine.high %v8991_v51, %v8993_v28  ;;  %v18906_v39 = vcombine.high %v8992_v53, %v8994_v54  ;;  %v8997_v63 = vld [vmem:[#allocation5 + $0x1710] sm:$0xff]  ;;  %v9004_v11 = vld [vmem:[#allocation5 + $0x1838] sm:$0xff] }
 0x6e0   : > { %v8999_v37 = vld [vmem:[#allocation5 + $0x1770] sm:$0xff]  ;;  %v9008_v18 = vld [vmem:[#allocation5 + $0x18f8] sm:$0xff] }
 0x6e1   : > { %10105 = vmatpush1.bf16.msra.mxu0 %v18879_v1  ;;  %v8998_v1 = vld [vmem:[#allocation5 + $0x1718] sm:$0xff]  ;;  %v9003_v8 = vld [vmem:[#allocation5 + $0x1830] sm:$0xff] }
 0x6e2   : > { %10228 = vmatpush1.bf16.msra.mxu1 %v18881_v2  ;;  %10106 = vmatprep.subr.bf16.mxu0 %v18884_v3  ;;  %v18903_v2 = vcombine.low %v8991_v51, %v8993_v28  ;;  %v18905_v3 = vcombine.low %v8992_v53, %v8994_v54  ;;  %v18910_v46 = vcombine.high %v8996_v0, %v8998_v1  ;;  %v9005_v9 = vld [vmem:[#allocation5 + $0x1890] sm:$0xff]  ;;  %v9012_v35 = vld [vmem:[#allocation5 + $0x19b8] sm:$0xff] }
 0x6e3   : > { %10229 = vmatprep.subr.bf16.mxu1 %v18886_v4  ;;  %v18908_v4 = vcombine.high %v8995_v61, %v8997_v63  ;;  %v9007_v29 = vld [vmem:[#allocation5 + $0x18f0] sm:$0xff]  ;;  %v9016_v54 = vld [vmem:[#allocation5 + $0x1a78] sm:$0xff] }
 0x6e4   : > { %v9009_v17 = vld [vmem:[#allocation5 + $0x1950] sm:$0xff] }
 0x6e5   : > { %10107 = vmatpush1.bf16.msra.mxu0 %v18883_v41  ;;  %v9002_v41 = vld [vmem:[#allocation5 + $0x17d8] sm:$0xff]  ;;  %v9011_v44 = vld [vmem:[#allocation5 + $0x19b0] sm:$0xff] }
 0x6e6   : > { %10230 = vmatpush1.bf16.msra.mxu1 %v18885_v50  ;;  %10108 = vmatprep.subr.bf16.mxu0 %v18888_v15  ;;  %v18907_v50 = vcombine.low %v8995_v61, %v8997_v63  ;;  %v18909_v15 = vcombine.low %v8996_v0, %v8998_v1  ;;  %v18914_v7 = vcombine.high %v9000_v21, %v9002_v41  ;;  %v9013_v60 = vld [vmem:[#allocation5 + $0x1a10] sm:$0xff]  ;;  %v9020_v1 = vld [vmem:[#allocation5 + $0x1b38] sm:$0xff] }
 0x6e7   : > { %10231 = vmatprep.subr.bf16.mxu1 %v18890_v36  ;;  %v18912_v36 = vcombine.high %v8999_v37, %v9001_v5  ;;  %v9015_v28 = vld [vmem:[#allocation5 + $0x1a70] sm:$0xff] }
 0x6e8   : > { %v9017_v53 = vld [vmem:[#allocation5 + $0x1ad0] sm:$0xff] }
 0x6e9   : > { %10109 = vmatpush1.bf16.msra.mxu0 %v18887_v10  ;;  %v9006_v10 = vld [vmem:[#allocation5 + $0x1898] sm:$0xff]  ;;  %v9019_v63 = vld [vmem:[#allocation5 + $0x1b30] sm:$0xff] }
 0x6ea   : > { %10232 = vmatpush1.bf16.msra.mxu1 %v18889_v13  ;;  %10110 = vmatprep.subr.bf16.mxu0 %v18892_v31  ;;  %v18911_v13 = vcombine.low %v8999_v37, %v9001_v5  ;;  %v18913_v31 = vcombine.low %v9000_v21, %v9002_v41  ;;  %v18918_v33 = vcombine.high %v9004_v11, %v9006_v10  ;;  %v9021_v0 = vld [vmem:[#allocation5 + $0x1b90] sm:$0xff]  ;;  %v9024_v41 = vld [vmem:[#allocation5 + $0x1bf8] sm:$0xff] }
 0x6eb   : > { %10233 = vmatprep.subr.bf16.mxu1 %v18894_v14  ;;  %v18916_v14 = vcombine.high %v9003_v8, %v9005_v9  ;;  %v9023_v5 = vld [vmem:[#allocation5 + $0x1bf0] sm:$0xff] }
 0x6ec   : > { %v9025_v21 = vld [vmem:[#allocation5 + $0x1c50] sm:$0xff] }
 0x6ed   : > { %10111 = vmatpush1.bf16.msra.mxu0 %v18891_v19  ;;  %v9010_v19 = vld [vmem:[#allocation5 + $0x1958] sm:$0xff] }
 0x6ee   : > { %10234 = vmatpush1.bf16.msra.mxu1 %v18893_v30  ;;  %10112 = vmatprep.subr.bf16.mxu0 %v18896_v40  ;;  %v18915_v30 = vcombine.low %v9003_v8, %v9005_v9  ;;  %v18917_v40 = vcombine.low %v9004_v11, %v9006_v10  ;;  %v18922_v43 = vcombine.high %v9008_v18, %v9010_v19  ;;  %v9027_v9 = vld [vmem:[#allocation5 + $0x1cb0] sm:$0xff]  ;;  %v9028_v10 = vld [vmem:[#allocation5 + $0x1cb8] sm:$0xff] }
 0x6ef   : > { %10235 = vmatprep.subr.bf16.mxu1 %v18898_v52  ;;  %v18920_v52 = vcombine.high %v9007_v29, %v9009_v17  ;;  %v9029_v11 = vld [vmem:[#allocation5 + $0x1d10] sm:$0xff] }
 0x6f1   : > { %10113 = vmatpush1.bf16.msra.mxu0 %v18895_v47  ;;  %v9014_v47 = vld [vmem:[#allocation5 + $0x1a18] sm:$0xff] }
 0x6f2   : > { %10236 = vmatpush1.bf16.msra.mxu1 %v18897_v16  ;;  %10114 = vmatprep.subr.bf16.mxu0 %v18900_v49  ;;  %v18919_v16 = vcombine.low %v9007_v29, %v9009_v17  ;;  %v18921_v49 = vcombine.low %v9008_v18, %v9010_v19  ;;  %v18926_v51 = vcombine.high %v9012_v35, %v9014_v47  ;;  %v9031_v18 = vld [vmem:[#allocation5 + $0x1d70] sm:$0xff] }
 0x6f3   : > { %10237 = vmatprep.subr.bf16.mxu1 %v18902_v55  ;;  %v18924_v55 = vcombine.high %v9011_v44, %v9013_v60  ;;  %v9033_v19 = vld [vmem:[#allocation5 + $0x1dd0] sm:$0xff] }
 0x6f5   : > { %10115 = vmatpush1.bf16.msra.mxu0 %v18899_v6  ;;  %v9018_v6 = vld [vmem:[#allocation5 + $0x1ad8] sm:$0xff] }
 0x6f6   : > { %10238 = vmatpush1.bf16.msra.mxu1 %v18901_v45  ;;  %10116 = vmatprep.subr.bf16.mxu0 %v18904_v59  ;;  %v18923_v45 = vcombine.low %v9011_v44, %v9013_v60  ;;  %v18925_v59 = vcombine.low %v9012_v35, %v9014_v47  ;;  %v18930_v61 = vcombine.high %v9016_v54, %v9018_v6 }
 0x6f7   : > { %10239 = vmatprep.subr.bf16.mxu1 %v18906_v39  ;;  %v18928_v39 = vcombine.high %v9015_v28, %v9017_v53  ;;  %v18939_v47 = vcombine.low %v9027_v9, %v9029_v11 }
 0x6f9   : > { %10117 = vmatpush1.bf16.msra.mxu0 %v18903_v2  ;;  %v9022_v2 = vld [vmem:[#allocation5 + $0x1b98] sm:$0xff] }
 0x6fa   : > { %10240 = vmatpush1.bf16.msra.mxu1 %v18905_v3  ;;  %10118 = vmatprep.subr.bf16.mxu0 %v18908_v4  ;;  %v18927_v3 = vcombine.low %v9015_v28, %v9017_v53  ;;  %v18929_v4 = vcombine.low %v9016_v54, %v9018_v6  ;;  %v18934_v37 = vcombine.high %v9020_v1, %v9022_v2 }
 0x6fb   : > { %10241 = vmatprep.subr.bf16.mxu1 %v18910_v46  ;;  %v18932_v46 = vcombine.high %v9019_v63, %v9021_v0  ;;  %v18944_v28 = vcombine.high %v9031_v18, %v9033_v19 }
 0x6fd   : > { %10119 = vmatpush1.bf16.msra.mxu0 %v18907_v50  ;;  %v9026_v50 = vld [vmem:[#allocation5 + $0x1c58] sm:$0xff] }
 0x6fe   : > { %10242 = vmatpush1.bf16.msra.mxu1 %v18909_v15  ;;  %10120 = vmatprep.subr.bf16.mxu0 %v18912_v36  ;;  %v18931_v15 = vcombine.low %v9019_v63, %v9021_v0  ;;  %v18933_v36 = vcombine.low %v9020_v1, %v9022_v2  ;;  %v18938_v8 = vcombine.high %v9024_v41, %v9026_v50  ;;  %v9038_v63 = vld [vmem:[#allocation5 + $0x1e98] sm:$0xff] }
 0x6ff   : > { %10243 = vmatprep.subr.bf16.mxu1 %v18914_v7  ;;  %v18936_v7 = vcombine.high %v9023_v5, %v9025_v21  ;;  %v18943_v0 = vcombine.low %v9031_v18, %v9033_v19 }
 0x701   : > { %10121 = vmatpush1.bf16.msra.mxu0 %v18911_v13  ;;  %v9030_v13 = vld [vmem:[#allocation5 + $0x1d18] sm:$0xff] }
 0x702   : > { %10244 = vmatpush1.bf16.msra.mxu1 %v18913_v31  ;;  %10131 = vmatprep.subr.bf16.mxu0 %v18916_v14  ;;  %v18935_v31 = vcombine.low %v9023_v5, %v9025_v21  ;;  %v18937_v14 = vcombine.low %v9024_v41, %v9026_v50  ;;  %v18942_v17 = vcombine.high %v9028_v10, %v9030_v13  ;;  %v9043_v50 = vld [vmem:[#allocation5 + $0x1fb0] sm:$0xff] }
 0x703   : > { %10254 = vmatprep.subr.bf16.mxu1 %v18918_v33  ;;  %v18940_v33 = vcombine.high %v9027_v9, %v9029_v11 }
 0x704   : > { %10123 = vmatmul.mubr.bf16.vlgmr.msra.gmra.mrb[48].mxu0 %v22434_v25 }
 0x705   : > { %10132 = vmatpush1.bf16.msra.mxu0 %v18915_v30  ;;  %10246 = vmatmul.mubr.bf16.vlgmr.msra.gmra.mrb[48].mxu1 %v22434_v25 }
 0x706   : > { %10255 = vmatpush1.bf16.msra.mxu1 %v18917_v40  ;;  %10133 = vmatprep.subr.bf16.mxu0 %v18920_v52  ;;  %v9032_v52 = vld [vmem:[#allocation5 + $0x1d78] sm:$0xff] }
 0x707   : > { %10256 = vmatprep.subr.bf16.mxu1 %v18922_v43  ;;  %10163 = vmatprep.mubr.bf16.mxu0 %v22436_v34  ;;  %v9034_v43 = vld [vmem:[#allocation5 + $0x1dd8] sm:$0xff] }
 0x708   : > { %10286 = vmatprep.mubr.bf16.mxu1 %v22436_v34  ;;  %v18946_v6 = vcombine.high %v9032_v52, %v9034_v43  ;;  %v18945_v1 = vcombine.low %v9032_v52, %v9034_v43  ;;  %v9052_v52 = vld [vmem:[#allocation5 + $0x2138] sm:$0xff] }
 0x709   : > { %10134 = vmatpush1.bf16.msra.mxu0 %v18919_v16  ;;  %v9054_v43 = vld [vmem:[#allocation5 + $0x2198] sm:$0xff] }
 0x70a   : > { %10257 = vmatpush1.bf16.msra.mxu1 %v18921_v49  ;;  %10135 = vmatprep.subr.bf16.mxu0 %v18924_v55 }
 0x70b   : > { %10258 = vmatprep.subr.bf16.mxu1 %v18926_v51  ;;  %v18941_v51 = vcombine.low %v9028_v10, %v9030_v13  ;;  %v9047_v13 = vld [vmem:[#allocation5 + $0x2070] sm:$0xff] }
 0x70d   : > { %10136 = vmatpush1.bf16.msra.mxu0 %v18923_v45  ;;  %v9035_v45 = vld [vmem:[#allocation5 + $0x1e30] sm:$0xff] }
 0x70e   : > { %10259 = vmatpush1.bf16.msra.mxu1 %v18925_v59  ;;  %10137 = vmatprep.subr.bf16.mxu0 %v18928_v39  ;;  %v9037_v59 = vld [vmem:[#allocation5 + $0x1e90] sm:$0xff] }
 0x70f   : > { %10260 = vmatprep.subr.bf16.mxu1 %v18930_v61  ;;  %v9036_v61 = vld [vmem:[#allocation5 + $0x1e38] sm:$0xff]  ;;  %v18948_v2 = vcombine.high %v9035_v45, %v9037_v59  ;;  %v18947_v5 = vcombine.low %v9035_v45, %v9037_v59  ;;  %v9059_v59 = vld [vmem:[#allocation5 + $0x22b0] sm:$0xff] }
 0x711   : > { %10138 = vmatpush1.bf16.msra.mxu0 %v18927_v3  ;;  %v18950_v3 = vcombine.high %v9036_v61, %v9038_v63 }
 0x712   : > { %10261 = vmatpush1.bf16.msra.mxu1 %v18929_v4  ;;  %10139 = vmatprep.subr.bf16.mxu0 %v18932_v46  ;;  %v9041_v4 = vld [vmem:[#allocation5 + $0x1f50] sm:$0xff]  ;;  %v9040_v46 = vld [vmem:[#allocation5 + $0x1ef8] sm:$0xff] }
 0x713   : > { %10262 = vmatprep.subr.bf16.mxu1 %v18934_v37  ;;  %v9042_v37 = vld [vmem:[#allocation5 + $0x1f58] sm:$0xff] }
 0x714   : > { %v18954_v41 = vcombine.high %v9040_v46, %v9042_v37  ;;  %v18953_v9 = vcombine.low %v9040_v46, %v9042_v37  ;;  %v9065_v46 = vld [vmem:[#allocation5 + $0x23d0] sm:$0xff]  ;;  %v9064_v37 = vld [vmem:[#allocation5 + $0x2378] sm:$0xff] }
 0x715   : > { %10140 = vmatpush1.bf16.msra.mxu0 %v18931_v15  ;;  %v9045_v15 = vld [vmem:[#allocation5 + $0x2010] sm:$0xff] }
 0x716   : > { %10263 = vmatpush1.bf16.msra.mxu1 %v18933_v36  ;;  %10141 = vmatprep.subr.bf16.mxu0 %v18936_v7  ;;  %v9044_v36 = vld [vmem:[#allocation5 + $0x1fb8] sm:$0xff]  ;;  %v18956_v11 = vcombine.high %v9043_v50, %v9045_v15 }
 0x717   : > { %v8739_v29 = vpop.f32.mrb[40].mxu0  ;;  %10264 = vmatprep.subr.bf16.mxu1 %v18938_v8  ;;  %v9046_v7 = vld [vmem:[#allocation5 + $0x2018] sm:$0xff] }
 0x718   : > { %v8780_v30 = vpop.f32.mrb[40].mxu1  ;;  %v8741_v40 = vpop.f32.mrb[41].mxu0  ;;  %v18958_v10 = vcombine.high %v9044_v36, %v9046_v7 }
 0x719   : > { %v8781_v44 = vadd.f32 %v8780_v30, %v8739_v29  ;;  %v8782_v60 = vpop.f32.mrb[41].mxu1  ;;  %v8743_v35 = vpop.f32.mrb[42].mxu0  ;;  %10142 = vmatpush1.bf16.msra.mxu0 %v18935_v31  ;;  %v9049_v31 = vld [vmem:[#allocation5 + $0x20d0] sm:$0xff]  ;;  %v18955_v29 = vcombine.low %v9043_v50, %v9045_v15 }
 0x71a   : > { %v8783_v16 = vadd.f32 %v8782_v60, %v8741_v40  ;;  %v8784_v49 = vpop.f32.mrb[42].mxu1  ;;  %10265 = vmatpush1.bf16.msra.mxu1 %v18937_v14  ;;  %v8744_v55 = vpop.f32.mrb[43].mxu0  ;;  %10143 = vmatprep.subr.bf16.mxu0 %v18940_v33  ;;  %v9048_v14 = vld [vmem:[#allocation5 + $0x2078] sm:$0xff]  ;;  %v18960_v18 = vcombine.high %v9047_v13, %v9049_v31  ;;  %v9051_v30 = vld [vmem:[#allocation5 + $0x2130] sm:$0xff] }
 0x71b   : > { %v22646_v53 = vadd.f32 %v8781_v44, %v22593_v42  ;;  %v8785_v54 = vpop.f32.mrb[43].mxu1  ;;  %10266 = vmatprep.subr.bf16.mxu1 %v18942_v17  ;;  %v9039_v42 = vld [vmem:[#allocation5 + $0x1ef0] sm:$0xff]  ;;  %v9050_v33 = vld [vmem:[#allocation5 + $0x20d8] sm:$0xff]  ;;  %v18957_v17 = vcombine.low %v9044_v36, %v9046_v7  ;;  %v18959_v44 = vcombine.low %v9047_v13, %v9049_v31  ;;  %v21032_v13 = vld [vmem:[#allocation8 + $0x1534] ss:$24 sps:$4 sm:$0xff]  }
 0x71c   : > { %v22649_v39 = vadd.f32 %v8783_v16, %v22595_v48  ;;  %v18949_v48 = vcombine.low %v9036_v61, %v9038_v63  ;;  %v18952_v21 = vcombine.high %v9039_v42, %v9041_v4  ;;  %v18951_v8 = vcombine.low %v9039_v42, %v9041_v4  ;;  %v9053_v40 = vld [vmem:[#allocation5 + $0x2190] sm:$0xff]  ;;  %v9056_v55 = vld [vmem:[#allocation5 + $0x21f8] sm:$0xff]  ;;  %v21027_v31 = vld [vmem:[#allocation8 + $0x1230] ss:$24 sps:$4 sm:$0xff]  }
 0x71d   : > { %10144 = vmatpush1.bf16.msra.mxu0 %v18939_v47  ;;  %v18962_v19 = vcombine.high %v9048_v14, %v9050_v33  ;;  %v18961_v60 = vcombine.low %v9048_v14, %v9050_v33  ;;  %v18964_v35 = vcombine.high %v9051_v30, %v9053_v40  ;;  %v18966_v47 = vcombine.high %v9052_v52, %v9054_v43  ;;  %v9055_v16 = vld [vmem:[#allocation5 + $0x21f0] sm:$0xff]  ;;  %v9060_v63 = vld [vmem:[#allocation5 + $0x22b8] sm:$0xff]  ;;  %v21030_v14 = vld [vmem:[#allocation8 + $0x1530] ss:$24 sps:$4 sm:$0xff]  }
 0x71e   : > { %10267 = vmatpush1.bf16.msra.mxu1 %v18941_v51  ;;  %10145 = vmatprep.subr.bf16.mxu0 %v18944_v28  ;;  %v9057_v49 = vld [vmem:[#allocation5 + $0x2250] sm:$0xff]  ;;  %v9058_v51 = vld [vmem:[#allocation5 + $0x2258] sm:$0xff]  ;;  %v18963_v28 = vcombine.low %v9051_v30, %v9053_v40  ;;  %v18965_v54 = vcombine.low %v9052_v52, %v9054_v43  ;;  %v21044_v30 = vld [vmem:[#allocation8 + $0x1594] ss:$24 sps:$4 sm:$0xff]  }
 0x71f   : > { %10268 = vmatprep.subr.bf16.mxu1 %v18946_v6  ;;  %v18968_v6 = vcombine.high %v9055_v16, %v9057_v49  ;;  %v18970_v45 = vcombine.high %v9056_v55, %v9058_v51  ;;  %v9061_v61 = vld [vmem:[#allocation5 + $0x2310] sm:$0xff]  ;;  %v21039_v40 = vld [vmem:[#allocation8 + $0x1290] ss:$24 sps:$4 sm:$0xff]  }
 0x720   : > { %v9063_v4 = vld [vmem:[#allocation5 + $0x2370] sm:$0xff]  ;;  %v21042_v52 = vld [vmem:[#allocation8 + $0x1590] ss:$24 sps:$4 sm:$0xff]  }
 0x721   : > { %10146 = vmatpush1.bf16.msra.mxu0 %v18943_v0  ;;  %v9062_v0 = vld [vmem:[#allocation5 + $0x2318] sm:$0xff]  ;;  %v18975_v15 = vcombine.low %v9063_v4, %v9065_v46 }
 0x722   : > { %10269 = vmatpush1.bf16.msra.mxu1 %v18945_v1  ;;  %10147 = vmatprep.subr.bf16.mxu0 %v18948_v2  ;;  %v18967_v1 = vcombine.low %v9055_v16, %v9057_v49  ;;  %v18969_v2 = vcombine.low %v9056_v55, %v9058_v51  ;;  %v18974_v42 = vcombine.high %v9060_v63, %v9062_v0  ;;  %v21023_v7 = vld [vmem:[#allocation8 + $0x1204] ss:$24 sps:$4 sm:$0xff]   ;;  %v21056_v16 = vld [vmem:[#allocation8 + $0x15f4] ss:$24 sps:$4 sm:$0xff]   ;;  %v21051_v49 = vld [vmem:[#allocation8 + $0x12f0] ss:$24 sps:$4 sm:$0xff]  }
 0x723   : > { %10270 = vmatprep.subr.bf16.mxu1 %v18950_v3  ;;  %v18972_v3 = vcombine.high %v9059_v59, %v9061_v61  ;;  %v21035_v33 = vld [vmem:[#allocation8 + $0x1264] ss:$24 sps:$4 sm:$0xff]   ;;  %v21054_v55 = vld [vmem:[#allocation8 + $0x15f0] ss:$24 sps:$4 sm:$0xff]  }
 0x724   : > { %v21047_v43 = vld [vmem:[#allocation8 + $0x12c4] ss:$24 sps:$4 sm:$0xff]  }
 0x725   : > { %10148 = vmatpush1.bf16.msra.mxu0 %v18947_v5  ;;  %v9066_v5 = vld [vmem:[#allocation5 + $0x23d8] sm:$0xff] }
 0x726   : > { %10271 = vmatpush1.bf16.msra.mxu1 %v18949_v48  ;;  %10149 = vmatprep.subr.bf16.mxu0 %v18952_v21  ;;  %v18971_v48 = vcombine.low %v9059_v59, %v9061_v61  ;;  %v18973_v21 = vcombine.low %v9060_v63, %v9062_v0  ;;  %v18978_v50 = vcombine.high %v9064_v37, %v9066_v5  ;;  %v21059_v51 = vld [vmem:[#allocation8 + $0x1324] ss:$24 sps:$4 sm:$0xff]   ;;  %v21057_v0 = vld [vmem:[#allocation8 + $0x1320] ss:$24 sps:$4 sm:$0xff]  }
 0x727   : > { %10272 = vmatprep.subr.bf16.mxu1 %v18954_v41  ;;  %v18976_v41 = vcombine.high %v9063_v4, %v9065_v46  ;;  %v18977_v36 = vcombine.low %v9064_v37, %v9066_v5  ;;  %v21065_v4 = vld [vmem:[#allocation8 + $0x1354] ss:$24 sps:$4 sm:$0xff]  }
 0x728   : > { %v21068_v5 = vld [vmem:[#allocation8 + $0x1654] ss:$24 sps:$4 sm:$0xff]  }
 0x729   : > { %10150 = vmatpush1.bf16.msra.mxu0 %v18951_v8  ;;  %v21026_v8 = vld [vmem:[#allocation8 + $0x1504] ss:$24 sps:$4 sm:$0xff]  }
 0x72a   : > { %10273 = vmatpush1.bf16.msra.mxu1 %v18953_v9  ;;  %10151 = vmatprep.subr.bf16.mxu0 %v18956_v11  ;;  %v21021_v9 = vld [vmem:[#allocation8 + $0x1200] ss:$24 sps:$4 sm:$0xff]  }
 0x72b   : > { %10274 = vmatprep.subr.bf16.mxu1 %v18958_v10  ;;  %v21024_v11 = vld [vmem:[#allocation8 + $0x1500] ss:$24 sps:$4 sm:$0xff]   ;;  %v21029_v10 = vld [vmem:[#allocation8 + $0x1234] ss:$24 sps:$4 sm:$0xff]  }
 0x72d   : > { %10152 = vmatpush1.bf16.msra.mxu0 %v18955_v29  ;;  %v21038_v29 = vld [vmem:[#allocation8 + $0x1564] ss:$24 sps:$4 sm:$0xff]  }
 0x72e   : > { %10275 = vmatpush1.bf16.msra.mxu1 %v18957_v17  ;;  %10153 = vmatprep.subr.bf16.mxu0 %v18960_v18  ;;  %v21033_v17 = vld [vmem:[#allocation8 + $0x1260] ss:$24 sps:$4 sm:$0xff]  }
 0x72f   : > { %10276 = vmatprep.subr.bf16.mxu1 %v18962_v19  ;;  %v21036_v18 = vld [vmem:[#allocation8 + $0x1560] ss:$24 sps:$4 sm:$0xff]   ;;  %v21041_v19 = vld [vmem:[#allocation8 + $0x1294] ss:$24 sps:$4 sm:$0xff]  }
 0x731   : > { %10154 = vmatpush1.bf16.msra.mxu0 %v18959_v44  ;;  %v21050_v44 = vld [vmem:[#allocation8 + $0x15c4] ss:$24 sps:$4 sm:$0xff]  }
 0x732   : > { %10277 = vmatpush1.bf16.msra.mxu1 %v18961_v60  ;;  %10155 = vmatprep.subr.bf16.mxu0 %v18964_v35  ;;  %v21045_v60 = vld [vmem:[#allocation8 + $0x12c0] ss:$24 sps:$4 sm:$0xff]  }
 0x733   : > { %10278 = vmatprep.subr.bf16.mxu1 %v18966_v47  ;;  %v21048_v35 = vld [vmem:[#allocation8 + $0x15c0] ss:$24 sps:$4 sm:$0xff]   ;;  %v21053_v47 = vld [vmem:[#allocation8 + $0x12f4] ss:$24 sps:$4 sm:$0xff]  }
 0x735   : > { %10156 = vmatpush1.bf16.msra.mxu0 %v18963_v28 }
 0x736   : > { %10279 = vmatpush1.bf16.msra.mxu1 %v18965_v54  ;;  %10157 = vmatprep.subr.bf16.mxu0 %v18968_v6  ;;  %v21062_v54 = vld [vmem:[#allocation8 + $0x1624] ss:$24 sps:$4 sm:$0xff]  }
 0x737   : > { %10280 = vmatprep.subr.bf16.mxu1 %v18970_v45 }
 0x739   : > { %10158 = vmatpush1.bf16.msra.mxu0 %v18967_v1 }
 0x73a   : > { %10281 = vmatpush1.bf16.msra.mxu1 %v18969_v2  ;;  %10159 = vmatprep.subr.bf16.mxu0 %v18972_v3 }
 0x73b   : > { %10282 = vmatprep.subr.bf16.mxu1 %v18974_v42  ;;  %v21060_v42 = vld [vmem:[#allocation8 + $0x1620] ss:$24 sps:$4 sm:$0xff]  }
 0x73d   : > { %10160 = vmatpush1.bf16.msra.mxu0 %v18971_v48 }
 0x73e   : > { %10283 = vmatpush1.bf16.msra.mxu1 %v18973_v21  ;;  %10161 = vmatprep.subr.bf16.mxu0 %v18976_v41  ;;  %v21063_v21 = vld [vmem:[#allocation8 + $0x1350] ss:$24 sps:$4 sm:$0xff]  }
 0x73f   : > { %10284 = vmatprep.subr.bf16.mxu1 %v18978_v50  ;;  %v21066_v41 = vld [vmem:[#allocation8 + $0x1650] ss:$24 sps:$4 sm:$0xff]   ;;  %v21071_v50 = vld [vmem:[#allocation8 + $0x1384] ss:$24 sps:$4 sm:$0xff]  }
 0x741   : > { %10162 = vmatpush1.bf16.msra.mxu0 %v18975_v15  ;;  %v21074_v15 = vld [vmem:[#allocation8 + $0x1684] ss:$24 sps:$4 sm:$0xff]  }
 0x742   : > { %10285 = vmatpush1.bf16.msra.mxu1 %v18977_v36  ;;  %11483 = vmatprep.subr.bf16.mxu0 %v21023_v7  ;;  %v21069_v36 = vld [vmem:[#allocation8 + $0x1380] ss:$24 sps:$4 sm:$0xff]   ;;  %v21077_v7 = vld [vmem:[#allocation8 + $0x13b4] ss:$24 sps:$4 sm:$0xff]  }
 0x743   : > { %11524 = vmatprep.subr.bf16.mxu1 %v21026_v8  ;;  %v21080_v8 = vld [vmem:[#allocation8 + $0x16b4] ss:$24 sps:$4 sm:$0xff]  }
 0x744   : > { %10164 = vmatmul.mubr.bf16.vlgmr.msra.gmra.mrb[48].mxu0 %v22443_v38 }
 0x745   : > { %10287 = vmatmul.mubr.bf16.vlgmr.msra.gmra.mrb[48].mxu1 %v22443_v38  ;;  %11484 = vmatpush1.bf16.msra.mxu0 %v21021_v9  ;;  %v21078_v9 = vld [vmem:[#allocation8 + $0x16b0] ss:$24 sps:$4 sm:$0xff]  }
 0x746   : > { %11525 = vmatpush1.bf16.msra.mxu1 %v21024_v11  ;;  %11485 = vmatprep.subr.bf16.mxu0 %v21029_v10  ;;  %v21083_v11 = vld [vmem:[#allocation8 + $0x13e4] ss:$24 sps:$4 sm:$0xff]  }
 0x747   : > { %11526 = vmatprep.subr.bf16.mxu1 %v21032_v13  ;;  %v21086_v10 = vld [vmem:[#allocation8 + $0x16e4] ss:$24 sps:$4 sm:$0xff]   ;;  %v21081_v13 = vld [vmem:[#allocation8 + $0x13e0] ss:$24 sps:$4 sm:$0xff]  }
 0x749   : > { %11486 = vmatpush1.bf16.msra.mxu0 %v21027_v31  ;;  %v21084_v31 = vld [vmem:[#allocation8 + $0x16e0] ss:$24 sps:$4 sm:$0xff]  }
 0x74a   : > { %11527 = vmatpush1.bf16.msra.mxu1 %v21030_v14  ;;  %11487 = vmatprep.subr.bf16.mxu0 %v21035_v33  ;;  %v21089_v14 = vld [vmem:[#allocation8 + $0x1414] ss:$24 sps:$4 sm:$0xff]  }
 0x74b   : > { %11528 = vmatprep.subr.bf16.mxu1 %v21038_v29  ;;  %v21092_v33 = vld [vmem:[#allocation8 + $0x1714] ss:$24 sps:$4 sm:$0xff]   ;;  %v21087_v29 = vld [vmem:[#allocation8 + $0x1410] ss:$24 sps:$4 sm:$0xff]  }
 0x74d   : > { %11488 = vmatpush1.bf16.msra.mxu0 %v21033_v17  ;;  %v21090_v17 = vld [vmem:[#allocation8 + $0x1710] ss:$24 sps:$4 sm:$0xff]  }
 0x74e   : > { %11529 = vmatpush1.bf16.msra.mxu1 %v21036_v18  ;;  %11489 = vmatprep.subr.bf16.mxu0 %v21041_v19  ;;  %v21095_v18 = vld [vmem:[#allocation8 + $0x1444] ss:$24 sps:$4 sm:$0xff]  }
 0x74f   : > { %11530 = vmatprep.subr.bf16.mxu1 %v21044_v30  ;;  %v21098_v19 = vld [vmem:[#allocation8 + $0x1744] ss:$24 sps:$4 sm:$0xff]   ;;  %v21093_v30 = vld [vmem:[#allocation8 + $0x1440] ss:$24 sps:$4 sm:$0xff]  }
 0x751   : > { %11490 = vmatpush1.bf16.msra.mxu0 %v21039_v40  ;;  %v21096_v40 = vld [vmem:[#allocation8 + $0x1740] ss:$24 sps:$4 sm:$0xff]  }
 0x752   : > { %11531 = vmatpush1.bf16.msra.mxu1 %v21042_v52  ;;  %11491 = vmatprep.subr.bf16.mxu0 %v21047_v43  ;;  %v21101_v52 = vld [vmem:[#allocation8 + $0x1474] ss:$24 sps:$4 sm:$0xff]  }
 0x753   : > { %11532 = vmatprep.subr.bf16.mxu1 %v21050_v44  ;;  %v21104_v43 = vld [vmem:[#allocation8 + $0x1774] ss:$24 sps:$4 sm:$0xff]   ;;  %v21099_v44 = vld [vmem:[#allocation8 + $0x1470] ss:$24 sps:$4 sm:$0xff]  }
 0x755   : > { %11492 = vmatpush1.bf16.msra.mxu0 %v21045_v60  ;;  %v21102_v60 = vld [vmem:[#allocation8 + $0x1770] ss:$24 sps:$4 sm:$0xff]  }
 0x756   : > { %11533 = vmatpush1.bf16.msra.mxu1 %v21048_v35  ;;  %11493 = vmatprep.subr.bf16.mxu0 %v21053_v47  ;;  %v21107_v35 = vld [vmem:[#allocation8 + $0x14a4] ss:$24 sps:$4 sm:$0xff]  }
 0x757   : > { %v8821_v28 = vpop.f32.mrb[44].mxu0  ;;  %11534 = vmatprep.subr.bf16.mxu1 %v21056_v16  ;;  %v21110_v47 = vld [vmem:[#allocation8 + $0x17a4] ss:$24 sps:$4 sm:$0xff]   ;;  %v21105_v16 = vld [vmem:[#allocation8 + $0x14a0] ss:$24 sps:$4 sm:$0xff]  }
 0x758   : > { %v8862_v6 = vpop.f32.mrb[44].mxu1  ;;  %v8823_v45 = vpop.f32.mrb[45].mxu0 }
 0x759   : > { %v8863_v59 = vadd.f32 %v8862_v6, %v8821_v28  ;;  %v8864_v61 = vpop.f32.mrb[45].mxu1  ;;  %v8825_v63 = vpop.f32.mrb[46].mxu0  ;;  %11494 = vmatpush1.bf16.msra.mxu0 %v21051_v49  ;;  %v21108_v49 = vld [vmem:[#allocation8 + $0x17a0] ss:$24 sps:$4 sm:$0xff]   ;;  %v21114_v28 = vld [vmem:[#allocation8 + $0x17d0] ss:$24 sps:$4 sm:$0xff]  }
 0x75a   : > { %v8865_v1 = vadd.f32 %v8864_v61, %v8823_v45  ;;  %v8866_v2 = vpop.f32.mrb[46].mxu1  ;;  %v8826_v3 = vpop.f32.mrb[47].mxu0  ;;  %11535 = vmatpush1.bf16.msra.mxu1 %v21054_v55  ;;  %11495 = vmatprep.subr.bf16.mxu0 %v21059_v51  ;;  %v21111_v55 = vld [vmem:[#allocation8 + $0x14d0] ss:$24 sps:$4 sm:$0xff]   ;;  %v21113_v51 = vld [vmem:[#allocation8 + $0x14d4] ss:$24 sps:$4 sm:$0xff]  }
 0x75b   : > { %v22654_v46 = vadd.f32 %v8863_v59, %v22601_v32  ;;  %v8867_v37 = vpop.f32.mrb[47].mxu1  ;;  %11536 = vmatprep.subr.bf16.mxu1 %v21062_v54  ;;  %v21072_v32 = vld [vmem:[#allocation8 + $0x1680] ss:$24 sps:$4 sm:$0xff]   ;;  %v21116_v54 = vld [vmem:[#allocation8 + $0x17d4] ss:$24 sps:$4 sm:$0xff]  }
 0x75c   : > { %v22657_v48 = vadd.f32 %v8865_v1, %v22603_v56  ;;  %v21075_v56 = vld [vmem:[#allocation8 + $0x13b0] ss:$24 sps:$4 sm:$0xff]   ;;  %v21119_v6 = vld [vmem:[#allocation8 + $0x120c] ss:$24 sps:$4 sm:$0xff]   ;;  %v9067_v59 = vld [vmem:[#allocation7 + $0xc] sm:$0xf] }
 0x75d   : > { %11496 = vmatpush1.bf16.msra.mxu0 %v21057_v0  ;;  %v21122_v45 = vld [vmem:[#allocation8 + $0x150c] ss:$24 sps:$4 sm:$0xff]   ;;  %v9072_v61 = vrot.slane %v9067_v59, %v22470_v22  ;;  %v9080_v63 = vrot.slane %v9067_v59, %v22473_v24  ;;  %v9076_v0 = vrot.slane %v9067_v59, %v22476_v26  ;;  %v9084_v1 = vrot.slane %v9067_v59, %v22479_v27 }
 0x75e   : > { %11537 = vmatpush1.bf16.msra.mxu1 %v21060_v42  ;;  %11497 = vmatprep.subr.bf16.mxu0 %v21065_v4 }
 0x75f   : > { %11538 = vmatprep.subr.bf16.mxu1 %v21068_v5 }
 0x761   : > { %11498 = vmatpush1.bf16.msra.mxu0 %v21063_v21 }
 0x762   : > { %11539 = vmatpush1.bf16.msra.mxu1 %v21066_v41  ;;  %11499 = vmatprep.subr.bf16.mxu0 %v21071_v50 }
 0x763   : > { %11540 = vmatprep.subr.bf16.mxu1 %v21074_v15 }
 0x765   : > { %11500 = vmatpush1.bf16.msra.mxu0 %v21069_v36 }
 0x766   : > { %11541 = vmatpush1.bf16.msra.mxu1 %v21072_v32  ;;  %11501 = vmatprep.subr.bf16.mxu0 %v21077_v7 }
 0x767   : > { %11542 = vmatprep.subr.bf16.mxu1 %v21080_v8 }
 0x769   : > { %11502 = vmatpush1.bf16.msra.mxu0 %v21075_v56 }
 0x76a   : > { %11543 = vmatpush1.bf16.msra.mxu1 %v21078_v9  ;;  %11503 = vmatprep.subr.bf16.mxu0 %v21083_v11 }
 0x76b   : > { %11544 = vmatprep.subr.bf16.mxu1 %v21086_v10 }
 0x76d   : > { %11504 = vmatpush1.bf16.msra.mxu0 %v21081_v13 }
 0x76e   : > { %11545 = vmatpush1.bf16.msra.mxu1 %v21084_v31  ;;  %11505 = vmatprep.subr.bf16.mxu0 %v21089_v14 }
 0x76f   : > { %11546 = vmatprep.subr.bf16.mxu1 %v21092_v33 }
 0x771   : > { %11506 = vmatpush1.bf16.msra.mxu0 %v21087_v29 }
 0x772   : > { %11547 = vmatpush1.bf16.msra.mxu1 %v21090_v17  ;;  %11507 = vmatprep.subr.bf16.mxu0 %v21095_v18 }
 0x773   : > { %11548 = vmatprep.subr.bf16.mxu1 %v21098_v19 }
 0x775   : > { %11508 = vmatpush1.bf16.msra.mxu0 %v21093_v30 }
 0x776   : > { %11549 = vmatpush1.bf16.msra.mxu1 %v21096_v40  ;;  %11509 = vmatprep.subr.bf16.mxu0 %v21101_v52 }
 0x777   : > { %11550 = vmatprep.subr.bf16.mxu1 %v21104_v43 }
 0x779   : > { %11510 = vmatpush1.bf16.msra.mxu0 %v21099_v44 }
 0x77a   : > { %11551 = vmatpush1.bf16.msra.mxu1 %v21102_v60  ;;  %11511 = vmatprep.subr.bf16.mxu0 %v21107_v35 }
 0x77b   : > { %11552 = vmatprep.subr.bf16.mxu1 %v21110_v47 }
 0x77d   : > { %11512 = vmatpush1.bf16.msra.mxu0 %v21105_v16 }
 0x77e   : > { %11553 = vmatpush1.bf16.msra.mxu1 %v21108_v49  ;;  %11513 = vmatprep.subr.bf16.mxu0 %v21113_v51 }
 0x77f   : > { %11554 = vmatprep.subr.bf16.mxu1 %v21116_v54 }
 0x781   : > { %11514 = vmatpush1.bf16.msra.mxu0 %v21111_v55 }
 0x782   : > { %11555 = vmatpush1.bf16.msra.mxu1 %v21114_v28  ;;  %11565 = vmatprep.subr.bf16.mxu0 %v21119_v6 }
 0x783   : > { %11606 = vmatprep.subr.bf16.mxu1 %v21122_v45 }
 0x817   : > { %v10165_v2 = vpop.f32.mrb[48].mxu0 }
 0x818   : > { %v19954_v3 = vadd.f32 %v10165_v2, %v9072_v61  ;;  %v10288_v42 = vpop.f32.mrb[48].mxu1  ;;  %v10167_v4 = vpop.f32.mrb[49].mxu0  ;;  %v21120_v2 = vld [vmem:[#allocation8 + $0x1508] ss:$24 sps:$4 sm:$0xff]  }
 0x819   : > { %v19956_v37 = vadd.f32 %v10288_v42, %v9080_v63  ;;  %v19955_v5 = vadd.f32 %v10167_v4, %v9076_v0  ;;  %v10290_v21 = vpop.f32.mrb[49].mxu1  ;;  %v10169_v41 = vpop.f32.mrb[50].mxu0  ;;  %v21117_v0 = vld [vmem:[#allocation8 + $0x1208] ss:$24 sps:$4 sm:$0xff]   ;;  %v21125_v4 = vld [vmem:[#allocation8 + $0x123c] ss:$24 sps:$4 sm:$0xff]  }
 0x81a   : > { %v10295_v50 = vmul.f32 %v19954_v3, %v19954_v3  ;;  %v19957_v15 = vadd.f32 %v10290_v21, %v9084_v1  ;;  %v10292_v36 = vpop.f32.mrb[50].mxu1  ;;  %v10170_v32 = vpop.f32.mrb[51].mxu0  ;;  %v10311_v35 = vmul.f32 0.5, %v19954_v3  ;;  %v21126_v21 = vld [vmem:[#allocation8 + $0x1538] ss:$24 sps:$4 sm:$0xff]  }
 0x81b   : > { %v10297_v7 = vmul.f32 %v19956_v37, %v19956_v37  ;;  %v10296_v8 = vmul.f32 %v19955_v5, %v19955_v5  ;;  %v10293_v56 = vpop.f32.mrb[51].mxu1  ;;  %v10313_v49 = vmul.f32 0.5, %v19956_v37  ;;  %v10312_v55 = vmul.f32 0.5, %v19955_v5  ;;  %v21131_v41 = vld [vmem:[#allocation8 + $0x126c] ss:$24 sps:$4 sm:$0xff]  }
 0x81c   : > { %v10299_v9 = vmul.f32 0.035677407, %v10295_v50  ;;  %v10298_v11 = vmul.f32 %v19957_v15, %v19957_v15  ;;  %v10314_v54 = vmul.f32 0.5, %v19957_v15  ;;  %v21134_v50 = vld [vmem:[#allocation8 + $0x156c] ss:$24 sps:$4 sm:$0xff]  }
 0x81d   : > { %v10301_v10 = vmul.f32 0.035677407, %v10297_v7  ;;  %v10300_v13 = vmul.f32 0.035677407, %v10296_v8  ;;  %v21132_v36 = vld [vmem:[#allocation8 + $0x1568] ss:$24 sps:$4 sm:$0xff]  }
 0x81e   : > { %v10303_v31 = vadd.f32 0.7978846, %v10299_v9  ;;  %v10302_v14 = vmul.f32 0.035677407, %v10298_v11  ;;  %v21137_v32 = vld [vmem:[#allocation8 + $0x129c] ss:$24 sps:$4 sm:$0xff]  }
 0x81f   : > { %v10305_v33 = vadd.f32 0.7978846, %v10301_v10  ;;  %v10304_v29 = vadd.f32 0.7978846, %v10300_v13  ;;  %v21140_v7 = vld [vmem:[#allocation8 + $0x159c] ss:$24 sps:$4 sm:$0xff]  }
 0x820   : > { %v10307_v17 = vmul.f32 %v19954_v3, %v10303_v31  ;;  %v10306_v18 = vadd.f32 0.7978846, %v10302_v14  ;;  %v21135_v8 = vld [vmem:[#allocation8 + $0x1298] ss:$24 sps:$4 sm:$0xff]   ;;  %v21143_v9 = vld [vmem:[#allocation8 + $0x12cc] ss:$24 sps:$4 sm:$0xff]  }
 0x821   : > { %v10309_v19 = vmul.f32 %v19956_v37, %v10305_v33  ;;  %v10308_v30 = vmul.f32 %v19955_v5, %v10304_v29  ;;  %v21128_v37 = vld [vmem:[#allocation8 + $0x153c] ss:$24 sps:$4 sm:$0xff]   ;;  %v21123_v5 = vld [vmem:[#allocation8 + $0x1238] ss:$24 sps:$4 sm:$0xff]   ;;  %v21146_v11 = vld [vmem:[#allocation8 + $0x15cc] ss:$24 sps:$4 sm:$0xff]  }
 0x822   : > { %21909 = vtanh.f32 %v10307_v17  ;;  %v10310_v40 = vmul.f32 %v19957_v15, %v10306_v18  ;;  %v21129_v15 = vld [vmem:[#allocation8 + $0x1268] ss:$24 sps:$4 sm:$0xff]   ;;  %v21138_v56 = vld [vmem:[#allocation8 + $0x1598] ss:$24 sps:$4 sm:$0xff]   ;;  %v21149_v31 = vld [vmem:[#allocation8 + $0x12fc] ss:$24 sps:$4 sm:$0xff]  }
 0x823   : > { %21911 = vtanh.f32 %v10309_v19  ;;  %v21141_v10 = vld [vmem:[#allocation8 + $0x12c8] ss:$24 sps:$4 sm:$0xff]   ;;  %v21152_v14 = vld [vmem:[#allocation8 + $0x15fc] ss:$24 sps:$4 sm:$0xff]   ;;  %v21147_v33 = vld [vmem:[#allocation8 + $0x12f8] ss:$24 sps:$4 sm:$0xff]  }
 0x824   : > { %21913 = vtanh.f32 %v10308_v30  ;;  %v21144_v13 = vld [vmem:[#allocation8 + $0x15c8] ss:$24 sps:$4 sm:$0xff]   ;;  %v21150_v29 = vld [vmem:[#allocation8 + $0x15f8] ss:$24 sps:$4 sm:$0xff]   ;;  %v21155_v17 = vld [vmem:[#allocation8 + $0x132c] ss:$24 sps:$4 sm:$0xff]  }
 0x825   : > { %21915 = vtanh.f32 %v10310_v40  ;;  %v21158_v18 = vld [vmem:[#allocation8 + $0x162c] ss:$24 sps:$4 sm:$0xff]   ;;  %v21153_v19 = vld [vmem:[#allocation8 + $0x1328] ss:$24 sps:$4 sm:$0xff]   ;;  %v21161_v40 = vld [vmem:[#allocation8 + $0x135c] ss:$24 sps:$4 sm:$0xff]  }
 0x826   : > { %v21156_v30 = vld [vmem:[#allocation8 + $0x1628] ss:$24 sps:$4 sm:$0xff]  }
 0x82c   : > { %v21910_v52 = vpop.eup %21909 }
 0x82d   : > { %v21912_v43 = vpop.eup %21911  ;;  %v10319_v44 = vadd.f32 1.0, %v21910_v52  ;;  %v21164_v52 = vld [vmem:[#allocation8 + $0x165c] ss:$24 sps:$4 sm:$0xff]  }
 0x82e   : > { %v21914_v60 = vpop.eup %21913  ;;  %v10321_v47 = vadd.f32 1.0, %v21912_v43  ;;  %v21159_v43 = vld [vmem:[#allocation8 + $0x1358] ss:$24 sps:$4 sm:$0xff]  }
 0x82f   : > { %v21916_v16 = vpop.eup %21915  ;;  %v10320_v51 = vadd.f32 1.0, %v21914_v60  ;;  %v10323_v28 = vmul.f32 %v10319_v44, %v10311_v35  ;;  %v21162_v44 = vld [vmem:[#allocation8 + $0x1658] ss:$24 sps:$4 sm:$0xff]   ;;  %v21167_v60 = vld [vmem:[#allocation8 + $0x138c] ss:$24 sps:$4 sm:$0xff]  }
 0x830   : > { %v10322_v6 = vadd.f32 1.0, %v21916_v16  ;;  %v10325_v45 = vmul.f32 %v10321_v47, %v10313_v49  ;;  %v21170_v35 = vld [vmem:[#allocation8 + $0x168c] ss:$24 sps:$4 sm:$0xff]   ;;  %v21165_v47 = vld [vmem:[#allocation8 + $0x1388] ss:$24 sps:$4 sm:$0xff]  }
 0x831   : > { %v10324_v59 = vmul.f32 %v10320_v51, %v10312_v55  ;;  %v22667_v42 = vpack.c.bf16 %v10323_v28, %v10323_v28  ;;  %v21168_v16 = vld [vmem:[#allocation8 + $0x1688] ss:$24 sps:$4 sm:$0xff]   ;;  %v21173_v49 = vld [vmem:[#allocation8 + $0x13bc] ss:$24 sps:$4 sm:$0xff]   ;;  %v21171_v51 = vld [vmem:[#allocation8 + $0x13b8] ss:$24 sps:$4 sm:$0xff]  }
 0x832   : > { %v10326_v61 = vmul.f32 %v10322_v6, %v10314_v54  ;;  %v22670_v3 = vpack.c.bf16 %v10325_v45, %v10325_v45  ;;  %v21176_v55 = vld [vmem:[#allocation8 + $0x16bc] ss:$24 sps:$4 sm:$0xff]   ;;  %v21174_v28 = vld [vmem:[#allocation8 + $0x16b8] ss:$24 sps:$4 sm:$0xff]   ;;  %v21179_v54 = vld [vmem:[#allocation8 + $0x13ec] ss:$24 sps:$4 sm:$0xff]  }
 0x833   : > { %v22663_v63 = vpack.c.bf16 %v10324_v59, %v10324_v59  ;;  %v21182_v6 = vld [vmem:[#allocation8 + $0x16ec] ss:$24 sps:$4 sm:$0xff]   ;;  %v21177_v45 = vld [vmem:[#allocation8 + $0x13e8] ss:$24 sps:$4 sm:$0xff]  }
 0x834   : > { %v22665_v1 = vpack.c.bf16 %v10326_v61, %v10326_v61  ;;  %v21180_v59 = vld [vmem:[#allocation8 + $0x16e8] ss:$24 sps:$4 sm:$0xff]   ;;  %v21185_v61 = vld [vmem:[#allocation8 + $0x141c] ss:$24 sps:$4 sm:$0xff]  }
 0x835   : > { %11515 = vmatprep.mubr.bf16.mxu0 %v22663_v63 }
 0x836   : > { %11556 = vmatprep.mubr.bf16.mxu1 %v22665_v1  ;;  %11516 = vmatmul.mubr.bf16.vlgmr.msra.gmra.mrb[52].mxu0 %v22667_v42 }
 0x837   : > { %11557 = vmatmul.mubr.bf16.vlgmr.msra.gmra.mrb[52].mxu1 %v22670_v3  ;;  %11566 = vmatpush1.bf16.msra.mxu0 %v21117_v0  ;;  %v21188_v0 = vld [vmem:[#allocation8 + $0x171c] ss:$24 sps:$4 sm:$0xff]  }
 0x838   : > { %11607 = vmatpush1.bf16.msra.mxu1 %v21120_v2  ;;  %11597 = vmatprep.mubr.bf16.mxu0 %v22663_v63  ;;  %v21183_v2 = vld [vmem:[#allocation8 + $0x1418] ss:$24 sps:$4 sm:$0xff]  }
 0x839   : > { %11638 = vmatprep.mubr.bf16.mxu1 %v22665_v1  ;;  %11567 = vmatprep.subr.bf16.mxu0 %v21125_v4  ;;  %v21186_v4 = vld [vmem:[#allocation8 + $0x1718] ss:$24 sps:$4 sm:$0xff]  }
 0x83a   : > { %11608 = vmatprep.subr.bf16.mxu1 %v21128_v37  ;;  %v21191_v37 = vld [vmem:[#allocation8 + $0x144c] ss:$24 sps:$4 sm:$0xff]  }
 0x83b   : > { %11568 = vmatpush1.bf16.msra.mxu0 %v21123_v5  ;;  %v21194_v5 = vld [vmem:[#allocation8 + $0x174c] ss:$24 sps:$4 sm:$0xff]  }
 0x83c   : > { %11609 = vmatpush1.bf16.msra.mxu1 %v21126_v21  ;;  %11569 = vmatprep.subr.bf16.mxu0 %v21131_v41  ;;  %v21189_v21 = vld [vmem:[#allocation8 + $0x1448] ss:$24 sps:$4 sm:$0xff]  }
 0x83d   : > { %11610 = vmatprep.subr.bf16.mxu1 %v21134_v50  ;;  %v21192_v41 = vld [vmem:[#allocation8 + $0x1748] ss:$24 sps:$4 sm:$0xff]   ;;  %v21197_v50 = vld [vmem:[#allocation8 + $0x147c] ss:$24 sps:$4 sm:$0xff]  }
 0x83f   : > { %11570 = vmatpush1.bf16.msra.mxu0 %v21129_v15  ;;  %v21200_v15 = vld [vmem:[#allocation8 + $0x177c] ss:$24 sps:$4 sm:$0xff]  }
 0x840   : > { %11611 = vmatpush1.bf16.msra.mxu1 %v21132_v36  ;;  %11571 = vmatprep.subr.bf16.mxu0 %v21137_v32  ;;  %v21195_v36 = vld [vmem:[#allocation8 + $0x1478] ss:$24 sps:$4 sm:$0xff]  }
 0x841   : > { %11612 = vmatprep.subr.bf16.mxu1 %v21140_v7  ;;  %v21198_v32 = vld [vmem:[#allocation8 + $0x1778] ss:$24 sps:$4 sm:$0xff]   ;;  %v21203_v7 = vld [vmem:[#allocation8 + $0x14ac] ss:$24 sps:$4 sm:$0xff]  }
 0x843   : > { %11572 = vmatpush1.bf16.msra.mxu0 %v21135_v8  ;;  %v21206_v8 = vld [vmem:[#allocation8 + $0x17ac] ss:$24 sps:$4 sm:$0xff]  }
 0x844   : > { %11613 = vmatpush1.bf16.msra.mxu1 %v21138_v56  ;;  %11573 = vmatprep.subr.bf16.mxu0 %v21143_v9  ;;  %v21201_v56 = vld [vmem:[#allocation8 + $0x14a8] ss:$24 sps:$4 sm:$0xff]  }
 0x845   : > { %11614 = vmatprep.subr.bf16.mxu1 %v21146_v11  ;;  %v21204_v9 = vld [vmem:[#allocation8 + $0x17a8] ss:$24 sps:$4 sm:$0xff]   ;;  %v21209_v11 = vld [vmem:[#allocation8 + $0x14dc] ss:$24 sps:$4 sm:$0xff]  }
 0x847   : > { %11574 = vmatpush1.bf16.msra.mxu0 %v21141_v10  ;;  %v21212_v10 = vld [vmem:[#allocation8 + $0x17dc] ss:$24 sps:$4 sm:$0xff]  }
 0x848   : > { %11615 = vmatpush1.bf16.msra.mxu1 %v21144_v13  ;;  %11575 = vmatprep.subr.bf16.mxu0 %v21149_v31  ;;  %v21207_v13 = vld [vmem:[#allocation8 + $0x14d8] ss:$24 sps:$4 sm:$0xff]  }
 0x849   : > { %11616 = vmatprep.subr.bf16.mxu1 %v21152_v14  ;;  %v21210_v31 = vld [vmem:[#allocation8 + $0x17d8] ss:$24 sps:$4 sm:$0xff]   ;;  %v21215_v14 = vld [vmem:[#allocation8 + $0x1214] ss:$24 sps:$4 sm:$0xff]  }
 0x84b   : > { %11576 = vmatpush1.bf16.msra.mxu0 %v21147_v33  ;;  %v21218_v33 = vld [vmem:[#allocation8 + $0x1514] ss:$24 sps:$4 sm:$0xff]  }
 0x84c   : > { %11617 = vmatpush1.bf16.msra.mxu1 %v21150_v29  ;;  %11577 = vmatprep.subr.bf16.mxu0 %v21155_v17  ;;  %v21213_v29 = vld [vmem:[#allocation8 + $0x1210] ss:$24 sps:$4 sm:$0xff]  }
 0x84d   : > { %11618 = vmatprep.subr.bf16.mxu1 %v21158_v18  ;;  %v21216_v17 = vld [vmem:[#allocation8 + $0x1510] ss:$24 sps:$4 sm:$0xff]   ;;  %v21221_v18 = vld [vmem:[#allocation8 + $0x1244] ss:$24 sps:$4 sm:$0xff]  }
 0x84f   : > { %11578 = vmatpush1.bf16.msra.mxu0 %v21153_v19  ;;  %v21224_v19 = vld [vmem:[#allocation8 + $0x1544] ss:$24 sps:$4 sm:$0xff]  }
 0x850   : > { %11619 = vmatpush1.bf16.msra.mxu1 %v21156_v30  ;;  %11579 = vmatprep.subr.bf16.mxu0 %v21161_v40  ;;  %v21219_v30 = vld [vmem:[#allocation8 + $0x1240] ss:$24 sps:$4 sm:$0xff]  }
 0x851   : > { %11620 = vmatprep.subr.bf16.mxu1 %v21164_v52  ;;  %v21222_v40 = vld [vmem:[#allocation8 + $0x1540] ss:$24 sps:$4 sm:$0xff]   ;;  %v21227_v52 = vld [vmem:[#allocation8 + $0x1274] ss:$24 sps:$4 sm:$0xff]  }
 0x853   : > { %11580 = vmatpush1.bf16.msra.mxu0 %v21159_v43  ;;  %v21230_v43 = vld [vmem:[#allocation8 + $0x1574] ss:$24 sps:$4 sm:$0xff]  }
 0x854   : > { %11621 = vmatpush1.bf16.msra.mxu1 %v21162_v44  ;;  %11581 = vmatprep.subr.bf16.mxu0 %v21167_v60  ;;  %v21225_v44 = vld [vmem:[#allocation8 + $0x1270] ss:$24 sps:$4 sm:$0xff]  }
 0x855   : > { %11622 = vmatprep.subr.bf16.mxu1 %v21170_v35  ;;  %v21228_v60 = vld [vmem:[#allocation8 + $0x1570] ss:$24 sps:$4 sm:$0xff]   ;;  %v21233_v35 = vld [vmem:[#allocation8 + $0x12a4] ss:$24 sps:$4 sm:$0xff]  }
 0x857   : > { %11582 = vmatpush1.bf16.msra.mxu0 %v21165_v47  ;;  %v21236_v47 = vld [vmem:[#allocation8 + $0x15a4] ss:$24 sps:$4 sm:$0xff]  }
 0x858   : > { %11623 = vmatpush1.bf16.msra.mxu1 %v21168_v16  ;;  %11583 = vmatprep.subr.bf16.mxu0 %v21173_v49  ;;  %v21231_v16 = vld [vmem:[#allocation8 + $0x12a0] ss:$24 sps:$4 sm:$0xff]   ;;  %v21239_v49 = vld [vmem:[#allocation8 + $0x12d4] ss:$24 sps:$4 sm:$0xff]  }
 0x859   : > { %11624 = vmatprep.subr.bf16.mxu1 %v21176_v55  ;;  %v21242_v55 = vld [vmem:[#allocation8 + $0x15d4] ss:$24 sps:$4 sm:$0xff]  }
 0x85b   : > { %11584 = vmatpush1.bf16.msra.mxu0 %v21171_v51  ;;  %v21240_v51 = vld [vmem:[#allocation8 + $0x15d0] ss:$24 sps:$4 sm:$0xff]  }
 0x85c   : > { %11625 = vmatpush1.bf16.msra.mxu1 %v21174_v28  ;;  %11585 = vmatprep.subr.bf16.mxu0 %v21179_v54  ;;  %v21245_v28 = vld [vmem:[#allocation8 + $0x1304] ss:$24 sps:$4 sm:$0xff]  }
 0x85d   : > { %11626 = vmatprep.subr.bf16.mxu1 %v21182_v6  ;;  %v21248_v54 = vld [vmem:[#allocation8 + $0x1604] ss:$24 sps:$4 sm:$0xff]   ;;  %v21243_v6 = vld [vmem:[#allocation8 + $0x1300] ss:$24 sps:$4 sm:$0xff]  }
 0x85f   : > { %11586 = vmatpush1.bf16.msra.mxu0 %v21177_v45  ;;  %v21246_v45 = vld [vmem:[#allocation8 + $0x1600] ss:$24 sps:$4 sm:$0xff]  }
 0x860   : > { %11627 = vmatpush1.bf16.msra.mxu1 %v21180_v59  ;;  %11587 = vmatprep.subr.bf16.mxu0 %v21185_v61  ;;  %v21251_v59 = vld [vmem:[#allocation8 + $0x1334] ss:$24 sps:$4 sm:$0xff]  }
 0x861   : > { %11628 = vmatprep.subr.bf16.mxu1 %v21188_v0  ;;  %v21254_v61 = vld [vmem:[#allocation8 + $0x1634] ss:$24 sps:$4 sm:$0xff]   ;;  %v21249_v0 = vld [vmem:[#allocation8 + $0x1330] ss:$24 sps:$4 sm:$0xff]  }
 0x863   : > { %11588 = vmatpush1.bf16.msra.mxu0 %v21183_v2  ;;  %v21252_v2 = vld [vmem:[#allocation8 + $0x1630] ss:$24 sps:$4 sm:$0xff]  }
 0x864   : > { %11629 = vmatpush1.bf16.msra.mxu1 %v21186_v4  ;;  %11589 = vmatprep.subr.bf16.mxu0 %v21191_v37  ;;  %v21257_v4 = vld [vmem:[#allocation8 + $0x1364] ss:$24 sps:$4 sm:$0xff]  }
 0x865   : > { %11630 = vmatprep.subr.bf16.mxu1 %v21194_v5  ;;  %v21260_v37 = vld [vmem:[#allocation8 + $0x1664] ss:$24 sps:$4 sm:$0xff]   ;;  %v21255_v5 = vld [vmem:[#allocation8 + $0x1360] ss:$24 sps:$4 sm:$0xff]  }
 0x867   : > { %11590 = vmatpush1.bf16.msra.mxu0 %v21189_v21  ;;  %v21258_v21 = vld [vmem:[#allocation8 + $0x1660] ss:$24 sps:$4 sm:$0xff]  }
 0x868   : > { %11631 = vmatpush1.bf16.msra.mxu1 %v21192_v41  ;;  %11591 = vmatprep.subr.bf16.mxu0 %v21197_v50  ;;  %v21263_v41 = vld [vmem:[#allocation8 + $0x1394] ss:$24 sps:$4 sm:$0xff]  }
 0x869   : > { %11632 = vmatprep.subr.bf16.mxu1 %v21200_v15  ;;  %v21266_v50 = vld [vmem:[#allocation8 + $0x1694] ss:$24 sps:$4 sm:$0xff]   ;;  %v21261_v15 = vld [vmem:[#allocation8 + $0x1390] ss:$24 sps:$4 sm:$0xff]  }
 0x86b   : > { %11592 = vmatpush1.bf16.msra.mxu0 %v21195_v36  ;;  %v21264_v36 = vld [vmem:[#allocation8 + $0x1690] ss:$24 sps:$4 sm:$0xff]  }
 0x86c   : > { %11633 = vmatpush1.bf16.msra.mxu1 %v21198_v32  ;;  %11593 = vmatprep.subr.bf16.mxu0 %v21203_v7  ;;  %v21269_v32 = vld [vmem:[#allocation8 + $0x13c4] ss:$24 sps:$4 sm:$0xff]  }
 0x86d   : > { %11634 = vmatprep.subr.bf16.mxu1 %v21206_v8  ;;  %v21272_v7 = vld [vmem:[#allocation8 + $0x16c4] ss:$24 sps:$4 sm:$0xff]   ;;  %v21267_v8 = vld [vmem:[#allocation8 + $0x13c0] ss:$24 sps:$4 sm:$0xff]  }
 0x86f   : > { %11594 = vmatpush1.bf16.msra.mxu0 %v21201_v56  ;;  %v21270_v56 = vld [vmem:[#allocation8 + $0x16c0] ss:$24 sps:$4 sm:$0xff]  }
 0x870   : > { %11635 = vmatpush1.bf16.msra.mxu1 %v21204_v9  ;;  %11595 = vmatprep.subr.bf16.mxu0 %v21209_v11  ;;  %v21275_v9 = vld [vmem:[#allocation8 + $0x13f4] ss:$24 sps:$4 sm:$0xff]  }
 0x871   : > { %11636 = vmatprep.subr.bf16.mxu1 %v21212_v10  ;;  %v21278_v11 = vld [vmem:[#allocation8 + $0x16f4] ss:$24 sps:$4 sm:$0xff]   ;;  %v21273_v10 = vld [vmem:[#allocation8 + $0x13f0] ss:$24 sps:$4 sm:$0xff]  }
 0x873   : > { %11596 = vmatpush1.bf16.msra.mxu0 %v21207_v13  ;;  %v21276_v13 = vld [vmem:[#allocation8 + $0x16f0] ss:$24 sps:$4 sm:$0xff]  }
 0x874   : > { %11637 = vmatpush1.bf16.msra.mxu1 %v21210_v31  ;;  %11647 = vmatprep.subr.bf16.mxu0 %v21215_v14  ;;  %v21281_v31 = vld [vmem:[#allocation8 + $0x1424] ss:$24 sps:$4 sm:$0xff]  }
 0x875   : > { %11688 = vmatprep.subr.bf16.mxu1 %v21218_v33  ;;  %v21284_v14 = vld [vmem:[#allocation8 + $0x1724] ss:$24 sps:$4 sm:$0xff]   ;;  %v21279_v33 = vld [vmem:[#allocation8 + $0x1420] ss:$24 sps:$4 sm:$0xff]  }
 0x876   : > { %11598 = vmatmul.mubr.bf16.vlgmr.msra.gmra.mrb[56].mxu0 %v22667_v42 }
 0x877   : > { %11639 = vmatmul.mubr.bf16.vlgmr.msra.gmra.mrb[56].mxu1 %v22670_v3  ;;  %11648 = vmatpush1.bf16.msra.mxu0 %v21213_v29  ;;  %v21282_v29 = vld [vmem:[#allocation8 + $0x1720] ss:$24 sps:$4 sm:$0xff]  }
 0x878   : > { %11679 = vmatprep.mubr.bf16.mxu0 %v22663_v63  ;;  %11689 = vmatpush1.bf16.msra.mxu1 %v21216_v17  ;;  %v21234_v63 = vld [vmem:[#allocation8 + $0x15a0] ss:$24 sps:$4 sm:$0xff]   ;;  %v21287_v17 = vld [vmem:[#allocation8 + $0x1454] ss:$24 sps:$4 sm:$0xff]  }
 0x879   : > { %11720 = vmatprep.mubr.bf16.mxu1 %v22665_v1  ;;  %11649 = vmatprep.subr.bf16.mxu0 %v21221_v18  ;;  %v21237_v1 = vld [vmem:[#allocation8 + $0x12d0] ss:$24 sps:$4 sm:$0xff]   ;;  %v21290_v18 = vld [vmem:[#allocation8 + $0x1754] ss:$24 sps:$4 sm:$0xff]  }
 0x87a   : > { %11690 = vmatprep.subr.bf16.mxu1 %v21224_v19  ;;  %v21285_v19 = vld [vmem:[#allocation8 + $0x1450] ss:$24 sps:$4 sm:$0xff]  }
 0x87b   : > { %11650 = vmatpush1.bf16.msra.mxu0 %v21219_v30  ;;  %v21288_v30 = vld [vmem:[#allocation8 + $0x1750] ss:$24 sps:$4 sm:$0xff]  }
 0x87c   : > { %11691 = vmatpush1.bf16.msra.mxu1 %v21222_v40  ;;  %11651 = vmatprep.subr.bf16.mxu0 %v21227_v52  ;;  %v21293_v40 = vld [vmem:[#allocation8 + $0x1484] ss:$24 sps:$4 sm:$0xff]  }
 0x87d   : > { %11692 = vmatprep.subr.bf16.mxu1 %v21230_v43  ;;  %v21296_v52 = vld [vmem:[#allocation8 + $0x1784] ss:$24 sps:$4 sm:$0xff]   ;;  %v21291_v43 = vld [vmem:[#allocation8 + $0x1480] ss:$24 sps:$4 sm:$0xff]  }
 0x87f   : > { %11652 = vmatpush1.bf16.msra.mxu0 %v21225_v44  ;;  %v21294_v44 = vld [vmem:[#allocation8 + $0x1780] ss:$24 sps:$4 sm:$0xff]  }
 0x880   : > { %11693 = vmatpush1.bf16.msra.mxu1 %v21228_v60  ;;  %11653 = vmatprep.subr.bf16.mxu0 %v21233_v35  ;;  %v21299_v60 = vld [vmem:[#allocation8 + $0x14b4] ss:$24 sps:$4 sm:$0xff]  }
 0x881   : > { %11694 = vmatprep.subr.bf16.mxu1 %v21236_v47  ;;  %v21302_v35 = vld [vmem:[#allocation8 + $0x17b4] ss:$24 sps:$4 sm:$0xff]   ;;  %v21297_v47 = vld [vmem:[#allocation8 + $0x14b0] ss:$24 sps:$4 sm:$0xff]  }
 0x883   : > { %11654 = vmatpush1.bf16.msra.mxu0 %v21231_v16  ;;  %v21300_v16 = vld [vmem:[#allocation8 + $0x17b0] ss:$24 sps:$4 sm:$0xff]  }
 0x884   : > { %11695 = vmatpush1.bf16.msra.mxu1 %v21234_v63  ;;  %11655 = vmatprep.subr.bf16.mxu0 %v21239_v49  ;;  %v21305_v63 = vld [vmem:[#allocation8 + $0x14e4] ss:$24 sps:$4 sm:$0xff]  }
 0x885   : > { %11696 = vmatprep.subr.bf16.mxu1 %v21242_v55  ;;  %v21308_v49 = vld [vmem:[#allocation8 + $0x17e4] ss:$24 sps:$4 sm:$0xff]   ;;  %v11735_v55 = vld [vmem:[#allocation5 + $0x40] sm:$0xff] }
 0x887   : > { %11656 = vmatpush1.bf16.msra.mxu0 %v21237_v1  ;;  %v11737_v1 = vld [vmem:[#allocation5 + $0xa0] sm:$0xff] }
 0x888   : > { %11697 = vmatpush1.bf16.msra.mxu1 %v21240_v51  ;;  %11657 = vmatprep.subr.bf16.mxu0 %v21245_v28  ;;  %v11736_v51 = vld [vmem:[#allocation5 + $0x48] sm:$0xff] }
 0x889   : > { %11698 = vmatprep.subr.bf16.mxu1 %v21248_v54  ;;  %v11738_v28 = vld [vmem:[#allocation5 + $0xa8] sm:$0xff]  ;;  %v21303_v54 = vld [vmem:[#allocation8 + $0x14e0] ss:$24 sps:$4 sm:$0xff]  }
 0x88b   : > { %11658 = vmatpush1.bf16.msra.mxu0 %v21243_v6  ;;  %v21306_v6 = vld [vmem:[#allocation8 + $0x17e0] ss:$24 sps:$4 sm:$0xff]  }
 0x88c   : > { %11699 = vmatpush1.bf16.msra.mxu1 %v21246_v45  ;;  %11659 = vmatprep.subr.bf16.mxu0 %v21251_v59  ;;  %v19172_v45 = vcombine.high %v11735_v55, %v11737_v1  ;;  %v19174_v59 = vcombine.high %v11736_v51, %v11738_v28 }
 0x88d   : > { %11700 = vmatprep.subr.bf16.mxu1 %v21254_v61  ;;  %v11739_v61 = vld [vmem:[#allocation5 + $0x100] sm:$0xff] }
 0x88f   : > { %11660 = vmatpush1.bf16.msra.mxu0 %v21249_v0  ;;  %v11741_v0 = vld [vmem:[#allocation5 + $0x160] sm:$0xff] }
 0x890   : > { %11701 = vmatpush1.bf16.msra.mxu1 %v21252_v2  ;;  %11661 = vmatprep.subr.bf16.mxu0 %v21257_v4  ;;  %v11740_v2 = vld [vmem:[#allocation5 + $0x108] sm:$0xff] }
 0x891   : > { %11702 = vmatprep.subr.bf16.mxu1 %v21260_v37  ;;  %v11742_v4 = vld [vmem:[#allocation5 + $0x168] sm:$0xff]  ;;  %v19171_v37 = vcombine.low %v11735_v55, %v11737_v1  ;;  %v11759_v1 = vld [vmem:[#allocation5 + $0x4c0] sm:$0xff] }
 0x893   : > { %11662 = vmatpush1.bf16.msra.mxu0 %v21255_v5  ;;  %v19173_v5 = vcombine.low %v11736_v51, %v11738_v28  ;;  %v11761_v51 = vld [vmem:[#allocation5 + $0x520] sm:$0xff]  ;;  %v11760_v28 = vld [vmem:[#allocation5 + $0x4c8] sm:$0xff] }
 0x894   : > { %11703 = vmatpush1.bf16.msra.mxu1 %v21258_v21  ;;  %11663 = vmatprep.subr.bf16.mxu0 %v21263_v41  ;;  %v19176_v21 = vcombine.high %v11739_v61, %v11741_v0  ;;  %v19178_v41 = vcombine.high %v11740_v2, %v11742_v4 }
 0x895   : > { %11704 = vmatprep.subr.bf16.mxu1 %v21266_v50  ;;  %v11743_v50 = vld [vmem:[#allocation5 + $0x1c0] sm:$0xff] }
 0x897   : > { %11664 = vmatpush1.bf16.msra.mxu0 %v21261_v15  ;;  %v11745_v15 = vld [vmem:[#allocation5 + $0x220] sm:$0xff] }
 0x898   : > { %11705 = vmatpush1.bf16.msra.mxu1 %v21264_v36  ;;  %11665 = vmatprep.subr.bf16.mxu0 %v21269_v32  ;;  %v11744_v36 = vld [vmem:[#allocation5 + $0x1c8] sm:$0xff] }
 0x899   : > { %11706 = vmatprep.subr.bf16.mxu1 %v21272_v7  ;;  %v11746_v32 = vld [vmem:[#allocation5 + $0x228] sm:$0xff]  ;;  %v19175_v7 = vcombine.low %v11739_v61, %v11741_v0  ;;  %v11763_v0 = vld [vmem:[#allocation5 + $0x580] sm:$0xff] }
 0x89b   : > { %11666 = vmatpush1.bf16.msra.mxu0 %v21267_v8  ;;  %v19177_v8 = vcombine.low %v11740_v2, %v11742_v4  ;;  %v11765_v2 = vld [vmem:[#allocation5 + $0x5e0] sm:$0xff]  ;;  %v11764_v4 = vld [vmem:[#allocation5 + $0x588] sm:$0xff] }
 0x89c   : > { %11707 = vmatpush1.bf16.msra.mxu1 %v21270_v56  ;;  %11667 = vmatprep.subr.bf16.mxu0 %v21275_v9  ;;  %v19180_v56 = vcombine.high %v11743_v50, %v11745_v15  ;;  %v19182_v9 = vcombine.high %v11744_v36, %v11746_v32 }
 0x89d   : > { %11708 = vmatprep.subr.bf16.mxu1 %v21278_v11  ;;  %v11747_v11 = vld [vmem:[#allocation5 + $0x280] sm:$0xff] }
 0x89f   : > { %11668 = vmatpush1.bf16.msra.mxu0 %v21273_v10  ;;  %v11749_v10 = vld [vmem:[#allocation5 + $0x2e0] sm:$0xff] }
 0x8a0   : > { %11709 = vmatpush1.bf16.msra.mxu1 %v21276_v13  ;;  %11669 = vmatprep.subr.bf16.mxu0 %v21281_v31  ;;  %v11748_v13 = vld [vmem:[#allocation5 + $0x288] sm:$0xff] }
 0x8a1   : > { %11710 = vmatprep.subr.bf16.mxu1 %v21284_v14  ;;  %v11750_v31 = vld [vmem:[#allocation5 + $0x2e8] sm:$0xff]  ;;  %v19184_v14 = vcombine.high %v11747_v11, %v11749_v10 }
 0x8a3   : > { %11670 = vmatpush1.bf16.msra.mxu0 %v21279_v33  ;;  %v19186_v33 = vcombine.high %v11748_v13, %v11750_v31 }
 0x8a4   : > { %11711 = vmatpush1.bf16.msra.mxu1 %v21282_v29  ;;  %11671 = vmatprep.subr.bf16.mxu0 %v21287_v17  ;;  %v11751_v29 = vld [vmem:[#allocation5 + $0x340] sm:$0xff] }
 0x8a5   : > { %11712 = vmatprep.subr.bf16.mxu1 %v21290_v18  ;;  %v11753_v17 = vld [vmem:[#allocation5 + $0x3a0] sm:$0xff]  ;;  %v11752_v18 = vld [vmem:[#allocation5 + $0x348] sm:$0xff] }
 0x8a7   : > { %11672 = vmatpush1.bf16.msra.mxu0 %v21285_v19  ;;  %v11754_v19 = vld [vmem:[#allocation5 + $0x3a8] sm:$0xff] }
 0x8a8   : > { %11713 = vmatpush1.bf16.msra.mxu1 %v21288_v30  ;;  %11673 = vmatprep.subr.bf16.mxu0 %v21293_v40  ;;  %v19183_v30 = vcombine.low %v11747_v11, %v11749_v10  ;;  %v19185_v40 = vcombine.low %v11748_v13, %v11750_v31  ;;  %v11771_v10 = vld [vmem:[#allocation5 + $0x700] sm:$0xff]  ;;  %v11772_v31 = vld [vmem:[#allocation5 + $0x708] sm:$0xff] }
 0x8a9   : > { %11714 = vmatprep.subr.bf16.mxu1 %v21296_v52  ;;  %v19188_v52 = vcombine.high %v11751_v29, %v11753_v17  ;;  %v11773_v13 = vld [vmem:[#allocation5 + $0x760] sm:$0xff] }
 0x8ab   : > { %11674 = vmatpush1.bf16.msra.mxu0 %v21291_v43  ;;  %v19190_v43 = vcombine.high %v11752_v18, %v11754_v19 }
 0x8ac   : > { %11715 = vmatpush1.bf16.msra.mxu1 %v21294_v44  ;;  %11675 = vmatprep.subr.bf16.mxu0 %v21299_v60  ;;  %v11755_v44 = vld [vmem:[#allocation5 + $0x400] sm:$0xff] }
 0x8ad   : > { %11716 = vmatprep.subr.bf16.mxu1 %v21302_v35  ;;  %v11757_v60 = vld [vmem:[#allocation5 + $0x460] sm:$0xff]  ;;  %v11756_v35 = vld [vmem:[#allocation5 + $0x408] sm:$0xff] }
 0x8af   : > { %11676 = vmatpush1.bf16.msra.mxu0 %v21297_v47  ;;  %v11758_v47 = vld [vmem:[#allocation5 + $0x468] sm:$0xff] }
 0x8b0   : > { %11717 = vmatpush1.bf16.msra.mxu1 %v21300_v16  ;;  %11677 = vmatprep.subr.bf16.mxu0 %v21305_v63  ;;  %v19187_v16 = vcombine.low %v11751_v29, %v11753_v17  ;;  %v19189_v63 = vcombine.low %v11752_v18, %v11754_v19  ;;  %v19194_v55 = vcombine.high %v11756_v35, %v11758_v47  ;;  %v11775_v17 = vld [vmem:[#allocation5 + $0x7c0] sm:$0xff]  ;;  %v11776_v19 = vld [vmem:[#allocation5 + $0x7c8] sm:$0xff] }
 0x8b1   : > { %11718 = vmatprep.subr.bf16.mxu1 %v21308_v49  ;;  %v19192_v49 = vcombine.high %v11755_v44, %v11757_v60  ;;  %v11777_v18 = vld [vmem:[#allocation5 + $0x820] sm:$0xff] }
 0x8b3   : > { %11678 = vmatpush1.bf16.msra.mxu0 %v21303_v54  ;;  %v11762_v54 = vld [vmem:[#allocation5 + $0x528] sm:$0xff] }
 0x8b4   : > { %11719 = vmatpush1.bf16.msra.mxu1 %v21306_v6  ;;  %12909 = vmatprep.subr.bf16.mxu0 %v19172_v45  ;;  %v19191_v6 = vcombine.low %v11755_v44, %v11757_v60  ;;  %v19193_v45 = vcombine.low %v11756_v35, %v11758_v47  ;;  %v19198_v61 = vcombine.high %v11760_v28, %v11762_v54  ;;  %v11779_v60 = vld [vmem:[#allocation5 + $0x880] sm:$0xff]  ;;  %v11780_v47 = vld [vmem:[#allocation5 + $0x888] sm:$0xff] }
 0x8b5   : > { %13032 = vmatprep.subr.bf16.mxu1 %v19174_v59  ;;  %v19196_v59 = vcombine.high %v11759_v1, %v11761_v51  ;;  %v11781_v35 = vld [vmem:[#allocation5 + $0x8e0] sm:$0xff] }
 0x8b6   : > { %11680 = vmatmul.mubr.bf16.vlgmr.msra.gmra.mrb[60].mxu0 %v22667_v42  ;;  %v19179_v42 = vcombine.low %v11743_v50, %v11745_v15  ;;  %v11767_v15 = vld [vmem:[#allocation5 + $0x640] sm:$0xff] }
 0x8b7   : > { %11721 = vmatmul.mubr.bf16.vlgmr.msra.gmra.mrb[60].mxu1 %v22670_v3  ;;  %12910 = vmatpush1.bf16.msra.mxu0 %v19171_v37  ;;  %v19181_v3 = vcombine.low %v11744_v36, %v11746_v32  ;;  %v11766_v37 = vld [vmem:[#allocation5 + $0x5e8] sm:$0xff]  ;;  %v11769_v36 = vld [vmem:[#allocation5 + $0x6a0] sm:$0xff] }
 0x8b8   : > { %13033 = vmatpush1.bf16.msra.mxu1 %v19173_v5  ;;  %12911 = vmatprep.subr.bf16.mxu0 %v19176_v21  ;;  %v19195_v5 = vcombine.low %v11759_v1, %v11761_v51  ;;  %v19197_v21 = vcombine.low %v11760_v28, %v11762_v54  ;;  %v19202_v50 = vcombine.high %v11764_v4, %v11766_v37  ;;  %v11768_v32 = vld [vmem:[#allocation5 + $0x648] sm:$0xff]  ;;  %v11783_v51 = vld [vmem:[#allocation5 + $0x940] sm:$0xff] }
 0x8b9   : > { %13034 = vmatprep.subr.bf16.mxu1 %v19178_v41  ;;  %12941 = vmatprep.mubr.bf16.mxu0 %v22418_v57  ;;  %v19200_v41 = vcombine.high %v11763_v0, %v11765_v2  ;;  %v11785_v28 = vld [vmem:[#allocation5 + $0x9a0] sm:$0xff]  ;;  %v11784_v54 = vld [vmem:[#allocation5 + $0x948] sm:$0xff] }
 0x8ba   : > { %13064 = vmatprep.mubr.bf16.mxu1 %v22418_v57 }
 0x8bb   : > { %12912 = vmatpush1.bf16.msra.mxu0 %v19175_v7  ;;  %v11770_v7 = vld [vmem:[#allocation5 + $0x6a8] sm:$0xff] }
 0x8bc   : > { %13035 = vmatpush1.bf16.msra.mxu1 %v19177_v8  ;;  %12913 = vmatprep.subr.bf16.mxu0 %v19180_v56  ;;  %v19199_v8 = vcombine.low %v11763_v0, %v11765_v2  ;;  %v19201_v56 = vcombine.low %v11764_v4, %v11766_v37  ;;  %v19206_v11 = vcombine.high %v11768_v32, %v11770_v7  ;;  %v11787_v2 = vld [vmem:[#allocation5 + $0xa00] sm:$0xff]  ;;  %v11788_v37 = vld [vmem:[#allocation5 + $0xa08] sm:$0xff] }
 0x8bd   : > { %13036 = vmatprep.subr.bf16.mxu1 %v19182_v9  ;;  %v19204_v9 = vcombine.high %v11767_v15, %v11769_v36  ;;  %v11789_v4 = vld [vmem:[#allocation5 + $0xa60] sm:$0xff] }
 0x8bf   : > { %12914 = vmatpush1.bf16.msra.mxu0 %v19179_v42  ;;  %v11774_v42 = vld [vmem:[#allocation5 + $0x768] sm:$0xff] }
 0x8c0   : > { %13037 = vmatpush1.bf16.msra.mxu1 %v19181_v3  ;;  %12915 = vmatprep.subr.bf16.mxu0 %v19184_v14  ;;  %v19203_v3 = vcombine.low %v11767_v15, %v11769_v36  ;;  %v19205_v14 = vcombine.low %v11768_v32, %v11770_v7  ;;  %v19210_v29 = vcombine.high %v11772_v31, %v11774_v42  ;;  %v11791_v36 = vld [vmem:[#allocation5 + $0xac0] sm:$0xff]  ;;  %v11792_v7 = vld [vmem:[#allocation5 + $0xac8] sm:$0xff] }
 0x8c1   : > { %13038 = vmatprep.subr.bf16.mxu1 %v19186_v33  ;;  %v19208_v33 = vcombine.high %v11771_v10, %v11773_v13  ;;  %v11793_v32 = vld [vmem:[#allocation5 + $0xb20] sm:$0xff] }
 0x8c3   : > { %12916 = vmatpush1.bf16.msra.mxu0 %v19183_v30  ;;  %v11778_v30 = vld [vmem:[#allocation5 + $0x828] sm:$0xff] }
 0x8c4   : > { %13039 = vmatpush1.bf16.msra.mxu1 %v19185_v40  ;;  %12917 = vmatprep.subr.bf16.mxu0 %v19188_v52  ;;  %v19207_v40 = vcombine.low %v11771_v10, %v11773_v13  ;;  %v19209_v52 = vcombine.low %v11772_v31, %v11774_v42  ;;  %v19214_v44 = vcombine.high %v11776_v19, %v11778_v30  ;;  %v11795_v13 = vld [vmem:[#allocation5 + $0xb80] sm:$0xff]  ;;  %v11796_v42 = vld [vmem:[#allocation5 + $0xb88] sm:$0xff] }
 0x8c5   : > { %13040 = vmatprep.subr.bf16.mxu1 %v19190_v43  ;;  %v19212_v43 = vcombine.high %v11775_v17, %v11777_v18  ;;  %v11797_v31 = vld [vmem:[#allocation5 + $0xbe0] sm:$0xff] }
 0x8c7   : > { %12918 = vmatpush1.bf16.msra.mxu0 %v19187_v16  ;;  %v11782_v16 = vld [vmem:[#allocation5 + $0x8e8] sm:$0xff] }
 0x8c8   : > { %13041 = vmatpush1.bf16.msra.mxu1 %v19189_v63  ;;  %12919 = vmatprep.subr.bf16.mxu0 %v19192_v49  ;;  %v19211_v63 = vcombine.low %v11775_v17, %v11777_v18  ;;  %v19213_v49 = vcombine.low %v11776_v19, %v11778_v30  ;;  %v19218_v1 = vcombine.high %v11780_v47, %v11782_v16  ;;  %v11799_v18 = vld [vmem:[#allocation5 + $0xc40] sm:$0xff]  ;;  %v11800_v30 = vld [vmem:[#allocation5 + $0xc48] sm:$0xff] }
 0x8c9   : > { %13042 = vmatprep.subr.bf16.mxu1 %v19194_v55  ;;  %v19216_v55 = vcombine.high %v11779_v60, %v11781_v35  ;;  %v11801_v19 = vld [vmem:[#allocation5 + $0xca0] sm:$0xff] }
 0x8cb   : > { %12920 = vmatpush1.bf16.msra.mxu0 %v19191_v6  ;;  %v11786_v6 = vld [vmem:[#allocation5 + $0x9a8] sm:$0xff] }
 0x8cc   : > { %13043 = vmatpush1.bf16.msra.mxu1 %v19193_v45  ;;  %12921 = vmatprep.subr.bf16.mxu0 %v19196_v59  ;;  %v19215_v45 = vcombine.low %v11779_v60, %v11781_v35  ;;  %v19217_v59 = vcombine.low %v11780_v47, %v11782_v16  ;;  %v19222_v0 = vcombine.high %v11784_v54, %v11786_v6  ;;  %v11803_v35 = vld [vmem:[#allocation5 + $0xd00] sm:$0xff]  ;;  %v11804_v16 = vld [vmem:[#allocation5 + $0xd08] sm:$0xff] }
 0x8cd   : > { %13044 = vmatprep.subr.bf16.mxu1 %v19198_v61  ;;  %v19220_v61 = vcombine.high %v11783_v51, %v11785_v28  ;;  %v11805_v47 = vld [vmem:[#allocation5 + $0xd60] sm:$0xff] }
 0x8cf   : > { %12922 = vmatpush1.bf16.msra.mxu0 %v19195_v5  ;;  %v11790_v5 = vld [vmem:[#allocation5 + $0xa68] sm:$0xff] }
 0x8d0   : > { %13045 = vmatpush1.bf16.msra.mxu1 %v19197_v21  ;;  %12923 = vmatprep.subr.bf16.mxu0 %v19200_v41  ;;  %v19219_v21 = vcombine.low %v11783_v51, %v11785_v28  ;;  %v19221_v41 = vcombine.low %v11784_v54, %v11786_v6  ;;  %v19226_v15 = vcombine.high %v11788_v37, %v11790_v5  ;;  %v11807_v28 = vld [vmem:[#allocation5 + $0xdc0] sm:$0xff]  ;;  %v11808_v6 = vld [vmem:[#allocation5 + $0xdc8] sm:$0xff] }
 0x8d1   : > { %13046 = vmatprep.subr.bf16.mxu1 %v19202_v50  ;;  %v19224_v50 = vcombine.high %v11787_v2, %v11789_v4  ;;  %v11809_v54 = vld [vmem:[#allocation5 + $0xe20] sm:$0xff] }
 0x8d3   : > { %12924 = vmatpush1.bf16.msra.mxu0 %v19199_v8  ;;  %v11794_v8 = vld [vmem:[#allocation5 + $0xb28] sm:$0xff] }
 0x8d4   : > { %13047 = vmatpush1.bf16.msra.mxu1 %v19201_v56  ;;  %12925 = vmatprep.subr.bf16.mxu0 %v19204_v9  ;;  %v19223_v56 = vcombine.low %v11787_v2, %v11789_v4  ;;  %v19225_v9 = vcombine.low %v11788_v37, %v11790_v5  ;;  %v19230_v10 = vcombine.high %v11792_v7, %v11794_v8  ;;  %v11811_v4 = vld [vmem:[#allocation5 + $0xe80] sm:$0xff]  ;;  %v11812_v5 = vld [vmem:[#allocation5 + $0xe88] sm:$0xff] }
 0x8d5   : > { %13048 = vmatprep.subr.bf16.mxu1 %v19206_v11  ;;  %v19228_v11 = vcombine.high %v11791_v36, %v11793_v32  ;;  %v11813_v37 = vld [vmem:[#allocation5 + $0xee0] sm:$0xff] }
 0x8d7   : > { %12926 = vmatpush1.bf16.msra.mxu0 %v19203_v3  ;;  %v11798_v3 = vld [vmem:[#allocation5 + $0xbe8] sm:$0xff] }
 0x8d8   : > { %13049 = vmatpush1.bf16.msra.mxu1 %v19205_v14  ;;  %12927 = vmatprep.subr.bf16.mxu0 %v19208_v33  ;;  %v19227_v14 = vcombine.low %v11791_v36, %v11793_v32  ;;  %v19229_v33 = vcombine.low %v11792_v7, %v11794_v8  ;;  %v19234_v17 = vcombine.high %v11796_v42, %v11798_v3  ;;  %v11815_v32 = vld [vmem:[#allocation5 + $0xf40] sm:$0xff]  ;;  %v11816_v8 = vld [vmem:[#allocation5 + $0xf48] sm:$0xff] }
 0x8d9   : > { %13050 = vmatprep.subr.bf16.mxu1 %v19210_v29  ;;  %v19232_v29 = vcombine.high %v11795_v13, %v11797_v31  ;;  %v11817_v7 = vld [vmem:[#allocation5 + $0xfa0] sm:$0xff] }
 0x8db   : > { %12928 = vmatpush1.bf16.msra.mxu0 %v19207_v40  ;;  %v11802_v40 = vld [vmem:[#allocation5 + $0xca8] sm:$0xff] }
 0x8dc   : > { %13051 = vmatpush1.bf16.msra.mxu1 %v19209_v52  ;;  %12929 = vmatprep.subr.bf16.mxu0 %v19212_v43  ;;  %v19231_v52 = vcombine.low %v11795_v13, %v11797_v31  ;;  %v19233_v43 = vcombine.low %v11796_v42, %v11798_v3  ;;  %v19238_v60 = vcombine.high %v11800_v30, %v11802_v40  ;;  %v11819_v31 = vld [vmem:[#allocation5 + $0x1000] sm:$0xff]  ;;  %v11820_v3 = vld [vmem:[#allocation5 + $0x1008] sm:$0xff] }
 0x8dd   : > { %13052 = vmatprep.subr.bf16.mxu1 %v19214_v44  ;;  %v19236_v44 = vcombine.high %v11799_v18, %v11801_v19  ;;  %v11821_v42 = vld [vmem:[#allocation5 + $0x1060] sm:$0xff] }
 0x8df   : > { %12930 = vmatpush1.bf16.msra.mxu0 %v19211_v63  ;;  %v11806_v63 = vld [vmem:[#allocation5 + $0xd68] sm:$0xff] }
 0x8e0   : > { %13053 = vmatpush1.bf16.msra.mxu1 %v19213_v49  ;;  %12931 = vmatprep.subr.bf16.mxu0 %v19216_v55  ;;  %v19235_v49 = vcombine.low %v11799_v18, %v11801_v19  ;;  %v19237_v55 = vcombine.low %v11800_v30, %v11802_v40  ;;  %v19242_v51 = vcombine.high %v11804_v16, %v11806_v63  ;;  %v11823_v19 = vld [vmem:[#allocation5 + $0x10c0] sm:$0xff]  ;;  %v11824_v40 = vld [vmem:[#allocation5 + $0x10c8] sm:$0xff] }
 0x8e1   : > { %13054 = vmatprep.subr.bf16.mxu1 %v19218_v1  ;;  %v19240_v1 = vcombine.high %v11803_v35, %v11805_v47  ;;  %v11825_v30 = vld [vmem:[#allocation5 + $0x1120] sm:$0xff] }
 0x8e3   : > { %12932 = vmatpush1.bf16.msra.mxu0 %v19215_v45  ;;  %v11810_v45 = vld [vmem:[#allocation5 + $0xe28] sm:$0xff] }
 0x8e4   : > { %13055 = vmatpush1.bf16.msra.mxu1 %v19217_v59  ;;  %12933 = vmatprep.subr.bf16.mxu0 %v19220_v61  ;;  %v19239_v59 = vcombine.low %v11803_v35, %v11805_v47  ;;  %v19241_v61 = vcombine.low %v11804_v16, %v11806_v63  ;;  %v19246_v2 = vcombine.high %v11808_v6, %v11810_v45  ;;  %v11827_v16 = vld [vmem:[#allocation5 + $0x1180] sm:$0xff] }
 0x8e5   : > { %13056 = vmatprep.subr.bf16.mxu1 %v19222_v0  ;;  %v19244_v0 = vcombine.high %v11807_v28, %v11809_v54  ;;  %v11829_v63 = vld [vmem:[#allocation5 + $0x11e0] sm:$0xff] }
 0x8e7   : > { %12934 = vmatpush1.bf16.msra.mxu0 %v19219_v21  ;;  %v11814_v21 = vld [vmem:[#allocation5 + $0xee8] sm:$0xff] }
 0x8e8   : > { %13057 = vmatpush1.bf16.msra.mxu1 %v19221_v41  ;;  %12935 = vmatprep.subr.bf16.mxu0 %v19224_v50  ;;  %v19243_v41 = vcombine.low %v11807_v28, %v11809_v54  ;;  %v19245_v50 = vcombine.low %v11808_v6, %v11810_v45  ;;  %v19250_v36 = vcombine.high %v11812_v5, %v11814_v21 }
 0x8e9   : > { %13058 = vmatprep.subr.bf16.mxu1 %v19226_v15  ;;  %v19248_v15 = vcombine.high %v11811_v4, %v11813_v37  ;;  %v19259_v45 = vcombine.low %v11823_v19, %v11825_v30 }
 0x8eb   : > { %12936 = vmatpush1.bf16.msra.mxu0 %v19223_v56  ;;  %v11818_v56 = vld [vmem:[#allocation5 + $0xfa8] sm:$0xff] }
 0x8ec   : > { %13059 = vmatpush1.bf16.msra.mxu1 %v19225_v9  ;;  %12937 = vmatprep.subr.bf16.mxu0 %v19228_v11  ;;  %v19247_v9 = vcombine.low %v11811_v4, %v11813_v37  ;;  %v19249_v11 = vcombine.low %v11812_v5, %v11814_v21  ;;  %v19254_v13 = vcombine.high %v11816_v8, %v11818_v56 }
 0x8ed   : > { %13060 = vmatprep.subr.bf16.mxu1 %v19230_v10  ;;  %v19252_v10 = vcombine.high %v11815_v32, %v11817_v7  ;;  %v19264_v4 = vcombine.high %v11827_v16, %v11829_v63 }
 0x8ef   : > { %12938 = vmatpush1.bf16.msra.mxu0 %v19227_v14  ;;  %v11822_v14 = vld [vmem:[#allocation5 + $0x1068] sm:$0xff] }
 0x8f0   : > { %13061 = vmatpush1.bf16.msra.mxu1 %v19229_v33  ;;  %12939 = vmatprep.subr.bf16.mxu0 %v19232_v29  ;;  %v19251_v33 = vcombine.low %v11815_v32, %v11817_v7  ;;  %v19253_v29 = vcombine.low %v11816_v8, %v11818_v56  ;;  %v19258_v18 = vcombine.high %v11820_v3, %v11822_v14  ;;  %v11834_v32 = vld [vmem:[#allocation5 + $0x12a8] sm:$0xff] }
 0x8f1   : > { %13062 = vmatprep.subr.bf16.mxu1 %v19234_v17  ;;  %v19256_v17 = vcombine.high %v11819_v31, %v11821_v42  ;;  %v19263_v7 = vcombine.low %v11827_v16, %v11829_v63 }
 0x8f3   : > { %12940 = vmatpush1.bf16.msra.mxu0 %v19231_v52  ;;  %v11826_v52 = vld [vmem:[#allocation5 + $0x1128] sm:$0xff] }
 0x8f4   : > { %13063 = vmatpush1.bf16.msra.mxu1 %v19233_v43  ;;  %12950 = vmatprep.subr.bf16.mxu0 %v19236_v44  ;;  %v19255_v43 = vcombine.low %v11819_v31, %v11821_v42  ;;  %v19257_v44 = vcombine.low %v11820_v3, %v11822_v14  ;;  %v19262_v47 = vcombine.high %v11824_v40, %v11826_v52  ;;  %v11839_v14 = vld [vmem:[#allocation5 + $0x13c0] sm:$0xff] }
 0x8f5   : > { %13073 = vmatprep.subr.bf16.mxu1 %v19238_v60  ;;  %v19260_v60 = vcombine.high %v11823_v19, %v11825_v30 }
 0x8f6   : > { %12942 = vmatmul.mubr.bf16.vlgmr.msra.gmra.mrb[64].mxu0 %v22423_v12 }
 0x8f7   : > { %12951 = vmatpush1.bf16.msra.mxu0 %v19235_v49  ;;  %13065 = vmatmul.mubr.bf16.vlgmr.msra.gmra.mrb[64].mxu1 %v22423_v12 }
 0x8f8   : > { %13074 = vmatpush1.bf16.msra.mxu1 %v19237_v55  ;;  %12952 = vmatprep.subr.bf16.mxu0 %v19240_v1  ;;  %v11828_v1 = vld [vmem:[#allocation5 + $0x1188] sm:$0xff] }
 0x8f9   : > { %13075 = vmatprep.subr.bf16.mxu1 %v19242_v51  ;;  %12982 = vmatprep.mubr.bf16.mxu0 %v22426_v23  ;;  %v11830_v51 = vld [vmem:[#allocation5 + $0x11e8] sm:$0xff] }
 0x8fa   : > { %13105 = vmatprep.mubr.bf16.mxu1 %v22426_v23  ;;  %v19266_v21 = vcombine.high %v11828_v1, %v11830_v51  ;;  %v19265_v8 = vcombine.low %v11828_v1, %v11830_v51  ;;  %v11848_v1 = vld [vmem:[#allocation5 + $0x1548] sm:$0xff] }
 0x8fb   : > { %12953 = vmatpush1.bf16.msra.mxu0 %v19239_v59  ;;  %v11850_v51 = vld [vmem:[#allocation5 + $0x15a8] sm:$0xff] }
 0x8fc   : > { %13076 = vmatpush1.bf16.msra.mxu1 %v19241_v61  ;;  %12954 = vmatprep.subr.bf16.mxu0 %v19244_v0 }
 0x8fd   : > { %13077 = vmatprep.subr.bf16.mxu1 %v19246_v2  ;;  %v19261_v2 = vcombine.low %v11824_v40, %v11826_v52  ;;  %v11843_v52 = vld [vmem:[#allocation5 + $0x1480] sm:$0xff] }
 0x8ff   : > { %12955 = vmatpush1.bf16.msra.mxu0 %v19243_v41  ;;  %v11831_v41 = vld [vmem:[#allocation5 + $0x1240] sm:$0xff] }
 0x900   : > { %13078 = vmatpush1.bf16.msra.mxu1 %v19245_v50  ;;  %12956 = vmatprep.subr.bf16.mxu0 %v19248_v15  ;;  %v11833_v50 = vld [vmem:[#allocation5 + $0x12a0] sm:$0xff] }
 0x901   : > { %13079 = vmatprep.subr.bf16.mxu1 %v19250_v36  ;;  %v11832_v36 = vld [vmem:[#allocation5 + $0x1248] sm:$0xff]  ;;  %v19268_v56 = vcombine.high %v11831_v41, %v11833_v50  ;;  %v19267_v31 = vcombine.low %v11831_v41, %v11833_v50  ;;  %v11855_v50 = vld [vmem:[#allocation5 + $0x16c0] sm:$0xff] }
 0x903   : > { %12957 = vmatpush1.bf16.msra.mxu0 %v19247_v9  ;;  %v19270_v9 = vcombine.high %v11832_v36, %v11834_v32 }
 0x904   : > { %13080 = vmatpush1.bf16.msra.mxu1 %v19249_v11  ;;  %12958 = vmatprep.subr.bf16.mxu0 %v19252_v10  ;;  %v11837_v11 = vld [vmem:[#allocation5 + $0x1360] sm:$0xff]  ;;  %v11836_v10 = vld [vmem:[#allocation5 + $0x1308] sm:$0xff] }
 0x905   : > { %13081 = vmatprep.subr.bf16.mxu1 %v19254_v13  ;;  %v11838_v13 = vld [vmem:[#allocation5 + $0x1368] sm:$0xff] }
 0x906   : > { %v19274_v3 = vcombine.high %v11836_v10, %v11838_v13  ;;  %v19273_v19 = vcombine.low %v11836_v10, %v11838_v13  ;;  %v11861_v10 = vld [vmem:[#allocation5 + $0x17e0] sm:$0xff]  ;;  %v11860_v13 = vld [vmem:[#allocation5 + $0x1788] sm:$0xff] }
 0x907   : > { %12959 = vmatpush1.bf16.msra.mxu0 %v19251_v33  ;;  %v11841_v33 = vld [vmem:[#allocation5 + $0x1420] sm:$0xff] }
 0x908   : > { %13082 = vmatpush1.bf16.msra.mxu1 %v19253_v29  ;;  %12960 = vmatprep.subr.bf16.mxu0 %v19256_v17  ;;  %v11840_v29 = vld [vmem:[#allocation5 + $0x13c8] sm:$0xff]  ;;  %v19276_v30 = vcombine.high %v11839_v14, %v11841_v33 }
 0x909   : > { %v11517_v35 = vpop.f32.mrb[52].mxu0  ;;  %13083 = vmatprep.subr.bf16.mxu1 %v19258_v18  ;;  %v11842_v17 = vld [vmem:[#allocation5 + $0x1428] sm:$0xff] }
 0x90a   : > { %v11558_v49 = vpop.f32.mrb[52].mxu1  ;;  %v11519_v55 = vpop.f32.mrb[53].mxu0  ;;  %v19278_v40 = vcombine.high %v11840_v29, %v11842_v17 }
 0x90b   : > { %v11559_v28 = vadd.f32 %v11558_v49, %v11517_v35  ;;  %v11560_v54 = vpop.f32.mrb[53].mxu1  ;;  %12961 = vmatpush1.bf16.msra.mxu0 %v19255_v43  ;;  %v11521_v6 = vpop.f32.mrb[54].mxu0  ;;  %v11845_v43 = vld [vmem:[#allocation5 + $0x14e0] sm:$0xff]  ;;  %v19275_v35 = vcombine.low %v11839_v14, %v11841_v33 }
 0x90c   : > { %v11561_v59 = vadd.f32 %v11560_v54, %v11519_v55  ;;  %13084 = vmatpush1.bf16.msra.mxu1 %v19257_v44  ;;  %v11562_v61 = vpop.f32.mrb[54].mxu1  ;;  %v11522_v0 = vpop.f32.mrb[55].mxu0  ;;  %12962 = vmatprep.subr.bf16.mxu0 %v19260_v60  ;;  %v11844_v44 = vld [vmem:[#allocation5 + $0x1488] sm:$0xff]  ;;  %v19280_v16 = vcombine.high %v11843_v52, %v11845_v43  ;;  %v11847_v49 = vld [vmem:[#allocation5 + $0x1540] sm:$0xff] }
 0x90d   : > { %v22690_v37 = vadd.f32 %v11559_v28, %v22636_v58  ;;  %v11563_v5 = vpop.f32.mrb[55].mxu1  ;;  %13085 = vmatprep.subr.bf16.mxu1 %v19262_v47  ;;  %v11835_v58 = vld [vmem:[#allocation5 + $0x1300] sm:$0xff]  ;;  %v11846_v60 = vld [vmem:[#allocation5 + $0x14e8] sm:$0xff]  ;;  %v19277_v47 = vcombine.low %v11840_v29, %v11842_v17  ;;  %v19279_v28 = vcombine.low %v11843_v52, %v11845_v43 }
 0x90e   : > { %v22693_v15 = vadd.f32 %v11561_v59, %v22639_v62  ;;  %v19269_v62 = vcombine.low %v11832_v36, %v11834_v32  ;;  %v19272_v42 = vcombine.high %v11835_v58, %v11837_v11  ;;  %v19271_v18 = vcombine.low %v11835_v58, %v11837_v11  ;;  %v11849_v55 = vld [vmem:[#allocation5 + $0x15a0] sm:$0xff]  ;;  %v11852_v0 = vld [vmem:[#allocation5 + $0x1608] sm:$0xff] }
 0x90f   : > { %12963 = vmatpush1.bf16.msra.mxu0 %v19259_v45  ;;  %v19282_v63 = vcombine.high %v11844_v44, %v11846_v60  ;;  %v19281_v54 = vcombine.low %v11844_v44, %v11846_v60  ;;  %v19284_v6 = vcombine.high %v11847_v49, %v11849_v55  ;;  %v19286_v45 = vcombine.high %v11848_v1, %v11850_v51  ;;  %v11851_v59 = vld [vmem:[#allocation5 + $0x1600] sm:$0xff]  ;;  %v11856_v32 = vld [vmem:[#allocation5 + $0x16c8] sm:$0xff] }
 0x910   : > { %13086 = vmatpush1.bf16.msra.mxu1 %v19261_v2  ;;  %12964 = vmatprep.subr.bf16.mxu0 %v19264_v4  ;;  %v11853_v61 = vld [vmem:[#allocation5 + $0x1660] sm:$0xff]  ;;  %v11854_v2 = vld [vmem:[#allocation5 + $0x1668] sm:$0xff]  ;;  %v19283_v4 = vcombine.low %v11847_v49, %v11849_v55  ;;  %v19285_v5 = vcombine.low %v11848_v1, %v11850_v51 }
 0x911   : > { %13087 = vmatprep.subr.bf16.mxu1 %v19266_v21  ;;  %v19288_v21 = vcombine.high %v11851_v59, %v11853_v61  ;;  %v19290_v41 = vcombine.high %v11852_v0, %v11854_v2  ;;  %v11857_v36 = vld [vmem:[#allocation5 + $0x1720] sm:$0xff]  ;;  %v11864_v17 = vld [vmem:[#allocation5 + $0x1848] sm:$0xff] }
 0x912   : > { %v11859_v11 = vld [vmem:[#allocation5 + $0x1780] sm:$0xff]  ;;  %v11868_v60 = vld [vmem:[#allocation5 + $0x1908] sm:$0xff] }
 0x913   : > { %12965 = vmatpush1.bf16.msra.mxu0 %v19263_v7  ;;  %v11858_v7 = vld [vmem:[#allocation5 + $0x1728] sm:$0xff]  ;;  %v11863_v33 = vld [vmem:[#allocation5 + $0x1840] sm:$0xff] }
 0x914   : > { %13088 = vmatpush1.bf16.msra.mxu1 %v19265_v8  ;;  %12966 = vmatprep.subr.bf16.mxu0 %v19268_v56  ;;  %v19287_v8 = vcombine.low %v11851_v59, %v11853_v61  ;;  %v19289_v56 = vcombine.low %v11852_v0, %v11854_v2  ;;  %v19294_v58 = vcombine.high %v11856_v32, %v11858_v7  ;;  %v11865_v29 = vld [vmem:[#allocation5 + $0x18a0] sm:$0xff]  ;;  %v11872_v51 = vld [vmem:[#allocation5 + $0x19c8] sm:$0xff] }
 0x915   : > { %13089 = vmatprep.subr.bf16.mxu1 %v19270_v9  ;;  %v19292_v9 = vcombine.high %v11855_v50, %v11857_v36  ;;  %v11867_v43 = vld [vmem:[#allocation5 + $0x1900] sm:$0xff]  ;;  %v11876_v2 = vld [vmem:[#allocation5 + $0x1a88] sm:$0xff] }
 0x916   : > { %v11869_v44 = vld [vmem:[#allocation5 + $0x1960] sm:$0xff] }
 0x917   : > { %12967 = vmatpush1.bf16.msra.mxu0 %v19267_v31  ;;  %v11862_v31 = vld [vmem:[#allocation5 + $0x17e8] sm:$0xff]  ;;  %v11871_v55 = vld [vmem:[#allocation5 + $0x19c0] sm:$0xff] }
 0x918   : > { %13090 = vmatpush1.bf16.msra.mxu1 %v19269_v62  ;;  %12968 = vmatprep.subr.bf16.mxu0 %v19272_v42  ;;  %v19291_v62 = vcombine.low %v11855_v50, %v11857_v36  ;;  %v19293_v42 = vcombine.low %v11856_v32, %v11858_v7  ;;  %v19298_v14 = vcombine.high %v11860_v13, %v11862_v31  ;;  %v11873_v1 = vld [vmem:[#allocation5 + $0x1a20] sm:$0xff]  ;;  %v11880_v7 = vld [vmem:[#allocation5 + $0x1b48] sm:$0xff] }
 0x919   : > { %13091 = vmatprep.subr.bf16.mxu1 %v19274_v3  ;;  %v19296_v3 = vcombine.high %v11859_v11, %v11861_v10  ;;  %v11875_v61 = vld [vmem:[#allocation5 + $0x1a80] sm:$0xff] }
 0x91a   : > { %v11877_v0 = vld [vmem:[#allocation5 + $0x1ae0] sm:$0xff] }
 0x91b   : > { %12969 = vmatpush1.bf16.msra.mxu0 %v19271_v18  ;;  %v11866_v18 = vld [vmem:[#allocation5 + $0x18a8] sm:$0xff]  ;;  %v11879_v36 = vld [vmem:[#allocation5 + $0x1b40] sm:$0xff] }
 0x91c   : > { %13092 = vmatpush1.bf16.msra.mxu1 %v19273_v19  ;;  %12970 = vmatprep.subr.bf16.mxu0 %v19276_v30  ;;  %v19295_v19 = vcombine.low %v11859_v11, %v11861_v10  ;;  %v19297_v30 = vcombine.low %v11860_v13, %v11862_v31  ;;  %v19302_v52 = vcombine.high %v11864_v17, %v11866_v18  ;;  %v11881_v32 = vld [vmem:[#allocation5 + $0x1ba0] sm:$0xff]  ;;  %v11884_v31 = vld [vmem:[#allocation5 + $0x1c08] sm:$0xff] }
 0x91d   : > { %13093 = vmatprep.subr.bf16.mxu1 %v19278_v40  ;;  %v19300_v40 = vcombine.high %v11863_v33, %v11865_v29  ;;  %v11883_v10 = vld [vmem:[#allocation5 + $0x1c00] sm:$0xff] }
 0x91e   : > { %v11885_v13 = vld [vmem:[#allocation5 + $0x1c60] sm:$0xff] }
 0x91f   : > { %12971 = vmatpush1.bf16.msra.mxu0 %v19275_v35  ;;  %v11870_v35 = vld [vmem:[#allocation5 + $0x1968] sm:$0xff] }
 0x920   : > { %13094 = vmatpush1.bf16.msra.mxu1 %v19277_v47  ;;  %12972 = vmatprep.subr.bf16.mxu0 %v19280_v16  ;;  %v19299_v47 = vcombine.low %v11863_v33, %v11865_v29  ;;  %v19301_v16 = vcombine.low %v11864_v17, %v11866_v18  ;;  %v19306_v49 = vcombine.high %v11868_v60, %v11870_v35  ;;  %v11887_v29 = vld [vmem:[#allocation5 + $0x1cc0] sm:$0xff]  ;;  %v11888_v18 = vld [vmem:[#allocation5 + $0x1cc8] sm:$0xff] }
 0x921   : > { %13095 = vmatprep.subr.bf16.mxu1 %v19282_v63  ;;  %v19304_v63 = vcombine.high %v11867_v43, %v11869_v44  ;;  %v11889_v17 = vld [vmem:[#allocation5 + $0x1d20] sm:$0xff] }
 0x923   : > { %12973 = vmatpush1.bf16.msra.mxu0 %v19279_v28  ;;  %v11874_v28 = vld [vmem:[#allocation5 + $0x1a28] sm:$0xff] }
 0x924   : > { %13096 = vmatpush1.bf16.msra.mxu1 %v19281_v54  ;;  %12974 = vmatprep.subr.bf16.mxu0 %v19284_v6  ;;  %v19303_v54 = vcombine.low %v11867_v43, %v11869_v44  ;;  %v19305_v6 = vcombine.low %v11868_v60, %v11870_v35  ;;  %v19310_v59 = vcombine.high %v11872_v51, %v11874_v28  ;;  %v11891_v60 = vld [vmem:[#allocation5 + $0x1d80] sm:$0xff] }
 0x925   : > { %13097 = vmatprep.subr.bf16.mxu1 %v19286_v45  ;;  %v19308_v45 = vcombine.high %v11871_v55, %v11873_v1  ;;  %v11893_v35 = vld [vmem:[#allocation5 + $0x1de0] sm:$0xff] }
 0x927   : > { %12975 = vmatpush1.bf16.msra.mxu0 %v19283_v4  ;;  %v11878_v4 = vld [vmem:[#allocation5 + $0x1ae8] sm:$0xff] }
 0x928   : > { %13098 = vmatpush1.bf16.msra.mxu1 %v19285_v5  ;;  %12976 = vmatprep.subr.bf16.mxu0 %v19288_v21  ;;  %v19307_v5 = vcombine.low %v11871_v55, %v11873_v1  ;;  %v19309_v21 = vcombine.low %v11872_v51, %v11874_v28  ;;  %v19314_v50 = vcombine.high %v11876_v2, %v11878_v4 }
 0x929   : > { %13099 = vmatprep.subr.bf16.mxu1 %v19290_v41  ;;  %v19312_v41 = vcombine.high %v11875_v61, %v11877_v0  ;;  %v19323_v28 = vcombine.low %v11887_v29, %v11889_v17 }
 0x92b   : > { %12977 = vmatpush1.bf16.msra.mxu0 %v19287_v8  ;;  %v11882_v8 = vld [vmem:[#allocation5 + $0x1ba8] sm:$0xff] }
 0x92c   : > { %13100 = vmatpush1.bf16.msra.mxu1 %v19289_v56  ;;  %12978 = vmatprep.subr.bf16.mxu0 %v19292_v9  ;;  %v19311_v56 = vcombine.low %v11875_v61, %v11877_v0  ;;  %v19313_v9 = vcombine.low %v11876_v2, %v11878_v4  ;;  %v19318_v11 = vcombine.high %v11880_v7, %v11882_v8 }
 0x92d   : > { %13101 = vmatprep.subr.bf16.mxu1 %v19294_v58  ;;  %v19316_v58 = vcombine.high %v11879_v36, %v11881_v32  ;;  %v19328_v61 = vcombine.high %v11891_v60, %v11893_v35 }
 0x92f   : > { %12979 = vmatpush1.bf16.msra.mxu0 %v19291_v62  ;;  %v11886_v62 = vld [vmem:[#allocation5 + $0x1c68] sm:$0xff] }
 0x930   : > { %13102 = vmatpush1.bf16.msra.mxu1 %v19293_v42  ;;  %12980 = vmatprep.subr.bf16.mxu0 %v19296_v3  ;;  %v19315_v42 = vcombine.low %v11879_v36, %v11881_v32  ;;  %v19317_v3 = vcombine.low %v11880_v7, %v11882_v8  ;;  %v19322_v33 = vcombine.high %v11884_v31, %v11886_v62  ;;  %v11898_v36 = vld [vmem:[#allocation5 + $0x1ea8] sm:$0xff] }
 0x931   : > { %13103 = vmatprep.subr.bf16.mxu1 %v19298_v14  ;;  %v19320_v14 = vcombine.high %v11883_v10, %v11885_v13  ;;  %v19327_v32 = vcombine.low %v11891_v60, %v11893_v35 }
 0x933   : > { %12981 = vmatpush1.bf16.msra.mxu0 %v19295_v19  ;;  %v11890_v19 = vld [vmem:[#allocation5 + $0x1d28] sm:$0xff] }
 0x934   : > { %13104 = vmatpush1.bf16.msra.mxu1 %v19297_v30  ;;  %12991 = vmatprep.subr.bf16.mxu0 %v19300_v40  ;;  %v19319_v30 = vcombine.low %v11883_v10, %v11885_v13  ;;  %v19321_v40 = vcombine.low %v11884_v31, %v11886_v62  ;;  %v19326_v44 = vcombine.high %v11888_v18, %v11890_v19  ;;  %v11903_v62 = vld [vmem:[#allocation5 + $0x1fc0] sm:$0xff] }
 0x935   : > { %13114 = vmatprep.subr.bf16.mxu1 %v19302_v52  ;;  %v19324_v52 = vcombine.high %v11887_v29, %v11889_v17 }
 0x936   : > { %12983 = vmatmul.mubr.bf16.vlgmr.msra.gmra.mrb[64].mxu0 %v22434_v25 }
 0x937   : > { %12992 = vmatpush1.bf16.msra.mxu0 %v19299_v47  ;;  %13106 = vmatmul.mubr.bf16.vlgmr.msra.gmra.mrb[64].mxu1 %v22434_v25 }
 0x938   : > { %13115 = vmatpush1.bf16.msra.mxu1 %v19301_v16  ;;  %12993 = vmatprep.subr.bf16.mxu0 %v19304_v63  ;;  %v11892_v63 = vld [vmem:[#allocation5 + $0x1d88] sm:$0xff] }
 0x939   : > { %13116 = vmatprep.subr.bf16.mxu1 %v19306_v49  ;;  %13023 = vmatprep.mubr.bf16.mxu0 %v22436_v34  ;;  %v11894_v49 = vld [vmem:[#allocation5 + $0x1de8] sm:$0xff] }
 0x93a   : > { %13146 = vmatprep.mubr.bf16.mxu1 %v22436_v34  ;;  %v19330_v4 = vcombine.high %v11892_v63, %v11894_v49  ;;  %v19329_v7 = vcombine.low %v11892_v63, %v11894_v49  ;;  %v11912_v63 = vld [vmem:[#allocation5 + $0x2148] sm:$0xff] }
 0x93b   : > { %12994 = vmatpush1.bf16.msra.mxu0 %v19303_v54  ;;  %v11914_v49 = vld [vmem:[#allocation5 + $0x21a8] sm:$0xff] }
 0x93c   : > { %13117 = vmatpush1.bf16.msra.mxu1 %v19305_v6  ;;  %12995 = vmatprep.subr.bf16.mxu0 %v19308_v45 }
 0x93d   : > { %13118 = vmatprep.subr.bf16.mxu1 %v19310_v59  ;;  %v19325_v59 = vcombine.low %v11888_v18, %v11890_v19  ;;  %v11907_v19 = vld [vmem:[#allocation5 + $0x2080] sm:$0xff] }
 0x93f   : > { %12996 = vmatpush1.bf16.msra.mxu0 %v19307_v5  ;;  %v11895_v5 = vld [vmem:[#allocation5 + $0x1e40] sm:$0xff] }
 0x940   : > { %13119 = vmatpush1.bf16.msra.mxu1 %v19309_v21  ;;  %12997 = vmatprep.subr.bf16.mxu0 %v19312_v41  ;;  %v11897_v21 = vld [vmem:[#allocation5 + $0x1ea0] sm:$0xff] }
 0x941   : > { %13120 = vmatprep.subr.bf16.mxu1 %v19314_v50  ;;  %v11896_v50 = vld [vmem:[#allocation5 + $0x1e48] sm:$0xff]  ;;  %v19332_v8 = vcombine.high %v11895_v5, %v11897_v21  ;;  %v19331_v10 = vcombine.low %v11895_v5, %v11897_v21  ;;  %v11919_v21 = vld [vmem:[#allocation5 + $0x22c0] sm:$0xff] }
 0x943   : > { %12998 = vmatpush1.bf16.msra.mxu0 %v19311_v56  ;;  %v19334_v56 = vcombine.high %v11896_v50, %v11898_v36 }
 0x944   : > { %13121 = vmatpush1.bf16.msra.mxu1 %v19313_v9  ;;  %12999 = vmatprep.subr.bf16.mxu0 %v19316_v58  ;;  %v11901_v9 = vld [vmem:[#allocation5 + $0x1f60] sm:$0xff]  ;;  %v11900_v58 = vld [vmem:[#allocation5 + $0x1f08] sm:$0xff] }
 0x945   : > { %13122 = vmatprep.subr.bf16.mxu1 %v19318_v11  ;;  %v11902_v11 = vld [vmem:[#allocation5 + $0x1f68] sm:$0xff] }
 0x946   : > { %v19338_v31 = vcombine.high %v11900_v58, %v11902_v11  ;;  %v19337_v29 = vcombine.low %v11900_v58, %v11902_v11  ;;  %v11925_v58 = vld [vmem:[#allocation5 + $0x23e0] sm:$0xff]  ;;  %v11924_v11 = vld [vmem:[#allocation5 + $0x2388] sm:$0xff] }
 0x947   : > { %13000 = vmatpush1.bf16.msra.mxu0 %v19315_v42  ;;  %v11905_v42 = vld [vmem:[#allocation5 + $0x2020] sm:$0xff] }
 0x948   : > { %13123 = vmatpush1.bf16.msra.mxu1 %v19317_v3  ;;  %13001 = vmatprep.subr.bf16.mxu0 %v19320_v14  ;;  %v11904_v3 = vld [vmem:[#allocation5 + $0x1fc8] sm:$0xff]  ;;  %v19340_v17 = vcombine.high %v11903_v62, %v11905_v42 }
 0x949   : > { %v11599_v43 = vpop.f32.mrb[56].mxu0  ;;  %13124 = vmatprep.subr.bf16.mxu1 %v19322_v33  ;;  %v11906_v14 = vld [vmem:[#allocation5 + $0x2028] sm:$0xff] }
 0x94a   : > { %v11640_v47 = vpop.f32.mrb[56].mxu1  ;;  %v11601_v16 = vpop.f32.mrb[57].mxu0  ;;  %v19342_v18 = vcombine.high %v11904_v3, %v11906_v14 }
 0x94b   : > { %v11641_v55 = vadd.f32 %v11640_v47, %v11599_v43  ;;  %v11642_v1 = vpop.f32.mrb[57].mxu1  ;;  %v11603_v51 = vpop.f32.mrb[58].mxu0  ;;  %13002 = vmatpush1.bf16.msra.mxu0 %v19319_v30  ;;  %v11909_v30 = vld [vmem:[#allocation5 + $0x20e0] sm:$0xff]  ;;  %v19339_v43 = vcombine.low %v11903_v62, %v11905_v42 }
 0x94c   : > { %v11643_v54 = vadd.f32 %v11642_v1, %v11601_v16  ;;  %v11644_v6 = vpop.f32.mrb[58].mxu1  ;;  %13125 = vmatpush1.bf16.msra.mxu1 %v19321_v40  ;;  %v11604_v45 = vpop.f32.mrb[59].mxu0  ;;  %13003 = vmatprep.subr.bf16.mxu0 %v19324_v52  ;;  %v11908_v40 = vld [vmem:[#allocation5 + $0x2088] sm:$0xff]  ;;  %v19344_v60 = vcombine.high %v11907_v19, %v11909_v30  ;;  %v11911_v47 = vld [vmem:[#allocation5 + $0x2140] sm:$0xff] }
 0x94d   : > { %v22700_v0 = vadd.f32 %v11641_v55, %v22646_v53  ;;  %v11645_v2 = vpop.f32.mrb[59].mxu1  ;;  %13126 = vmatprep.subr.bf16.mxu1 %v19326_v44  ;;  %v11899_v53 = vld [vmem:[#allocation5 + $0x1f00] sm:$0xff]  ;;  %v11910_v52 = vld [vmem:[#allocation5 + $0x20e8] sm:$0xff]  ;;  %v19341_v44 = vcombine.low %v11904_v3, %v11906_v14  ;;  %v19343_v55 = vcombine.low %v11907_v19, %v11909_v30  ;;  %v21311_v14 = vld [vmem:[#allocation8 + $0x1804] ss:$24 sps:$4 sm:$0xff]  }
 0x94e   : > { %v22703_v41 = vadd.f32 %v11643_v54, %v22649_v39  ;;  %v19333_v39 = vcombine.low %v11896_v50, %v11898_v36  ;;  %v19336_v13 = vcombine.high %v11899_v53, %v11901_v9  ;;  %v19335_v33 = vcombine.low %v11899_v53, %v11901_v9  ;;  %v11913_v16 = vld [vmem:[#allocation5 + $0x21a0] sm:$0xff]  ;;  %v11916_v45 = vld [vmem:[#allocation5 + $0x2208] sm:$0xff] }
 0x94f   : > { %13004 = vmatpush1.bf16.msra.mxu0 %v19323_v28  ;;  %v19346_v35 = vcombine.high %v11908_v40, %v11910_v52  ;;  %v19345_v1 = vcombine.low %v11908_v40, %v11910_v52  ;;  %v19348_v51 = vcombine.high %v11911_v47, %v11913_v16  ;;  %v19350_v28 = vcombine.high %v11912_v63, %v11914_v49  ;;  %v11915_v54 = vld [vmem:[#allocation5 + $0x2200] sm:$0xff]  ;;  %v11920_v36 = vld [vmem:[#allocation5 + $0x22c8] sm:$0xff]  ;;  %v21323_v52 = vld [vmem:[#allocation8 + $0x1864] ss:$24 sps:$4 sm:$0xff]  }
 0x950   : > { %13127 = vmatpush1.bf16.msra.mxu1 %v19325_v59  ;;  %13005 = vmatprep.subr.bf16.mxu0 %v19328_v61  ;;  %v11917_v6 = vld [vmem:[#allocation5 + $0x2260] sm:$0xff]  ;;  %v11918_v59 = vld [vmem:[#allocation5 + $0x2268] sm:$0xff]  ;;  %v19347_v61 = vcombine.low %v11911_v47, %v11913_v16  ;;  %v19349_v2 = vcombine.low %v11912_v63, %v11914_v49  ;;  %v21335_v49 = vld [vmem:[#allocation8 + $0x18c4] ss:$24 sps:$4 sm:$0xff]  }
 0x951   : > { %13128 = vmatprep.subr.bf16.mxu1 %v19330_v4  ;;  %v19352_v4 = vcombine.high %v11915_v54, %v11917_v6  ;;  %v19354_v5 = vcombine.high %v11916_v45, %v11918_v59  ;;  %v11921_v50 = vld [vmem:[#allocation5 + $0x2320] sm:$0xff] }
 0x952   : > { %v11923_v9 = vld [vmem:[#allocation5 + $0x2380] sm:$0xff] }
 0x953   : > { %13006 = vmatpush1.bf16.msra.mxu0 %v19327_v32  ;;  %v11922_v32 = vld [vmem:[#allocation5 + $0x2328] sm:$0xff]  ;;  %v19359_v42 = vcombine.low %v11923_v9, %v11925_v58 }
 0x954   : > { %13129 = vmatpush1.bf16.msra.mxu1 %v19329_v7  ;;  %13007 = vmatprep.subr.bf16.mxu0 %v19332_v8  ;;  %v19351_v7 = vcombine.low %v11915_v54, %v11917_v6  ;;  %v19353_v8 = vcombine.low %v11916_v45, %v11918_v59  ;;  %v19358_v53 = vcombine.high %v11920_v36, %v11922_v32  ;;  %v21320_v19 = vld [vmem:[#allocation8 + $0x1b34] ss:$24 sps:$4 sm:$0xff]   ;;  %v21315_v30 = vld [vmem:[#allocation8 + $0x1830] ss:$24 sps:$4 sm:$0xff]   ;;  %v21347_v59 = vld [vmem:[#allocation8 + $0x1924] ss:$24 sps:$4 sm:$0xff]  }
 0x955   : > { %13130 = vmatprep.subr.bf16.mxu1 %v19334_v56  ;;  %v19356_v56 = vcombine.high %v11919_v21, %v11921_v50  ;;  %v21318_v40 = vld [vmem:[#allocation8 + $0x1b30] ss:$24 sps:$4 sm:$0xff]   ;;  %v21332_v47 = vld [vmem:[#allocation8 + $0x1b94] ss:$24 sps:$4 sm:$0xff]  }
 0x956   : > { %v21327_v16 = vld [vmem:[#allocation8 + $0x1890] ss:$24 sps:$4 sm:$0xff]   ;;  %v21344_v54 = vld [vmem:[#allocation8 + $0x1bf4] ss:$24 sps:$4 sm:$0xff]  }
 0x957   : > { %13008 = vmatpush1.bf16.msra.mxu0 %v19331_v10  ;;  %v11926_v10 = vld [vmem:[#allocation5 + $0x23e8] sm:$0xff] }
 0x958   : > { %13131 = vmatpush1.bf16.msra.mxu1 %v19333_v39  ;;  %13009 = vmatprep.subr.bf16.mxu0 %v19336_v13  ;;  %v19355_v39 = vcombine.low %v11919_v21, %v11921_v50  ;;  %v19357_v13 = vcombine.low %v11920_v36, %v11922_v32  ;;  %v19362_v62 = vcombine.high %v11924_v11, %v11926_v10  ;;  %v21330_v63 = vld [vmem:[#allocation8 + $0x1b90] ss:$24 sps:$4 sm:$0xff]   ;;  %v21345_v32 = vld [vmem:[#allocation8 + $0x1920] ss:$24 sps:$4 sm:$0xff]  }
 0x959   : > { %13132 = vmatprep.subr.bf16.mxu1 %v19338_v31  ;;  %v19360_v31 = vcombine.high %v11923_v9, %v11925_v58  ;;  %v19361_v3 = vcombine.low %v11924_v11, %v11926_v10  ;;  %v21339_v6 = vld [vmem:[#allocation8 + $0x18f0] ss:$24 sps:$4 sm:$0xff]   ;;  %v21353_v9 = vld [vmem:[#allocation8 + $0x1954] ss:$24 sps:$4 sm:$0xff]  }
 0x95a   : > { %v21342_v45 = vld [vmem:[#allocation8 + $0x1bf0] ss:$24 sps:$4 sm:$0xff]   ;;  %v21356_v10 = vld [vmem:[#allocation8 + $0x1c54] ss:$24 sps:$4 sm:$0xff]  }
 0x95b   : > { %13010 = vmatpush1.bf16.msra.mxu0 %v19335_v33  ;;  %v21314_v33 = vld [vmem:[#allocation8 + $0x1b04] ss:$24 sps:$4 sm:$0xff]  }
 0x95c   : > { %13133 = vmatpush1.bf16.msra.mxu1 %v19337_v29  ;;  %13011 = vmatprep.subr.bf16.mxu0 %v19340_v17  ;;  %v21309_v29 = vld [vmem:[#allocation8 + $0x1800] ss:$24 sps:$4 sm:$0xff]  }
 0x95d   : > { %13134 = vmatprep.subr.bf16.mxu1 %v19342_v18  ;;  %v21312_v17 = vld [vmem:[#allocation8 + $0x1b00] ss:$24 sps:$4 sm:$0xff]   ;;  %v21317_v18 = vld [vmem:[#allocation8 + $0x1834] ss:$24 sps:$4 sm:$0xff]  }
 0x95f   : > { %13012 = vmatpush1.bf16.msra.mxu0 %v19339_v43  ;;  %v21326_v43 = vld [vmem:[#allocation8 + $0x1b64] ss:$24 sps:$4 sm:$0xff]  }
 0x960   : > { %13135 = vmatpush1.bf16.msra.mxu1 %v19341_v44  ;;  %13013 = vmatprep.subr.bf16.mxu0 %v19344_v60  ;;  %v21321_v44 = vld [vmem:[#allocation8 + $0x1860] ss:$24 sps:$4 sm:$0xff]  }
 0x961   : > { %13136 = vmatprep.subr.bf16.mxu1 %v19346_v35  ;;  %v21324_v60 = vld [vmem:[#allocation8 + $0x1b60] ss:$24 sps:$4 sm:$0xff]   ;;  %v21329_v35 = vld [vmem:[#allocation8 + $0x1894] ss:$24 sps:$4 sm:$0xff]  }
 0x963   : > { %13014 = vmatpush1.bf16.msra.mxu0 %v19343_v55  ;;  %v21338_v55 = vld [vmem:[#allocation8 + $0x1bc4] ss:$24 sps:$4 sm:$0xff]  }
 0x964   : > { %13137 = vmatpush1.bf16.msra.mxu1 %v19345_v1  ;;  %13015 = vmatprep.subr.bf16.mxu0 %v19348_v51  ;;  %v21333_v1 = vld [vmem:[#allocation8 + $0x18c0] ss:$24 sps:$4 sm:$0xff]  }
 0x965   : > { %13138 = vmatprep.subr.bf16.mxu1 %v19350_v28  ;;  %v21336_v51 = vld [vmem:[#allocation8 + $0x1bc0] ss:$24 sps:$4 sm:$0xff]   ;;  %v21341_v28 = vld [vmem:[#allocation8 + $0x18f4] ss:$24 sps:$4 sm:$0xff]  }
 0x967   : > { %13016 = vmatpush1.bf16.msra.mxu0 %v19347_v61 }
 0x968   : > { %13139 = vmatpush1.bf16.msra.mxu1 %v19349_v2  ;;  %13017 = vmatprep.subr.bf16.mxu0 %v19352_v4  ;;  %v21350_v2 = vld [vmem:[#allocation8 + $0x1c24] ss:$24 sps:$4 sm:$0xff]  }
 0x969   : > { %13140 = vmatprep.subr.bf16.mxu1 %v19354_v5 }
 0x96b   : > { %13018 = vmatpush1.bf16.msra.mxu0 %v19351_v7 }
 0x96c   : > { %13141 = vmatpush1.bf16.msra.mxu1 %v19353_v8  ;;  %13019 = vmatprep.subr.bf16.mxu0 %v19356_v56 }
 0x96d   : > { %13142 = vmatprep.subr.bf16.mxu1 %v19358_v53  ;;  %v21348_v53 = vld [vmem:[#allocation8 + $0x1c20] ss:$24 sps:$4 sm:$0xff]  }
 0x96f   : > { %13020 = vmatpush1.bf16.msra.mxu0 %v19355_v39 }
 0x970   : > { %13143 = vmatpush1.bf16.msra.mxu1 %v19357_v13  ;;  %13021 = vmatprep.subr.bf16.mxu0 %v19360_v31  ;;  %v21351_v13 = vld [vmem:[#allocation8 + $0x1950] ss:$24 sps:$4 sm:$0xff]  }
 0x971   : > { %13144 = vmatprep.subr.bf16.mxu1 %v19362_v62  ;;  %v21354_v31 = vld [vmem:[#allocation8 + $0x1c50] ss:$24 sps:$4 sm:$0xff]   ;;  %v21359_v62 = vld [vmem:[#allocation8 + $0x1984] ss:$24 sps:$4 sm:$0xff]  }
 0x973   : > { %13022 = vmatpush1.bf16.msra.mxu0 %v19359_v42  ;;  %v21362_v42 = vld [vmem:[#allocation8 + $0x1c84] ss:$24 sps:$4 sm:$0xff]  }
 0x974   : > { %13145 = vmatpush1.bf16.msra.mxu1 %v19361_v3  ;;  %14343 = vmatprep.subr.bf16.mxu0 %v21311_v14  ;;  %v21357_v3 = vld [vmem:[#allocation8 + $0x1980] ss:$24 sps:$4 sm:$0xff]   ;;  %v21365_v14 = vld [vmem:[#allocation8 + $0x19b4] ss:$24 sps:$4 sm:$0xff]  }
 0x975   : > { %14384 = vmatprep.subr.bf16.mxu1 %v21314_v33  ;;  %v21368_v33 = vld [vmem:[#allocation8 + $0x1cb4] ss:$24 sps:$4 sm:$0xff]  }
 0x976   : > { %13024 = vmatmul.mubr.bf16.vlgmr.msra.gmra.mrb[64].mxu0 %v22443_v38 }
 0x977   : > { %13147 = vmatmul.mubr.bf16.vlgmr.msra.gmra.mrb[64].mxu1 %v22443_v38  ;;  %14344 = vmatpush1.bf16.msra.mxu0 %v21309_v29  ;;  %v21366_v29 = vld [vmem:[#allocation8 + $0x1cb0] ss:$24 sps:$4 sm:$0xff]  }
 0x978   : > { %14385 = vmatpush1.bf16.msra.mxu1 %v21312_v17  ;;  %14345 = vmatprep.subr.bf16.mxu0 %v21317_v18  ;;  %v21371_v17 = vld [vmem:[#allocation8 + $0x19e4] ss:$24 sps:$4 sm:$0xff]  }
 0x979   : > { %14386 = vmatprep.subr.bf16.mxu1 %v21320_v19  ;;  %v21374_v18 = vld [vmem:[#allocation8 + $0x1ce4] ss:$24 sps:$4 sm:$0xff]   ;;  %v21369_v19 = vld [vmem:[#allocation8 + $0x19e0] ss:$24 sps:$4 sm:$0xff]  }
 0x97b   : > { %14346 = vmatpush1.bf16.msra.mxu0 %v21315_v30  ;;  %v21372_v30 = vld [vmem:[#allocation8 + $0x1ce0] ss:$24 sps:$4 sm:$0xff]  }
 0x97c   : > { %14387 = vmatpush1.bf16.msra.mxu1 %v21318_v40  ;;  %14347 = vmatprep.subr.bf16.mxu0 %v21323_v52  ;;  %v21377_v40 = vld [vmem:[#allocation8 + $0x1a14] ss:$24 sps:$4 sm:$0xff]  }
 0x97d   : > { %14388 = vmatprep.subr.bf16.mxu1 %v21326_v43  ;;  %v21380_v52 = vld [vmem:[#allocation8 + $0x1d14] ss:$24 sps:$4 sm:$0xff]   ;;  %v21375_v43 = vld [vmem:[#allocation8 + $0x1a10] ss:$24 sps:$4 sm:$0xff]  }
 0x97f   : > { %14348 = vmatpush1.bf16.msra.mxu0 %v21321_v44  ;;  %v21378_v44 = vld [vmem:[#allocation8 + $0x1d10] ss:$24 sps:$4 sm:$0xff]  }
 0x980   : > { %14389 = vmatpush1.bf16.msra.mxu1 %v21324_v60  ;;  %14349 = vmatprep.subr.bf16.mxu0 %v21329_v35  ;;  %v21383_v60 = vld [vmem:[#allocation8 + $0x1a44] ss:$24 sps:$4 sm:$0xff]  }
 0x981   : > { %14390 = vmatprep.subr.bf16.mxu1 %v21332_v47  ;;  %v21386_v35 = vld [vmem:[#allocation8 + $0x1d44] ss:$24 sps:$4 sm:$0xff]   ;;  %v21381_v47 = vld [vmem:[#allocation8 + $0x1a40] ss:$24 sps:$4 sm:$0xff]  }
 0x983   : > { %14350 = vmatpush1.bf16.msra.mxu0 %v21327_v16  ;;  %v21384_v16 = vld [vmem:[#allocation8 + $0x1d40] ss:$24 sps:$4 sm:$0xff]  }
 0x984   : > { %14391 = vmatpush1.bf16.msra.mxu1 %v21330_v63  ;;  %14351 = vmatprep.subr.bf16.mxu0 %v21335_v49  ;;  %v21389_v63 = vld [vmem:[#allocation8 + $0x1a74] ss:$24 sps:$4 sm:$0xff]  }
 0x985   : > { %14392 = vmatprep.subr.bf16.mxu1 %v21338_v55  ;;  %v21392_v49 = vld [vmem:[#allocation8 + $0x1d74] ss:$24 sps:$4 sm:$0xff]   ;;  %v21387_v55 = vld [vmem:[#allocation8 + $0x1a70] ss:$24 sps:$4 sm:$0xff]  }
 0x987   : > { %14352 = vmatpush1.bf16.msra.mxu0 %v21333_v1  ;;  %v21390_v1 = vld [vmem:[#allocation8 + $0x1d70] ss:$24 sps:$4 sm:$0xff]  }
 0x988   : > { %14393 = vmatpush1.bf16.msra.mxu1 %v21336_v51  ;;  %14353 = vmatprep.subr.bf16.mxu0 %v21341_v28  ;;  %v21395_v51 = vld [vmem:[#allocation8 + $0x1aa4] ss:$24 sps:$4 sm:$0xff]  }
 0x989   : > { %v11681_v61 = vpop.f32.mrb[60].mxu0  ;;  %14394 = vmatprep.subr.bf16.mxu1 %v21344_v54  ;;  %v21398_v28 = vld [vmem:[#allocation8 + $0x1da4] ss:$24 sps:$4 sm:$0xff]   ;;  %v21393_v54 = vld [vmem:[#allocation8 + $0x1aa0] ss:$24 sps:$4 sm:$0xff]  }
 0x98a   : > { %v11722_v4 = vpop.f32.mrb[60].mxu1  ;;  %v11683_v5 = vpop.f32.mrb[61].mxu0 }
 0x98b   : > { %v11723_v21 = vadd.f32 %v11722_v4, %v11681_v61  ;;  %v11724_v50 = vpop.f32.mrb[61].mxu1  ;;  %v11685_v36 = vpop.f32.mrb[62].mxu0  ;;  %14354 = vmatpush1.bf16.msra.mxu0 %v21339_v6  ;;  %v21396_v6 = vld [vmem:[#allocation8 + $0x1da0] ss:$24 sps:$4 sm:$0xff]   ;;  %v21402_v61 = vld [vmem:[#allocation8 + $0x1dd0] ss:$24 sps:$4 sm:$0xff]  }
 0x98c   : > { %v11725_v7 = vadd.f32 %v11724_v50, %v11683_v5  ;;  %v11726_v8 = vpop.f32.mrb[62].mxu1  ;;  %v11686_v56 = vpop.f32.mrb[63].mxu0  ;;  %14395 = vmatpush1.bf16.msra.mxu1 %v21342_v45  ;;  %14355 = vmatprep.subr.bf16.mxu0 %v21347_v59  ;;  %v21399_v45 = vld [vmem:[#allocation8 + $0x1ad0] ss:$24 sps:$4 sm:$0xff]   ;;  %v21401_v59 = vld [vmem:[#allocation8 + $0x1ad4] ss:$24 sps:$4 sm:$0xff]  }
 0x98d   : > { %v22708_v58 = vadd.f32 %v11723_v21, %v22654_v46  ;;  %v11727_v11 = vpop.f32.mrb[63].mxu1  ;;  %14396 = vmatprep.subr.bf16.mxu1 %v21350_v2  ;;  %v21360_v46 = vld [vmem:[#allocation8 + $0x1c80] ss:$24 sps:$4 sm:$0xff]   ;;  %v21404_v2 = vld [vmem:[#allocation8 + $0x1dd4] ss:$24 sps:$4 sm:$0xff]  }
 0x98e   : > { %v22711_v39 = vadd.f32 %v11725_v7, %v22657_v48  ;;  %v21363_v48 = vld [vmem:[#allocation8 + $0x19b0] ss:$24 sps:$4 sm:$0xff]   ;;  %v21407_v4 = vld [vmem:[#allocation8 + $0x180c] ss:$24 sps:$4 sm:$0xff]   ;;  %v11927_v21 = vld [vmem:[#allocation7 + $0x10] sm:$0xf] }
 0x98f   : > { %14356 = vmatpush1.bf16.msra.mxu0 %v21345_v32  ;;  %v21410_v5 = vld [vmem:[#allocation8 + $0x1b0c] ss:$24 sps:$4 sm:$0xff]   ;;  %v11932_v50 = vrot.slane %v11927_v21, %v22470_v22  ;;  %v11940_v36 = vrot.slane %v11927_v21, %v22473_v24  ;;  %v11936_v32 = vrot.slane %v11927_v21, %v22476_v26  ;;  %v11944_v7 = vrot.slane %v11927_v21, %v22479_v27 }
 0x990   : > { %14397 = vmatpush1.bf16.msra.mxu1 %v21348_v53  ;;  %14357 = vmatprep.subr.bf16.mxu0 %v21353_v9 }
 0x991   : > { %14398 = vmatprep.subr.bf16.mxu1 %v21356_v10 }
 0x993   : > { %14358 = vmatpush1.bf16.msra.mxu0 %v21351_v13 }
 0x994   : > { %14399 = vmatpush1.bf16.msra.mxu1 %v21354_v31  ;;  %14359 = vmatprep.subr.bf16.mxu0 %v21359_v62 }
 0x995   : > { %14400 = vmatprep.subr.bf16.mxu1 %v21362_v42 }
 0x997   : > { %14360 = vmatpush1.bf16.msra.mxu0 %v21357_v3 }
 0x998   : > { %14401 = vmatpush1.bf16.msra.mxu1 %v21360_v46  ;;  %14361 = vmatprep.subr.bf16.mxu0 %v21365_v14 }
 0x999   : > { %14402 = vmatprep.subr.bf16.mxu1 %v21368_v33 }
 0x99b   : > { %14362 = vmatpush1.bf16.msra.mxu0 %v21363_v48 }
 0x99c   : > { %14403 = vmatpush1.bf16.msra.mxu1 %v21366_v29  ;;  %14363 = vmatprep.subr.bf16.mxu0 %v21371_v17 }
 0x99d   : > { %14404 = vmatprep.subr.bf16.mxu1 %v21374_v18 }
 0x99f   : > { %14364 = vmatpush1.bf16.msra.mxu0 %v21369_v19 }
 0x9a0   : > { %14405 = vmatpush1.bf16.msra.mxu1 %v21372_v30  ;;  %14365 = vmatprep.subr.bf16.mxu0 %v21377_v40 }
 0x9a1   : > { %14406 = vmatprep.subr.bf16.mxu1 %v21380_v52 }
 0x9a3   : > { %14366 = vmatpush1.bf16.msra.mxu0 %v21375_v43 }
 0x9a4   : > { %14407 = vmatpush1.bf16.msra.mxu1 %v21378_v44  ;;  %14367 = vmatprep.subr.bf16.mxu0 %v21383_v60 }
 0x9a5   : > { %14408 = vmatprep.subr.bf16.mxu1 %v21386_v35 }
 0x9a7   : > { %14368 = vmatpush1.bf16.msra.mxu0 %v21381_v47 }
 0x9a8   : > { %14409 = vmatpush1.bf16.msra.mxu1 %v21384_v16  ;;  %14369 = vmatprep.subr.bf16.mxu0 %v21389_v63 }
 0x9a9   : > { %14410 = vmatprep.subr.bf16.mxu1 %v21392_v49 }
 0x9ab   : > { %14370 = vmatpush1.bf16.msra.mxu0 %v21387_v55 }
 0x9ac   : > { %14411 = vmatpush1.bf16.msra.mxu1 %v21390_v1  ;;  %14371 = vmatprep.subr.bf16.mxu0 %v21395_v51 }
 0x9ad   : > { %14412 = vmatprep.subr.bf16.mxu1 %v21398_v28 }
 0x9af   : > { %14372 = vmatpush1.bf16.msra.mxu0 %v21393_v54 }
 0x9b0   : > { %14413 = vmatpush1.bf16.msra.mxu1 %v21396_v6  ;;  %14373 = vmatprep.subr.bf16.mxu0 %v21401_v59 }
 0x9b1   : > { %14414 = vmatprep.subr.bf16.mxu1 %v21404_v2 }
 0x9b3   : > { %14374 = vmatpush1.bf16.msra.mxu0 %v21399_v45 }
 0x9b4   : > { %14415 = vmatpush1.bf16.msra.mxu1 %v21402_v61  ;;  %14425 = vmatprep.subr.bf16.mxu0 %v21407_v4 }
 0x9b5   : > { %14466 = vmatprep.subr.bf16.mxu1 %v21410_v5 }
 0xa49   : > { %v13025_v8 = vpop.f32.mrb[64].mxu0 }
 0xa4a   : > { %v19958_v56 = vadd.f32 %v13025_v8, %v11932_v50  ;;  %v13148_v53 = vpop.f32.mrb[64].mxu1  ;;  %v13027_v9 = vpop.f32.mrb[65].mxu0  ;;  %v21408_v8 = vld [vmem:[#allocation8 + $0x1b08] ss:$24 sps:$4 sm:$0xff]  }
 0xa4b   : > { %v19960_v11 = vadd.f32 %v13148_v53, %v11940_v36  ;;  %v19959_v10 = vadd.f32 %v13027_v9, %v11936_v32  ;;  %v13150_v13 = vpop.f32.mrb[65].mxu1  ;;  %v13029_v31 = vpop.f32.mrb[66].mxu0  ;;  %v21405_v32 = vld [vmem:[#allocation8 + $0x1808] ss:$24 sps:$4 sm:$0xff]   ;;  %v21413_v9 = vld [vmem:[#allocation8 + $0x183c] ss:$24 sps:$4 sm:$0xff]  }
 0xa4c   : > { %v13155_v62 = vmul.f32 %v19958_v56, %v19958_v56  ;;  %v19961_v42 = vadd.f32 %v13150_v13, %v11944_v7  ;;  %v13152_v3 = vpop.f32.mrb[66].mxu1  ;;  %v13030_v46 = vpop.f32.mrb[67].mxu0  ;;  %v13171_v51 = vmul.f32 0.5, %v19958_v56  ;;  %v21414_v13 = vld [vmem:[#allocation8 + $0x1b38] ss:$24 sps:$4 sm:$0xff]  }
 0xa4d   : > { %v13157_v14 = vmul.f32 %v19960_v11, %v19960_v11  ;;  %v13156_v33 = vmul.f32 %v19959_v10, %v19959_v10  ;;  %v13153_v48 = vpop.f32.mrb[67].mxu1  ;;  %v13173_v6 = vmul.f32 0.5, %v19960_v11  ;;  %v13172_v45 = vmul.f32 0.5, %v19959_v10  ;;  %v21419_v31 = vld [vmem:[#allocation8 + $0x186c] ss:$24 sps:$4 sm:$0xff]  }
 0xa4e   : > { %v13159_v29 = vmul.f32 0.035677407, %v13155_v62  ;;  %v13158_v17 = vmul.f32 %v19961_v42, %v19961_v42  ;;  %v13174_v2 = vmul.f32 0.5, %v19961_v42  ;;  %v21422_v62 = vld [vmem:[#allocation8 + $0x1b6c] ss:$24 sps:$4 sm:$0xff]  }
 0xa4f   : > { %v13161_v18 = vmul.f32 0.035677407, %v13157_v14  ;;  %v13160_v19 = vmul.f32 0.035677407, %v13156_v33  ;;  %v21420_v3 = vld [vmem:[#allocation8 + $0x1b68] ss:$24 sps:$4 sm:$0xff]  }
 0xa50   : > { %v13163_v30 = vadd.f32 0.7978846, %v13159_v29  ;;  %v13162_v40 = vmul.f32 0.035677407, %v13158_v17  ;;  %v21425_v46 = vld [vmem:[#allocation8 + $0x189c] ss:$24 sps:$4 sm:$0xff]  }
 0xa51   : > { %v13165_v52 = vadd.f32 0.7978846, %v13161_v18  ;;  %v13164_v43 = vadd.f32 0.7978846, %v13160_v19  ;;  %v21428_v14 = vld [vmem:[#allocation8 + $0x1b9c] ss:$24 sps:$4 sm:$0xff]  }
 0xa52   : > { %v13167_v44 = vmul.f32 %v19958_v56, %v13163_v30  ;;  %v13166_v60 = vadd.f32 0.7978846, %v13162_v40  ;;  %v21423_v33 = vld [vmem:[#allocation8 + $0x1898] ss:$24 sps:$4 sm:$0xff]   ;;  %v21431_v29 = vld [vmem:[#allocation8 + $0x18cc] ss:$24 sps:$4 sm:$0xff]  }
 0xa53   : > { %v13169_v35 = vmul.f32 %v19960_v11, %v13165_v52  ;;  %v13168_v47 = vmul.f32 %v19959_v10, %v13164_v43  ;;  %v21416_v11 = vld [vmem:[#allocation8 + $0x1b3c] ss:$24 sps:$4 sm:$0xff]   ;;  %v21411_v10 = vld [vmem:[#allocation8 + $0x1838] ss:$24 sps:$4 sm:$0xff]   ;;  %v21434_v17 = vld [vmem:[#allocation8 + $0x1bcc] ss:$24 sps:$4 sm:$0xff]  }
 0xa54   : > { %21917 = vtanh.f32 %v13167_v44  ;;  %v13170_v16 = vmul.f32 %v19961_v42, %v13166_v60  ;;  %v21417_v42 = vld [vmem:[#allocation8 + $0x1868] ss:$24 sps:$4 sm:$0xff]   ;;  %v21426_v48 = vld [vmem:[#allocation8 + $0x1b98] ss:$24 sps:$4 sm:$0xff]   ;;  %v21437_v30 = vld [vmem:[#allocation8 + $0x18fc] ss:$24 sps:$4 sm:$0xff]  }
 0xa55   : > { %21919 = vtanh.f32 %v13169_v35  ;;  %v21429_v18 = vld [vmem:[#allocation8 + $0x18c8] ss:$24 sps:$4 sm:$0xff]   ;;  %v21440_v40 = vld [vmem:[#allocation8 + $0x1bfc] ss:$24 sps:$4 sm:$0xff]   ;;  %v21435_v52 = vld [vmem:[#allocation8 + $0x18f8] ss:$24 sps:$4 sm:$0xff]  }
 0xa56   : > { %21921 = vtanh.f32 %v13168_v47  ;;  %v21432_v19 = vld [vmem:[#allocation8 + $0x1bc8] ss:$24 sps:$4 sm:$0xff]   ;;  %v21438_v43 = vld [vmem:[#allocation8 + $0x1bf8] ss:$24 sps:$4 sm:$0xff]   ;;  %v21443_v44 = vld [vmem:[#allocation8 + $0x192c] ss:$24 sps:$4 sm:$0xff]  }
 0xa57   : > { %21923 = vtanh.f32 %v13170_v16  ;;  %v21446_v60 = vld [vmem:[#allocation8 + $0x1c2c] ss:$24 sps:$4 sm:$0xff]   ;;  %v21441_v35 = vld [vmem:[#allocation8 + $0x1928] ss:$24 sps:$4 sm:$0xff]   ;;  %v21449_v16 = vld [vmem:[#allocation8 + $0x195c] ss:$24 sps:$4 sm:$0xff]  }
 0xa58   : > { %v21444_v47 = vld [vmem:[#allocation8 + $0x1c28] ss:$24 sps:$4 sm:$0xff]  }
 0xa5e   : > { %v21918_v63 = vpop.eup %21917 }
 0xa5f   : > { %v21920_v49 = vpop.eup %21919  ;;  %v13179_v55 = vadd.f32 1.0, %v21918_v63  ;;  %v21452_v63 = vld [vmem:[#allocation8 + $0x1c5c] ss:$24 sps:$4 sm:$0xff]  }
 0xa60   : > { %v21922_v1 = vpop.eup %21921  ;;  %v13181_v28 = vadd.f32 1.0, %v21920_v49  ;;  %v21447_v49 = vld [vmem:[#allocation8 + $0x1958] ss:$24 sps:$4 sm:$0xff]  }
 0xa61   : > { %v21924_v54 = vpop.eup %21923  ;;  %v13180_v59 = vadd.f32 1.0, %v21922_v1  ;;  %v13183_v61 = vmul.f32 %v13179_v55, %v13171_v51  ;;  %v21450_v55 = vld [vmem:[#allocation8 + $0x1c58] ss:$24 sps:$4 sm:$0xff]   ;;  %v21455_v1 = vld [vmem:[#allocation8 + $0x198c] ss:$24 sps:$4 sm:$0xff]  }
 0xa62   : > { %v13182_v4 = vadd.f32 1.0, %v21924_v54  ;;  %v13185_v5 = vmul.f32 %v13181_v28, %v13173_v6  ;;  %v21458_v51 = vld [vmem:[#allocation8 + $0x1c8c] ss:$24 sps:$4 sm:$0xff]   ;;  %v21453_v28 = vld [vmem:[#allocation8 + $0x1988] ss:$24 sps:$4 sm:$0xff]  }
 0xa63   : > { %v13184_v21 = vmul.f32 %v13180_v59, %v13172_v45  ;;  %v22721_v53 = vpack.c.bf16 %v13183_v61, %v13183_v61  ;;  %v21456_v54 = vld [vmem:[#allocation8 + $0x1c88] ss:$24 sps:$4 sm:$0xff]   ;;  %v21461_v6 = vld [vmem:[#allocation8 + $0x19bc] ss:$24 sps:$4 sm:$0xff]   ;;  %v21459_v59 = vld [vmem:[#allocation8 + $0x19b8] ss:$24 sps:$4 sm:$0xff]  }
 0xa64   : > { %v13186_v50 = vmul.f32 %v13182_v4, %v13174_v2  ;;  %v22724_v56 = vpack.c.bf16 %v13185_v5, %v13185_v5  ;;  %v21464_v45 = vld [vmem:[#allocation8 + $0x1cbc] ss:$24 sps:$4 sm:$0xff]   ;;  %v21462_v61 = vld [vmem:[#allocation8 + $0x1cb8] ss:$24 sps:$4 sm:$0xff]   ;;  %v21467_v2 = vld [vmem:[#allocation8 + $0x19ec] ss:$24 sps:$4 sm:$0xff]  }
 0xa65   : > { %v22717_v36 = vpack.c.bf16 %v13184_v21, %v13184_v21  ;;  %v21470_v4 = vld [vmem:[#allocation8 + $0x1cec] ss:$24 sps:$4 sm:$0xff]   ;;  %v21465_v5 = vld [vmem:[#allocation8 + $0x19e8] ss:$24 sps:$4 sm:$0xff]  }
 0xa66   : > { %v22719_v7 = vpack.c.bf16 %v13186_v50, %v13186_v50  ;;  %v21468_v21 = vld [vmem:[#allocation8 + $0x1ce8] ss:$24 sps:$4 sm:$0xff]   ;;  %v21473_v50 = vld [vmem:[#allocation8 + $0x1a1c] ss:$24 sps:$4 sm:$0xff]  }
 0xa67   : > { %14375 = vmatprep.mubr.bf16.mxu0 %v22717_v36 }
 0xa68   : > { %14416 = vmatprep.mubr.bf16.mxu1 %v22719_v7  ;;  %14376 = vmatmul.mubr.bf16.vlgmr.msra.gmra.mrb[68].mxu0 %v22721_v53 }
 0xa69   : > { %14417 = vmatmul.mubr.bf16.vlgmr.msra.gmra.mrb[68].mxu1 %v22724_v56  ;;  %14426 = vmatpush1.bf16.msra.mxu0 %v21405_v32  ;;  %v21476_v32 = vld [vmem:[#allocation8 + $0x1d1c] ss:$24 sps:$4 sm:$0xff]  }
 0xa6a   : > { %14467 = vmatpush1.bf16.msra.mxu1 %v21408_v8  ;;  %14457 = vmatprep.mubr.bf16.mxu0 %v22717_v36  ;;  %v21471_v8 = vld [vmem:[#allocation8 + $0x1a18] ss:$24 sps:$4 sm:$0xff]  }
 0xa6b   : > { %14498 = vmatprep.mubr.bf16.mxu1 %v22719_v7  ;;  %14427 = vmatprep.subr.bf16.mxu0 %v21413_v9  ;;  %v21474_v9 = vld [vmem:[#allocation8 + $0x1d18] ss:$24 sps:$4 sm:$0xff]  }
 0xa6c   : > { %14468 = vmatprep.subr.bf16.mxu1 %v21416_v11  ;;  %v21479_v11 = vld [vmem:[#allocation8 + $0x1a4c] ss:$24 sps:$4 sm:$0xff]  }
 0xa6d   : > { %14428 = vmatpush1.bf16.msra.mxu0 %v21411_v10  ;;  %v21482_v10 = vld [vmem:[#allocation8 + $0x1d4c] ss:$24 sps:$4 sm:$0xff]  }
 0xa6e   : > { %14469 = vmatpush1.bf16.msra.mxu1 %v21414_v13  ;;  %14429 = vmatprep.subr.bf16.mxu0 %v21419_v31  ;;  %v21477_v13 = vld [vmem:[#allocation8 + $0x1a48] ss:$24 sps:$4 sm:$0xff]  }
 0xa6f   : > { %14470 = vmatprep.subr.bf16.mxu1 %v21422_v62  ;;  %v21480_v31 = vld [vmem:[#allocation8 + $0x1d48] ss:$24 sps:$4 sm:$0xff]   ;;  %v21485_v62 = vld [vmem:[#allocation8 + $0x1a7c] ss:$24 sps:$4 sm:$0xff]  }
 0xa71   : > { %14430 = vmatpush1.bf16.msra.mxu0 %v21417_v42  ;;  %v21488_v42 = vld [vmem:[#allocation8 + $0x1d7c] ss:$24 sps:$4 sm:$0xff]  }
 0xa72   : > { %14471 = vmatpush1.bf16.msra.mxu1 %v21420_v3  ;;  %14431 = vmatprep.subr.bf16.mxu0 %v21425_v46  ;;  %v21483_v3 = vld [vmem:[#allocation8 + $0x1a78] ss:$24 sps:$4 sm:$0xff]  }
 0xa73   : > { %14472 = vmatprep.subr.bf16.mxu1 %v21428_v14  ;;  %v21486_v46 = vld [vmem:[#allocation8 + $0x1d78] ss:$24 sps:$4 sm:$0xff]   ;;  %v21491_v14 = vld [vmem:[#allocation8 + $0x1aac] ss:$24 sps:$4 sm:$0xff]  }
 0xa75   : > { %14432 = vmatpush1.bf16.msra.mxu0 %v21423_v33  ;;  %v21494_v33 = vld [vmem:[#allocation8 + $0x1dac] ss:$24 sps:$4 sm:$0xff]  }
 0xa76   : > { %14473 = vmatpush1.bf16.msra.mxu1 %v21426_v48  ;;  %14433 = vmatprep.subr.bf16.mxu0 %v21431_v29  ;;  %v21489_v48 = vld [vmem:[#allocation8 + $0x1aa8] ss:$24 sps:$4 sm:$0xff]  }
 0xa77   : > { %14474 = vmatprep.subr.bf16.mxu1 %v21434_v17  ;;  %v21492_v29 = vld [vmem:[#allocation8 + $0x1da8] ss:$24 sps:$4 sm:$0xff]   ;;  %v21497_v17 = vld [vmem:[#allocation8 + $0x1adc] ss:$24 sps:$4 sm:$0xff]  }
 0xa79   : > { %14434 = vmatpush1.bf16.msra.mxu0 %v21429_v18  ;;  %v21500_v18 = vld [vmem:[#allocation8 + $0x1ddc] ss:$24 sps:$4 sm:$0xff]  }
 0xa7a   : > { %14475 = vmatpush1.bf16.msra.mxu1 %v21432_v19  ;;  %14435 = vmatprep.subr.bf16.mxu0 %v21437_v30  ;;  %v21495_v19 = vld [vmem:[#allocation8 + $0x1ad8] ss:$24 sps:$4 sm:$0xff]  }
 0xa7b   : > { %14476 = vmatprep.subr.bf16.mxu1 %v21440_v40  ;;  %v21498_v30 = vld [vmem:[#allocation8 + $0x1dd8] ss:$24 sps:$4 sm:$0xff]   ;;  %v21503_v40 = vld [vmem:[#allocation8 + $0x1814] ss:$24 sps:$4 sm:$0xff]  }
 0xa7d   : > { %14436 = vmatpush1.bf16.msra.mxu0 %v21435_v52  ;;  %v21506_v52 = vld [vmem:[#allocation8 + $0x1b14] ss:$24 sps:$4 sm:$0xff]  }
 0xa7e   : > { %14477 = vmatpush1.bf16.msra.mxu1 %v21438_v43  ;;  %14437 = vmatprep.subr.bf16.mxu0 %v21443_v44  ;;  %v21501_v43 = vld [vmem:[#allocation8 + $0x1810] ss:$24 sps:$4 sm:$0xff]  }
 0xa7f   : > { %14478 = vmatprep.subr.bf16.mxu1 %v21446_v60  ;;  %v21504_v44 = vld [vmem:[#allocation8 + $0x1b10] ss:$24 sps:$4 sm:$0xff]   ;;  %v21509_v60 = vld [vmem:[#allocation8 + $0x1844] ss:$24 sps:$4 sm:$0xff]  }
 0xa81   : > { %14438 = vmatpush1.bf16.msra.mxu0 %v21441_v35  ;;  %v21512_v35 = vld [vmem:[#allocation8 + $0x1b44] ss:$24 sps:$4 sm:$0xff]  }
 0xa82   : > { %14479 = vmatpush1.bf16.msra.mxu1 %v21444_v47  ;;  %14439 = vmatprep.subr.bf16.mxu0 %v21449_v16  ;;  %v21507_v47 = vld [vmem:[#allocation8 + $0x1840] ss:$24 sps:$4 sm:$0xff]  }
 0xa83   : > { %14480 = vmatprep.subr.bf16.mxu1 %v21452_v63  ;;  %v21510_v16 = vld [vmem:[#allocation8 + $0x1b40] ss:$24 sps:$4 sm:$0xff]   ;;  %v21515_v63 = vld [vmem:[#allocation8 + $0x1874] ss:$24 sps:$4 sm:$0xff]  }
 0xa85   : > { %14440 = vmatpush1.bf16.msra.mxu0 %v21447_v49  ;;  %v21518_v49 = vld [vmem:[#allocation8 + $0x1b74] ss:$24 sps:$4 sm:$0xff]  }
 0xa86   : > { %14481 = vmatpush1.bf16.msra.mxu1 %v21450_v55  ;;  %14441 = vmatprep.subr.bf16.mxu0 %v21455_v1  ;;  %v21513_v55 = vld [vmem:[#allocation8 + $0x1870] ss:$24 sps:$4 sm:$0xff]  }
 0xa87   : > { %14482 = vmatprep.subr.bf16.mxu1 %v21458_v51  ;;  %v21516_v1 = vld [vmem:[#allocation8 + $0x1b70] ss:$24 sps:$4 sm:$0xff]   ;;  %v21521_v51 = vld [vmem:[#allocation8 + $0x18a4] ss:$24 sps:$4 sm:$0xff]  }
 0xa89   : > { %14442 = vmatpush1.bf16.msra.mxu0 %v21453_v28  ;;  %v21524_v28 = vld [vmem:[#allocation8 + $0x1ba4] ss:$24 sps:$4 sm:$0xff]  }
 0xa8a   : > { %14483 = vmatpush1.bf16.msra.mxu1 %v21456_v54  ;;  %14443 = vmatprep.subr.bf16.mxu0 %v21461_v6  ;;  %v21519_v54 = vld [vmem:[#allocation8 + $0x18a0] ss:$24 sps:$4 sm:$0xff]   ;;  %v21527_v6 = vld [vmem:[#allocation8 + $0x18d4] ss:$24 sps:$4 sm:$0xff]  }
 0xa8b   : > { %14484 = vmatprep.subr.bf16.mxu1 %v21464_v45  ;;  %v21530_v45 = vld [vmem:[#allocation8 + $0x1bd4] ss:$24 sps:$4 sm:$0xff]  }
 0xa8d   : > { %14444 = vmatpush1.bf16.msra.mxu0 %v21459_v59  ;;  %v21528_v59 = vld [vmem:[#allocation8 + $0x1bd0] ss:$24 sps:$4 sm:$0xff]  }
 0xa8e   : > { %14485 = vmatpush1.bf16.msra.mxu1 %v21462_v61  ;;  %14445 = vmatprep.subr.bf16.mxu0 %v21467_v2  ;;  %v21533_v61 = vld [vmem:[#allocation8 + $0x1904] ss:$24 sps:$4 sm:$0xff]  }
 0xa8f   : > { %14486 = vmatprep.subr.bf16.mxu1 %v21470_v4  ;;  %v21536_v2 = vld [vmem:[#allocation8 + $0x1c04] ss:$24 sps:$4 sm:$0xff]   ;;  %v21531_v4 = vld [vmem:[#allocation8 + $0x1900] ss:$24 sps:$4 sm:$0xff]  }
 0xa91   : > { %14446 = vmatpush1.bf16.msra.mxu0 %v21465_v5  ;;  %v21534_v5 = vld [vmem:[#allocation8 + $0x1c00] ss:$24 sps:$4 sm:$0xff]  }
 0xa92   : > { %14487 = vmatpush1.bf16.msra.mxu1 %v21468_v21  ;;  %14447 = vmatprep.subr.bf16.mxu0 %v21473_v50  ;;  %v21539_v21 = vld [vmem:[#allocation8 + $0x1934] ss:$24 sps:$4 sm:$0xff]  }
 0xa93   : > { %14488 = vmatprep.subr.bf16.mxu1 %v21476_v32  ;;  %v21542_v50 = vld [vmem:[#allocation8 + $0x1c34] ss:$24 sps:$4 sm:$0xff]   ;;  %v21537_v32 = vld [vmem:[#allocation8 + $0x1930] ss:$24 sps:$4 sm:$0xff]  }
 0xa95   : > { %14448 = vmatpush1.bf16.msra.mxu0 %v21471_v8  ;;  %v21540_v8 = vld [vmem:[#allocation8 + $0x1c30] ss:$24 sps:$4 sm:$0xff]  }
 0xa96   : > { %14489 = vmatpush1.bf16.msra.mxu1 %v21474_v9  ;;  %14449 = vmatprep.subr.bf16.mxu0 %v21479_v11  ;;  %v21545_v9 = vld [vmem:[#allocation8 + $0x1964] ss:$24 sps:$4 sm:$0xff]  }
 0xa97   : > { %14490 = vmatprep.subr.bf16.mxu1 %v21482_v10  ;;  %v21548_v11 = vld [vmem:[#allocation8 + $0x1c64] ss:$24 sps:$4 sm:$0xff]   ;;  %v21543_v10 = vld [vmem:[#allocation8 + $0x1960] ss:$24 sps:$4 sm:$0xff]  }
 0xa99   : > { %14450 = vmatpush1.bf16.msra.mxu0 %v21477_v13  ;;  %v21546_v13 = vld [vmem:[#allocation8 + $0x1c60] ss:$24 sps:$4 sm:$0xff]  }
 0xa9a   : > { %14491 = vmatpush1.bf16.msra.mxu1 %v21480_v31  ;;  %14451 = vmatprep.subr.bf16.mxu0 %v21485_v62  ;;  %v21551_v31 = vld [vmem:[#allocation8 + $0x1994] ss:$24 sps:$4 sm:$0xff]  }
 0xa9b   : > { %14492 = vmatprep.subr.bf16.mxu1 %v21488_v42  ;;  %v21554_v62 = vld [vmem:[#allocation8 + $0x1c94] ss:$24 sps:$4 sm:$0xff]   ;;  %v21549_v42 = vld [vmem:[#allocation8 + $0x1990] ss:$24 sps:$4 sm:$0xff]  }
 0xa9d   : > { %14452 = vmatpush1.bf16.msra.mxu0 %v21483_v3  ;;  %v21552_v3 = vld [vmem:[#allocation8 + $0x1c90] ss:$24 sps:$4 sm:$0xff]  }
 0xa9e   : > { %14493 = vmatpush1.bf16.msra.mxu1 %v21486_v46  ;;  %14453 = vmatprep.subr.bf16.mxu0 %v21491_v14  ;;  %v21557_v46 = vld [vmem:[#allocation8 + $0x19c4] ss:$24 sps:$4 sm:$0xff]  }
 0xa9f   : > { %14494 = vmatprep.subr.bf16.mxu1 %v21494_v33  ;;  %v21560_v14 = vld [vmem:[#allocation8 + $0x1cc4] ss:$24 sps:$4 sm:$0xff]   ;;  %v21555_v33 = vld [vmem:[#allocation8 + $0x19c0] ss:$24 sps:$4 sm:$0xff]  }
 0xaa1   : > { %14454 = vmatpush1.bf16.msra.mxu0 %v21489_v48  ;;  %v21558_v48 = vld [vmem:[#allocation8 + $0x1cc0] ss:$24 sps:$4 sm:$0xff]  }
 0xaa2   : > { %14495 = vmatpush1.bf16.msra.mxu1 %v21492_v29  ;;  %14455 = vmatprep.subr.bf16.mxu0 %v21497_v17  ;;  %v21563_v29 = vld [vmem:[#allocation8 + $0x19f4] ss:$24 sps:$4 sm:$0xff]  }
 0xaa3   : > { %14496 = vmatprep.subr.bf16.mxu1 %v21500_v18  ;;  %v21566_v17 = vld [vmem:[#allocation8 + $0x1cf4] ss:$24 sps:$4 sm:$0xff]   ;;  %v21561_v18 = vld [vmem:[#allocation8 + $0x19f0] ss:$24 sps:$4 sm:$0xff]  }
 0xaa5   : > { %14456 = vmatpush1.bf16.msra.mxu0 %v21495_v19  ;;  %v21564_v19 = vld [vmem:[#allocation8 + $0x1cf0] ss:$24 sps:$4 sm:$0xff]  }
 0xaa6   : > { %14497 = vmatpush1.bf16.msra.mxu1 %v21498_v30  ;;  %14507 = vmatprep.subr.bf16.mxu0 %v21503_v40  ;;  %v21569_v30 = vld [vmem:[#allocation8 + $0x1a24] ss:$24 sps:$4 sm:$0xff]  }
 0xaa7   : > { %14548 = vmatprep.subr.bf16.mxu1 %v21506_v52  ;;  %v21572_v40 = vld [vmem:[#allocation8 + $0x1d24] ss:$24 sps:$4 sm:$0xff]   ;;  %v21567_v52 = vld [vmem:[#allocation8 + $0x1a20] ss:$24 sps:$4 sm:$0xff]  }
 0xaa8   : > { %14458 = vmatmul.mubr.bf16.vlgmr.msra.gmra.mrb[72].mxu0 %v22721_v53 }
 0xaa9   : > { %14499 = vmatmul.mubr.bf16.vlgmr.msra.gmra.mrb[72].mxu1 %v22724_v56  ;;  %14508 = vmatpush1.bf16.msra.mxu0 %v21501_v43  ;;  %v21570_v43 = vld [vmem:[#allocation8 + $0x1d20] ss:$24 sps:$4 sm:$0xff]  }
 0xaaa   : > { %14539 = vmatprep.mubr.bf16.mxu0 %v22717_v36  ;;  %14549 = vmatpush1.bf16.msra.mxu1 %v21504_v44  ;;  %v21522_v36 = vld [vmem:[#allocation8 + $0x1ba0] ss:$24 sps:$4 sm:$0xff]   ;;  %v21575_v44 = vld [vmem:[#allocation8 + $0x1a54] ss:$24 sps:$4 sm:$0xff]  }
 0xaab   : > { %14580 = vmatprep.mubr.bf16.mxu1 %v22719_v7  ;;  %14509 = vmatprep.subr.bf16.mxu0 %v21509_v60  ;;  %v21525_v7 = vld [vmem:[#allocation8 + $0x18d0] ss:$24 sps:$4 sm:$0xff]   ;;  %v21578_v60 = vld [vmem:[#allocation8 + $0x1d54] ss:$24 sps:$4 sm:$0xff]  }
 0xaac   : > { %14550 = vmatprep.subr.bf16.mxu1 %v21512_v35  ;;  %v21573_v35 = vld [vmem:[#allocation8 + $0x1a50] ss:$24 sps:$4 sm:$0xff]  }
 0xaad   : > { %14510 = vmatpush1.bf16.msra.mxu0 %v21507_v47  ;;  %v21576_v47 = vld [vmem:[#allocation8 + $0x1d50] ss:$24 sps:$4 sm:$0xff]  }
 0xaae   : > { %14551 = vmatpush1.bf16.msra.mxu1 %v21510_v16  ;;  %14511 = vmatprep.subr.bf16.mxu0 %v21515_v63  ;;  %v21581_v16 = vld [vmem:[#allocation8 + $0x1a84] ss:$24 sps:$4 sm:$0xff]  }
 0xaaf   : > { %14552 = vmatprep.subr.bf16.mxu1 %v21518_v49  ;;  %v21584_v63 = vld [vmem:[#allocation8 + $0x1d84] ss:$24 sps:$4 sm:$0xff]   ;;  %v21579_v49 = vld [vmem:[#allocation8 + $0x1a80] ss:$24 sps:$4 sm:$0xff]  }
 0xab1   : > { %14512 = vmatpush1.bf16.msra.mxu0 %v21513_v55  ;;  %v21582_v55 = vld [vmem:[#allocation8 + $0x1d80] ss:$24 sps:$4 sm:$0xff]  }
 0xab2   : > { %14553 = vmatpush1.bf16.msra.mxu1 %v21516_v1  ;;  %14513 = vmatprep.subr.bf16.mxu0 %v21521_v51  ;;  %v21587_v1 = vld [vmem:[#allocation8 + $0x1ab4] ss:$24 sps:$4 sm:$0xff]  }
 0xab3   : > { %14554 = vmatprep.subr.bf16.mxu1 %v21524_v28  ;;  %v21590_v51 = vld [vmem:[#allocation8 + $0x1db4] ss:$24 sps:$4 sm:$0xff]   ;;  %v21585_v28 = vld [vmem:[#allocation8 + $0x1ab0] ss:$24 sps:$4 sm:$0xff]  }
 0xab5   : > { %14514 = vmatpush1.bf16.msra.mxu0 %v21519_v54  ;;  %v21588_v54 = vld [vmem:[#allocation8 + $0x1db0] ss:$24 sps:$4 sm:$0xff]  }
 0xab6   : > { %14555 = vmatpush1.bf16.msra.mxu1 %v21522_v36  ;;  %14515 = vmatprep.subr.bf16.mxu0 %v21527_v6  ;;  %v21593_v36 = vld [vmem:[#allocation8 + $0x1ae4] ss:$24 sps:$4 sm:$0xff]  }
 0xab7   : > { %14556 = vmatprep.subr.bf16.mxu1 %v21530_v45  ;;  %v21596_v6 = vld [vmem:[#allocation8 + $0x1de4] ss:$24 sps:$4 sm:$0xff]  }
 0xab8   : > { %v14595_v45 = vld [vmem:[#allocation5 + $0x50] sm:$0xff] }
 0xab9   : > { %14516 = vmatpush1.bf16.msra.mxu0 %v21525_v7  ;;  %v14597_v7 = vld [vmem:[#allocation5 + $0xb0] sm:$0xff] }
 0xaba   : > { %14557 = vmatpush1.bf16.msra.mxu1 %v21528_v59  ;;  %14517 = vmatprep.subr.bf16.mxu0 %v21533_v61  ;;  %v14596_v59 = vld [vmem:[#allocation5 + $0x58] sm:$0xff] }
 0xabb   : > { %14558 = vmatprep.subr.bf16.mxu1 %v21536_v2  ;;  %v14598_v61 = vld [vmem:[#allocation5 + $0xb8] sm:$0xff] }
 0xabc   : > { %v21591_v2 = vld [vmem:[#allocation8 + $0x1ae0] ss:$24 sps:$4 sm:$0xff]  }
 0xabd   : > { %14518 = vmatpush1.bf16.msra.mxu0 %v21531_v4  ;;  %v21594_v4 = vld [vmem:[#allocation8 + $0x1de0] ss:$24 sps:$4 sm:$0xff]  }
 0xabe   : > { %14559 = vmatpush1.bf16.msra.mxu1 %v21534_v5  ;;  %14519 = vmatprep.subr.bf16.mxu0 %v21539_v21  ;;  %v19556_v5 = vcombine.high %v14595_v45, %v14597_v7  ;;  %v19558_v21 = vcombine.high %v14596_v59, %v14598_v61 }
 0xabf   : > { %14560 = vmatprep.subr.bf16.mxu1 %v21542_v50  ;;  %v14599_v50 = vld [vmem:[#allocation5 + $0x110] sm:$0xff] }
 0xac1   : > { %14520 = vmatpush1.bf16.msra.mxu0 %v21537_v32  ;;  %v14601_v32 = vld [vmem:[#allocation5 + $0x170] sm:$0xff] }
 0xac2   : > { %14561 = vmatpush1.bf16.msra.mxu1 %v21540_v8  ;;  %14521 = vmatprep.subr.bf16.mxu0 %v21545_v9  ;;  %v14600_v8 = vld [vmem:[#allocation5 + $0x118] sm:$0xff] }
 0xac3   : > { %14562 = vmatprep.subr.bf16.mxu1 %v21548_v11  ;;  %v14602_v9 = vld [vmem:[#allocation5 + $0x178] sm:$0xff]  ;;  %v19555_v11 = vcombine.low %v14595_v45, %v14597_v7  ;;  %v14619_v45 = vld [vmem:[#allocation5 + $0x4d0] sm:$0xff] }
 0xac4   : > { %v14621_v7 = vld [vmem:[#allocation5 + $0x530] sm:$0xff] }
 0xac5   : > { %14522 = vmatpush1.bf16.msra.mxu0 %v21543_v10  ;;  %v19557_v10 = vcombine.low %v14596_v59, %v14598_v61  ;;  %v14620_v59 = vld [vmem:[#allocation5 + $0x4d8] sm:$0xff] }
 0xac6   : > { %14563 = vmatpush1.bf16.msra.mxu1 %v21546_v13  ;;  %14523 = vmatprep.subr.bf16.mxu0 %v21551_v31  ;;  %v19560_v13 = vcombine.high %v14599_v50, %v14601_v32  ;;  %v19562_v31 = vcombine.high %v14600_v8, %v14602_v9  ;;  %v14622_v61 = vld [vmem:[#allocation5 + $0x538] sm:$0xff] }
 0xac7   : > { %14564 = vmatprep.subr.bf16.mxu1 %v21554_v62  ;;  %v14603_v62 = vld [vmem:[#allocation5 + $0x1d0] sm:$0xff] }
 0xac9   : > { %14524 = vmatpush1.bf16.msra.mxu0 %v21549_v42  ;;  %v14605_v42 = vld [vmem:[#allocation5 + $0x230] sm:$0xff] }
 0xaca   : > { %14565 = vmatpush1.bf16.msra.mxu1 %v21552_v3  ;;  %14525 = vmatprep.subr.bf16.mxu0 %v21557_v46  ;;  %v14604_v3 = vld [vmem:[#allocation5 + $0x1d8] sm:$0xff] }
 0xacb   : > { %14566 = vmatprep.subr.bf16.mxu1 %v21560_v14  ;;  %v14606_v46 = vld [vmem:[#allocation5 + $0x238] sm:$0xff]  ;;  %v19559_v14 = vcombine.low %v14599_v50, %v14601_v32  ;;  %v14623_v50 = vld [vmem:[#allocation5 + $0x590] sm:$0xff] }
 0xacc   : > { %v14625_v32 = vld [vmem:[#allocation5 + $0x5f0] sm:$0xff] }
 0xacd   : > { %14526 = vmatpush1.bf16.msra.mxu0 %v21555_v33  ;;  %v19561_v33 = vcombine.low %v14600_v8, %v14602_v9  ;;  %v14624_v8 = vld [vmem:[#allocation5 + $0x598] sm:$0xff] }
 0xace   : > { %14567 = vmatpush1.bf16.msra.mxu1 %v21558_v48  ;;  %14527 = vmatprep.subr.bf16.mxu0 %v21563_v29  ;;  %v19564_v48 = vcombine.high %v14603_v62, %v14605_v42  ;;  %v19566_v29 = vcombine.high %v14604_v3, %v14606_v46  ;;  %v14626_v9 = vld [vmem:[#allocation5 + $0x5f8] sm:$0xff] }
 0xacf   : > { %14568 = vmatprep.subr.bf16.mxu1 %v21566_v17  ;;  %v14607_v17 = vld [vmem:[#allocation5 + $0x290] sm:$0xff] }
 0xad1   : > { %14528 = vmatpush1.bf16.msra.mxu0 %v21561_v18  ;;  %v14609_v18 = vld [vmem:[#allocation5 + $0x2f0] sm:$0xff] }
 0xad2   : > { %14569 = vmatpush1.bf16.msra.mxu1 %v21564_v19  ;;  %14529 = vmatprep.subr.bf16.mxu0 %v21569_v30  ;;  %v14608_v19 = vld [vmem:[#allocation5 + $0x298] sm:$0xff] }
 0xad3   : > { %14570 = vmatprep.subr.bf16.mxu1 %v21572_v40  ;;  %v14610_v30 = vld [vmem:[#allocation5 + $0x2f8] sm:$0xff]  ;;  %v19568_v40 = vcombine.high %v14607_v17, %v14609_v18 }
 0xad5   : > { %14530 = vmatpush1.bf16.msra.mxu0 %v21567_v52  ;;  %v19570_v52 = vcombine.high %v14608_v19, %v14610_v30 }
 0xad6   : > { %14571 = vmatpush1.bf16.msra.mxu1 %v21570_v43  ;;  %14531 = vmatprep.subr.bf16.mxu0 %v21575_v44  ;;  %v14611_v43 = vld [vmem:[#allocation5 + $0x350] sm:$0xff] }
 0xad7   : > { %14572 = vmatprep.subr.bf16.mxu1 %v21578_v60  ;;  %v14613_v44 = vld [vmem:[#allocation5 + $0x3b0] sm:$0xff]  ;;  %v14612_v60 = vld [vmem:[#allocation5 + $0x358] sm:$0xff] }
 0xad9   : > { %14532 = vmatpush1.bf16.msra.mxu0 %v21573_v35  ;;  %v14614_v35 = vld [vmem:[#allocation5 + $0x3b8] sm:$0xff] }
 0xada   : > { %14573 = vmatpush1.bf16.msra.mxu1 %v21576_v47  ;;  %14533 = vmatprep.subr.bf16.mxu0 %v21581_v16  ;;  %v19567_v47 = vcombine.low %v14607_v17, %v14609_v18  ;;  %v19569_v16 = vcombine.low %v14608_v19, %v14610_v30  ;;  %v14631_v17 = vld [vmem:[#allocation5 + $0x710] sm:$0xff]  ;;  %v14632_v19 = vld [vmem:[#allocation5 + $0x718] sm:$0xff] }
 0xadb   : > { %14574 = vmatprep.subr.bf16.mxu1 %v21584_v63  ;;  %v19572_v63 = vcombine.high %v14611_v43, %v14613_v44  ;;  %v14633_v18 = vld [vmem:[#allocation5 + $0x770] sm:$0xff]  ;;  %v14634_v30 = vld [vmem:[#allocation5 + $0x778] sm:$0xff] }
 0xadd   : > { %14534 = vmatpush1.bf16.msra.mxu0 %v21579_v49  ;;  %v14615_v49 = vld [vmem:[#allocation5 + $0x410] sm:$0xff] }
 0xade   : > { %14575 = vmatpush1.bf16.msra.mxu1 %v21582_v55  ;;  %14535 = vmatprep.subr.bf16.mxu0 %v21587_v1  ;;  %v14617_v55 = vld [vmem:[#allocation5 + $0x470] sm:$0xff]  ;;  %v14616_v1 = vld [vmem:[#allocation5 + $0x418] sm:$0xff] }
 0xadf   : > { %14576 = vmatprep.subr.bf16.mxu1 %v21590_v51  ;;  %v14618_v51 = vld [vmem:[#allocation5 + $0x478] sm:$0xff] }
 0xae1   : > { %14536 = vmatpush1.bf16.msra.mxu0 %v21585_v28  ;;  %v19571_v28 = vcombine.low %v14611_v43, %v14613_v44  ;;  %v14635_v43 = vld [vmem:[#allocation5 + $0x7d0] sm:$0xff] }
 0xae2   : > { %14577 = vmatpush1.bf16.msra.mxu1 %v21588_v54  ;;  %14537 = vmatprep.subr.bf16.mxu0 %v21593_v36  ;;  %v19573_v54 = vcombine.low %v14612_v60, %v14614_v35  ;;  %v19576_v36 = vcombine.high %v14615_v49, %v14617_v55  ;;  %v14637_v44 = vld [vmem:[#allocation5 + $0x830] sm:$0xff] }
 0xae3   : > { %14578 = vmatprep.subr.bf16.mxu1 %v21596_v6  ;;  %v19578_v6 = vcombine.high %v14616_v1, %v14618_v51 }
 0xae5   : > { %14538 = vmatpush1.bf16.msra.mxu0 %v21591_v2  ;;  %v19575_v2 = vcombine.low %v14615_v49, %v14617_v55  ;;  %v14639_v49 = vld [vmem:[#allocation5 + $0x890] sm:$0xff] }
 0xae6   : > { %14579 = vmatpush1.bf16.msra.mxu1 %v21594_v4  ;;  %15769 = vmatprep.subr.bf16.mxu0 %v19556_v5  ;;  %v19577_v4 = vcombine.low %v14616_v1, %v14618_v51  ;;  %v19580_v5 = vcombine.high %v14619_v45, %v14621_v7  ;;  %v14641_v55 = vld [vmem:[#allocation5 + $0x8f0] sm:$0xff]  ;;  %v14640_v1 = vld [vmem:[#allocation5 + $0x898] sm:$0xff] }
 0xae7   : > { %15892 = vmatprep.subr.bf16.mxu1 %v19558_v21  ;;  %v19582_v21 = vcombine.high %v14620_v59, %v14622_v61  ;;  %v14642_v51 = vld [vmem:[#allocation5 + $0x8f8] sm:$0xff] }
 0xae8   : > { %14540 = vmatmul.mubr.bf16.vlgmr.msra.gmra.mrb[76].mxu0 %v22721_v53  ;;  %v19563_v53 = vcombine.low %v14603_v62, %v14605_v42  ;;  %v14627_v62 = vld [vmem:[#allocation5 + $0x650] sm:$0xff] }
 0xae9   : > { %14581 = vmatmul.mubr.bf16.vlgmr.msra.gmra.mrb[76].mxu1 %v22724_v56  ;;  %15770 = vmatpush1.bf16.msra.mxu0 %v19555_v11  ;;  %v19565_v56 = vcombine.low %v14604_v3, %v14606_v46  ;;  %v19579_v11 = vcombine.low %v14619_v45, %v14621_v7  ;;  %v14629_v42 = vld [vmem:[#allocation5 + $0x6b0] sm:$0xff]  ;;  %v14628_v3 = vld [vmem:[#allocation5 + $0x658] sm:$0xff] }
 0xaea   : > { %15893 = vmatpush1.bf16.msra.mxu1 %v19557_v10  ;;  %15771 = vmatprep.subr.bf16.mxu0 %v19560_v13  ;;  %v19581_v10 = vcombine.low %v14620_v59, %v14622_v61  ;;  %v19584_v13 = vcombine.high %v14623_v50, %v14625_v32  ;;  %v14630_v46 = vld [vmem:[#allocation5 + $0x6b8] sm:$0xff]  ;;  %v14643_v45 = vld [vmem:[#allocation5 + $0x950] sm:$0xff] }
 0xaeb   : > { %15894 = vmatprep.subr.bf16.mxu1 %v19562_v31  ;;  %15801 = vmatprep.mubr.bf16.mxu0 %v22418_v57  ;;  %v19586_v31 = vcombine.high %v14624_v8, %v14626_v9  ;;  %v14645_v7 = vld [vmem:[#allocation5 + $0x9b0] sm:$0xff]  ;;  %v14644_v59 = vld [vmem:[#allocation5 + $0x958] sm:$0xff] }
 0xaec   : > { %15924 = vmatprep.mubr.bf16.mxu1 %v22418_v57  ;;  %v19574_v57 = vcombine.high %v14612_v60, %v14614_v35  ;;  %v14636_v60 = vld [vmem:[#allocation5 + $0x7d8] sm:$0xff] }
 0xaed   : > { %15772 = vmatpush1.bf16.msra.mxu0 %v19559_v14  ;;  %v19583_v14 = vcombine.low %v14623_v50, %v14625_v32  ;;  %v14638_v35 = vld [vmem:[#allocation5 + $0x838] sm:$0xff]  ;;  %v14647_v50 = vld [vmem:[#allocation5 + $0xa10] sm:$0xff] }
 0xaee   : > { %15895 = vmatpush1.bf16.msra.mxu1 %v19561_v33  ;;  %15773 = vmatprep.subr.bf16.mxu0 %v19564_v48  ;;  %v19585_v33 = vcombine.low %v14624_v8, %v14626_v9  ;;  %v19588_v48 = vcombine.high %v14627_v62, %v14629_v42  ;;  %v14646_v61 = vld [vmem:[#allocation5 + $0x9b8] sm:$0xff]  ;;  %v14649_v32 = vld [vmem:[#allocation5 + $0xa70] sm:$0xff] }
 0xaef   : > { %15896 = vmatprep.subr.bf16.mxu1 %v19566_v29  ;;  %v19590_v29 = vcombine.high %v14628_v3, %v14630_v46  ;;  %v14648_v8 = vld [vmem:[#allocation5 + $0xa18] sm:$0xff] }
 0xaf0   : > { %v14650_v9 = vld [vmem:[#allocation5 + $0xa78] sm:$0xff] }
 0xaf1   : > { %15774 = vmatpush1.bf16.msra.mxu0 %v19563_v53  ;;  %v19587_v53 = vcombine.low %v14627_v62, %v14629_v42  ;;  %v14651_v62 = vld [vmem:[#allocation5 + $0xad0] sm:$0xff] }
 0xaf2   : > { %15897 = vmatpush1.bf16.msra.mxu1 %v19565_v56  ;;  %15775 = vmatprep.subr.bf16.mxu0 %v19568_v40  ;;  %v19589_v56 = vcombine.low %v14628_v3, %v14630_v46  ;;  %v19592_v40 = vcombine.high %v14631_v17, %v14633_v18  ;;  %v14653_v42 = vld [vmem:[#allocation5 + $0xb30] sm:$0xff]  ;;  %v14652_v3 = vld [vmem:[#allocation5 + $0xad8] sm:$0xff] }
 0xaf3   : > { %15898 = vmatprep.subr.bf16.mxu1 %v19570_v52  ;;  %v19594_v52 = vcombine.high %v14632_v19, %v14634_v30  ;;  %v14654_v46 = vld [vmem:[#allocation5 + $0xb38] sm:$0xff] }
 0xaf5   : > { %15776 = vmatpush1.bf16.msra.mxu0 %v19567_v47  ;;  %v19591_v47 = vcombine.low %v14631_v17, %v14633_v18  ;;  %v14655_v17 = vld [vmem:[#allocation5 + $0xb90] sm:$0xff] }
 0xaf6   : > { %15899 = vmatpush1.bf16.msra.mxu1 %v19569_v16  ;;  %15777 = vmatprep.subr.bf16.mxu0 %v19572_v63  ;;  %v19593_v16 = vcombine.low %v14632_v19, %v14634_v30  ;;  %v19596_v63 = vcombine.high %v14635_v43, %v14637_v44  ;;  %v14657_v18 = vld [vmem:[#allocation5 + $0xbf0] sm:$0xff]  ;;  %v14656_v19 = vld [vmem:[#allocation5 + $0xb98] sm:$0xff] }
 0xaf7   : > { %15900 = vmatprep.subr.bf16.mxu1 %v19574_v57  ;;  %v19598_v57 = vcombine.high %v14636_v60, %v14638_v35  ;;  %v14658_v30 = vld [vmem:[#allocation5 + $0xbf8] sm:$0xff] }
 0xaf9   : > { %15778 = vmatpush1.bf16.msra.mxu0 %v19571_v28  ;;  %v19595_v28 = vcombine.low %v14635_v43, %v14637_v44  ;;  %v14659_v43 = vld [vmem:[#allocation5 + $0xc50] sm:$0xff] }
 0xafa   : > { %15901 = vmatpush1.bf16.msra.mxu1 %v19573_v54  ;;  %15779 = vmatprep.subr.bf16.mxu0 %v19576_v36  ;;  %v19597_v54 = vcombine.low %v14636_v60, %v14638_v35  ;;  %v19600_v36 = vcombine.high %v14639_v49, %v14641_v55  ;;  %v14661_v44 = vld [vmem:[#allocation5 + $0xcb0] sm:$0xff]  ;;  %v14660_v60 = vld [vmem:[#allocation5 + $0xc58] sm:$0xff] }
 0xafb   : > { %15902 = vmatprep.subr.bf16.mxu1 %v19578_v6  ;;  %v19602_v6 = vcombine.high %v14640_v1, %v14642_v51  ;;  %v14662_v35 = vld [vmem:[#allocation5 + $0xcb8] sm:$0xff] }
 0xafd   : > { %15780 = vmatpush1.bf16.msra.mxu0 %v19575_v2  ;;  %v19599_v2 = vcombine.low %v14639_v49, %v14641_v55  ;;  %v14663_v49 = vld [vmem:[#allocation5 + $0xd10] sm:$0xff] }
 0xafe   : > { %15903 = vmatpush1.bf16.msra.mxu1 %v19577_v4  ;;  %15781 = vmatprep.subr.bf16.mxu0 %v19580_v5  ;;  %v19601_v4 = vcombine.low %v14640_v1, %v14642_v51  ;;  %v19604_v5 = vcombine.high %v14643_v45, %v14645_v7  ;;  %v14665_v55 = vld [vmem:[#allocation5 + $0xd70] sm:$0xff]  ;;  %v14664_v1 = vld [vmem:[#allocation5 + $0xd18] sm:$0xff] }
 0xaff   : > { %15904 = vmatprep.subr.bf16.mxu1 %v19582_v21  ;;  %v19606_v21 = vcombine.high %v14644_v59, %v14646_v61  ;;  %v14666_v51 = vld [vmem:[#allocation5 + $0xd78] sm:$0xff] }
 0xb01   : > { %15782 = vmatpush1.bf16.msra.mxu0 %v19579_v11  ;;  %v19603_v11 = vcombine.low %v14643_v45, %v14645_v7  ;;  %v14667_v45 = vld [vmem:[#allocation5 + $0xdd0] sm:$0xff] }
 0xb02   : > { %15905 = vmatpush1.bf16.msra.mxu1 %v19581_v10  ;;  %15783 = vmatprep.subr.bf16.mxu0 %v19584_v13  ;;  %v19605_v10 = vcombine.low %v14644_v59, %v14646_v61  ;;  %v19608_v13 = vcombine.high %v14647_v50, %v14649_v32  ;;  %v14669_v7 = vld [vmem:[#allocation5 + $0xe30] sm:$0xff]  ;;  %v14668_v59 = vld [vmem:[#allocation5 + $0xdd8] sm:$0xff] }
 0xb03   : > { %15906 = vmatprep.subr.bf16.mxu1 %v19586_v31  ;;  %v19610_v31 = vcombine.high %v14648_v8, %v14650_v9  ;;  %v14670_v61 = vld [vmem:[#allocation5 + $0xe38] sm:$0xff] }
 0xb05   : > { %15784 = vmatpush1.bf16.msra.mxu0 %v19583_v14  ;;  %v19607_v14 = vcombine.low %v14647_v50, %v14649_v32  ;;  %v14671_v50 = vld [vmem:[#allocation5 + $0xe90] sm:$0xff] }
 0xb06   : > { %15907 = vmatpush1.bf16.msra.mxu1 %v19585_v33  ;;  %15785 = vmatprep.subr.bf16.mxu0 %v19588_v48  ;;  %v19609_v33 = vcombine.low %v14648_v8, %v14650_v9  ;;  %v19612_v48 = vcombine.high %v14651_v62, %v14653_v42  ;;  %v14673_v32 = vld [vmem:[#allocation5 + $0xef0] sm:$0xff]  ;;  %v14672_v8 = vld [vmem:[#allocation5 + $0xe98] sm:$0xff] }
 0xb07   : > { %15908 = vmatprep.subr.bf16.mxu1 %v19590_v29  ;;  %v19614_v29 = vcombine.high %v14652_v3, %v14654_v46  ;;  %v14674_v9 = vld [vmem:[#allocation5 + $0xef8] sm:$0xff] }
 0xb09   : > { %15786 = vmatpush1.bf16.msra.mxu0 %v19587_v53  ;;  %v19611_v53 = vcombine.low %v14651_v62, %v14653_v42  ;;  %v14677_v62 = vld [vmem:[#allocation5 + $0xfb0] sm:$0xff]  ;;  %v14676_v42 = vld [vmem:[#allocation5 + $0xf58] sm:$0xff] }
 0xb0a   : > { %15909 = vmatpush1.bf16.msra.mxu1 %v19589_v56  ;;  %15787 = vmatprep.subr.bf16.mxu0 %v19592_v40  ;;  %v19613_v56 = vcombine.low %v14652_v3, %v14654_v46  ;;  %v19616_v40 = vcombine.high %v14655_v17, %v14657_v18  ;;  %v14678_v3 = vld [vmem:[#allocation5 + $0xfb8] sm:$0xff]  ;;  %v19631_v46 = vcombine.low %v14671_v50, %v14673_v32 }
 0xb0b   : > { %15910 = vmatprep.subr.bf16.mxu1 %v19594_v52  ;;  %v19618_v52 = vcombine.high %v14656_v19, %v14658_v30 }
 0xb0d   : > { %15788 = vmatpush1.bf16.msra.mxu0 %v19591_v47  ;;  %v19615_v47 = vcombine.low %v14655_v17, %v14657_v18  ;;  %v14680_v17 = vld [vmem:[#allocation5 + $0x1018] sm:$0xff] }
 0xb0e   : > { %15911 = vmatpush1.bf16.msra.mxu1 %v19593_v16  ;;  %15789 = vmatprep.subr.bf16.mxu0 %v19596_v63  ;;  %v19617_v16 = vcombine.low %v14656_v19, %v14658_v30  ;;  %v19620_v63 = vcombine.high %v14659_v43, %v14661_v44  ;;  %v14682_v18 = vld [vmem:[#allocation5 + $0x1078] sm:$0xff]  ;;  %v19637_v30 = vcombine.low %v14676_v42, %v14678_v3 }
 0xb0f   : > { %15912 = vmatprep.subr.bf16.mxu1 %v19598_v57  ;;  %v19622_v57 = vcombine.high %v14660_v60, %v14662_v35 }
 0xb11   : > { %15790 = vmatpush1.bf16.msra.mxu0 %v19595_v28  ;;  %v19619_v28 = vcombine.low %v14659_v43, %v14661_v44  ;;  %v14684_v43 = vld [vmem:[#allocation5 + $0x10d8] sm:$0xff] }
 0xb12   : > { %15913 = vmatpush1.bf16.msra.mxu1 %v19597_v54  ;;  %15791 = vmatprep.subr.bf16.mxu0 %v19600_v36  ;;  %v19621_v54 = vcombine.low %v14660_v60, %v14662_v35  ;;  %v19624_v36 = vcombine.high %v14663_v49, %v14665_v55  ;;  %v14686_v44 = vld [vmem:[#allocation5 + $0x1138] sm:$0xff]  ;;  %v19641_v35 = vcombine.low %v14680_v17, %v14682_v18 }
 0xb13   : > { %15914 = vmatprep.subr.bf16.mxu1 %v19602_v6  ;;  %v19626_v6 = vcombine.high %v14664_v1, %v14666_v51 }
 0xb15   : > { %15792 = vmatpush1.bf16.msra.mxu0 %v19599_v2  ;;  %v19623_v2 = vcombine.low %v14663_v49, %v14665_v55  ;;  %v14689_v49 = vld [vmem:[#allocation5 + $0x11f0] sm:$0xff] }
 0xb16   : > { %15915 = vmatpush1.bf16.msra.mxu1 %v19601_v4  ;;  %15793 = vmatprep.subr.bf16.mxu0 %v19604_v5  ;;  %v19625_v4 = vcombine.low %v14664_v1, %v14666_v51  ;;  %v19628_v5 = vcombine.high %v14667_v45, %v14669_v7  ;;  %v14688_v51 = vld [vmem:[#allocation5 + $0x1198] sm:$0xff] }
 0xb17   : > { %15916 = vmatprep.subr.bf16.mxu1 %v19606_v21  ;;  %v19630_v21 = vcombine.high %v14668_v59, %v14670_v61 }
 0xb19   : > { %15794 = vmatpush1.bf16.msra.mxu0 %v19603_v11  ;;  %v19627_v11 = vcombine.low %v14667_v45, %v14669_v7 }
 0xb1a   : > { %15917 = vmatpush1.bf16.msra.mxu1 %v19605_v10  ;;  %15795 = vmatprep.subr.bf16.mxu0 %v19608_v13  ;;  %v19632_v10 = vcombine.high %v14671_v50, %v14673_v32  ;;  %v19634_v13 = vcombine.high %v14672_v8, %v14674_v9  ;;  %v14691_v32 = vld [vmem:[#allocation5 + $0x1250] sm:$0xff] }
 0xb1b   : > { %15918 = vmatprep.subr.bf16.mxu1 %v19610_v31  ;;  %v14675_v31 = vld [vmem:[#allocation5 + $0xf50] sm:$0xff] }
 0xb1c   : > { %v19635_v19 = vcombine.low %v14675_v31, %v14677_v62 }
 0xb1d   : > { %15796 = vmatpush1.bf16.msra.mxu0 %v19607_v14  ;;  %v19633_v14 = vcombine.low %v14672_v8, %v14674_v9  ;;  %v14693_v8 = vld [vmem:[#allocation5 + $0x12b0] sm:$0xff] }
 0xb1e   : > { %15919 = vmatpush1.bf16.msra.mxu1 %v19609_v33  ;;  %15797 = vmatprep.subr.bf16.mxu0 %v19612_v48  ;;  %v19636_v33 = vcombine.high %v14675_v31, %v14677_v62  ;;  %v14679_v48 = vld [vmem:[#allocation5 + $0x1010] sm:$0xff]  ;;  %v19652_v31 = vcombine.high %v14691_v32, %v14693_v8 }
 0xb1f   : > { %15920 = vmatprep.subr.bf16.mxu1 %v19614_v29  ;;  %v14681_v29 = vld [vmem:[#allocation5 + $0x1070] sm:$0xff] }
 0xb20   : > { %v19639_v60 = vcombine.low %v14679_v48, %v14681_v29 }
 0xb21   : > { %15798 = vmatpush1.bf16.msra.mxu0 %v19611_v53  ;;  %v19640_v53 = vcombine.high %v14679_v48, %v14681_v29  ;;  %v14699_v48 = vld [vmem:[#allocation5 + $0x13d0] sm:$0xff] }
 0xb22   : > { %15921 = vmatpush1.bf16.msra.mxu1 %v19613_v56  ;;  %15799 = vmatprep.subr.bf16.mxu0 %v19616_v40  ;;  %v19642_v56 = vcombine.high %v14680_v17, %v14682_v18  ;;  %v14683_v40 = vld [vmem:[#allocation5 + $0x10d0] sm:$0xff]  ;;  %v14700_v17 = vld [vmem:[#allocation5 + $0x13d8] sm:$0xff] }
 0xb23   : > { %15922 = vmatprep.subr.bf16.mxu1 %v19618_v52  ;;  %v14685_v52 = vld [vmem:[#allocation5 + $0x1130] sm:$0xff]  ;;  %v14702_v18 = vld [vmem:[#allocation5 + $0x1438] sm:$0xff] }
 0xb24   : > { %v19643_v45 = vcombine.low %v14683_v40, %v14685_v52  ;;  %v14701_v29 = vld [vmem:[#allocation5 + $0x1430] sm:$0xff] }
 0xb25   : > { %15800 = vmatpush1.bf16.msra.mxu0 %v19615_v47  ;;  %v19644_v47 = vcombine.high %v14683_v40, %v14685_v52  ;;  %v14703_v40 = vld [vmem:[#allocation5 + $0x1490] sm:$0xff] }
 0xb26   : > { %15923 = vmatpush1.bf16.msra.mxu1 %v19617_v16  ;;  %15810 = vmatprep.subr.bf16.mxu0 %v19620_v63  ;;  %v19646_v63 = vcombine.high %v14684_v43, %v14686_v44  ;;  %v14705_v52 = vld [vmem:[#allocation5 + $0x14f0] sm:$0xff] }
 0xb27   : > { %15933 = vmatprep.subr.bf16.mxu1 %v19622_v57  ;;  %v14687_v57 = vld [vmem:[#allocation5 + $0x1190] sm:$0xff] }
 0xb28   : > { %15802 = vmatmul.mubr.bf16.vlgmr.msra.gmra.mrb[80].mxu0 %v22423_v12 }
 0xb29   : > { %15811 = vmatpush1.bf16.msra.mxu0 %v19619_v28  ;;  %15925 = vmatmul.mubr.bf16.vlgmr.msra.gmra.mrb[80].mxu1 %v22423_v12  ;;  %v19629_v12 = vcombine.low %v14668_v59, %v14670_v61  ;;  %v14690_v28 = vld [vmem:[#allocation5 + $0x11f8] sm:$0xff] }
 0xb2a   : > { %15934 = vmatpush1.bf16.msra.mxu1 %v19621_v54  ;;  %15812 = vmatprep.subr.bf16.mxu0 %v19624_v36  ;;  %v19650_v50 = vcombine.high %v14688_v51, %v14690_v28 }
 0xb2b   : > { %15935 = vmatprep.subr.bf16.mxu1 %v19626_v6  ;;  %15842 = vmatprep.mubr.bf16.mxu0 %v22426_v23 }
 0xb2c   : > { %15965 = vmatprep.mubr.bf16.mxu1 %v22426_v23  ;;  %v19638_v23 = vcombine.high %v14676_v42, %v14678_v3  ;;  %v14697_v42 = vld [vmem:[#allocation5 + $0x1370] sm:$0xff]  ;;  %v14696_v3 = vld [vmem:[#allocation5 + $0x1318] sm:$0xff] }
 0xb2d   : > { %15813 = vmatpush1.bf16.msra.mxu0 %v19623_v2  ;;  %v19645_v2 = vcombine.low %v14684_v43, %v14686_v44  ;;  %v14704_v43 = vld [vmem:[#allocation5 + $0x1498] sm:$0xff] }
 0xb2e   : > { %15936 = vmatpush1.bf16.msra.mxu1 %v19625_v4  ;;  %15814 = vmatprep.subr.bf16.mxu0 %v19628_v5  ;;  %v19648_v4 = vcombine.high %v14687_v57, %v14689_v49  ;;  %v14706_v44 = vld [vmem:[#allocation5 + $0x14f8] sm:$0xff] }
 0xb2f   : > { %15937 = vmatprep.subr.bf16.mxu1 %v19630_v21 }
 0xb31   : > { %15815 = vmatpush1.bf16.msra.mxu0 %v19627_v11  ;;  %v14692_v11 = vld [vmem:[#allocation5 + $0x1258] sm:$0xff] }
 0xb32   : > { %15938 = vmatpush1.bf16.msra.mxu1 %v19629_v12  ;;  %15816 = vmatprep.subr.bf16.mxu0 %v19632_v10  ;;  %v14694_v12 = vld [vmem:[#allocation5 + $0x12b8] sm:$0xff]  ;;  %v19647_v10 = vcombine.low %v14687_v57, %v14689_v49  ;;  %v14709_v57 = vld [vmem:[#allocation5 + $0x15b0] sm:$0xff] }
 0xb33   : > { %15939 = vmatprep.subr.bf16.mxu1 %v19634_v13  ;;  %v19649_v13 = vcombine.low %v14688_v51, %v14690_v28  ;;  %v19654_v62 = vcombine.high %v14692_v11, %v14694_v12  ;;  %v14708_v49 = vld [vmem:[#allocation5 + $0x1558] sm:$0xff]  ;;  %v19665_v51 = vcombine.low %v14704_v43, %v14706_v44 }
 0xb35   : > { %15817 = vmatpush1.bf16.msra.mxu0 %v19631_v46  ;;  %v14698_v46 = vld [vmem:[#allocation5 + $0x1378] sm:$0xff] }
 0xb36   : > { %15940 = vmatpush1.bf16.msra.mxu1 %v19633_v14  ;;  %15818 = vmatprep.subr.bf16.mxu0 %v19636_v33  ;;  %v19651_v14 = vcombine.low %v14691_v32, %v14693_v8  ;;  %v14716_v32 = vld [vmem:[#allocation5 + $0x16d8] sm:$0xff] }
 0xb37   : > { %15941 = vmatprep.subr.bf16.mxu1 %v19638_v23  ;;  %v19658_v23 = vcombine.high %v14696_v3, %v14698_v46  ;;  %v14718_v8 = vld [vmem:[#allocation5 + $0x1738] sm:$0xff] }
 0xb39   : > { %15819 = vmatpush1.bf16.msra.mxu0 %v19635_v19 }
 0xb3a   : > { %15942 = vmatpush1.bf16.msra.mxu1 %v19637_v30  ;;  %15820 = vmatprep.subr.bf16.mxu0 %v19640_v53  ;;  %v19657_v30 = vcombine.low %v14696_v3, %v14698_v46  ;;  %v19660_v53 = vcombine.high %v14699_v48, %v14701_v29  ;;  %v19677_v46 = vcombine.low %v14716_v32, %v14718_v8 }
 0xb3b   : > { %v14377_v16 = vpop.f32.mrb[68].mxu0  ;;  %15943 = vmatprep.subr.bf16.mxu1 %v19642_v56  ;;  %v19662_v56 = vcombine.high %v14700_v17, %v14702_v18 }
 0xb3c   : > { %v14418_v55 = vpop.f32.mrb[68].mxu1  ;;  %v14379_v1 = vpop.f32.mrb[69].mxu0 }
 0xb3d   : > { %v14419_v54 = vadd.f32 %v14418_v55, %v14377_v16  ;;  %v14420_v36 = vpop.f32.mrb[69].mxu1  ;;  %15821 = vmatpush1.bf16.msra.mxu0 %v19639_v60  ;;  %v14381_v6 = vpop.f32.mrb[70].mxu0  ;;  %v19659_v60 = vcombine.low %v14699_v48, %v14701_v29  ;;  %v19666_v16 = vcombine.high %v14704_v43, %v14706_v44  ;;  %v14710_v55 = vld [vmem:[#allocation5 + $0x15b8] sm:$0xff] }
 0xb3e   : > { %v14421_v7 = vadd.f32 %v14420_v36, %v14379_v1  ;;  %15944 = vmatpush1.bf16.msra.mxu1 %v19641_v35  ;;  %v14422_v59 = vpop.f32.mrb[70].mxu1  ;;  %v14382_v61 = vpop.f32.mrb[71].mxu0  ;;  %15822 = vmatprep.subr.bf16.mxu0 %v19644_v47  ;;  %v19661_v35 = vcombine.low %v14700_v17, %v14702_v18  ;;  %v19664_v47 = vcombine.high %v14703_v40, %v14705_v52  ;;  %v14711_v36 = vld [vmem:[#allocation5 + $0x1610] sm:$0xff]  ;;  %v14724_v48 = vld [vmem:[#allocation5 + $0x1858] sm:$0xff] }
 0xb3f   : > { %v22744_v5 = vadd.f32 %v14419_v54, %v22690_v37  ;;  %v14423_v21 = vpop.f32.mrb[71].mxu1  ;;  %15945 = vmatprep.subr.bf16.mxu1 %v19646_v63  ;;  %v14695_v37 = vld [vmem:[#allocation5 + $0x1310] sm:$0xff]  ;;  %v19663_v1 = vcombine.low %v14703_v40, %v14705_v52  ;;  %v19670_v54 = vcombine.high %v14708_v49, %v14710_v55  ;;  %v19669_v61 = vcombine.low %v14708_v49, %v14710_v55  ;;  %v14726_v29 = vld [vmem:[#allocation5 + $0x18b8] sm:$0xff] }
 0xb40   : > { %v22747_v9 = vadd.f32 %v14421_v7, %v22693_v15  ;;  %v19653_v15 = vcombine.low %v14692_v11, %v14694_v12  ;;  %v19656_v33 = vcombine.high %v14695_v37, %v14697_v42  ;;  %v19655_v19 = vcombine.low %v14695_v37, %v14697_v42  ;;  %v14707_v63 = vld [vmem:[#allocation5 + $0x1550] sm:$0xff]  ;;  %v14714_v7 = vld [vmem:[#allocation5 + $0x1678] sm:$0xff] }
 0xb41   : > { %15823 = vmatpush1.bf16.msra.mxu0 %v19643_v45  ;;  %v19668_v28 = vcombine.high %v14707_v63, %v14709_v57  ;;  %v14713_v6 = vld [vmem:[#allocation5 + $0x1670] sm:$0xff]  ;;  %v14712_v45 = vld [vmem:[#allocation5 + $0x1618] sm:$0xff]  ;;  %v19667_v59 = vcombine.low %v14707_v63, %v14709_v57  ;;  %v19685_v44 = vcombine.low %v14724_v48, %v14726_v29 }
 0xb42   : > { %15946 = vmatpush1.bf16.msra.mxu1 %v19645_v2  ;;  %15824 = vmatprep.subr.bf16.mxu0 %v19648_v4  ;;  %v19672_v2 = vcombine.high %v14711_v36, %v14713_v6  ;;  %v19674_v4 = vcombine.high %v14712_v45, %v14714_v7  ;;  %v14715_v21 = vld [vmem:[#allocation5 + $0x16d0] sm:$0xff]  ;;  %v19671_v11 = vcombine.low %v14711_v36, %v14713_v6  ;;  %v14720_v37 = vld [vmem:[#allocation5 + $0x1798] sm:$0xff] }
 0xb43   : > { %15947 = vmatprep.subr.bf16.mxu1 %v19650_v50  ;;  %v14717_v50 = vld [vmem:[#allocation5 + $0x1730] sm:$0xff]  ;;  %v19673_v12 = vcombine.low %v14712_v45, %v14714_v7  ;;  %v14722_v42 = vld [vmem:[#allocation5 + $0x17f8] sm:$0xff] }
 0xb44   : > { %v19675_v3 = vcombine.low %v14715_v21, %v14717_v50  ;;  %v19681_v18 = vcombine.low %v14720_v37, %v14722_v42  ;;  %v14728_v40 = vld [vmem:[#allocation5 + $0x1918] sm:$0xff] }
 0xb45   : > { %15825 = vmatpush1.bf16.msra.mxu0 %v19647_v10  ;;  %v19676_v10 = vcombine.high %v14715_v21, %v14717_v50  ;;  %v14730_v52 = vld [vmem:[#allocation5 + $0x1978] sm:$0xff] }
 0xb46   : > { %15948 = vmatpush1.bf16.msra.mxu1 %v19649_v13  ;;  %15826 = vmatprep.subr.bf16.mxu0 %v19652_v31  ;;  %v19678_v13 = vcombine.high %v14716_v32, %v14718_v8  ;;  %v14719_v31 = vld [vmem:[#allocation5 + $0x1790] sm:$0xff]  ;;  %v14732_v63 = vld [vmem:[#allocation5 + $0x19d8] sm:$0xff]  ;;  %v19689_v55 = vcombine.low %v14728_v40, %v14730_v52 }
 0xb47   : > { %15949 = vmatprep.subr.bf16.mxu1 %v19654_v62  ;;  %v14721_v62 = vld [vmem:[#allocation5 + $0x17f0] sm:$0xff]  ;;  %v14734_v57 = vld [vmem:[#allocation5 + $0x1a38] sm:$0xff] }
 0xb48   : > { %v19679_v17 = vcombine.low %v14719_v31, %v14721_v62  ;;  %v14736_v36 = vld [vmem:[#allocation5 + $0x1a98] sm:$0xff] }
 0xb49   : > { %15827 = vmatpush1.bf16.msra.mxu0 %v19651_v14  ;;  %v19680_v14 = vcombine.high %v14719_v31, %v14721_v62  ;;  %v14738_v6 = vld [vmem:[#allocation5 + $0x1af8] sm:$0xff] }
 0xb4a   : > { %15950 = vmatpush1.bf16.msra.mxu1 %v19653_v15  ;;  %15828 = vmatprep.subr.bf16.mxu0 %v19656_v33  ;;  %v19682_v15 = vcombine.high %v14720_v37, %v14722_v42  ;;  %v14723_v33 = vld [vmem:[#allocation5 + $0x1850] sm:$0xff]  ;;  %v14742_v21 = vld [vmem:[#allocation5 + $0x1bb8] sm:$0xff]  ;;  %v19697_v32 = vcombine.low %v14736_v36, %v14738_v6 }
 0xb4b   : > { %15951 = vmatprep.subr.bf16.mxu1 %v19658_v23  ;;  %v14725_v23 = vld [vmem:[#allocation5 + $0x18b0] sm:$0xff] }
 0xb4c   : > { %v19683_v43 = vcombine.low %v14723_v33, %v14725_v23 }
 0xb4d   : > { %15829 = vmatpush1.bf16.msra.mxu0 %v19655_v19  ;;  %v19684_v19 = vcombine.high %v14723_v33, %v14725_v23 }
 0xb4e   : > { %15952 = vmatpush1.bf16.msra.mxu1 %v19657_v30  ;;  %15830 = vmatprep.subr.bf16.mxu0 %v19660_v53  ;;  %v19686_v30 = vcombine.high %v14724_v48, %v14726_v29  ;;  %v14727_v53 = vld [vmem:[#allocation5 + $0x1910] sm:$0xff] }
 0xb4f   : > { %15953 = vmatprep.subr.bf16.mxu1 %v19662_v56  ;;  %v14729_v56 = vld [vmem:[#allocation5 + $0x1970] sm:$0xff] }
 0xb50   : > { %v19687_v49 = vcombine.low %v14727_v53, %v14729_v56 }
 0xb51   : > { %15831 = vmatpush1.bf16.msra.mxu0 %v19659_v60  ;;  %v19688_v60 = vcombine.high %v14727_v53, %v14729_v56  ;;  %v14752_v56 = vld [vmem:[#allocation5 + $0x1d98] sm:$0xff] }
 0xb52   : > { %15954 = vmatpush1.bf16.msra.mxu1 %v19661_v35  ;;  %15832 = vmatprep.subr.bf16.mxu0 %v19664_v47  ;;  %v19690_v35 = vcombine.high %v14728_v40, %v14730_v52  ;;  %v14731_v47 = vld [vmem:[#allocation5 + $0x19d0] sm:$0xff]  ;;  %v14754_v40 = vld [vmem:[#allocation5 + $0x1df8] sm:$0xff] }
 0xb53   : > { %15955 = vmatprep.subr.bf16.mxu1 %v19666_v16  ;;  %v14733_v16 = vld [vmem:[#allocation5 + $0x1a30] sm:$0xff] }
 0xb54   : > { %v19691_v45 = vcombine.low %v14731_v47, %v14733_v16 }
 0xb55   : > { %15833 = vmatpush1.bf16.msra.mxu0 %v19663_v1  ;;  %v19692_v1 = vcombine.high %v14731_v47, %v14733_v16 }
 0xb56   : > { %15956 = vmatpush1.bf16.msra.mxu1 %v19665_v51  ;;  %15834 = vmatprep.subr.bf16.mxu0 %v19668_v28  ;;  %v19694_v51 = vcombine.high %v14732_v63, %v14734_v57  ;;  %v14735_v28 = vld [vmem:[#allocation5 + $0x1a90] sm:$0xff] }
 0xb57   : > { %15957 = vmatprep.subr.bf16.mxu1 %v19670_v54  ;;  %v14737_v54 = vld [vmem:[#allocation5 + $0x1af0] sm:$0xff] }
 0xb58   : > { %v19696_v7 = vcombine.high %v14735_v28, %v14737_v54  ;;  %v19695_v50 = vcombine.low %v14735_v28, %v14737_v54  ;;  %v14757_v28 = vld [vmem:[#allocation5 + $0x1eb0] sm:$0xff] }
 0xb59   : > { %15835 = vmatpush1.bf16.msra.mxu0 %v19667_v59  ;;  %v19698_v59 = vcombine.high %v14736_v36, %v14738_v6  ;;  %v14756_v36 = vld [vmem:[#allocation5 + $0x1e58] sm:$0xff] }
 0xb5a   : > { %15958 = vmatpush1.bf16.msra.mxu1 %v19669_v61  ;;  %15836 = vmatprep.subr.bf16.mxu0 %v19672_v2  ;;  %v14739_v61 = vld [vmem:[#allocation5 + $0x1b50] sm:$0xff]  ;;  %v14758_v6 = vld [vmem:[#allocation5 + $0x1eb8] sm:$0xff] }
 0xb5b   : > { %15959 = vmatprep.subr.bf16.mxu1 %v19674_v4  ;;  %v14741_v2 = vld [vmem:[#allocation5 + $0x1bb0] sm:$0xff]  ;;  %v14740_v4 = vld [vmem:[#allocation5 + $0x1b58] sm:$0xff] }
 0xb5c   : > { %v19700_v8 = vcombine.high %v14739_v61, %v14741_v2  ;;  %v19699_v31 = vcombine.low %v14739_v61, %v14741_v2  ;;  %v19701_v62 = vcombine.low %v14740_v4, %v14742_v21  ;;  %v14761_v61 = vld [vmem:[#allocation5 + $0x1f70] sm:$0xff]  ;;  %v14760_v2 = vld [vmem:[#allocation5 + $0x1f18] sm:$0xff] }
 0xb5d   : > { %15837 = vmatpush1.bf16.msra.mxu0 %v19671_v11  ;;  %v14743_v11 = vld [vmem:[#allocation5 + $0x1c10] sm:$0xff] }
 0xb5e   : > { %15960 = vmatpush1.bf16.msra.mxu1 %v19673_v12  ;;  %15838 = vmatprep.subr.bf16.mxu0 %v19676_v10  ;;  %v14745_v12 = vld [vmem:[#allocation5 + $0x1c70] sm:$0xff]  ;;  %v14744_v10 = vld [vmem:[#allocation5 + $0x1c18] sm:$0xff] }
 0xb5f   : > { %15961 = vmatprep.subr.bf16.mxu1 %v19678_v13  ;;  %v14746_v13 = vld [vmem:[#allocation5 + $0x1c78] sm:$0xff]  ;;  %v19704_v37 = vcombine.high %v14743_v11, %v14745_v12  ;;  %v19703_v33 = vcombine.low %v14743_v11, %v14745_v12 }
 0xb60   : > { %v19706_v42 = vcombine.high %v14744_v10, %v14746_v13  ;;  %v19705_v23 = vcombine.low %v14744_v10, %v14746_v13  ;;  %v14764_v11 = vld [vmem:[#allocation5 + $0x1fd8] sm:$0xff] }
 0xb61   : > { %15839 = vmatpush1.bf16.msra.mxu0 %v19675_v3  ;;  %v14747_v3 = vld [vmem:[#allocation5 + $0x1cd0] sm:$0xff]  ;;  %v14766_v12 = vld [vmem:[#allocation5 + $0x2038] sm:$0xff] }
 0xb62   : > { %15962 = vmatpush1.bf16.msra.mxu1 %v19677_v46  ;;  %15840 = vmatprep.subr.bf16.mxu0 %v19680_v14  ;;  %v14749_v46 = vld [vmem:[#allocation5 + $0x1d30] sm:$0xff]  ;;  %v14748_v14 = vld [vmem:[#allocation5 + $0x1cd8] sm:$0xff] }
 0xb63   : > { %15963 = vmatprep.subr.bf16.mxu1 %v19682_v15  ;;  %v14750_v15 = vld [vmem:[#allocation5 + $0x1d38] sm:$0xff]  ;;  %v19708_v48 = vcombine.high %v14747_v3, %v14749_v46 }
 0xb65   : > { %15841 = vmatpush1.bf16.msra.mxu0 %v19679_v17  ;;  %v19710_v17 = vcombine.high %v14748_v14, %v14750_v15 }
 0xb66   : > { %15964 = vmatpush1.bf16.msra.mxu1 %v19681_v18  ;;  %15851 = vmatprep.subr.bf16.mxu0 %v19684_v19  ;;  %v14751_v18 = vld [vmem:[#allocation5 + $0x1d90] sm:$0xff] }
 0xb67   : > { %15974 = vmatprep.subr.bf16.mxu1 %v19686_v30  ;;  %v14753_v19 = vld [vmem:[#allocation5 + $0x1df0] sm:$0xff] }
 0xb68   : > { %15843 = vmatmul.mubr.bf16.vlgmr.msra.gmra.mrb[80].mxu0 %v22434_v25 }
 0xb69   : > { %15852 = vmatpush1.bf16.msra.mxu0 %v19683_v43  ;;  %15966 = vmatmul.mubr.bf16.vlgmr.msra.gmra.mrb[80].mxu1 %v22434_v25  ;;  %v19693_v25 = vcombine.low %v14732_v63, %v14734_v57  ;;  %v19709_v63 = vcombine.low %v14748_v14, %v14750_v15  ;;  %v19712_v57 = vcombine.high %v14751_v18, %v14753_v19 }
 0xb6a   : > { %15975 = vmatpush1.bf16.msra.mxu1 %v19685_v44  ;;  %15853 = vmatprep.subr.bf16.mxu0 %v19688_v60  ;;  %v19707_v60 = vcombine.low %v14747_v3, %v14749_v46  ;;  %v14768_v3 = vld [vmem:[#allocation5 + $0x2098] sm:$0xff]  ;;  %v19725_v15 = vcombine.low %v14764_v11, %v14766_v12 }
 0xb6b   : > { %15976 = vmatprep.subr.bf16.mxu1 %v19690_v35  ;;  %15883 = vmatprep.mubr.bf16.mxu0 %v22436_v34  ;;  %v14770_v46 = vld [vmem:[#allocation5 + $0x20f8] sm:$0xff] }
 0xb6c   : > { %16006 = vmatprep.mubr.bf16.mxu1 %v22436_v34  ;;  %v19702_v34 = vcombine.high %v14740_v4, %v14742_v21  ;;  %v14762_v4 = vld [vmem:[#allocation5 + $0x1f78] sm:$0xff] }
 0xb6d   : > { %15854 = vmatpush1.bf16.msra.mxu0 %v19687_v49  ;;  %v19721_v13 = vcombine.low %v14760_v2, %v14762_v4 }
 0xb6e   : > { %15977 = vmatpush1.bf16.msra.mxu1 %v19689_v55  ;;  %15855 = vmatprep.subr.bf16.mxu0 %v19692_v1  ;;  %v19714_v1 = vcombine.high %v14752_v56, %v14754_v40 }
 0xb6f   : > { %15978 = vmatprep.subr.bf16.mxu1 %v19694_v51  ;;  %v14755_v51 = vld [vmem:[#allocation5 + $0x1e50] sm:$0xff] }
 0xb70   : > { %v19715_v21 = vcombine.low %v14755_v51, %v14757_v28 }
 0xb71   : > { %15856 = vmatpush1.bf16.msra.mxu0 %v19691_v45  ;;  %v19711_v45 = vcombine.low %v14751_v18, %v14753_v19  ;;  %v14774_v18 = vld [vmem:[#allocation5 + $0x21b8] sm:$0xff] }
 0xb72   : > { %15979 = vmatpush1.bf16.msra.mxu1 %v19693_v25  ;;  %15857 = vmatprep.subr.bf16.mxu0 %v19696_v7  ;;  %v19713_v25 = vcombine.low %v14752_v56, %v14754_v40  ;;  %v19716_v7 = vcombine.high %v14755_v51, %v14757_v28  ;;  %v14775_v40 = vld [vmem:[#allocation5 + $0x2210] sm:$0xff] }
 0xb73   : > { %15980 = vmatprep.subr.bf16.mxu1 %v19698_v59  ;;  %v19718_v59 = vcombine.high %v14756_v36, %v14758_v6 }
 0xb75   : > { %15858 = vmatpush1.bf16.msra.mxu0 %v19695_v50 }
 0xb76   : > { %15981 = vmatpush1.bf16.msra.mxu1 %v19697_v32  ;;  %15859 = vmatprep.subr.bf16.mxu0 %v19700_v8  ;;  %v19722_v32 = vcombine.high %v14760_v2, %v14762_v4  ;;  %v14763_v8 = vld [vmem:[#allocation5 + $0x1fd0] sm:$0xff] }
 0xb77   : > { %15982 = vmatprep.subr.bf16.mxu1 %v19702_v34  ;;  %v14765_v34 = vld [vmem:[#allocation5 + $0x2030] sm:$0xff] }
 0xb78   : > { %v19723_v14 = vcombine.low %v14763_v8, %v14765_v34 }
 0xb79   : > { %15860 = vmatpush1.bf16.msra.mxu0 %v19699_v31  ;;  %v19724_v31 = vcombine.high %v14763_v8, %v14765_v34  ;;  %v21597_v8 = vld [vmem:[#allocation8 + $0x1e00] ss:$24 sps:$4 sm:$0xff]  }
 0xb7a   : > { %15983 = vmatpush1.bf16.msra.mxu1 %v19701_v62  ;;  %15861 = vmatprep.subr.bf16.mxu0 %v19704_v37  ;;  %v19726_v62 = vcombine.high %v14764_v11, %v14766_v12  ;;  %v14767_v37 = vld [vmem:[#allocation5 + $0x2090] sm:$0xff]  ;;  %v21605_v11 = vld [vmem:[#allocation8 + $0x1e34] ss:$24 sps:$4 sm:$0xff]  }
 0xb7b   : > { %v14459_v29 = vpop.f32.mrb[72].mxu0  ;;  %15984 = vmatprep.subr.bf16.mxu1 %v19706_v42  ;;  %v14769_v42 = vld [vmem:[#allocation5 + $0x20f0] sm:$0xff]  ;;  %v21608_v12 = vld [vmem:[#allocation8 + $0x2134] ss:$24 sps:$4 sm:$0xff]  }
 0xb7c   : > { %v14500_v30 = vpop.f32.mrb[72].mxu1  ;;  %v14461_v53 = vpop.f32.mrb[73].mxu0  ;;  %v19727_v19 = vcombine.low %v14767_v37, %v14769_v42  ;;  %v21600_v34 = vld [vmem:[#allocation8 + $0x2100] ss:$24 sps:$4 sm:$0xff]  }
 0xb7d   : > { %v14501_v52 = vadd.f32 %v14500_v30, %v14459_v29  ;;  %v14502_v43 = vpop.f32.mrb[73].mxu1  ;;  %v14463_v44 = vpop.f32.mrb[74].mxu0  ;;  %15862 = vmatpush1.bf16.msra.mxu0 %v19703_v33  ;;  %v19728_v33 = vcombine.high %v14767_v37, %v14769_v42  ;;  %v14773_v29 = vld [vmem:[#allocation5 + $0x21b0] sm:$0xff]  ;;  %v19729_v30 = vcombine.low %v14768_v3, %v14770_v46 }
 0xb7e   : > { %v14503_v35 = vadd.f32 %v14502_v43, %v14461_v53  ;;  %v14504_v47 = vpop.f32.mrb[74].mxu1  ;;  %15985 = vmatpush1.bf16.msra.mxu1 %v19705_v23  ;;  %v14464_v16 = vpop.f32.mrb[75].mxu0  ;;  %15863 = vmatprep.subr.bf16.mxu0 %v19708_v48  ;;  %v19730_v23 = vcombine.high %v14768_v3, %v14770_v46  ;;  %v14771_v48 = vld [vmem:[#allocation5 + $0x2150] sm:$0xff]  ;;  %v14776_v43 = vld [vmem:[#allocation5 + $0x2218] sm:$0xff]  ;;  %v21617_v3 = vld [vmem:[#allocation8 + $0x1e94] ss:$24 sps:$4 sm:$0xff]  }
 0xb7f   : > { %v22754_v49 = vadd.f32 %v14501_v52, %v22700_v0  ;;  %v14505_v55 = vpop.f32.mrb[75].mxu1  ;;  %15986 = vmatprep.subr.bf16.mxu1 %v19710_v17  ;;  %v14759_v0 = vld [vmem:[#allocation5 + $0x1f10] sm:$0xff]  ;;  %v14772_v17 = vld [vmem:[#allocation5 + $0x2158] sm:$0xff]  ;;  %v19732_v53 = vcombine.high %v14771_v48, %v14773_v29  ;;  %v21620_v46 = vld [vmem:[#allocation8 + $0x2194] ss:$24 sps:$4 sm:$0xff]  }
 0xb80   : > { %v22757_v54 = vadd.f32 %v14503_v35, %v22703_v41  ;;  %v19717_v41 = vcombine.low %v14756_v36, %v14758_v6  ;;  %v19720_v50 = vcombine.high %v14759_v0, %v14761_v61  ;;  %v19719_v10 = vcombine.low %v14759_v0, %v14761_v61  ;;  %v14777_v52 = vld [vmem:[#allocation5 + $0x2270] sm:$0xff]  ;;  %v14778_v44 = vld [vmem:[#allocation5 + $0x2278] sm:$0xff] }
 0xb81   : > { %15864 = vmatpush1.bf16.msra.mxu0 %v19707_v60  ;;  %v19734_v56 = vcombine.high %v14772_v17, %v14774_v18  ;;  %v19731_v60 = vcombine.low %v14771_v48, %v14773_v29  ;;  %v19733_v35 = vcombine.low %v14772_v17, %v14774_v18  ;;  %v19736_v47 = vcombine.high %v14775_v40, %v14777_v52  ;;  %v14780_v55 = vld [vmem:[#allocation5 + $0x22d8] sm:$0xff]  ;;  %v21629_v29 = vld [vmem:[#allocation8 + $0x1ef4] ss:$24 sps:$4 sm:$0xff]   ;;  %v21627_v18 = vld [vmem:[#allocation8 + $0x1ef0] ss:$24 sps:$4 sm:$0xff]  }
 0xb82   : > { %15987 = vmatpush1.bf16.msra.mxu1 %v19709_v63  ;;  %15865 = vmatprep.subr.bf16.mxu0 %v19712_v57  ;;  %v19738_v16 = vcombine.high %v14776_v43, %v14778_v44  ;;  %v14779_v63 = vld [vmem:[#allocation5 + $0x22d0] sm:$0xff]  ;;  %v19735_v51 = vcombine.low %v14775_v40, %v14777_v52  ;;  %v19737_v28 = vcombine.low %v14776_v43, %v14778_v44  ;;  %v21632_v17 = vld [vmem:[#allocation8 + $0x21f4] ss:$24 sps:$4 sm:$0xff]  }
 0xb83   : > { %15988 = vmatprep.subr.bf16.mxu1 %v19714_v1  ;;  %v14781_v57 = vld [vmem:[#allocation5 + $0x2330] sm:$0xff]  ;;  %v14782_v1 = vld [vmem:[#allocation5 + $0x2338] sm:$0xff] }
 0xb84   : > { %v19740_v36 = vcombine.high %v14779_v63, %v14781_v57  ;;  %v19742_v6 = vcombine.high %v14780_v55, %v14782_v1  ;;  %v19739_v0 = vcombine.low %v14779_v63, %v14781_v57  ;;  %v19741_v61 = vcombine.low %v14780_v55, %v14782_v1  ;;  %v21609_v37 = vld [vmem:[#allocation8 + $0x1e60] ss:$24 sps:$4 sm:$0xff]   ;;  %v21641_v55 = vld [vmem:[#allocation8 + $0x1f54] ss:$24 sps:$4 sm:$0xff]  }
 0xb85   : > { %15866 = vmatpush1.bf16.msra.mxu0 %v19711_v45  ;;  %v14783_v45 = vld [vmem:[#allocation5 + $0x2390] sm:$0xff] }
 0xb86   : > { %15989 = vmatpush1.bf16.msra.mxu1 %v19713_v25  ;;  %15867 = vmatprep.subr.bf16.mxu0 %v19716_v7  ;;  %v14785_v25 = vld [vmem:[#allocation5 + $0x23f0] sm:$0xff]  ;;  %v14784_v7 = vld [vmem:[#allocation5 + $0x2398] sm:$0xff] }
 0xb87   : > { %15990 = vmatprep.subr.bf16.mxu1 %v19718_v59  ;;  %v14786_v59 = vld [vmem:[#allocation5 + $0x23f8] sm:$0xff]  ;;  %v19744_v2 = vcombine.high %v14783_v45, %v14785_v25 }
 0xb88   : > { %v19746_v4 = vcombine.high %v14784_v7, %v14786_v59  ;;  %v21612_v42 = vld [vmem:[#allocation8 + $0x2160] ss:$24 sps:$4 sm:$0xff]  }
 0xb89   : > { %15868 = vmatpush1.bf16.msra.mxu0 %v19715_v21  ;;  %v19743_v21 = vcombine.low %v14783_v45, %v14785_v25  ;;  %v21624_v48 = vld [vmem:[#allocation8 + $0x21c0] ss:$24 sps:$4 sm:$0xff]   ;;  %v21642_v45 = vld [vmem:[#allocation8 + $0x2250] ss:$24 sps:$4 sm:$0xff]   ;;  %v21647_v25 = vld [vmem:[#allocation8 + $0x1f84] ss:$24 sps:$4 sm:$0xff]  }
 0xb8a   : > { %15991 = vmatpush1.bf16.msra.mxu1 %v19717_v41  ;;  %15869 = vmatprep.subr.bf16.mxu0 %v19720_v50  ;;  %v19745_v41 = vcombine.low %v14784_v7, %v14786_v59  ;;  %v21599_v50 = vld [vmem:[#allocation8 + $0x1e04] ss:$24 sps:$4 sm:$0xff]   ;;  %v21636_v57 = vld [vmem:[#allocation8 + $0x2220] ss:$24 sps:$4 sm:$0xff]  }
 0xb8b   : > { %15992 = vmatprep.subr.bf16.mxu1 %v19722_v32  ;;  %v21602_v32 = vld [vmem:[#allocation8 + $0x2104] ss:$24 sps:$4 sm:$0xff]   ;;  %v21645_v59 = vld [vmem:[#allocation8 + $0x1f80] ss:$24 sps:$4 sm:$0xff]  }
 0xb8c   : > { %v21650_v7 = vld [vmem:[#allocation8 + $0x2284] ss:$24 sps:$4 sm:$0xff]  }
 0xb8d   : > { %15870 = vmatpush1.bf16.msra.mxu0 %v19719_v10  ;;  %v21603_v10 = vld [vmem:[#allocation8 + $0x1e30] ss:$24 sps:$4 sm:$0xff]  }
 0xb8e   : > { %15993 = vmatpush1.bf16.msra.mxu1 %v19721_v13  ;;  %15871 = vmatprep.subr.bf16.mxu0 %v19724_v31  ;;  %v21606_v13 = vld [vmem:[#allocation8 + $0x2130] ss:$24 sps:$4 sm:$0xff]   ;;  %v21611_v31 = vld [vmem:[#allocation8 + $0x1e64] ss:$24 sps:$4 sm:$0xff]  }
 0xb8f   : > { %15994 = vmatprep.subr.bf16.mxu1 %v19726_v62  ;;  %v21614_v62 = vld [vmem:[#allocation8 + $0x2164] ss:$24 sps:$4 sm:$0xff]  }
 0xb91   : > { %15872 = vmatpush1.bf16.msra.mxu0 %v19723_v14  ;;  %v21615_v14 = vld [vmem:[#allocation8 + $0x1e90] ss:$24 sps:$4 sm:$0xff]  }
 0xb92   : > { %15995 = vmatpush1.bf16.msra.mxu1 %v19725_v15  ;;  %15873 = vmatprep.subr.bf16.mxu0 %v19728_v33  ;;  %v21623_v15 = vld [vmem:[#allocation8 + $0x1ec4] ss:$24 sps:$4 sm:$0xff]  }
 0xb93   : > { %15996 = vmatprep.subr.bf16.mxu1 %v19730_v23  ;;  %v21626_v33 = vld [vmem:[#allocation8 + $0x21c4] ss:$24 sps:$4 sm:$0xff]   ;;  %v21621_v23 = vld [vmem:[#allocation8 + $0x1ec0] ss:$24 sps:$4 sm:$0xff]  }
 0xb95   : > { %15874 = vmatpush1.bf16.msra.mxu0 %v19727_v19  ;;  %v21630_v19 = vld [vmem:[#allocation8 + $0x21f0] ss:$24 sps:$4 sm:$0xff]  }
 0xb96   : > { %15997 = vmatpush1.bf16.msra.mxu1 %v19729_v30  ;;  %15875 = vmatprep.subr.bf16.mxu0 %v19732_v53  ;;  %v21635_v30 = vld [vmem:[#allocation8 + $0x1f24] ss:$24 sps:$4 sm:$0xff]  }
 0xb97   : > { %15998 = vmatprep.subr.bf16.mxu1 %v19734_v56  ;;  %v21638_v56 = vld [vmem:[#allocation8 + $0x2224] ss:$24 sps:$4 sm:$0xff]  }
 0xb99   : > { %15876 = vmatpush1.bf16.msra.mxu0 %v19731_v60 }
 0xb9a   : > { %15999 = vmatpush1.bf16.msra.mxu1 %v19733_v35  ;;  %15877 = vmatprep.subr.bf16.mxu0 %v19736_v47  ;;  %v21633_v35 = vld [vmem:[#allocation8 + $0x1f20] ss:$24 sps:$4 sm:$0xff]  }
 0xb9b   : > { %16000 = vmatprep.subr.bf16.mxu1 %v19738_v16 }
 0xb9d   : > { %15878 = vmatpush1.bf16.msra.mxu0 %v19735_v51 }
 0xb9e   : > { %16001 = vmatpush1.bf16.msra.mxu1 %v19737_v28  ;;  %15879 = vmatprep.subr.bf16.mxu0 %v19740_v36  ;;  %v21644_v28 = vld [vmem:[#allocation8 + $0x2254] ss:$24 sps:$4 sm:$0xff]  }
 0xb9f   : > { %16002 = vmatprep.subr.bf16.mxu1 %v19742_v6  ;;  %v21639_v6 = vld [vmem:[#allocation8 + $0x1f50] ss:$24 sps:$4 sm:$0xff]  }
 0xba1   : > { %15880 = vmatpush1.bf16.msra.mxu0 %v19739_v0  ;;  %v21653_v0 = vld [vmem:[#allocation8 + $0x1fb4] ss:$24 sps:$4 sm:$0xff]  }
 0xba2   : > { %16003 = vmatpush1.bf16.msra.mxu1 %v19741_v61  ;;  %15881 = vmatprep.subr.bf16.mxu0 %v19744_v2  ;;  %v21656_v61 = vld [vmem:[#allocation8 + $0x22b4] ss:$24 sps:$4 sm:$0xff]   ;;  %v21654_v2 = vld [vmem:[#allocation8 + $0x22b0] ss:$24 sps:$4 sm:$0xff]  }
 0xba3   : > { %16004 = vmatprep.subr.bf16.mxu1 %v19746_v4  ;;  %v21659_v4 = vld [vmem:[#allocation8 + $0x1fe4] ss:$24 sps:$4 sm:$0xff]  }
 0xba5   : > { %15882 = vmatpush1.bf16.msra.mxu0 %v19743_v21  ;;  %v21662_v21 = vld [vmem:[#allocation8 + $0x22e4] ss:$24 sps:$4 sm:$0xff]  }
 0xba6   : > { %16005 = vmatpush1.bf16.msra.mxu1 %v19745_v41  ;;  %17203 = vmatprep.subr.bf16.mxu0 %v21599_v50  ;;  %v21657_v41 = vld [vmem:[#allocation8 + $0x1fe0] ss:$24 sps:$4 sm:$0xff]  }
 0xba7   : > { %17244 = vmatprep.subr.bf16.mxu1 %v21602_v32  ;;  %v21660_v50 = vld [vmem:[#allocation8 + $0x22e0] ss:$24 sps:$4 sm:$0xff]   ;;  %v21665_v32 = vld [vmem:[#allocation8 + $0x2014] ss:$24 sps:$4 sm:$0xff]  }
 0xba8   : > { %15884 = vmatmul.mubr.bf16.vlgmr.msra.gmra.mrb[80].mxu0 %v22443_v38 }
 0xba9   : > { %16007 = vmatmul.mubr.bf16.vlgmr.msra.gmra.mrb[80].mxu1 %v22443_v38  ;;  %17204 = vmatpush1.bf16.msra.mxu0 %v21597_v8  ;;  %v21618_v38 = vld [vmem:[#allocation8 + $0x2190] ss:$24 sps:$4 sm:$0xff]   ;;  %v21668_v8 = vld [vmem:[#allocation8 + $0x2314] ss:$24 sps:$4 sm:$0xff]  }
 0xbaa   : > { %17245 = vmatpush1.bf16.msra.mxu1 %v21600_v34  ;;  %17205 = vmatprep.subr.bf16.mxu0 %v21605_v11  ;;  %v21663_v34 = vld [vmem:[#allocation8 + $0x2010] ss:$24 sps:$4 sm:$0xff]  }
 0xbab   : > { %17246 = vmatprep.subr.bf16.mxu1 %v21608_v12  ;;  %v21666_v11 = vld [vmem:[#allocation8 + $0x2310] ss:$24 sps:$4 sm:$0xff]   ;;  %v21671_v12 = vld [vmem:[#allocation8 + $0x2044] ss:$24 sps:$4 sm:$0xff]  }
 0xbad   : > { %17206 = vmatpush1.bf16.msra.mxu0 %v21603_v10  ;;  %v21674_v10 = vld [vmem:[#allocation8 + $0x2344] ss:$24 sps:$4 sm:$0xff]  }
 0xbae   : > { %17247 = vmatpush1.bf16.msra.mxu1 %v21606_v13  ;;  %17207 = vmatprep.subr.bf16.mxu0 %v21611_v31  ;;  %v21669_v13 = vld [vmem:[#allocation8 + $0x2040] ss:$24 sps:$4 sm:$0xff]  }
 0xbaf   : > { %17248 = vmatprep.subr.bf16.mxu1 %v21614_v62  ;;  %v21672_v31 = vld [vmem:[#allocation8 + $0x2340] ss:$24 sps:$4 sm:$0xff]   ;;  %v21677_v62 = vld [vmem:[#allocation8 + $0x2074] ss:$24 sps:$4 sm:$0xff]  }
 0xbb1   : > { %17208 = vmatpush1.bf16.msra.mxu0 %v21609_v37  ;;  %v21680_v37 = vld [vmem:[#allocation8 + $0x2374] ss:$24 sps:$4 sm:$0xff]  }
 0xbb2   : > { %17249 = vmatpush1.bf16.msra.mxu1 %v21612_v42  ;;  %17209 = vmatprep.subr.bf16.mxu0 %v21617_v3  ;;  %v21675_v42 = vld [vmem:[#allocation8 + $0x2070] ss:$24 sps:$4 sm:$0xff]  }
 0xbb3   : > { %17250 = vmatprep.subr.bf16.mxu1 %v21620_v46  ;;  %v21678_v3 = vld [vmem:[#allocation8 + $0x2370] ss:$24 sps:$4 sm:$0xff]   ;;  %v21683_v46 = vld [vmem:[#allocation8 + $0x20a4] ss:$24 sps:$4 sm:$0xff]  }
 0xbb5   : > { %17210 = vmatpush1.bf16.msra.mxu0 %v21615_v14  ;;  %v21686_v14 = vld [vmem:[#allocation8 + $0x23a4] ss:$24 sps:$4 sm:$0xff]  }
 0xbb6   : > { %17251 = vmatpush1.bf16.msra.mxu1 %v21618_v38  ;;  %17211 = vmatprep.subr.bf16.mxu0 %v21623_v15  ;;  %v21681_v38 = vld [vmem:[#allocation8 + $0x20a0] ss:$24 sps:$4 sm:$0xff]  }
 0xbb7   : > { %17252 = vmatprep.subr.bf16.mxu1 %v21626_v33  ;;  %v21684_v15 = vld [vmem:[#allocation8 + $0x23a0] ss:$24 sps:$4 sm:$0xff]   ;;  %v21687_v33 = vld [vmem:[#allocation8 + $0x20d0] ss:$24 sps:$4 sm:$0xff]  }
 0xbb9   : > { %17212 = vmatpush1.bf16.msra.mxu0 %v21621_v23  ;;  %v21689_v23 = vld [vmem:[#allocation8 + $0x20d4] ss:$24 sps:$4 sm:$0xff]  }
 0xbba   : > { %17253 = vmatpush1.bf16.msra.mxu1 %v21624_v48  ;;  %17213 = vmatprep.subr.bf16.mxu0 %v21629_v29  ;;  %v21690_v48 = vld [vmem:[#allocation8 + $0x23d0] ss:$24 sps:$4 sm:$0xff]   ;;  %v21692_v29 = vld [vmem:[#allocation8 + $0x23d4] ss:$24 sps:$4 sm:$0xff]  }
 0xbbb   : > { %v14541_v53 = vpop.f32.mrb[76].mxu0  ;;  %17254 = vmatprep.subr.bf16.mxu1 %v21632_v17  ;;  %v21695_v17 = vld [vmem:[#allocation8 + $0x1e0c] ss:$24 sps:$4 sm:$0xff]  }
 0xbbc   : > { %v14582_v40 = vpop.f32.mrb[76].mxu1  ;;  %v14543_v52 = vpop.f32.mrb[77].mxu0 }
 0xbbd   : > { %v14583_v43 = vadd.f32 %v14582_v40, %v14541_v53  ;;  %v14584_v44 = vpop.f32.mrb[77].mxu1  ;;  %v14545_v60 = vpop.f32.mrb[78].mxu0  ;;  %17214 = vmatpush1.bf16.msra.mxu0 %v21627_v18  ;;  %v21698_v18 = vld [vmem:[#allocation8 + $0x210c] ss:$24 sps:$4 sm:$0xff]  }
 0xbbe   : > { %v14585_v47 = vadd.f32 %v14584_v44, %v14543_v52  ;;  %v14586_v16 = vpop.f32.mrb[78].mxu1  ;;  %v14546_v63 = vpop.f32.mrb[79].mxu0  ;;  %17255 = vmatpush1.bf16.msra.mxu1 %v21630_v19  ;;  %17215 = vmatprep.subr.bf16.mxu0 %v21635_v30  ;;  %v14787_v19 = vld [vmem:[#allocation7 + $0x14] sm:$0xf] }
 0xbbf   : > { %v22762_v1 = vadd.f32 %v14583_v43, %v22708_v58  ;;  %v14587_v51 = vpop.f32.mrb[79].mxu1  ;;  %17256 = vmatprep.subr.bf16.mxu1 %v21638_v56  ;;  %v21648_v58 = vld [vmem:[#allocation8 + $0x2280] ss:$24 sps:$4 sm:$0xff]   ;;  %v14792_v30 = vrot.slane %v14787_v19, %v22470_v22  ;;  %v14800_v53 = vrot.slane %v14787_v19, %v22473_v24  ;;  %v14796_v56 = vrot.slane %v14787_v19, %v22476_v26 }
 0xbc0   : > { %v22765_v36 = vadd.f32 %v14585_v47, %v22711_v39  ;;  %v21651_v39 = vld [vmem:[#allocation8 + $0x1fb0] ss:$24 sps:$4 sm:$0xff]   ;;  %v14804_v40 = vrot.slane %v14787_v19, %v22479_v27 }
 0xbc1   : > { %17216 = vmatpush1.bf16.msra.mxu0 %v21633_v35 }
 0xbc2   : > { %17257 = vmatpush1.bf16.msra.mxu1 %v21636_v57  ;;  %17217 = vmatprep.subr.bf16.mxu0 %v21641_v55 }
 0xbc3   : > { %17258 = vmatprep.subr.bf16.mxu1 %v21644_v28 }
 0xbc5   : > { %17218 = vmatpush1.bf16.msra.mxu0 %v21639_v6 }
 0xbc6   : > { %17259 = vmatpush1.bf16.msra.mxu1 %v21642_v45  ;;  %17219 = vmatprep.subr.bf16.mxu0 %v21647_v25 }
 0xbc7   : > { %17260 = vmatprep.subr.bf16.mxu1 %v21650_v7 }
 0xbc9   : > { %17220 = vmatpush1.bf16.msra.mxu0 %v21645_v59 }
 0xbca   : > { %17261 = vmatpush1.bf16.msra.mxu1 %v21648_v58  ;;  %17221 = vmatprep.subr.bf16.mxu0 %v21653_v0 }
 0xbcb   : > { %17262 = vmatprep.subr.bf16.mxu1 %v21656_v61 }
 0xbcd   : > { %17222 = vmatpush1.bf16.msra.mxu0 %v21651_v39 }
 0xbce   : > { %17263 = vmatpush1.bf16.msra.mxu1 %v21654_v2  ;;  %17223 = vmatprep.subr.bf16.mxu0 %v21659_v4 }
 0xbcf   : > { %17264 = vmatprep.subr.bf16.mxu1 %v21662_v21 }
 0xbd1   : > { %17224 = vmatpush1.bf16.msra.mxu0 %v21657_v41 }
 0xbd2   : > { %17265 = vmatpush1.bf16.msra.mxu1 %v21660_v50  ;;  %17225 = vmatprep.subr.bf16.mxu0 %v21665_v32 }
 0xbd3   : > { %17266 = vmatprep.subr.bf16.mxu1 %v21668_v8 }
 0xbd5   : > { %17226 = vmatpush1.bf16.msra.mxu0 %v21663_v34 }
 0xbd6   : > { %17267 = vmatpush1.bf16.msra.mxu1 %v21666_v11  ;;  %17227 = vmatprep.subr.bf16.mxu0 %v21671_v12 }
 0xbd7   : > { %17268 = vmatprep.subr.bf16.mxu1 %v21674_v10 }
 0xbd9   : > { %17228 = vmatpush1.bf16.msra.mxu0 %v21669_v13 }
 0xbda   : > { %17269 = vmatpush1.bf16.msra.mxu1 %v21672_v31  ;;  %17229 = vmatprep.subr.bf16.mxu0 %v21677_v62 }
 0xbdb   : > { %17270 = vmatprep.subr.bf16.mxu1 %v21680_v37 }
 0xbdd   : > { %17230 = vmatpush1.bf16.msra.mxu0 %v21675_v42 }
 0xbde   : > { %17271 = vmatpush1.bf16.msra.mxu1 %v21678_v3  ;;  %17231 = vmatprep.subr.bf16.mxu0 %v21683_v46 }
 0xbdf   : > { %17272 = vmatprep.subr.bf16.mxu1 %v21686_v14 }
 0xbe1   : > { %17232 = vmatpush1.bf16.msra.mxu0 %v21681_v38 }
 0xbe2   : > { %17273 = vmatpush1.bf16.msra.mxu1 %v21684_v15  ;;  %17233 = vmatprep.subr.bf16.mxu0 %v21689_v23 }
 0xbe3   : > { %17274 = vmatprep.subr.bf16.mxu1 %v21692_v29  ;;  %v21693_v29 = vld [vmem:[#allocation8 + $0x1e08] ss:$24 sps:$4 sm:$0xff]  }
 0xbe5   : > { %17234 = vmatpush1.bf16.msra.mxu0 %v21687_v33 }
 0xbe6   : > { %17275 = vmatpush1.bf16.msra.mxu1 %v21690_v48  ;;  %17285 = vmatprep.subr.bf16.mxu0 %v21695_v17 }
 0xbe7   : > { %17326 = vmatprep.subr.bf16.mxu1 %v21698_v18  ;;  %v21696_v18 = vld [vmem:[#allocation8 + $0x2108] ss:$24 sps:$4 sm:$0xff]  }
 0xc7b   : > { %v15885_v52 = vpop.f32.mrb[80].mxu0 }
 0xc7c   : > { %v19962_v43 = vadd.f32 %v15885_v52, %v14792_v30  ;;  %v16008_v44 = vpop.f32.mrb[80].mxu1  ;;  %v15887_v60 = vpop.f32.mrb[81].mxu0  ;;  %v21702_v52 = vld [vmem:[#allocation8 + $0x2138] ss:$24 sps:$4 sm:$0xff]  }
 0xc7d   : > { %v19964_v35 = vadd.f32 %v16008_v44, %v14800_v53  ;;  %v19963_v47 = vadd.f32 %v15887_v60, %v14796_v56  ;;  %v16010_v16 = vpop.f32.mrb[81].mxu1  ;;  %v15889_v63 = vpop.f32.mrb[82].mxu0  ;;  %v21701_v53 = vld [vmem:[#allocation8 + $0x1e3c] ss:$24 sps:$4 sm:$0xff]   ;;  %v21710_v44 = vld [vmem:[#allocation8 + $0x216c] ss:$24 sps:$4 sm:$0xff]  }
 0xc7e   : > { %v16015_v57 = vmul.f32 %v19962_v43, %v19962_v43  ;;  %v19965_v55 = vadd.f32 %v16010_v16, %v14804_v40  ;;  %v16012_v51 = vpop.f32.mrb[82].mxu1  ;;  %v15890_v28 = vpop.f32.mrb[83].mxu0  ;;  %v16031_v13 = vmul.f32 0.5, %v19962_v43  ;;  %v21704_v56 = vld [vmem:[#allocation8 + $0x213c] ss:$24 sps:$4 sm:$0xff]  }
 0xc7f   : > { %v16017_v6 = vmul.f32 %v19964_v35, %v19964_v35  ;;  %v16016_v45 = vmul.f32 %v19963_v47, %v19963_v47  ;;  %v16013_v25 = vpop.f32.mrb[83].mxu1  ;;  %v16033_v37 = vmul.f32 0.5, %v19964_v35  ;;  %v16032_v42 = vmul.f32 0.5, %v19963_v47  ;;  %v21699_v40 = vld [vmem:[#allocation8 + $0x1e38] ss:$24 sps:$4 sm:$0xff]  }
 0xc80   : > { %v16019_v7 = vmul.f32 0.035677407, %v16015_v57  ;;  %v16018_v59 = vmul.f32 %v19965_v55, %v19965_v55  ;;  %v16034_v14 = vmul.f32 0.5, %v19965_v55  ;;  %v21705_v60 = vld [vmem:[#allocation8 + $0x1e68] ss:$24 sps:$4 sm:$0xff]  }
 0xc81   : > { %v16021_v58 = vmul.f32 0.035677407, %v16017_v6  ;;  %v16020_v0 = vmul.f32 0.035677407, %v16016_v45  ;;  %v21716_v16 = vld [vmem:[#allocation8 + $0x219c] ss:$24 sps:$4 sm:$0xff]  }
 0xc82   : > { %v16023_v61 = vadd.f32 0.7978846, %v16019_v7  ;;  %v16022_v39 = vmul.f32 0.035677407, %v16018_v59  ;;  %v21711_v63 = vld [vmem:[#allocation8 + $0x1e98] ss:$24 sps:$4 sm:$0xff]  }
 0xc83   : > { %v16025_v2 = vadd.f32 0.7978846, %v16021_v58  ;;  %v16024_v4 = vadd.f32 0.7978846, %v16020_v0  ;;  %v21714_v57 = vld [vmem:[#allocation8 + $0x2198] ss:$24 sps:$4 sm:$0xff]  }
 0xc84   : > { %v16027_v21 = vmul.f32 %v19962_v43, %v16023_v61  ;;  %v16026_v41 = vadd.f32 0.7978846, %v16022_v39  ;;  %v21707_v43 = vld [vmem:[#allocation8 + $0x1e6c] ss:$24 sps:$4 sm:$0xff]   ;;  %v21717_v28 = vld [vmem:[#allocation8 + $0x1ec8] ss:$24 sps:$4 sm:$0xff]  }
 0xc85   : > { %v16029_v50 = vmul.f32 %v19964_v35, %v16025_v2  ;;  %v16028_v32 = vmul.f32 %v19963_v47, %v16024_v4  ;;  %v21708_v35 = vld [vmem:[#allocation8 + $0x2168] ss:$24 sps:$4 sm:$0xff]   ;;  %v21713_v47 = vld [vmem:[#allocation8 + $0x1e9c] ss:$24 sps:$4 sm:$0xff]   ;;  %v21722_v51 = vld [vmem:[#allocation8 + $0x21cc] ss:$24 sps:$4 sm:$0xff]  }
 0xc86   : > { %21925 = vtanh.f32 %v16027_v21  ;;  %v16030_v8 = vmul.f32 %v19965_v55, %v16026_v41  ;;  %v21719_v55 = vld [vmem:[#allocation8 + $0x1ecc] ss:$24 sps:$4 sm:$0xff]   ;;  %v21720_v6 = vld [vmem:[#allocation8 + $0x21c8] ss:$24 sps:$4 sm:$0xff]   ;;  %v21725_v45 = vld [vmem:[#allocation8 + $0x1efc] ss:$24 sps:$4 sm:$0xff]  }
 0xc87   : > { %21927 = vtanh.f32 %v16029_v50  ;;  %v21728_v25 = vld [vmem:[#allocation8 + $0x21fc] ss:$24 sps:$4 sm:$0xff]   ;;  %v21723_v7 = vld [vmem:[#allocation8 + $0x1ef8] ss:$24 sps:$4 sm:$0xff]   ;;  %v21731_v58 = vld [vmem:[#allocation8 + $0x1f2c] ss:$24 sps:$4 sm:$0xff]  }
 0xc88   : > { %21929 = vtanh.f32 %v16028_v32  ;;  %v21726_v59 = vld [vmem:[#allocation8 + $0x21f8] ss:$24 sps:$4 sm:$0xff]   ;;  %v21734_v0 = vld [vmem:[#allocation8 + $0x222c] ss:$24 sps:$4 sm:$0xff]   ;;  %v21729_v61 = vld [vmem:[#allocation8 + $0x1f28] ss:$24 sps:$4 sm:$0xff]  }
 0xc89   : > { %21931 = vtanh.f32 %v16030_v8  ;;  %v21732_v39 = vld [vmem:[#allocation8 + $0x2228] ss:$24 sps:$4 sm:$0xff]   ;;  %v21737_v2 = vld [vmem:[#allocation8 + $0x1f5c] ss:$24 sps:$4 sm:$0xff]   ;;  %v21735_v21 = vld [vmem:[#allocation8 + $0x1f58] ss:$24 sps:$4 sm:$0xff]  }
 0xc8a   : > { %v21740_v4 = vld [vmem:[#allocation8 + $0x225c] ss:$24 sps:$4 sm:$0xff]   ;;  %v21738_v41 = vld [vmem:[#allocation8 + $0x2258] ss:$24 sps:$4 sm:$0xff]   ;;  %v21743_v50 = vld [vmem:[#allocation8 + $0x1f8c] ss:$24 sps:$4 sm:$0xff]  }
 0xc8b   : > { %v21746_v32 = vld [vmem:[#allocation8 + $0x228c] ss:$24 sps:$4 sm:$0xff]   ;;  %v21741_v8 = vld [vmem:[#allocation8 + $0x1f88] ss:$24 sps:$4 sm:$0xff]  }
 0xc90   : > { %v21926_v34 = vpop.eup %21925 }
 0xc91   : > { %v21928_v11 = vpop.eup %21927  ;;  %v16039_v12 = vadd.f32 1.0, %v21926_v34  ;;  %v21744_v34 = vld [vmem:[#allocation8 + $0x2288] ss:$24 sps:$4 sm:$0xff]  }
 0xc92   : > { %v21930_v10 = vpop.eup %21929  ;;  %v16041_v31 = vadd.f32 1.0, %v21928_v11  ;;  %v21749_v11 = vld [vmem:[#allocation8 + $0x1fbc] ss:$24 sps:$4 sm:$0xff]  }
 0xc93   : > { %v21932_v62 = vpop.eup %21931  ;;  %v16040_v3 = vadd.f32 1.0, %v21930_v10  ;;  %v16043_v46 = vmul.f32 %v16039_v12, %v16031_v13  ;;  %v21752_v12 = vld [vmem:[#allocation8 + $0x22bc] ss:$24 sps:$4 sm:$0xff]   ;;  %v21747_v10 = vld [vmem:[#allocation8 + $0x1fb8] ss:$24 sps:$4 sm:$0xff]  }
 0xc94   : > { %v16042_v38 = vadd.f32 1.0, %v21932_v62  ;;  %v16045_v15 = vmul.f32 %v16041_v31, %v16033_v37  ;;  %v21750_v13 = vld [vmem:[#allocation8 + $0x22b8] ss:$24 sps:$4 sm:$0xff]   ;;  %v21755_v31 = vld [vmem:[#allocation8 + $0x1fec] ss:$24 sps:$4 sm:$0xff]  }
 0xc95   : > { %v16044_v33 = vmul.f32 %v16040_v3, %v16032_v42  ;;  %v22775_v19 = vpack.c.bf16 %v16043_v46, %v16043_v46  ;;  %v21758_v62 = vld [vmem:[#allocation8 + $0x22ec] ss:$24 sps:$4 sm:$0xff]   ;;  %v21753_v37 = vld [vmem:[#allocation8 + $0x1fe8] ss:$24 sps:$4 sm:$0xff]   ;;  %v21761_v3 = vld [vmem:[#allocation8 + $0x201c] ss:$24 sps:$4 sm:$0xff]  }
 0xc96   : > { %v16046_v23 = vmul.f32 %v16042_v38, %v16034_v14  ;;  %v22778_v30 = vpack.c.bf16 %v16045_v15, %v16045_v15  ;;  %v21756_v42 = vld [vmem:[#allocation8 + $0x22e8] ss:$24 sps:$4 sm:$0xff]   ;;  %v21764_v46 = vld [vmem:[#allocation8 + $0x231c] ss:$24 sps:$4 sm:$0xff]   ;;  %v21759_v14 = vld [vmem:[#allocation8 + $0x2018] ss:$24 sps:$4 sm:$0xff]  }
 0xc97   : > { %v22771_v48 = vpack.c.bf16 %v16044_v33, %v16044_v33  ;;  %v21762_v38 = vld [vmem:[#allocation8 + $0x2318] ss:$24 sps:$4 sm:$0xff]   ;;  %v21767_v15 = vld [vmem:[#allocation8 + $0x204c] ss:$24 sps:$4 sm:$0xff]  }
 0xc98   : > { %v22773_v17 = vpack.c.bf16 %v16046_v23, %v16046_v23  ;;  %v21770_v33 = vld [vmem:[#allocation8 + $0x234c] ss:$24 sps:$4 sm:$0xff]   ;;  %v21765_v23 = vld [vmem:[#allocation8 + $0x2048] ss:$24 sps:$4 sm:$0xff]  }
 0xc99   : > { %17235 = vmatprep.mubr.bf16.mxu0 %v22771_v48 }
 0xc9a   : > { %17276 = vmatprep.mubr.bf16.mxu1 %v22773_v17  ;;  %17236 = vmatmul.mubr.bf16.vlgmr.msra.gmra.mrb[84].mxu0 %v22775_v19 }
 0xc9b   : > { %17277 = vmatmul.mubr.bf16.vlgmr.msra.gmra.mrb[84].mxu1 %v22778_v30  ;;  %17286 = vmatpush1.bf16.msra.mxu0 %v21693_v29  ;;  %v21768_v29 = vld [vmem:[#allocation8 + $0x2348] ss:$24 sps:$4 sm:$0xff]  }
 0xc9c   : > { %17327 = vmatpush1.bf16.msra.mxu1 %v21696_v18  ;;  %17317 = vmatprep.mubr.bf16.mxu0 %v22771_v48  ;;  %v21773_v18 = vld [vmem:[#allocation8 + $0x207c] ss:$24 sps:$4 sm:$0xff]  }
 0xc9d   : > { %17358 = vmatprep.mubr.bf16.mxu1 %v22773_v17  ;;  %17287 = vmatprep.subr.bf16.mxu0 %v21701_v53  ;;  %v21776_v53 = vld [vmem:[#allocation8 + $0x237c] ss:$24 sps:$4 sm:$0xff]  }
 0xc9e   : > { %17328 = vmatprep.subr.bf16.mxu1 %v21704_v56  ;;  %v21771_v56 = vld [vmem:[#allocation8 + $0x2078] ss:$24 sps:$4 sm:$0xff]  }
 0xc9f   : > { %17288 = vmatpush1.bf16.msra.mxu0 %v21699_v40  ;;  %v21774_v40 = vld [vmem:[#allocation8 + $0x2378] ss:$24 sps:$4 sm:$0xff]  }
 0xca0   : > { %17329 = vmatpush1.bf16.msra.mxu1 %v21702_v52  ;;  %17289 = vmatprep.subr.bf16.mxu0 %v21707_v43  ;;  %v21779_v52 = vld [vmem:[#allocation8 + $0x20ac] ss:$24 sps:$4 sm:$0xff]  }
 0xca1   : > { %17330 = vmatprep.subr.bf16.mxu1 %v21710_v44  ;;  %v21782_v43 = vld [vmem:[#allocation8 + $0x23ac] ss:$24 sps:$4 sm:$0xff]   ;;  %v21777_v44 = vld [vmem:[#allocation8 + $0x20a8] ss:$24 sps:$4 sm:$0xff]  }
 0xca3   : > { %17290 = vmatpush1.bf16.msra.mxu0 %v21705_v60  ;;  %v21780_v60 = vld [vmem:[#allocation8 + $0x23a8] ss:$24 sps:$4 sm:$0xff]  }
 0xca4   : > { %17331 = vmatpush1.bf16.msra.mxu1 %v21708_v35  ;;  %17291 = vmatprep.subr.bf16.mxu0 %v21713_v47  ;;  %v21785_v35 = vld [vmem:[#allocation8 + $0x20dc] ss:$24 sps:$4 sm:$0xff]  }
 0xca5   : > { %17332 = vmatprep.subr.bf16.mxu1 %v21716_v16  ;;  %v21788_v47 = vld [vmem:[#allocation8 + $0x23dc] ss:$24 sps:$4 sm:$0xff]   ;;  %v21783_v16 = vld [vmem:[#allocation8 + $0x20d8] ss:$24 sps:$4 sm:$0xff]  }
 0xca7   : > { %17292 = vmatpush1.bf16.msra.mxu0 %v21711_v63  ;;  %v21786_v63 = vld [vmem:[#allocation8 + $0x23d8] ss:$24 sps:$4 sm:$0xff]  }
 0xca8   : > { %17333 = vmatpush1.bf16.msra.mxu1 %v21714_v57  ;;  %17293 = vmatprep.subr.bf16.mxu0 %v21719_v55  ;;  %v21791_v57 = vld [vmem:[#allocation8 + $0x1e14] ss:$24 sps:$4 sm:$0xff]  }
 0xca9   : > { %17334 = vmatprep.subr.bf16.mxu1 %v21722_v51  ;;  %v21794_v55 = vld [vmem:[#allocation8 + $0x2114] ss:$24 sps:$4 sm:$0xff]   ;;  %v21789_v51 = vld [vmem:[#allocation8 + $0x1e10] ss:$24 sps:$4 sm:$0xff]  }
 0xcab   : > { %17294 = vmatpush1.bf16.msra.mxu0 %v21717_v28  ;;  %v21792_v28 = vld [vmem:[#allocation8 + $0x2110] ss:$24 sps:$4 sm:$0xff]  }
 0xcac   : > { %17335 = vmatpush1.bf16.msra.mxu1 %v21720_v6  ;;  %17295 = vmatprep.subr.bf16.mxu0 %v21725_v45  ;;  %v21797_v6 = vld [vmem:[#allocation8 + $0x1e44] ss:$24 sps:$4 sm:$0xff]  }
 0xcad   : > { %17336 = vmatprep.subr.bf16.mxu1 %v21728_v25  ;;  %v21800_v45 = vld [vmem:[#allocation8 + $0x2144] ss:$24 sps:$4 sm:$0xff]   ;;  %v21795_v25 = vld [vmem:[#allocation8 + $0x1e40] ss:$24 sps:$4 sm:$0xff]  }
 0xcaf   : > { %17296 = vmatpush1.bf16.msra.mxu0 %v21723_v7  ;;  %v21798_v7 = vld [vmem:[#allocation8 + $0x2140] ss:$24 sps:$4 sm:$0xff]  }
 0xcb0   : > { %17337 = vmatpush1.bf16.msra.mxu1 %v21726_v59  ;;  %17297 = vmatprep.subr.bf16.mxu0 %v21731_v58  ;;  %v21803_v59 = vld [vmem:[#allocation8 + $0x1e74] ss:$24 sps:$4 sm:$0xff]  }
 0xcb1   : > { %17338 = vmatprep.subr.bf16.mxu1 %v21734_v0  ;;  %v21806_v58 = vld [vmem:[#allocation8 + $0x2174] ss:$24 sps:$4 sm:$0xff]   ;;  %v21801_v0 = vld [vmem:[#allocation8 + $0x1e70] ss:$24 sps:$4 sm:$0xff]  }
 0xcb3   : > { %17298 = vmatpush1.bf16.msra.mxu0 %v21729_v61  ;;  %v21804_v61 = vld [vmem:[#allocation8 + $0x2170] ss:$24 sps:$4 sm:$0xff]  }
 0xcb4   : > { %17339 = vmatpush1.bf16.msra.mxu1 %v21732_v39  ;;  %17299 = vmatprep.subr.bf16.mxu0 %v21737_v2  ;;  %v21809_v39 = vld [vmem:[#allocation8 + $0x1ea4] ss:$24 sps:$4 sm:$0xff]  }
 0xcb5   : > { %17340 = vmatprep.subr.bf16.mxu1 %v21740_v4  ;;  %v21812_v2 = vld [vmem:[#allocation8 + $0x21a4] ss:$24 sps:$4 sm:$0xff]   ;;  %v21807_v4 = vld [vmem:[#allocation8 + $0x1ea0] ss:$24 sps:$4 sm:$0xff]  }
 0xcb7   : > { %17300 = vmatpush1.bf16.msra.mxu0 %v21735_v21  ;;  %v21815_v21 = vld [vmem:[#allocation8 + $0x1ed4] ss:$24 sps:$4 sm:$0xff]  }
 0xcb8   : > { %17341 = vmatpush1.bf16.msra.mxu1 %v21738_v41  ;;  %17301 = vmatprep.subr.bf16.mxu0 %v21743_v50  ;;  %v21818_v41 = vld [vmem:[#allocation8 + $0x21d4] ss:$24 sps:$4 sm:$0xff]   ;;  %v21816_v50 = vld [vmem:[#allocation8 + $0x21d0] ss:$24 sps:$4 sm:$0xff]  }
 0xcb9   : > { %17342 = vmatprep.subr.bf16.mxu1 %v21746_v32  ;;  %v21821_v32 = vld [vmem:[#allocation8 + $0x1f04] ss:$24 sps:$4 sm:$0xff]  }
 0xcbb   : > { %17302 = vmatpush1.bf16.msra.mxu0 %v21741_v8  ;;  %v21824_v8 = vld [vmem:[#allocation8 + $0x2204] ss:$24 sps:$4 sm:$0xff]  }
 0xcbc   : > { %17343 = vmatpush1.bf16.msra.mxu1 %v21744_v34  ;;  %17303 = vmatprep.subr.bf16.mxu0 %v21749_v11  ;;  %v21819_v34 = vld [vmem:[#allocation8 + $0x1f00] ss:$24 sps:$4 sm:$0xff]  }
 0xcbd   : > { %17344 = vmatprep.subr.bf16.mxu1 %v21752_v12  ;;  %v21822_v11 = vld [vmem:[#allocation8 + $0x2200] ss:$24 sps:$4 sm:$0xff]   ;;  %v21827_v12 = vld [vmem:[#allocation8 + $0x1f34] ss:$24 sps:$4 sm:$0xff]  }
 0xcbf   : > { %17304 = vmatpush1.bf16.msra.mxu0 %v21747_v10  ;;  %v21830_v10 = vld [vmem:[#allocation8 + $0x2234] ss:$24 sps:$4 sm:$0xff]  }
 0xcc0   : > { %17345 = vmatpush1.bf16.msra.mxu1 %v21750_v13  ;;  %17305 = vmatprep.subr.bf16.mxu0 %v21755_v31  ;;  %v21825_v13 = vld [vmem:[#allocation8 + $0x1f30] ss:$24 sps:$4 sm:$0xff]  }
 0xcc1   : > { %17346 = vmatprep.subr.bf16.mxu1 %v21758_v62  ;;  %v21828_v31 = vld [vmem:[#allocation8 + $0x2230] ss:$24 sps:$4 sm:$0xff]   ;;  %v21833_v62 = vld [vmem:[#allocation8 + $0x1f64] ss:$24 sps:$4 sm:$0xff]  }
 0xcc3   : > { %17306 = vmatpush1.bf16.msra.mxu0 %v21753_v37  ;;  %v21836_v37 = vld [vmem:[#allocation8 + $0x2264] ss:$24 sps:$4 sm:$0xff]  }
 0xcc4   : > { %17347 = vmatpush1.bf16.msra.mxu1 %v21756_v42  ;;  %17307 = vmatprep.subr.bf16.mxu0 %v21761_v3  ;;  %v21831_v42 = vld [vmem:[#allocation8 + $0x1f60] ss:$24 sps:$4 sm:$0xff]  }
 0xcc5   : > { %17348 = vmatprep.subr.bf16.mxu1 %v21764_v46  ;;  %v21834_v3 = vld [vmem:[#allocation8 + $0x2260] ss:$24 sps:$4 sm:$0xff]   ;;  %v21839_v46 = vld [vmem:[#allocation8 + $0x1f94] ss:$24 sps:$4 sm:$0xff]  }
 0xcc7   : > { %17308 = vmatpush1.bf16.msra.mxu0 %v21759_v14  ;;  %v21842_v14 = vld [vmem:[#allocation8 + $0x2294] ss:$24 sps:$4 sm:$0xff]  }
 0xcc8   : > { %17349 = vmatpush1.bf16.msra.mxu1 %v21762_v38  ;;  %17309 = vmatprep.subr.bf16.mxu0 %v21767_v15  ;;  %v21837_v38 = vld [vmem:[#allocation8 + $0x1f90] ss:$24 sps:$4 sm:$0xff]  }
 0xcc9   : > { %17350 = vmatprep.subr.bf16.mxu1 %v21770_v33  ;;  %v21840_v15 = vld [vmem:[#allocation8 + $0x2290] ss:$24 sps:$4 sm:$0xff]   ;;  %v21845_v33 = vld [vmem:[#allocation8 + $0x1fc4] ss:$24 sps:$4 sm:$0xff]  }
 0xccb   : > { %17310 = vmatpush1.bf16.msra.mxu0 %v21765_v23  ;;  %v21848_v23 = vld [vmem:[#allocation8 + $0x22c4] ss:$24 sps:$4 sm:$0xff]  }
 0xccc   : > { %17351 = vmatpush1.bf16.msra.mxu1 %v21768_v29  ;;  %17311 = vmatprep.subr.bf16.mxu0 %v21773_v18  ;;  %v21843_v29 = vld [vmem:[#allocation8 + $0x1fc0] ss:$24 sps:$4 sm:$0xff]  }
 0xccd   : > { %17352 = vmatprep.subr.bf16.mxu1 %v21776_v53  ;;  %v21846_v18 = vld [vmem:[#allocation8 + $0x22c0] ss:$24 sps:$4 sm:$0xff]   ;;  %v21851_v53 = vld [vmem:[#allocation8 + $0x1ff4] ss:$24 sps:$4 sm:$0xff]  }
 0xccf   : > { %17312 = vmatpush1.bf16.msra.mxu0 %v21771_v56  ;;  %v21854_v56 = vld [vmem:[#allocation8 + $0x22f4] ss:$24 sps:$4 sm:$0xff]  }
 0xcd0   : > { %17353 = vmatpush1.bf16.msra.mxu1 %v21774_v40  ;;  %17313 = vmatprep.subr.bf16.mxu0 %v21779_v52  ;;  %v21849_v40 = vld [vmem:[#allocation8 + $0x1ff0] ss:$24 sps:$4 sm:$0xff]  }
 0xcd1   : > { %17354 = vmatprep.subr.bf16.mxu1 %v21782_v43  ;;  %v21852_v52 = vld [vmem:[#allocation8 + $0x22f0] ss:$24 sps:$4 sm:$0xff]   ;;  %v21857_v43 = vld [vmem:[#allocation8 + $0x2024] ss:$24 sps:$4 sm:$0xff]  }
 0xcd3   : > { %17314 = vmatpush1.bf16.msra.mxu0 %v21777_v44  ;;  %v21860_v44 = vld [vmem:[#allocation8 + $0x2324] ss:$24 sps:$4 sm:$0xff]  }
 0xcd4   : > { %17355 = vmatpush1.bf16.msra.mxu1 %v21780_v60  ;;  %17315 = vmatprep.subr.bf16.mxu0 %v21785_v35  ;;  %v21855_v60 = vld [vmem:[#allocation8 + $0x2020] ss:$24 sps:$4 sm:$0xff]  }
 0xcd5   : > { %17356 = vmatprep.subr.bf16.mxu1 %v21788_v47  ;;  %v21858_v35 = vld [vmem:[#allocation8 + $0x2320] ss:$24 sps:$4 sm:$0xff]   ;;  %v21863_v47 = vld [vmem:[#allocation8 + $0x2054] ss:$24 sps:$4 sm:$0xff]  }
 0xcd7   : > { %17316 = vmatpush1.bf16.msra.mxu0 %v21783_v16  ;;  %v21866_v16 = vld [vmem:[#allocation8 + $0x2354] ss:$24 sps:$4 sm:$0xff]  }
 0xcd8   : > { %17357 = vmatpush1.bf16.msra.mxu1 %v21786_v63  ;;  %17367 = vmatprep.subr.bf16.mxu0 %v21791_v57  ;;  %v21861_v63 = vld [vmem:[#allocation8 + $0x2050] ss:$24 sps:$4 sm:$0xff]  }
 0xcd9   : > { %17408 = vmatprep.subr.bf16.mxu1 %v21794_v55  ;;  %v21864_v57 = vld [vmem:[#allocation8 + $0x2350] ss:$24 sps:$4 sm:$0xff]   ;;  %v21869_v55 = vld [vmem:[#allocation8 + $0x2084] ss:$24 sps:$4 sm:$0xff]  }
 0xcda   : > { %17318 = vmatmul.mubr.bf16.vlgmr.msra.gmra.mrb[88].mxu0 %v22775_v19 }
 0xcdb   : > { %17359 = vmatmul.mubr.bf16.vlgmr.msra.gmra.mrb[88].mxu1 %v22778_v30  ;;  %17368 = vmatpush1.bf16.msra.mxu0 %v21789_v51  ;;  %v21872_v51 = vld [vmem:[#allocation8 + $0x2384] ss:$24 sps:$4 sm:$0xff]  }
 0xcdc   : > { %17399 = vmatprep.mubr.bf16.mxu0 %v22771_v48  ;;  %17409 = vmatpush1.bf16.msra.mxu1 %v21792_v28  ;;  %v21810_v48 = vld [vmem:[#allocation8 + $0x21a0] ss:$24 sps:$4 sm:$0xff]  }
 0xcdd   : > { %17440 = vmatprep.mubr.bf16.mxu1 %v22773_v17  ;;  %17369 = vmatprep.subr.bf16.mxu0 %v21797_v6  ;;  %v21813_v17 = vld [vmem:[#allocation8 + $0x1ed0] ss:$24 sps:$4 sm:$0xff]   ;;  %v21867_v28 = vld [vmem:[#allocation8 + $0x2080] ss:$24 sps:$4 sm:$0xff]  }
 0xcde   : > { %17410 = vmatprep.subr.bf16.mxu1 %v21800_v45  ;;  %v21870_v6 = vld [vmem:[#allocation8 + $0x2380] ss:$24 sps:$4 sm:$0xff]   ;;  %v21875_v45 = vld [vmem:[#allocation8 + $0x20b4] ss:$24 sps:$4 sm:$0xff]  }
 0xcdf   : > { %17370 = vmatpush1.bf16.msra.mxu0 %v21795_v25  ;;  %v21878_v25 = vld [vmem:[#allocation8 + $0x23b4] ss:$24 sps:$4 sm:$0xff]  }
 0xce0   : > { %17411 = vmatpush1.bf16.msra.mxu1 %v21798_v7  ;;  %17371 = vmatprep.subr.bf16.mxu0 %v21803_v59  ;;  %v21873_v7 = vld [vmem:[#allocation8 + $0x20b0] ss:$24 sps:$4 sm:$0xff]  }
 0xce1   : > { %17412 = vmatprep.subr.bf16.mxu1 %v21806_v58  ;;  %v21876_v59 = vld [vmem:[#allocation8 + $0x23b0] ss:$24 sps:$4 sm:$0xff]   ;;  %v21881_v58 = vld [vmem:[#allocation8 + $0x20e4] ss:$24 sps:$4 sm:$0xff]  }
 0xce3   : > { %17372 = vmatpush1.bf16.msra.mxu0 %v21801_v0  ;;  %v21884_v0 = vld [vmem:[#allocation8 + $0x23e4] ss:$24 sps:$4 sm:$0xff]  }
 0xce4   : > { %17413 = vmatpush1.bf16.msra.mxu1 %v21804_v61  ;;  %17373 = vmatprep.subr.bf16.mxu0 %v21809_v39  ;;  %v21879_v61 = vld [vmem:[#allocation8 + $0x20e0] ss:$24 sps:$4 sm:$0xff]  }
 0xce5   : > { %17414 = vmatprep.subr.bf16.mxu1 %v21812_v2  ;;  %v21882_v39 = vld [vmem:[#allocation8 + $0x23e0] ss:$24 sps:$4 sm:$0xff]  }
 0xce6   : > { %v17455_v2 = vld [vmem:[#allocation10] sm:$0x3f] }
 0xce7   : > { %17374 = vmatpush1.bf16.msra.mxu0 %v21807_v4 }
 0xce8   : > { %17415 = vmatpush1.bf16.msra.mxu1 %v21810_v48  ;;  %17375 = vmatprep.subr.bf16.mxu0 %v21815_v21 }
 0xce9   : > { %17416 = vmatprep.subr.bf16.mxu1 %v21818_v41 }
 0xceb   : > { %17376 = vmatpush1.bf16.msra.mxu0 %v21813_v17  ;;  %v17460_v17 = vrot.slane %v17455_v2, %v22470_v22 }
 0xcec   : > { %17417 = vmatpush1.bf16.msra.mxu1 %v21816_v50  ;;  %17377 = vmatprep.subr.bf16.mxu0 %v21821_v32 }
 0xced   : > { %17418 = vmatprep.subr.bf16.mxu1 %v21824_v8 }
 0xcef   : > { %17378 = vmatpush1.bf16.msra.mxu0 %v21819_v34  ;;  %v17464_v34 = vrot.slane %v17455_v2, %v22476_v26 }
 0xcf0   : > { %17419 = vmatpush1.bf16.msra.mxu1 %v21822_v11  ;;  %17379 = vmatprep.subr.bf16.mxu0 %v21827_v12 }
 0xcf1   : > { %17420 = vmatprep.subr.bf16.mxu1 %v21830_v10 }
 0xcf3   : > { %17380 = vmatpush1.bf16.msra.mxu0 %v21825_v13 }
 0xcf4   : > { %17421 = vmatpush1.bf16.msra.mxu1 %v21828_v31  ;;  %17381 = vmatprep.subr.bf16.mxu0 %v21833_v62 }
 0xcf5   : > { %17422 = vmatprep.subr.bf16.mxu1 %v21836_v37 }
 0xcf7   : > { %17382 = vmatpush1.bf16.msra.mxu0 %v21831_v42 }
 0xcf8   : > { %17423 = vmatpush1.bf16.msra.mxu1 %v21834_v3  ;;  %17383 = vmatprep.subr.bf16.mxu0 %v21839_v46  ;;  %v17472_v46 = vrot.slane %v17455_v2, %v22479_v27 }
 0xcf9   : > { %17424 = vmatprep.subr.bf16.mxu1 %v21842_v14 }
 0xcfb   : > { %17384 = vmatpush1.bf16.msra.mxu0 %v21837_v38 }
 0xcfc   : > { %17425 = vmatpush1.bf16.msra.mxu1 %v21840_v15  ;;  %17385 = vmatprep.subr.bf16.mxu0 %v21845_v33 }
 0xcfd   : > { %17426 = vmatprep.subr.bf16.mxu1 %v21848_v23 }
 0xcff   : > { %17386 = vmatpush1.bf16.msra.mxu0 %v21843_v29 }
 0xd00   : > { %17427 = vmatpush1.bf16.msra.mxu1 %v21846_v18  ;;  %17387 = vmatprep.subr.bf16.mxu0 %v21851_v53  ;;  %v17475_v53 = vsub.s32 4, %v22467_v20 }
 0xd01   : > { %17428 = vmatprep.subr.bf16.mxu1 %v21854_v56 }
 0xd03   : > { %17388 = vmatpush1.bf16.msra.mxu0 %v21849_v40 }
 0xd04   : > { %17429 = vmatpush1.bf16.msra.mxu1 %v21852_v52  ;;  %17389 = vmatprep.subr.bf16.mxu0 %v21857_v43  ;;  %v17476_v43 = vrot.slane %v17455_v2, %v17475_v53 }
 0xd05   : > { %17430 = vmatprep.subr.bf16.mxu1 %v21860_v44 }
 0xd07   : > { %17390 = vmatpush1.bf16.msra.mxu0 %v21855_v60 }
 0xd08   : > { %17431 = vmatpush1.bf16.msra.mxu1 %v21858_v35  ;;  %17391 = vmatprep.subr.bf16.mxu0 %v21863_v47 }
 0xd09   : > { %17432 = vmatprep.subr.bf16.mxu1 %v21866_v16 }
 0xd0b   : > { %17392 = vmatpush1.bf16.msra.mxu0 %v21861_v63 }
 0xd0c   : > { %17433 = vmatpush1.bf16.msra.mxu1 %v21864_v57  ;;  %17393 = vmatprep.subr.bf16.mxu0 %v21869_v55 }
 0xd0d   : > { %17434 = vmatprep.subr.bf16.mxu1 %v21872_v51 }
 0xd0f   : > { %17394 = vmatpush1.bf16.msra.mxu0 %v21867_v28 }
 0xd10   : > { %17435 = vmatpush1.bf16.msra.mxu1 %v21870_v6  ;;  %17395 = vmatprep.subr.bf16.mxu0 %v21875_v45 }
 0xd11   : > { %17436 = vmatprep.subr.bf16.mxu1 %v21878_v25 }
 0xd13   : > { %17396 = vmatpush1.bf16.msra.mxu0 %v21873_v7 }
 0xd14   : > { %17437 = vmatpush1.bf16.msra.mxu1 %v21876_v59  ;;  %17397 = vmatprep.subr.bf16.mxu0 %v21881_v58 }
 0xd15   : > { %17438 = vmatprep.subr.bf16.mxu1 %v21884_v0 }
 0xd17   : > { %17398 = vmatpush1.bf16.msra.mxu0 %v21879_v61 }
 0xd18   : > { %17439 = vmatpush1.bf16.msra.mxu1 %v21882_v39 }
 0xd1a   : > { %17400 = vmatmul.mubr.bf16.vlgmr.msra.gmra.mrb[92].mxu0 %v22775_v19 }
 0xd1b   : > { %17441 = vmatmul.mubr.bf16.vlgmr.msra.gmra.mrb[92].mxu1 %v22778_v30 }
 0xd6d   : > { %v17237_v4 = vpop.f32.mrb[84].mxu0 }
 0xd6e   : > { %v17278_v48 = vpop.f32.mrb[84].mxu1  ;;  %v17239_v21 = vpop.f32.mrb[85].mxu0 }
 0xd6f   : > { %v17279_v41 = vadd.f32 %v17278_v48, %v17237_v4  ;;  %v17280_v50 = vpop.f32.mrb[85].mxu1  ;;  %v17241_v32 = vpop.f32.mrb[86].mxu0 }
 0xd70   : > { %v17281_v8 = vadd.f32 %v17280_v50, %v17239_v21  ;;  %v17282_v11 = vpop.f32.mrb[86].mxu1  ;;  %v17242_v12 = vpop.f32.mrb[87].mxu0 }
 0xd71   : > { %v17449_v10 = vadd.f32 %v17279_v41, %v22744_v5  ;;  %v17283_v19 = vpop.f32.mrb[87].mxu1  ;;  %v17468_v5 = vrot.slane %v17455_v2, %v22473_v24  ;;  %v17479_v24 = vsub.s32 5, %v22467_v20 }
 0xd72   : > { %v17450_v30 = vadd.f32 %v17281_v8, %v22747_v9 }
 0xd73   : > { %v17487_v13 = vadd.f32 %v17460_v17, %v17449_v10  ;;  %v17480_v60 = vrot.slane %v17455_v2, %v17479_v24 }
 0xd74   : > { %v17488_v31 = vadd.f32 %v17464_v34, %v17450_v30 }
 0xd75   : > { %17493 = vst [vmem:[%s22797_s25] sm:$0xff] %v17487_v13 }
 0xd76   : > { %17494 = vst [vmem:[%s22797_s25 + $0x8] sm:$0xff] %v17488_v31 }
 0xdad   : > { %v17319_v22 = vpop.f32.mrb[88].mxu0 }
 0xdae   : > { %v17360_v62 = vpop.f32.mrb[88].mxu1  ;;  %v17321_v26 = vpop.f32.mrb[89].mxu0 }
 0xdaf   : > { %v17361_v37 = vadd.f32 %v17360_v62, %v17319_v22  ;;  %v17362_v42 = vpop.f32.mrb[89].mxu1  ;;  %v17323_v3 = vpop.f32.mrb[90].mxu0 }
 0xdb0   : > { %v17363_v9 = vadd.f32 %v17362_v42, %v17321_v26  ;;  %v17364_v14 = vpop.f32.mrb[90].mxu1  ;;  %v17324_v38 = vpop.f32.mrb[91].mxu0 }
 0xdb1   : > { %v17451_v15 = vadd.f32 %v17361_v37, %v22754_v49  ;;  %v17365_v33 = vpop.f32.mrb[91].mxu1 }
 0xdb2   : > { %v17452_v23 = vadd.f32 %v17363_v9, %v22757_v54 }
 0xdb3   : > { %v17489_v29 = vadd.f32 %v17468_v5, %v17451_v15 }
 0xdb4   : > { %v17490_v18 = vadd.f32 %v17472_v46, %v17452_v23 }
 0xdb5   : > { %17495 = vst [vmem:[%s22797_s25 + $0x10] sm:$0xff] %v17489_v29 }
 0xdb6   : > { %17496 = vst [vmem:[%s22797_s25 + $0x18] sm:$0xff] %v17490_v18 }
 0xded   : > { %v17401_v56 = vpop.f32.mrb[92].mxu0 }
 0xdee   : > { %v17442_v40 = vpop.f32.mrb[92].mxu1  ;;  %v17403_v27 = vpop.f32.mrb[93].mxu0 }
 0xdef   : > { %v17443_v52 = vadd.f32 %v17442_v40, %v17401_v56  ;;  %v17444_v49 = vpop.f32.mrb[93].mxu1  ;;  %v17405_v44 = vpop.f32.mrb[94].mxu0 }
 0xdf0   : > { %v17445_v54 = vadd.f32 %v17444_v49, %v17403_v27  ;;  %v17446_v35 = vpop.f32.mrb[94].mxu1  ;;  %v17406_v47 = vpop.f32.mrb[95].mxu0 }
 0xdf1   : > { %v17453_v16 = vadd.f32 %v17443_v52, %v22762_v1  ;;  %v17447_v63 = vpop.f32.mrb[95].mxu1 }
 0xdf2   : > { %v17454_v20 = vadd.f32 %v17445_v54, %v22765_v36 }
 0xdf3   : > { %v17491_v57 = vadd.f32 %v17476_v43, %v17453_v16 }
 0xdf4   : > { %v17492_v55 = vadd.f32 %v17480_v60, %v17454_v20 }
 0xdf5   : > { %17497 = vst [vmem:[%s22797_s25 + $0x20] sm:$0xff] %v17491_v57 }
 0xdf6   : > { %17498 = vst [vmem:[%s22797_s25 + $0x28] sm:$0xff] %v17492_v55 }
 0xdf7   : > { %22088 = shalt.err (!%p22085_p12)
}
 0xdf8   : > { %s22089_s16 = scalar_lea.hbm %s22816_s26, 768  ;;  %s22093_s11 = scalar_lea.hbm %s22867_s5, 1536 }
 0xdf9   : > { %p22090_p13 = scmp.ne.s32.totalorder %s22816_s26, %s22089_s16  ;;  %p22094_p9 = scmp.lt.u32.totalorder %s22816_s26, %s22867_s5 }
 0xdfa   : > { %p22095_p4 = scmp.lt.u32.totalorder %s22093_s11, %s22089_s16  ;;  %p22097_p0 = scmp.lt.u32.totalorder %s22089_s16, %s22816_s26 }
 0xdfb   : > { %p22091_p1 = pnand %p22090_p13, %p22884_p6 }
 0xdfc   : > { %p22096_p8 = por %p22095_p4, %p22094_p9 }
 0xdfd   : > { %p22092_p7 = pneg %p22091_p1 }
 0xdfe   : > { %p22098_p2 = por %p22097_p0, %p22096_p8 }
 0xe00   : > { %p22099_p5 = pnand %p22098_p2, %p22092_p7 }
 0xe02   : > { %22102 = shalt.err (!%p22099_p5)
}
 0xe03   : > { %20084 = dma.vmem_to_hbm [thread:$0]  (%p22884_p6), %s22818_s14, 768, %s22816_s26, %s17500_s24  }
 0xe04 PF: > { %s17526_s25 = sand.u32 1, %s22137_s18   ;;  %p22885_p10 = scmp.ne.s32.totalorder %s22877_s23, 0 }
 0xe05   : > { %p22886_p11 = scmp.ge.s32.totalorder %s22149_s21, 2  ;;  %s17527_s27 = scalar_lea.sflag [#allocation4], %s17526_s25 }
 0xe07   : > { %p20104_p3 = pnand %p22886_p11, %p22885_p10 }
 0xe09   : > { %22132 = dma.done.wait (!%p20104_p3), %s17527_s27, 768  }
 0xe0a   : > { %22134 = vsyncadd (!%p20104_p3), %s17527_s27, 4294966528  ;;  %p20_p12 = scmp.ge.s32.totalorder %s22327_s28, 4   ;;  %s22887_s18 = smov %s22141_s19 }
 0xe0b   : > { %s22888_s19 = smov %s22145_s20  ;;  %s22889_s20 = smov %s22338_s8 }
 0xe0c   : > { %s22890_s21 = smov %s22327_s28  ;;  %22 = sbr.rel (!%p20_p12) target bundleno = 7 (0x7), region = 101 }
 0xe13   :  { %17532 = vsyncpa [#allocation3], 1 }
 0xe14   :  { %17534 = vsyncpa [#allocation3 + $0x1], 1 }
 0xe15   :  { %17535 = vsyncpa [#allocation6], 1 }
 0xe16   :  { %17536 = vsyncpa [#allocation9], 1 }
 0xe17   :  { %17537 = vsyncpa [#allocation4], 1 }
 0xe18   :  { %17539 = vsyncpa [#allocation4 + $0x1], 1 }

</bundles_post_ra>
